<compile_context>
chip_gen: v7x
topology: tpu7x:2x2x1
jax: 0.10.0
libtpu: 0.0.40
codegen_flags: <defaults>
</compile_context>

<pallas_src>
import math
import numpy as np
import jax
import jax.numpy as jnp
from jax import lax
from jax.experimental import pallas as pl
from jax.experimental.pallas import tpu as pltpu

EPS = 1e-5
ACT_DTYPE = jnp.bfloat16   # inter-kernel activation storage dtype (halves HBM traffic)
WGT_DTYPE = jnp.bfloat16   # weights cast once on the host (no per-step in-kernel casts)


def _pick_vmem_limit():
    # 64 MiB scoped VMEM on v5e/v6e (128 MiB physical), 32 MiB on v7x (64 MiB physical).
    try:
        cap = int(pltpu.get_tpu_info().vmem_capacity_bytes)
    except Exception:
        return 32 * 1024 * 1024
    return max(32 * 1024 * 1024, min(cap // 2, 96 * 1024 * 1024))


VMEM_LIMIT = _pick_vmem_limit()


def _cparams(n_grid_dims):
    return pltpu.CompilerParams(
        dimension_semantics=("parallel",) * n_grid_dims,
        vmem_limit_bytes=VMEM_LIMIT)


# ----------------------------- K1: fused residual block -----------------------------

def _resblock_kernel(x_ref, s1_ref, b1_ref, w1_ref, s2_ref, b2_ref,
                     w2_ref, s3_ref, b3_ref, w3_ref, o_ref, hp_ref):
    # One whole ResidualBlock per grid step (one batch image, full H x W in VMEM).
    H, W = x_ref.shape[1], x_ref.shape[2]
    # Zero the halo scratch; borders stay zero == conv2's zero padding.
    hp_ref[...] = jnp.zeros(hp_ref.shape, hp_ref.dtype)
    s1 = s1_ref[...]
    b1 = b1_ref[...]
    s2 = s2_ref[...]
    b2 = b2_ref[...]
    w1 = w1_ref[...]

    def pre_row(r, carry):
        xr = x_ref[0, r].astype(jnp.float32)                       # (W, C)
        t = jnp.maximum(xr * s1 + b1, 0.0)                         # bn1 + relu
        h = jnp.dot(t.astype(jnp.bfloat16), w1,
                    preferred_element_type=jnp.float32)            # conv1 (1x1)
        h = jnp.maximum(h * s2 + b2, 0.0)                          # bn2 + relu
        hp_ref[r + 1, 1:W + 1, :] = h.astype(hp_ref.dtype)
        return carry

    lax.fori_loop(0, H, pre_row, 0)

    w2 = w2_ref[...]
    w3 = w3_ref[...]
    s3 = s3_ref[...]
    b3 = b3_ref[...]

    def post_row(r, carry):
        # conv2 (3x3, pad 1): single K = 9*C4 contraction against the VMEM halo window.
        taps = [hp_ref[r + dh, dw:dw + W, :] for dh in range(3) for dw in range(3)]
        slab = jnp.concatenate(taps, axis=-1)                      # (W, 9*C4)
        z = jnp.dot(slab, w2, preferred_element_type=jnp.float32)
        z = jnp.maximum(z * s3 + b3, 0.0)                          # bn3 + relu
        y = jnp.dot(z.astype(jnp.bfloat16), w3,
                    preferred_element_type=jnp.float32)            # conv3 (1x1)
        y = y + x_ref[0, r].astype(jnp.float32)                    # residual add
        o_ref[0, r] = y.astype(o_ref.dtype)
        return carry

    lax.fori_loop(0, H, post_row, 0)


def pallas_residual_block(x, p):
    # ResidualBlock with input_channels == output_channels, stride == 1
    # (the PyTorch conv4 shortcut is never taken for those settings).
    N, H, W, C = x.shape
    C4 = p['w1'].shape[1]
    xmap = lambda n: (n, 0, 0, 0)
    cmap = lambda n: (0, 0)
    in_specs = [pl.BlockSpec((1, H, W, C), xmap),
                pl.BlockSpec((1, C), cmap), pl.BlockSpec((1, C), cmap),
                pl.BlockSpec((C, C4), cmap),
                pl.BlockSpec((1, C4), cmap), pl.BlockSpec((1, C4), cmap),
                pl.BlockSpec((9 * C4, C4), cmap),
                pl.BlockSpec((1, C4), cmap), pl.BlockSpec((1, C4), cmap),
                pl.BlockSpec((C4, C), cmap)]
    # TODO(synk): for large H (e.g. 112) tile H with a 1-row halo (pl.Element offsets or
    # a manual make_async_copy of halo rows) instead of one whole image per grid step.
    return pl.pallas_call(
        _resblock_kernel,
        grid=(N,),
        in_specs=in_specs,
        out_specs=pl.BlockSpec((1, H, W, C), xmap),
        out_shape=jax.ShapeDtypeStruct((N, H, W, C), ACT_DTYPE),
        scratch_shapes=[pltpu.VMEM((H + 2, W + 2, C4), jnp.bfloat16)],
        compiler_params=_cparams(1),
    )(x, p['s1'], p['b1'], p['w1'], p['s2'], p['b2'],
      p['w2'], p['s3'], p['b3'], p['w3'])


# ----------------------------- K2: max pool 3x3 / s2 / p1 -----------------------------

def _maxpool_kernel(xf_ref, o_ref, pf_ref):
    # Separable 3x3/s2/p1 max, fully in VMEM.
    # xf_ref: (1, H, W//2, 2C): W column pairs folded onto lanes (free wrapper reshape).
    H = xf_ref.shape[1]
    Wf = xf_ref.shape[2]
    Ho, Wo, C = o_ref.shape[1], o_ref.shape[2], o_ref.shape[3]
    pf_ref[...] = jnp.full(pf_ref.shape, -jnp.inf, dtype=pf_ref.dtype)
    pf_ref[1:H + 1, 1:Wf + 1, :] = xf_ref[0].astype(pf_ref.dtype)
    # Column stage: even lane half = col 2*ow, odd half = col 2*ow+1, prev odd = 2*ow-1.
    colmax = jnp.maximum(
        jnp.maximum(pf_ref[:, 1:Wf + 1, 0:C], pf_ref[:, 1:Wf + 1, C:2 * C]),
        pf_ref[:, 0:Wf, C:2 * C])                                  # (H+2, Wo, C)
    # Row stage: regroup padded rows into (even, odd) pairs -- leading-dim-only reshape.
    cm2 = colmax.reshape(Ho + 1, 2, Wo, C)
    out = jnp.maximum(jnp.maximum(cm2[0:Ho, 0], cm2[0:Ho, 1]), cm2[1:Ho + 1, 0])
    o_ref[0] = out.astype(o_ref.dtype)


def pallas_maxpool_3x3_s2(x):
    N, H, W, C = x.shape
    assert H % 2 == 0 and W % 2 == 0
    Ho, Wo = H // 2, W // 2
    xf = x.reshape(N, H, W // 2, 2 * C)        # free fold of adjacent column pairs
    xmap = lambda n: (n, 0, 0, 0)
    return pl.pallas_call(
        _maxpool_kernel,
        grid=(N,),
        in_specs=[pl.BlockSpec((1, H, W // 2, 2 * C), xmap)],
        out_specs=pl.BlockSpec((1, Ho, Wo, C), xmap),
        out_shape=jax.ShapeDtypeStruct((N, Ho, Wo, C), ACT_DTYPE),
        scratch_shapes=[pltpu.VMEM((H + 2, W // 2 + 1, 2 * C), jnp.float32)],
        compiler_params=_cparams(1),
    )(xf)


# ----------------------------- bilinear helpers (host, numpy) -----------------------------

def _interp_axis(out_size, in_size):
    # nn.UpsamplingBilinear2d => align_corners=True
    if out_size > 1:
        src = np.arange(out_size, dtype=np.float64) * (in_size - 1) / (out_size - 1)
    else:
        src = np.zeros((out_size,), dtype=np.float64)
    i0 = np.clip(np.floor(src), 0, in_size - 1).astype(np.int32)
    i1 = np.minimum(i0 + 1, in_size - 1).astype(np.int32)
    f = (src - i0).astype(np.float32)
    return i0, i1, f


def _w_interp_matrix(out_size, in_size):
    i0, i1, f = _interp_axis(out_size, in_size)
    m = np.zeros((out_size, in_size), np.float32)
    m[np.arange(out_size), i0] += 1.0 - f
    m[np.arange(out_size), i1] += f
    return m


def _row_tile(Ho):
    return 8 if (Ho % 8 == 0 and Ho >= 16) else Ho


# ----------------------------- K3: upsample + combine -----------------------------

def _combine_kernel(i0h_ref, i1h_ref, src_ref, fh_ref, a1_ref, a2_ref, wm_ref,
                    o_ref, s0_ref, s1_ref):
    # bilinear upsample of the resident low-res source + two residual adds.
    t = pl.program_id(1)
    Wo = wm_ref.shape[0]
    RT = o_ref.shape[1]
    TH = RT // Wo
    wm = wm_ref[...]

    def gather_row(r, carry):
        oh = t * TH + r
        i0 = i0h_ref[oh]
        i1 = i1h_ref[oh]
        start = pl.multiple_of(r * Wo, Wo)
        s0_ref[pl.ds(start, Wo), :] = jnp.dot(
            wm, src_ref[0, i0, :, :].astype(jnp.float32),
            preferred_element_type=jnp.float32)
        s1_ref[pl.ds(start, Wo), :] = jnp.dot(
            wm, src_ref[0, i1, :, :].astype(jnp.float32),
            preferred_element_type=jnp.float32)
        return carry

    lax.fori_loop(0, TH, gather_row, 0)

    f = fh_ref[...]                                  # (RT, 1) per-row H fraction
    p0 = s0_ref[...]
    p1 = s1_ref[...]
    out = (p0 + f * (p1 - p0)
           + a1_ref[0].astype(jnp.float32) + a2_ref[0].astype(jnp.float32))
    o_ref[0] = out.astype(o_ref.dtype)


def pallas_upsample_combine(xs, add1, add2):
    # bilinear_upsample(xs -> add1 spatial size, align_corners=True) + add1 + add2
    N, Hi, Wi, C = xs.shape
    _, Ho, Wo, _ = add1.shape
    i0h, i1h, fh = _interp_axis(Ho, Hi)
    wmat = jnp.asarray(_w_interp_matrix(Wo, Wi))
    TH = _row_tile(Ho)
    T = Ho // TH
    RT = TH * Wo
    fh_rows = jnp.asarray(np.repeat(fh, Wo).reshape(Ho * Wo, 1))
    a1 = add1.reshape(N, Ho * Wo, C)
    a2 = add2.reshape(N, Ho * Wo, C)

    src_map = lambda n, t, i0, i1: (n, 0, 0, 0)
    fh_map = lambda n, t, i0, i1: (t, 0)
    row_map = lambda n, t, i0, i1: (n, t, 0)
    cst_map = lambda n, t, i0, i1: (0, 0)

    gs = pltpu.PrefetchScalarGridSpec(
        num_scalar_prefetch=2,
        grid=(N, T),
        in_specs=[pl.BlockSpec((1, Hi, Wi, C), src_map),
                  pl.BlockSpec((RT, 1), fh_map),
                  pl.BlockSpec((1, RT, C), row_map),
                  pl.BlockSpec((1, RT, C), row_map),
                  pl.BlockSpec((Wo, Wi), cst_map)],
        out_specs=pl.BlockSpec((1, RT, C), row_map),
        scratch_shapes=[pltpu.VMEM((RT, C), jnp.float32),
                        pltpu.VMEM((RT, C), jnp.float32)])
    out = pl.pallas_call(
        _combine_kernel,
        grid_spec=gs,
        out_shape=jax.ShapeDtypeStruct((N, Ho * Wo, C), ACT_DTYPE),
        compiler_params=_cparams(2),
    )(jnp.asarray(i0h), jnp.asarray(i1h), xs, fh_rows, a1, a2, wmat)
    return out.reshape(N, Ho, Wo, C)


# ----------------------------- K4: final attention mask -----------------------------

def _final_mask_kernel(i0h_ref, i1h_ref, src_ref, fh_ref, trunk_ref, wm_ref,
                       sa_ref, ba_ref, wA_ref, sb_ref, bb_ref, wB_ref,
                       o_ref, s0_ref, s1_ref):
    # fused: bilinear(src) + trunk -> BN+ReLU -> 1x1 -> BN+ReLU -> 1x1 -> sigmoid
    #        -> (1 + sigmoid) * trunk
    t = pl.program_id(1)
    Wo = wm_ref.shape[0]
    RT = o_ref.shape[1]
    TH = RT // Wo
    wm = wm_ref[...]

    def gather_row(r, carry):
        oh = t * TH + r
        i0 = i0h_ref[oh]
        i1 = i1h_ref[oh]
        start = pl.multiple_of(r * Wo, Wo)
        s0_ref[pl.ds(start, Wo), :] = jnp.dot(
            wm, src_ref[0, i0, :, :].astype(jnp.float32),
            preferred_element_type=jnp.float32)
        s1_ref[pl.ds(start, Wo), :] = jnp.dot(
            wm, src_ref[0, i1, :, :].astype(jnp.float32),
            preferred_element_type=jnp.float32)
        return carry

    lax.fori_loop(0, TH, gather_row, 0)

    f = fh_ref[...]
    p0 = s0_ref[...]
    p1 = s1_ref[...]
    trunk = trunk_ref[0].astype(jnp.float32)
    a = p0 + f * (p1 - p0) + trunk                              # interp1 + trunk
    a = jnp.maximum(a * sa_ref[...] + ba_ref[...], 0.0)
    a = jnp.dot(a.astype(jnp.bfloat16), wA_ref[...], preferred_element_type=jnp.float32)
    a = jnp.maximum(a * sb_ref[...] + bb_ref[...], 0.0)
    a = jnp.dot(a.astype(jnp.bfloat16), wB_ref[...], preferred_element_type=jnp.float32)
    o_ref[0] = ((1.0 + jax.nn.sigmoid(a)) * trunk).astype(o_ref.dtype)


def pallas_final_mask(xs_low, trunk, p8):
    # out = (1 + sigmoid(softmax8(upsample(xs_low) + trunk))) * trunk, in one kernel
    N, Hi, Wi, C = xs_low.shape
    _, Ho, Wo, _ = trunk.shape
    i0h, i1h, fh = _interp_axis(Ho, Hi)
    wmat = jnp.asarray(_w_interp_matrix(Wo, Wi))
    TH = _row_tile(Ho)
    T = Ho // TH
    RT = TH * Wo
    fh_rows = jnp.asarray(np.repeat(fh, Wo).reshape(Ho * Wo, 1))
    trunk2 = trunk.reshape(N, Ho * Wo, C)

    src_map = lambda n, t, i0, i1: (n, 0, 0, 0)
    fh_map = lambda n, t, i0, i1: (t, 0)
    row_map = lambda n, t, i0, i1: (n, t, 0)
    cst_map = lambda n, t, i0, i1: (0, 0)

    gs = pltpu.PrefetchScalarGridSpec(
        num_scalar_prefetch=2,
        grid=(N, T),
        in_specs=[pl.BlockSpec((1, Hi, Wi, C), src_map),
                  pl.BlockSpec((RT, 1), fh_map),
                  pl.BlockSpec((1, RT, C), row_map),
                  pl.BlockSpec((Wo, Wi), cst_map),
                  pl.BlockSpec((1, C), cst_map), pl.BlockSpec((1, C), cst_map),
                  pl.BlockSpec((C, C), cst_map),
                  pl.BlockSpec((1, C), cst_map), pl.BlockSpec((1, C), cst_map),
                  pl.BlockSpec((C, C), cst_map)],
        out_specs=pl.BlockSpec((1, RT, C), row_map),
        scratch_shapes=[pltpu.VMEM((RT, C), jnp.float32),
                        pltpu.VMEM((RT, C), jnp.float32)])
    out = pl.pallas_call(
        _final_mask_kernel,
        grid_spec=gs,
        out_shape=jax.ShapeDtypeStruct((N, Ho * Wo, C), ACT_DTYPE),
        compiler_params=_cparams(2),
    )(jnp.asarray(i0h), jnp.asarray(i1h), xs_low, fh_rows, trunk2, wmat,
      p8['sa'], p8['ba'], p8['wA'], p8['sb'], p8['bb'], p8['wB'])
    return out.reshape(N, Ho, Wo, C)


# ----------------------------- parameters -----------------------------

def _bn_affine(key, c):
    k1, k2 = jax.random.split(key)
    gamma = 1.0 + 0.1 * jax.random.normal(k1, (c,), jnp.float32)
    beta = 0.1 * jax.random.normal(k2, (c,), jnp.float32)
    # BatchNorm (inference mode) folded to affine (running_mean=0, running_var=1)
    scale = (gamma / jnp.sqrt(1.0 + EPS)).reshape(1, c)
    bias = beta.reshape(1, c)
    return scale, bias


def make_resblock_params(key, c):
    # TODO(synk): at production channel counts, pad C4 / C up to multiples of 128 so
    # every kernel's stores are lane-dense and the MXU contraction depth is filled.
    c4 = c // 4
    ks = jax.random.split(key, 6)
    s1, b1 = _bn_affine(ks[0], c)
    s2, b2 = _bn_affine(ks[1], c4)
    s3, b3 = _bn_affine(ks[2], c4)
    w1 = (jax.random.normal(ks[3], (c, c4), jnp.float32) / math.sqrt(c)).astype(WGT_DTYPE)
    w2 = (jax.random.normal(ks[4], (9 * c4, c4), jnp.float32) / math.sqrt(9 * c4)).astype(WGT_DTYPE)
    w3 = (jax.random.normal(ks[5], (c4, c), jnp.float32) / math.sqrt(c4)).astype(WGT_DTYPE)
    # conv4 is not materialized: in_channels == out_channels and stride == 1 everywhere here.
    return dict(s1=s1, b1=b1, w1=w1, s2=s2, b2=b2, w2=w2, s3=s3, b3=b3, w3=w3)


def make_params(key, c):
    names = ['first', 'trunk1', 'trunk2',
             'softmax1', 'skip1', 'softmax2', 'skip2', 'softmax3', 'skip3',
             'softmax4a', 'softmax4b', 'softmax5', 'softmax6', 'softmax7', 'last']
    keys = jax.random.split(key, len(names) + 1)
    params = {n: make_resblock_params(k, c) for n, k in zip(names, keys[:-1])}
    k8 = jax.random.split(keys[-1], 4)
    sa, ba = _bn_affine(k8[0], c)
    sb, bb = _bn_affine(k8[1], c)
    wA = (jax.random.normal(k8[2], (c, c), jnp.float32) / math.sqrt(c)).astype(WGT_DTYPE)
    wB = (jax.random.normal(k8[3], (c, c), jnp.float32) / math.sqrt(c)).astype(WGT_DTYPE)
    params['softmax8'] = dict(sa=sa, ba=ba, wA=wA, sb=sb, bb=bb, wB=wB)
    return params


# ----------------------------- model forward -----------------------------

def attention_module_stage0(x_nchw, params):
    # interpolation sizes (size1..size4) follow the actual pyramid resolutions of the input.
    x = jnp.transpose(x_nchw, (0, 2, 3, 1)).astype(ACT_DTYPE)    # NCHW -> NHWC
    x = pallas_residual_block(x, params['first'])
    out_trunk = pallas_residual_block(
        pallas_residual_block(x, params['trunk1']), params['trunk2'])

    out_mpool1 = pallas_maxpool_3x3_s2(x)
    out_softmax1 = pallas_residual_block(out_mpool1, params['softmax1'])
    out_skip1 = pallas_residual_block(out_softmax1, params['skip1'])

    out_mpool2 = pallas_maxpool_3x3_s2(out_softmax1)
    out_softmax2 = pallas_residual_block(out_mpool2, params['softmax2'])
    out_skip2 = pallas_residual_block(out_softmax2, params['skip2'])

    out_mpool3 = pallas_maxpool_3x3_s2(out_softmax2)
    out_softmax3 = pallas_residual_block(out_mpool3, params['softmax3'])
    out_skip3 = pallas_residual_block(out_softmax3, params['skip3'])

    out_mpool4 = pallas_maxpool_3x3_s2(out_softmax3)
    out_softmax4 = pallas_residual_block(
        pallas_residual_block(out_mpool4, params['softmax4a']), params['softmax4b'])

    # TODO(synk): on v7x, fold each upsample-combine into the following residual block's
    # kernel prologue to cut the pallas_call count further (launch-overhead bound there).
    out = pallas_upsample_combine(out_softmax4, out_softmax3, out_skip3)
    out_softmax5 = pallas_residual_block(out, params['softmax5'])
    out = pallas_upsample_combine(out_softmax5, out_softmax2, out_skip2)
    out_softmax6 = pallas_residual_block(out, params['softmax6'])
    out = pallas_upsample_combine(out_softmax6, out_softmax1, out_skip1)
    out_softmax7 = pallas_residual_block(out, params['softmax7'])

    # interp1 + trunk add + softmax8 chain + (1 + sigmoid) * trunk, fused in one kernel
    out = pallas_final_mask(out_softmax7, out_trunk, params['softmax8'])
    out_last = pallas_residual_block(out, params['last'])
    return jnp.transpose(out_last, (0, 3, 1, 2)).astype(jnp.float32)   # NHWC -> NCHW


if __name__ == "__main__":
    key = jax.random.PRNGKey(0)
    kx, kp = jax.random.split(key)
    # small shapes consistent with the module: C divisible by 4, H=W=16 -> pyramid 16/8/4/2/1
    N, C, H, W = 2, 8, 16, 16
    x = jax.random.normal(kx, (N, C, H, W), jnp.float32)
    params = make_params(kp, C)
    fwd = jax.jit(lambda inp: attention_module_stage0(inp, params))
    out = fwd(x)
    jax.block_until_ready(out)
    assert out.shape == (N, C, H, W) and out.dtype == jnp.float32
    assert bool(jnp.all(jnp.isfinite(out)))
    print("KERNEL_OK")
</pallas_src>

<mosaic_0001>
module attributes {stable_mosaic.version = 11 : i64} {
  func.func @_resblock_kernel(%arg0: i32, %arg1: memref<1x16x16x8xbf16, #tpu.memory_space<vmem>>, %arg2: memref<1x8xf32, #tpu.memory_space<vmem>>, %arg3: memref<1x8xf32, #tpu.memory_space<vmem>>, %arg4: memref<8x2xbf16, #tpu.memory_space<vmem>>, %arg5: memref<1x2xf32, #tpu.memory_space<vmem>>, %arg6: memref<1x2xf32, #tpu.memory_space<vmem>>, %arg7: memref<18x2xbf16, #tpu.memory_space<vmem>>, %arg8: memref<1x2xf32, #tpu.memory_space<vmem>>, %arg9: memref<1x2xf32, #tpu.memory_space<vmem>>, %arg10: memref<2x8xbf16, #tpu.memory_space<vmem>>, %arg11: memref<1x16x16x8xbf16, #tpu.memory_space<vmem>>, %arg12: memref<18x18x2xbf16, #tpu.memory_space<vmem>>) attributes {dimension_semantics = [#tpu.dimension_semantics<parallel>], iteration_bounds = array<i64: 2>, scalar_prefetch = 0 : i64, scratch_operands = 1 : i64, tpu.core_type = #tpu.core_type<tc>, window_params = [{transform_indices = @transform_0, window_bounds = array<i64: 1, 16, 16, 8>}, {pipeline_mode = #tpu.pipeline_mode<synchronous>, transform_indices = @transform_1, window_bounds = array<i64: 1, 8>}, {pipeline_mode = #tpu.pipeline_mode<synchronous>, transform_indices = @transform_2, window_bounds = array<i64: 1, 8>}, {pipeline_mode = #tpu.pipeline_mode<synchronous>, transform_indices = @transform_3, window_bounds = array<i64: 8, 2>}, {pipeline_mode = #tpu.pipeline_mode<synchronous>, transform_indices = @transform_4, window_bounds = array<i64: 1, 2>}, {pipeline_mode = #tpu.pipeline_mode<synchronous>, transform_indices = @transform_5, window_bounds = array<i64: 1, 2>}, {pipeline_mode = #tpu.pipeline_mode<synchronous>, transform_indices = @transform_6, window_bounds = array<i64: 18, 2>}, {pipeline_mode = #tpu.pipeline_mode<synchronous>, transform_indices = @transform_7, window_bounds = array<i64: 1, 2>}, {pipeline_mode = #tpu.pipeline_mode<synchronous>, transform_indices = @transform_8, window_bounds = array<i64: 1, 2>}, {pipeline_mode = #tpu.pipeline_mode<synchronous>, transform_indices = @transform_9, window_bounds = array<i64: 2, 8>}, {transform_indices = @transform_10, window_bounds = array<i64: 1, 16, 16, 8>}]} {
    %cst = arith.constant 0.000000e+00 : bf16
    %0 = vector.broadcast %cst : bf16 to vector<18x18x2xbf16>
    %c0 = arith.constant 0 : index
    %c0_0 = arith.constant 0 : index
    %c0_1 = arith.constant 0 : index
    %1 = vector.load %arg12[%c0, %c0_0, %c0_1] : memref<18x18x2xbf16, #tpu.memory_space<vmem>>, vector<18x18x2xbf16>
    tpu.vector_store %arg12[%c0, %c0_0, %c0_1], %0 {strides = array<i32>} : memref<18x18x2xbf16, #tpu.memory_space<vmem>>, vector<18x18x2xbf16>,
    %c0_2 = arith.constant 0 : index
    %c0_3 = arith.constant 0 : index
    %2 = vector.load %arg2[%c0_2, %c0_3] : memref<1x8xf32, #tpu.memory_space<vmem>>, vector<1x8xf32>
    %c0_4 = arith.constant 0 : index
    %c0_5 = arith.constant 0 : index
    %3 = vector.load %arg3[%c0_4, %c0_5] : memref<1x8xf32, #tpu.memory_space<vmem>>, vector<1x8xf32>
    %c0_6 = arith.constant 0 : index
    %c0_7 = arith.constant 0 : index
    %4 = vector.load %arg5[%c0_6, %c0_7] : memref<1x2xf32, #tpu.memory_space<vmem>>, vector<1x2xf32>
    %c0_8 = arith.constant 0 : index
    %c0_9 = arith.constant 0 : index
    %5 = vector.load %arg6[%c0_8, %c0_9] : memref<1x2xf32, #tpu.memory_space<vmem>>, vector<1x2xf32>
    %c0_10 = arith.constant 0 : index
    %c0_11 = arith.constant 0 : index
    %6 = vector.load %arg4[%c0_10, %c0_11] : memref<8x2xbf16, #tpu.memory_space<vmem>>, vector<8x2xbf16>
    %c0_i32 = arith.constant 0 : i32
    %c16_i32 = arith.constant 16 : i32
    %7 = arith.addi %c0_i32, %c16_i32 : i32
    %c1_i32 = arith.constant 1 : i32
    scf.for %arg13 = %c0_i32 to %7 step %c1_i32  : i32 {
      %c0_25 = arith.constant 0 : index
      %13 = arith.index_cast %arg13 : i32 to index
      %c0_26 = arith.constant 0 : index
      %c0_27 = arith.constant 0 : index
      %14 = vector.load %arg1[%c0_25, %13, %c0_26, %c0_27] : memref<1x16x16x8xbf16, #tpu.memory_space<vmem>>, vector<1x1x16x8xbf16>
      %15 = vector.shape_cast %14 : vector<1x1x16x8xbf16> to vector<16x8xbf16>
      %16 = arith.extf %15 : vector<16x8xbf16> to vector<16x8xf32>
      %17 = vector.broadcast %2 : vector<1x8xf32> to vector<16x8xf32>
      %18 = arith.mulf %16, %17 : vector<16x8xf32>
      %19 = vector.broadcast %3 : vector<1x8xf32> to vector<16x8xf32>
      %20 = arith.addf %18, %19 : vector<16x8xf32>
      %cst_28 = arith.constant 0.000000e+00 : f32
      %21 = vector.broadcast %cst_28 : f32 to vector<16x8xf32>
      %22 = arith.maximumf %20, %21 : vector<16x8xf32>
      %23 = arith.truncf %22 : vector<16x8xf32> to vector<16x8xbf16>
      %cst_29 = arith.constant dense<0.000000e+00> : vector<16x2xf32>
      %24 = tpu.matmul %23, %6, %cst_29 {dimension_numbers = #tpu.dot_dimension_numbers<[1], [0], [0], [1], [0, 0, 1, 1], [], []>} : vector<16x8xbf16>, vector<8x2xbf16>, vector<16x2xf32> -> vector<16x2xf32>
      %25 = vector.broadcast %4 : vector<1x2xf32> to vector<16x2xf32>
      %26 = arith.mulf %24, %25 : vector<16x2xf32>
      %27 = vector.broadcast %5 : vector<1x2xf32> to vector<16x2xf32>
      %28 = arith.addf %26, %27 : vector<16x2xf32>
      %cst_30 = arith.constant 0.000000e+00 : f32
      %29 = vector.broadcast %cst_30 : f32 to vector<16x2xf32>
      %30 = arith.maximumf %28, %29 : vector<16x2xf32>
      %31 = arith.truncf %30 : vector<16x2xf32> to vector<16x2xbf16>
      %c1_i32_31 = arith.constant 1 : i32
      %32 = arith.addi %arg13, %c1_i32_31 : i32
      %33 = arith.index_cast %32 : i32 to index
      %c1 = arith.constant 1 : index
      %c0_32 = arith.constant 0 : index
      %34 = vector.load %arg12[%33, %c1, %c0_32] : memref<18x18x2xbf16, #tpu.memory_space<vmem>>, vector<1x16x2xbf16>
      %35 = vector.shape_cast %34 : vector<1x16x2xbf16> to vector<16x2xbf16>
      %36 = vector.shape_cast %31 : vector<16x2xbf16> to vector<1x16x2xbf16>
      tpu.vector_store %arg12[%33, %c1, %c0_32], %36 {strides = array<i32>} : memref<18x18x2xbf16, #tpu.memory_space<vmem>>, vector<1x16x2xbf16>,
    }
    %c16_i32_12 = arith.constant 16 : i32
    %c0_13 = arith.constant 0 : index
    %c0_14 = arith.constant 0 : index
    %8 = vector.load %arg7[%c0_13, %c0_14] : memref<18x2xbf16, #tpu.memory_space<vmem>>, vector<18x2xbf16>
    %c0_15 = arith.constant 0 : index
    %c0_16 = arith.constant 0 : index
    %9 = vector.load %arg10[%c0_15, %c0_16] : memref<2x8xbf16, #tpu.memory_space<vmem>>, vector<2x8xbf16>
    %c0_17 = arith.constant 0 : index
    %c0_18 = arith.constant 0 : index
    %10 = vector.load %arg8[%c0_17, %c0_18] : memref<1x2xf32, #tpu.memory_space<vmem>>, vector<1x2xf32>
    %c0_19 = arith.constant 0 : index
    %c0_20 = arith.constant 0 : index
    %11 = vector.load %arg9[%c0_19, %c0_20] : memref<1x2xf32, #tpu.memory_space<vmem>>, vector<1x2xf32>
    %c0_i32_21 = arith.constant 0 : i32
    %c16_i32_22 = arith.constant 16 : i32
    %12 = arith.addi %c0_i32_21, %c16_i32_22 : i32
    %c1_i32_23 = arith.constant 1 : i32
    scf.for %arg13 = %c0_i32_21 to %12 step %c1_i32_23  : i32 {
      %c0_i32_25 = arith.constant 0 : i32
      %13 = arith.addi %arg13, %c0_i32_25 : i32
      %14 = arith.index_cast %13 : i32 to index
      %c0_26 = arith.constant 0 : index
      %c0_27 = arith.constant 0 : index
      %15 = vector.load %arg12[%14, %c0_26, %c0_27] : memref<18x18x2xbf16, #tpu.memory_space<vmem>>, vector<1x16x2xbf16>
      %16 = vector.shape_cast %15 : vector<1x16x2xbf16> to vector<16x2xbf16>
      %c0_i32_28 = arith.constant 0 : i32
      %17 = arith.addi %arg13, %c0_i32_28 : i32
      %18 = arith.index_cast %17 : i32 to index
      %c1 = arith.constant 1 : index
      %c0_29 = arith.constant 0 : index
      %19 = vector.load %arg12[%18, %c1, %c0_29] : memref<18x18x2xbf16, #tpu.memory_space<vmem>>, vector<1x16x2xbf16>
      %20 = vector.shape_cast %19 : vector<1x16x2xbf16> to vector<16x2xbf16>
      %c0_i32_30 = arith.constant 0 : i32
      %21 = arith.addi %arg13, %c0_i32_30 : i32
      %22 = arith.index_cast %21 : i32 to index
      %c2 = arith.constant 2 : index
      %c0_31 = arith.constant 0 : index
      %23 = vector.load %arg12[%22, %c2, %c0_31] : memref<18x18x2xbf16, #tpu.memory_space<vmem>>, vector<1x16x2xbf16>
      %24 = vector.shape_cast %23 : vector<1x16x2xbf16> to vector<16x2xbf16>
      %c1_i32_32 = arith.constant 1 : i32
      %25 = arith.addi %arg13, %c1_i32_32 : i32
      %26 = arith.index_cast %25 : i32 to index
      %c0_33 = arith.constant 0 : index
      %c0_34 = arith.constant 0 : index
      %27 = vector.load %arg12[%26, %c0_33, %c0_34] : memref<18x18x2xbf16, #tpu.memory_space<vmem>>, vector<1x16x2xbf16>
      %28 = vector.shape_cast %27 : vector<1x16x2xbf16> to vector<16x2xbf16>
      %c1_i32_35 = arith.constant 1 : i32
      %29 = arith.addi %arg13, %c1_i32_35 : i32
      %30 = arith.index_cast %29 : i32 to index
      %c1_36 = arith.constant 1 : index
      %c0_37 = arith.constant 0 : index
      %31 = vector.load %arg12[%30, %c1_36, %c0_37] : memref<18x18x2xbf16, #tpu.memory_space<vmem>>, vector<1x16x2xbf16>
      %32 = vector.shape_cast %31 : vector<1x16x2xbf16> to vector<16x2xbf16>
      %c1_i32_38 = arith.constant 1 : i32
      %33 = arith.addi %arg13, %c1_i32_38 : i32
      %34 = arith.index_cast %33 : i32 to index
      %c2_39 = arith.constant 2 : index
      %c0_40 = arith.constant 0 : index
      %35 = vector.load %arg12[%34, %c2_39, %c0_40] : memref<18x18x2xbf16, #tpu.memory_space<vmem>>, vector<1x16x2xbf16>
      %36 = vector.shape_cast %35 : vector<1x16x2xbf16> to vector<16x2xbf16>
      %c2_i32 = arith.constant 2 : i32
      %37 = arith.addi %arg13, %c2_i32 : i32
      %38 = arith.index_cast %37 : i32 to index
      %c0_41 = arith.constant 0 : index
      %c0_42 = arith.constant 0 : index
      %39 = vector.load %arg12[%38, %c0_41, %c0_42] : memref<18x18x2xbf16, #tpu.memory_space<vmem>>, vector<1x16x2xbf16>
      %40 = vector.shape_cast %39 : vector<1x16x2xbf16> to vector<16x2xbf16>
      %c2_i32_43 = arith.constant 2 : i32
      %41 = arith.addi %arg13, %c2_i32_43 : i32
      %42 = arith.index_cast %41 : i32 to index
      %c1_44 = arith.constant 1 : index
      %c0_45 = arith.constant 0 : index
      %43 = vector.load %arg12[%42, %c1_44, %c0_45] : memref<18x18x2xbf16, #tpu.memory_space<vmem>>, vector<1x16x2xbf16>
      %44 = vector.shape_cast %43 : vector<1x16x2xbf16> to vector<16x2xbf16>
      %c2_i32_46 = arith.constant 2 : i32
      %45 = arith.addi %arg13, %c2_i32_46 : i32
      %46 = arith.index_cast %45 : i32 to index
      %c2_47 = arith.constant 2 : index
      %c0_48 = arith.constant 0 : index
      %47 = vector.load %arg12[%46, %c2_47, %c0_48] : memref<18x18x2xbf16, #tpu.memory_space<vmem>>, vector<1x16x2xbf16>
      %48 = vector.shape_cast %47 : vector<1x16x2xbf16> to vector<16x2xbf16>
      %49 = tpu.concatenate %16, %20, %24, %28, %32, %36, %40, %44, %48 in 1 : vector<16x2xbf16>, vector<16x2xbf16>, vector<16x2xbf16>, vector<16x2xbf16>, vector<16x2xbf16>, vector<16x2xbf16>, vector<16x2xbf16>, vector<16x2xbf16>, vector<16x2xbf16> -> vector<16x18xbf16>
      %cst_49 = arith.constant dense<0.000000e+00> : vector<16x2xf32>
      %50 = tpu.matmul %49, %8, %cst_49 {dimension_numbers = #tpu.dot_dimension_numbers<[1], [0], [0], [1], [0, 0, 1, 1], [], []>} : vector<16x18xbf16>, vector<18x2xbf16>, vector<16x2xf32> -> vector<16x2xf32>
      %51 = vector.broadcast %10 : vector<1x2xf32> to vector<16x2xf32>
      %52 = arith.mulf %50, %51 : vector<16x2xf32>
      %53 = vector.broadcast %11 : vector<1x2xf32> to vector<16x2xf32>
      %54 = arith.addf %52, %53 : vector<16x2xf32>
      %cst_50 = arith.constant 0.000000e+00 : f32
      %55 = vector.broadcast %cst_50 : f32 to vector<16x2xf32>
      %56 = arith.maximumf %54, %55 : vector<16x2xf32>
      %57 = arith.truncf %56 : vector<16x2xf32> to vector<16x2xbf16>
      %cst_51 = arith.constant dense<0.000000e+00> : vector<16x8xf32>
      %58 = tpu.matmul %57, %9, %cst_51 {dimension_numbers = #tpu.dot_dimension_numbers<[1], [0], [0], [1], [0, 0, 1, 1], [], []>} : vector<16x2xbf16>, vector<2x8xbf16>, vector<16x8xf32> -> vector<16x8xf32>
      %c0_52 = arith.constant 0 : index
      %59 = arith.index_cast %arg13 : i32 to index
      %c0_53 = arith.constant 0 : index
      %c0_54 = arith.constant 0 : index
      %60 = vector.load %arg1[%c0_52, %59, %c0_53, %c0_54] : memref<1x16x16x8xbf16, #tpu.memory_space<vmem>>, vector<1x1x16x8xbf16>
      %61 = vector.shape_cast %60 : vector<1x1x16x8xbf16> to vector<16x8xbf16>
      %62 = arith.extf %61 : vector<16x8xbf16> to vector<16x8xf32>
      %63 = arith.addf %58, %62 : vector<16x8xf32>
      %64 = arith.truncf %63 : vector<16x8xf32> to vector<16x8xbf16>
      %c0_55 = arith.constant 0 : index
      %65 = arith.index_cast %arg13 : i32 to index
      %c0_56 = arith.constant 0 : index
      %c0_57 = arith.constant 0 : index
      %66 = vector.load %arg11[%c0_55, %65, %c0_56, %c0_57] : memref<1x16x16x8xbf16, #tpu.memory_space<vmem>>, vector<1x1x16x8xbf16>
      %67 = vector.shape_cast %66 : vector<1x1x16x8xbf16> to vector<16x8xbf16>
      %68 = vector.shape_cast %64 : vector<16x8xbf16> to vector<1x1x16x8xbf16>
      tpu.vector_store %arg11[%c0_55, %65, %c0_56, %c0_57], %68 {strides = array<i32>} : memref<1x16x16x8xbf16, #tpu.memory_space<vmem>>, vector<1x1x16x8xbf16>,
    }
    %c16_i32_24 = arith.constant 16 : i32
    return
  }
  func.func @transform_0(%arg0: i32) -> (i32, i32, i32, i32) {
    %c0_i32 = arith.constant 0 : i32
    %c0_i32_0 = arith.constant 0 : i32
    %c0_i32_1 = arith.constant 0 : i32
    %c0_i32_2 = arith.constant 0 : i32
    return %arg0, %c0_i32, %c0_i32_0, %c0_i32_1 : i32, i32, i32, i32
  }
  func.func @transform_1(%arg0: i32) -> (i32, i32) {
    %c0_i32 = arith.constant 0 : i32
    %c0_i32_0 = arith.constant 0 : i32
    %c0_i32_1 = arith.constant 0 : i32
    return %c0_i32, %c0_i32_0 : i32, i32
  }
  func.func @transform_2(%arg0: i32) -> (i32, i32) {
    %c0_i32 = arith.constant 0 : i32
    %c0_i32_0 = arith.constant 0 : i32
    %c0_i32_1 = arith.constant 0 : i32
    return %c0_i32, %c0_i32_0 : i32, i32
  }
  func.func @transform_3(%arg0: i32) -> (i32, i32) {
    %c0_i32 = arith.constant 0 : i32
    %c0_i32_0 = arith.constant 0 : i32
    %c0_i32_1 = arith.constant 0 : i32
    return %c0_i32, %c0_i32_0 : i32, i32
  }
  func.func @transform_4(%arg0: i32) -> (i32, i32) {
    %c0_i32 = arith.constant 0 : i32
    %c0_i32_0 = arith.constant 0 : i32
    %c0_i32_1 = arith.constant 0 : i32
    return %c0_i32, %c0_i32_0 : i32, i32
  }
  func.func @transform_5(%arg0: i32) -> (i32, i32) {
    %c0_i32 = arith.constant 0 : i32
    %c0_i32_0 = arith.constant 0 : i32
    %c0_i32_1 = arith.constant 0 : i32
    return %c0_i32, %c0_i32_0 : i32, i32
  }
  func.func @transform_6(%arg0: i32) -> (i32, i32) {
    %c0_i32 = arith.constant 0 : i32
    %c0_i32_0 = arith.constant 0 : i32
    %c0_i32_1 = arith.constant 0 : i32
    return %c0_i32, %c0_i32_0 : i32, i32
  }
  func.func @transform_7(%arg0: i32) -> (i32, i32) {
    %c0_i32 = arith.constant 0 : i32
    %c0_i32_0 = arith.constant 0 : i32
    %c0_i32_1 = arith.constant 0 : i32
    return %c0_i32, %c0_i32_0 : i32, i32
  }
  func.func @transform_8(%arg0: i32) -> (i32, i32) {
    %c0_i32 = arith.constant 0 : i32
    %c0_i32_0 = arith.constant 0 : i32
    %c0_i32_1 = arith.constant 0 : i32
    return %c0_i32, %c0_i32_0 : i32, i32
  }
  func.func @transform_9(%arg0: i32) -> (i32, i32) {
    %c0_i32 = arith.constant 0 : i32
    %c0_i32_0 = arith.constant 0 : i32
    %c0_i32_1 = arith.constant 0 : i32
    return %c0_i32, %c0_i32_0 : i32, i32
  }
  func.func @transform_10(%arg0: i32) -> (i32, i32, i32, i32) {
    %c0_i32 = arith.constant 0 : i32
    %c0_i32_0 = arith.constant 0 : i32
    %c0_i32_1 = arith.constant 0 : i32
    %c0_i32_2 = arith.constant 0 : i32
    return %arg0, %c0_i32, %c0_i32_0, %c0_i32_1 : i32, i32, i32, i32
  }
}

module attributes {stable_mosaic.version = 11 : i64} {
  func.func @_maxpool_kernel(%arg0: i32, %arg1: memref<1x16x8x16xbf16, #tpu.memory_space<vmem>>, %arg2: memref<1x8x8x8xbf16, #tpu.memory_space<vmem>>, %arg3: memref<18x9x16xf32, #tpu.memory_space<vmem>>) attributes {dimension_semantics = [#tpu.dimension_semantics<parallel>], iteration_bounds = array<i64: 2>, scalar_prefetch = 0 : i64, scratch_operands = 1 : i64, tpu.core_type = #tpu.core_type<tc>, window_params = [{transform_indices = @transform_0, window_bounds = array<i64: 1, 16, 8, 16>}, {transform_indices = @transform_1, window_bounds = array<i64: 1, 8, 8, 8>}]} {
    %cst = arith.constant 0xFF800000 : f32
    %0 = vector.broadcast %cst : f32 to vector<18x9x16xf32>
    %c0 = arith.constant 0 : index
    %c0_0 = arith.constant 0 : index
    %c0_1 = arith.constant 0 : index
    %1 = vector.load %arg3[%c0, %c0_0, %c0_1] : memref<18x9x16xf32, #tpu.memory_space<vmem>>, vector<18x9x16xf32>
    tpu.vector_store %arg3[%c0, %c0_0, %c0_1], %0 {strides = array<i32>} : memref<18x9x16xf32, #tpu.memory_space<vmem>>, vector<18x9x16xf32>,
    %c0_2 = arith.constant 0 : index
    %c0_3 = arith.constant 0 : index
    %c0_4 = arith.constant 0 : index
    %c0_5 = arith.constant 0 : index
    %2 = vector.load %arg1[%c0_2, %c0_3, %c0_4, %c0_5] : memref<1x16x8x16xbf16, #tpu.memory_space<vmem>>, vector<1x16x8x16xbf16>
    %3 = vector.shape_cast %2 : vector<1x16x8x16xbf16> to vector<16x8x16xbf16>
    %4 = arith.extf %3 : vector<16x8x16xbf16> to vector<16x8x16xf32>
    %c1 = arith.constant 1 : index
    %c1_6 = arith.constant 1 : index
    %c0_7 = arith.constant 0 : index
    %5 = vector.load %arg3[%c1, %c1_6, %c0_7] : memref<18x9x16xf32, #tpu.memory_space<vmem>>, vector<16x8x16xf32>
    tpu.vector_store %arg3[%c1, %c1_6, %c0_7], %4 {strides = array<i32>} : memref<18x9x16xf32, #tpu.memory_space<vmem>>, vector<16x8x16xf32>,
    %c0_8 = arith.constant 0 : index
    %c1_9 = arith.constant 1 : index
    %c0_10 = arith.constant 0 : index
    %6 = vector.load %arg3[%c0_8, %c1_9, %c0_10] : memref<18x9x16xf32, #tpu.memory_space<vmem>>, vector<18x8x8xf32>
    %c0_11 = arith.constant 0 : index
    %c1_12 = arith.constant 1 : index
    %c8 = arith.constant 8 : index
    %7 = vector.load %arg3[%c0_11, %c1_12, %c8] : memref<18x9x16xf32, #tpu.memory_space<vmem>>, vector<18x8x8xf32>
    %8 = arith.maximumf %6, %7 : vector<18x8x8xf32>
    %c0_13 = arith.constant 0 : index
    %c0_14 = arith.constant 0 : index
    %c8_15 = arith.constant 8 : index
    %9 = vector.load %arg3[%c0_13, %c0_14, %c8_15] : memref<18x9x16xf32, #tpu.memory_space<vmem>>, vector<18x8x8xf32>
    %10 = arith.maximumf %8, %9 : vector<18x8x8xf32>
    %11 = vector.shape_cast %10 : vector<18x8x8xf32> to vector<9x2x8x8xf32>
    %12 = vector.extract_strided_slice %11 {offsets = [0, 0, 0, 0], sizes = [8, 1, 8, 8], strides = [1, 1, 1, 1]} : vector<9x2x8x8xf32> to vector<8x1x8x8xf32>
    %13 = vector.shape_cast %12 : vector<8x1x8x8xf32> to vector<8x8x8xf32>
    %14 = vector.extract_strided_slice %11 {offsets = [0, 1, 0, 0], sizes = [8, 1, 8, 8], strides = [1, 1, 1, 1]} : vector<9x2x8x8xf32> to vector<8x1x8x8xf32>
    %15 = vector.shape_cast %14 : vector<8x1x8x8xf32> to vector<8x8x8xf32>
    %16 = arith.maximumf %13, %15 : vector<8x8x8xf32>
    %17 = vector.extract_strided_slice %11 {offsets = [1, 0, 0, 0], sizes = [8, 1, 8, 8], strides = [1, 1, 1, 1]} : vector<9x2x8x8xf32> to vector<8x1x8x8xf32>
    %18 = vector.shape_cast %17 : vector<8x1x8x8xf32> to vector<8x8x8xf32>
    %19 = arith.maximumf %16, %18 : vector<8x8x8xf32>
    %20 = arith.truncf %19 : vector<8x8x8xf32> to vector<8x8x8xbf16>
    %c0_16 = arith.constant 0 : index
    %c0_17 = arith.constant 0 : index
    %c0_18 = arith.constant 0 : index
    %c0_19 = arith.constant 0 : index
    %21 = vector.load %arg2[%c0_16, %c0_17, %c0_18, %c0_19] : memref<1x8x8x8xbf16, #tpu.memory_space<vmem>>, vector<1x8x8x8xbf16>
    %22 = vector.shape_cast %21 : vector<1x8x8x8xbf16> to vector<8x8x8xbf16>
    %23 = vector.shape_cast %20 : vector<8x8x8xbf16> to vector<1x8x8x8xbf16>
    tpu.vector_store %arg2[%c0_16, %c0_17, %c0_18, %c0_19], %23 {strides = array<i32>} : memref<1x8x8x8xbf16, #tpu.memory_space<vmem>>, vector<1x8x8x8xbf16>,
    return
  }
  func.func @transform_0(%arg0: i32) -> (i32, i32, i32, i32) {
    %c0_i32 = arith.constant 0 : i32
    %c0_i32_0 = arith.constant 0 : i32
    %c0_i32_1 = arith.constant 0 : i32
    %c0_i32_2 = arith.constant 0 : i32
    return %arg0, %c0_i32, %c0_i32_0, %c0_i32_1 : i32, i32, i32, i32
  }
  func.func @transform_1(%arg0: i32) -> (i32, i32, i32, i32) {
    %c0_i32 = arith.constant 0 : i32
    %c0_i32_0 = arith.constant 0 : i32
    %c0_i32_1 = arith.constant 0 : i32
    %c0_i32_2 = arith.constant 0 : i32
    return %arg0, %c0_i32, %c0_i32_0, %c0_i32_1 : i32, i32, i32, i32
  }
}

module attributes {stable_mosaic.version = 11 : i64} {
  func.func @_resblock_kernel(%arg0: i32, %arg1: memref<1x8x8x8xbf16, #tpu.memory_space<vmem>>, %arg2: memref<1x8xf32, #tpu.memory_space<vmem>>, %arg3: memref<1x8xf32, #tpu.memory_space<vmem>>, %arg4: memref<8x2xbf16, #tpu.memory_space<vmem>>, %arg5: memref<1x2xf32, #tpu.memory_space<vmem>>, %arg6: memref<1x2xf32, #tpu.memory_space<vmem>>, %arg7: memref<18x2xbf16, #tpu.memory_space<vmem>>, %arg8: memref<1x2xf32, #tpu.memory_space<vmem>>, %arg9: memref<1x2xf32, #tpu.memory_space<vmem>>, %arg10: memref<2x8xbf16, #tpu.memory_space<vmem>>, %arg11: memref<1x8x8x8xbf16, #tpu.memory_space<vmem>>, %arg12: memref<10x10x2xbf16, #tpu.memory_space<vmem>>) attributes {dimension_semantics = [#tpu.dimension_semantics<parallel>], iteration_bounds = array<i64: 2>, scalar_prefetch = 0 : i64, scratch_operands = 1 : i64, tpu.core_type = #tpu.core_type<tc>, window_params = [{transform_indices = @transform_0, window_bounds = array<i64: 1, 8, 8, 8>}, {pipeline_mode = #tpu.pipeline_mode<synchronous>, transform_indices = @transform_1, window_bounds = array<i64: 1, 8>}, {pipeline_mode = #tpu.pipeline_mode<synchronous>, transform_indices = @transform_2, window_bounds = array<i64: 1, 8>}, {pipeline_mode = #tpu.pipeline_mode<synchronous>, transform_indices = @transform_3, window_bounds = array<i64: 8, 2>}, {pipeline_mode = #tpu.pipeline_mode<synchronous>, transform_indices = @transform_4, window_bounds = array<i64: 1, 2>}, {pipeline_mode = #tpu.pipeline_mode<synchronous>, transform_indices = @transform_5, window_bounds = array<i64: 1, 2>}, {pipeline_mode = #tpu.pipeline_mode<synchronous>, transform_indices = @transform_6, window_bounds = array<i64: 18, 2>}, {pipeline_mode = #tpu.pipeline_mode<synchronous>, transform_indices = @transform_7, window_bounds = array<i64: 1, 2>}, {pipeline_mode = #tpu.pipeline_mode<synchronous>, transform_indices = @transform_8, window_bounds = array<i64: 1, 2>}, {pipeline_mode = #tpu.pipeline_mode<synchronous>, transform_indices = @transform_9, window_bounds = array<i64: 2, 8>}, {transform_indices = @transform_10, window_bounds = array<i64: 1, 8, 8, 8>}]} {
    %cst = arith.constant 0.000000e+00 : bf16
    %0 = vector.broadcast %cst : bf16 to vector<10x10x2xbf16>
    %c0 = arith.constant 0 : index
    %c0_0 = arith.constant 0 : index
    %c0_1 = arith.constant 0 : index
    %1 = vector.load %arg12[%c0, %c0_0, %c0_1] : memref<10x10x2xbf16, #tpu.memory_space<vmem>>, vector<10x10x2xbf16>
    tpu.vector_store %arg12[%c0, %c0_0, %c0_1], %0 {strides = array<i32>} : memref<10x10x2xbf16, #tpu.memory_space<vmem>>, vector<10x10x2xbf16>,
    %c0_2 = arith.constant 0 : index
    %c0_3 = arith.constant 0 : index
    %2 = vector.load %arg2[%c0_2, %c0_3] : memref<1x8xf32, #tpu.memory_space<vmem>>, vector<1x8xf32>
    %c0_4 = arith.constant 0 : index
    %c0_5 = arith.constant 0 : index
    %3 = vector.load %arg3[%c0_4, %c0_5] : memref<1x8xf32, #tpu.memory_space<vmem>>, vector<1x8xf32>
    %c0_6 = arith.constant 0 : index
    %c0_7 = arith.constant 0 : index
    %4 = vector.load %arg5[%c0_6, %c0_7] : memref<1x2xf32, #tpu.memory_space<vmem>>, vector<1x2xf32>
    %c0_8 = arith.constant 0 : index
    %c0_9 = arith.constant 0 : index
    %5 = vector.load %arg6[%c0_8, %c0_9] : memref<1x2xf32, #tpu.memory_space<vmem>>, vector<1x2xf32>
    %c0_10 = arith.constant 0 : index
    %c0_11 = arith.constant 0 : index
    %6 = vector.load %arg4[%c0_10, %c0_11] : memref<8x2xbf16, #tpu.memory_space<vmem>>, vector<8x2xbf16>
    %c0_i32 = arith.constant 0 : i32
    %c8_i32 = arith.constant 8 : i32
    %7 = arith.addi %c0_i32, %c8_i32 : i32
    %c1_i32 = arith.constant 1 : i32
    scf.for %arg13 = %c0_i32 to %7 step %c1_i32  : i32 {
      %c0_25 = arith.constant 0 : index
      %13 = arith.index_cast %arg13 : i32 to index
      %c0_26 = arith.constant 0 : index
      %c0_27 = arith.constant 0 : index
      %14 = vector.load %arg1[%c0_25, %13, %c0_26, %c0_27] : memref<1x8x8x8xbf16, #tpu.memory_space<vmem>>, vector<1x1x8x8xbf16>
      %15 = vector.shape_cast %14 : vector<1x1x8x8xbf16> to vector<8x8xbf16>
      %16 = arith.extf %15 : vector<8x8xbf16> to vector<8x8xf32>
      %17 = vector.broadcast %2 : vector<1x8xf32> to vector<8x8xf32>
      %18 = arith.mulf %16, %17 : vector<8x8xf32>
      %19 = vector.broadcast %3 : vector<1x8xf32> to vector<8x8xf32>
      %20 = arith.addf %18, %19 : vector<8x8xf32>
      %cst_28 = arith.constant 0.000000e+00 : f32
      %21 = vector.broadcast %cst_28 : f32 to vector<8x8xf32>
      %22 = arith.maximumf %20, %21 : vector<8x8xf32>
      %23 = arith.truncf %22 : vector<8x8xf32> to vector<8x8xbf16>
      %cst_29 = arith.constant dense<0.000000e+00> : vector<8x2xf32>
      %24 = tpu.matmul %23, %6, %cst_29 {dimension_numbers = #tpu.dot_dimension_numbers<[1], [0], [0], [1], [0, 0, 1, 1], [], []>} : vector<8x8xbf16>, vector<8x2xbf16>, vector<8x2xf32> -> vector<8x2xf32>
      %25 = vector.broadcast %4 : vector<1x2xf32> to vector<8x2xf32>
      %26 = arith.mulf %24, %25 : vector<8x2xf32>
      %27 = vector.broadcast %5 : vector<1x2xf32> to vector<8x2xf32>
      %28 = arith.addf %26, %27 : vector<8x2xf32>
      %cst_30 = arith.constant 0.000000e+00 : f32
      %29 = vector.broadcast %cst_30 : f32 to vector<8x2xf32>
      %30 = arith.maximumf %28, %29 : vector<8x2xf32>
      %31 = arith.truncf %30 : vector<8x2xf32> to vector<8x2xbf16>
      %c1_i32_31 = arith.constant 1 : i32
      %32 = arith.addi %arg13, %c1_i32_31 : i32
      %33 = arith.index_cast %32 : i32 to index
      %c1 = arith.constant 1 : index
      %c0_32 = arith.constant 0 : index
      %34 = vector.load %arg12[%33, %c1, %c0_32] : memref<10x10x2xbf16, #tpu.memory_space<vmem>>, vector<1x8x2xbf16>
      %35 = vector.shape_cast %34 : vector<1x8x2xbf16> to vector<8x2xbf16>
      %36 = vector.shape_cast %31 : vector<8x2xbf16> to vector<1x8x2xbf16>
      tpu.vector_store %arg12[%33, %c1, %c0_32], %36 {strides = array<i32>} : memref<10x10x2xbf16, #tpu.memory_space<vmem>>, vector<1x8x2xbf16>,
    }
    %c8_i32_12 = arith.constant 8 : i32
    %c0_13 = arith.constant 0 : index
    %c0_14 = arith.constant 0 : index
    %8 = vector.load %arg7[%c0_13, %c0_14] : memref<18x2xbf16, #tpu.memory_space<vmem>>, vector<18x2xbf16>
    %c0_15 = arith.constant 0 : index
    %c0_16 = arith.constant 0 : index
    %9 = vector.load %arg10[%c0_15, %c0_16] : memref<2x8xbf16, #tpu.memory_space<vmem>>, vector<2x8xbf16>
    %c0_17 = arith.constant 0 : index
    %c0_18 = arith.constant 0 : index
    %10 = vector.load %arg8[%c0_17, %c0_18] : memref<1x2xf32, #tpu.memory_space<vmem>>, vector<1x2xf32>
    %c0_19 = arith.constant 0 : index
    %c0_20 = arith.constant 0 : index
    %11 = vector.load %arg9[%c0_19, %c0_20] : memref<1x2xf32, #tpu.memory_space<vmem>>, vector<1x2xf32>
    %c0_i32_21 = arith.constant 0 : i32
    %c8_i32_22 = arith.constant 8 : i32
    %12 = arith.addi %c0_i32_21, %c8_i32_22 : i32
    %c1_i32_23 = arith.constant 1 : i32
    scf.for %arg13 = %c0_i32_21 to %12 step %c1_i32_23  : i32 {
      %c0_i32_25 = arith.constant 0 : i32
      %13 = arith.addi %arg13, %c0_i32_25 : i32
      %14 = arith.index_cast %13 : i32 to index
      %c0_26 = arith.constant 0 : index
      %c0_27 = arith.constant 0 : index
      %15 = vector.load %arg12[%14, %c0_26, %c0_27] : memref<10x10x2xbf16, #tpu.memory_space<vmem>>, vector<1x8x2xbf16>
      %16 = vector.shape_cast %15 : vector<1x8x2xbf16> to vector<8x2xbf16>
      %c0_i32_28 = arith.constant 0 : i32
      %17 = arith.addi %arg13, %c0_i32_28 : i32
      %18 = arith.index_cast %17 : i32 to index
      %c1 = arith.constant 1 : index
      %c0_29 = arith.constant 0 : index
      %19 = vector.load %arg12[%18, %c1, %c0_29] : memref<10x10x2xbf16, #tpu.memory_space<vmem>>, vector<1x8x2xbf16>
      %20 = vector.shape_cast %19 : vector<1x8x2xbf16> to vector<8x2xbf16>
      %c0_i32_30 = arith.constant 0 : i32
      %21 = arith.addi %arg13, %c0_i32_30 : i32
      %22 = arith.index_cast %21 : i32 to index
      %c2 = arith.constant 2 : index
      %c0_31 = arith.constant 0 : index
      %23 = vector.load %arg12[%22, %c2, %c0_31] : memref<10x10x2xbf16, #tpu.memory_space<vmem>>, vector<1x8x2xbf16>
      %24 = vector.shape_cast %23 : vector<1x8x2xbf16> to vector<8x2xbf16>
      %c1_i32_32 = arith.constant 1 : i32
      %25 = arith.addi %arg13, %c1_i32_32 : i32
      %26 = arith.index_cast %25 : i32 to index
      %c0_33 = arith.constant 0 : index
      %c0_34 = arith.constant 0 : index
      %27 = vector.load %arg12[%26, %c0_33, %c0_34] : memref<10x10x2xbf16, #tpu.memory_space<vmem>>, vector<1x8x2xbf16>
      %28 = vector.shape_cast %27 : vector<1x8x2xbf16> to vector<8x2xbf16>
      %c1_i32_35 = arith.constant 1 : i32
      %29 = arith.addi %arg13, %c1_i32_35 : i32
      %30 = arith.index_cast %29 : i32 to index
      %c1_36 = arith.constant 1 : index
      %c0_37 = arith.constant 0 : index
      %31 = vector.load %arg12[%30, %c1_36, %c0_37] : memref<10x10x2xbf16, #tpu.memory_space<vmem>>, vector<1x8x2xbf16>
      %32 = vector.shape_cast %31 : vector<1x8x2xbf16> to vector<8x2xbf16>
      %c1_i32_38 = arith.constant 1 : i32
      %33 = arith.addi %arg13, %c1_i32_38 : i32
      %34 = arith.index_cast %33 : i32 to index
      %c2_39 = arith.constant 2 : index
      %c0_40 = arith.constant 0 : index
      %35 = vector.load %arg12[%34, %c2_39, %c0_40] : memref<10x10x2xbf16, #tpu.memory_space<vmem>>, vector<1x8x2xbf16>
      %36 = vector.shape_cast %35 : vector<1x8x2xbf16> to vector<8x2xbf16>
      %c2_i32 = arith.constant 2 : i32
      %37 = arith.addi %arg13, %c2_i32 : i32
      %38 = arith.index_cast %37 : i32 to index
      %c0_41 = arith.constant 0 : index
      %c0_42 = arith.constant 0 : index
      %39 = vector.load %arg12[%38, %c0_41, %c0_42] : memref<10x10x2xbf16, #tpu.memory_space<vmem>>, vector<1x8x2xbf16>
      %40 = vector.shape_cast %39 : vector<1x8x2xbf16> to vector<8x2xbf16>
      %c2_i32_43 = arith.constant 2 : i32
      %41 = arith.addi %arg13, %c2_i32_43 : i32
      %42 = arith.index_cast %41 : i32 to index
      %c1_44 = arith.constant 1 : index
      %c0_45 = arith.constant 0 : index
      %43 = vector.load %arg12[%42, %c1_44, %c0_45] : memref<10x10x2xbf16, #tpu.memory_space<vmem>>, vector<1x8x2xbf16>
      %44 = vector.shape_cast %43 : vector<1x8x2xbf16> to vector<8x2xbf16>
      %c2_i32_46 = arith.constant 2 : i32
      %45 = arith.addi %arg13, %c2_i32_46 : i32
      %46 = arith.index_cast %45 : i32 to index
      %c2_47 = arith.constant 2 : index
      %c0_48 = arith.constant 0 : index
      %47 = vector.load %arg12[%46, %c2_47, %c0_48] : memref<10x10x2xbf16, #tpu.memory_space<vmem>>, vector<1x8x2xbf16>
      %48 = vector.shape_cast %47 : vector<1x8x2xbf16> to vector<8x2xbf16>
      %49 = tpu.concatenate %16, %20, %24, %28, %32, %36, %40, %44, %48 in 1 : vector<8x2xbf16>, vector<8x2xbf16>, vector<8x2xbf16>, vector<8x2xbf16>, vector<8x2xbf16>, vector<8x2xbf16>, vector<8x2xbf16>, vector<8x2xbf16>, vector<8x2xbf16> -> vector<8x18xbf16>
      %cst_49 = arith.constant dense<0.000000e+00> : vector<8x2xf32>
      %50 = tpu.matmul %49, %8, %cst_49 {dimension_numbers = #tpu.dot_dimension_numbers<[1], [0], [0], [1], [0, 0, 1, 1], [], []>} : vector<8x18xbf16>, vector<18x2xbf16>, vector<8x2xf32> -> vector<8x2xf32>
      %51 = vector.broadcast %10 : vector<1x2xf32> to vector<8x2xf32>
      %52 = arith.mulf %50, %51 : vector<8x2xf32>
      %53 = vector.broadcast %11 : vector<1x2xf32> to vector<8x2xf32>
      %54 = arith.addf %52, %53 : vector<8x2xf32>
      %cst_50 = arith.constant 0.000000e+00 : f32
      %55 = vector.broadcast %cst_50 : f32 to vector<8x2xf32>
      %56 = arith.maximumf %54, %55 : vector<8x2xf32>
      %57 = arith.truncf %56 : vector<8x2xf32> to vector<8x2xbf16>
      %cst_51 = arith.constant dense<0.000000e+00> : vector<8x8xf32>
      %58 = tpu.matmul %57, %9, %cst_51 {dimension_numbers = #tpu.dot_dimension_numbers<[1], [0], [0], [1], [0, 0, 1, 1], [], []>} : vector<8x2xbf16>, vector<2x8xbf16>, vector<8x8xf32> -> vector<8x8xf32>
      %c0_52 = arith.constant 0 : index
      %59 = arith.index_cast %arg13 : i32 to index
      %c0_53 = arith.constant 0 : index
      %c0_54 = arith.constant 0 : index
      %60 = vector.load %arg1[%c0_52, %59, %c0_53, %c0_54] : memref<1x8x8x8xbf16, #tpu.memory_space<vmem>>, vector<1x1x8x8xbf16>
      %61 = vector.shape_cast %60 : vector<1x1x8x8xbf16> to vector<8x8xbf16>
      %62 = arith.extf %61 : vector<8x8xbf16> to vector<8x8xf32>
      %63 = arith.addf %58, %62 : vector<8x8xf32>
      %64 = arith.truncf %63 : vector<8x8xf32> to vector<8x8xbf16>
      %c0_55 = arith.constant 0 : index
      %65 = arith.index_cast %arg13 : i32 to index
      %c0_56 = arith.constant 0 : index
      %c0_57 = arith.constant 0 : index
      %66 = vector.load %arg11[%c0_55, %65, %c0_56, %c0_57] : memref<1x8x8x8xbf16, #tpu.memory_space<vmem>>, vector<1x1x8x8xbf16>
      %67 = vector.shape_cast %66 : vector<1x1x8x8xbf16> to vector<8x8xbf16>
      %68 = vector.shape_cast %64 : vector<8x8xbf16> to vector<1x1x8x8xbf16>
      tpu.vector_store %arg11[%c0_55, %65, %c0_56, %c0_57], %68 {strides = array<i32>} : memref<1x8x8x8xbf16, #tpu.memory_space<vmem>>, vector<1x1x8x8xbf16>,
    }
    %c8_i32_24 = arith.constant 8 : i32
    return
  }
  func.func @transform_0(%arg0: i32) -> (i32, i32, i32, i32) {
    %c0_i32 = arith.constant 0 : i32
    %c0_i32_0 = arith.constant 0 : i32
    %c0_i32_1 = arith.constant 0 : i32
    %c0_i32_2 = arith.constant 0 : i32
    return %arg0, %c0_i32, %c0_i32_0, %c0_i32_1 : i32, i32, i32, i32
  }
  func.func @transform_1(%arg0: i32) -> (i32, i32) {
    %c0_i32 = arith.constant 0 : i32
    %c0_i32_0 = arith.constant 0 : i32
    %c0_i32_1 = arith.constant 0 : i32
    return %c0_i32, %c0_i32_0 : i32, i32
  }
  func.func @transform_2(%arg0: i32) -> (i32, i32) {
    %c0_i32 = arith.constant 0 : i32
    %c0_i32_0 = arith.constant 0 : i32
    %c0_i32_1 = arith.constant 0 : i32
    return %c0_i32, %c0_i32_0 : i32, i32
  }
  func.func @transform_3(%arg0: i32) -> (i32, i32) {
    %c0_i32 = arith.constant 0 : i32
    %c0_i32_0 = arith.constant 0 : i32
    %c0_i32_1 = arith.constant 0 : i32
    return %c0_i32, %c0_i32_0 : i32, i32
  }
  func.func @transform_4(%arg0: i32) -> (i32, i32) {
    %c0_i32 = arith.constant 0 : i32
    %c0_i32_0 = arith.constant 0 : i32
    %c0_i32_1 = arith.constant 0 : i32
    return %c0_i32, %c0_i32_0 : i32, i32
  }
  func.func @transform_5(%arg0: i32) -> (i32, i32) {
    %c0_i32 = arith.constant 0 : i32
    %c0_i32_0 = arith.constant 0 : i32
    %c0_i32_1 = arith.constant 0 : i32
    return %c0_i32, %c0_i32_0 : i32, i32
  }
  func.func @transform_6(%arg0: i32) -> (i32, i32) {
    %c0_i32 = arith.constant 0 : i32
    %c0_i32_0 = arith.constant 0 : i32
    %c0_i32_1 = arith.constant 0 : i32
    return %c0_i32, %c0_i32_0 : i32, i32
  }
  func.func @transform_7(%arg0: i32) -> (i32, i32) {
    %c0_i32 = arith.constant 0 : i32
    %c0_i32_0 = arith.constant 0 : i32
    %c0_i32_1 = arith.constant 0 : i32
    return %c0_i32, %c0_i32_0 : i32, i32
  }
  func.func @transform_8(%arg0: i32) -> (i32, i32) {
    %c0_i32 = arith.constant 0 : i32
    %c0_i32_0 = arith.constant 0 : i32
    %c0_i32_1 = arith.constant 0 : i32
    return %c0_i32, %c0_i32_0 : i32, i32
  }
  func.func @transform_9(%arg0: i32) -> (i32, i32) {
    %c0_i32 = arith.constant 0 : i32
    %c0_i32_0 = arith.constant 0 : i32
    %c0_i32_1 = arith.constant 0 : i32
    return %c0_i32, %c0_i32_0 : i32, i32
  }
  func.func @transform_10(%arg0: i32) -> (i32, i32, i32, i32) {
    %c0_i32 = arith.constant 0 : i32
    %c0_i32_0 = arith.constant 0 : i32
    %c0_i32_1 = arith.constant 0 : i32
    %c0_i32_2 = arith.constant 0 : i32
    return %arg0, %c0_i32, %c0_i32_0, %c0_i32_1 : i32, i32, i32, i32
  }
}

module attributes {stable_mosaic.version = 11 : i64} {
  func.func @_maxpool_kernel(%arg0: i32, %arg1: memref<1x8x4x16xbf16, #tpu.memory_space<vmem>>, %arg2: memref<1x4x4x8xbf16, #tpu.memory_space<vmem>>, %arg3: memref<10x5x16xf32, #tpu.memory_space<vmem>>) attributes {dimension_semantics = [#tpu.dimension_semantics<parallel>], iteration_bounds = array<i64: 2>, scalar_prefetch = 0 : i64, scratch_operands = 1 : i64, tpu.core_type = #tpu.core_type<tc>, window_params = [{transform_indices = @transform_0, window_bounds = array<i64: 1, 8, 4, 16>}, {transform_indices = @transform_1, window_bounds = array<i64: 1, 4, 4, 8>}]} {
    %cst = arith.constant 0xFF800000 : f32
    %0 = vector.broadcast %cst : f32 to vector<10x5x16xf32>
    %c0 = arith.constant 0 : index
    %c0_0 = arith.constant 0 : index
    %c0_1 = arith.constant 0 : index
    %1 = vector.load %arg3[%c0, %c0_0, %c0_1] : memref<10x5x16xf32, #tpu.memory_space<vmem>>, vector<10x5x16xf32>
    tpu.vector_store %arg3[%c0, %c0_0, %c0_1], %0 {strides = array<i32>} : memref<10x5x16xf32, #tpu.memory_space<vmem>>, vector<10x5x16xf32>,
    %c0_2 = arith.constant 0 : index
    %c0_3 = arith.constant 0 : index
    %c0_4 = arith.constant 0 : index
    %c0_5 = arith.constant 0 : index
    %2 = vector.load %arg1[%c0_2, %c0_3, %c0_4, %c0_5] : memref<1x8x4x16xbf16, #tpu.memory_space<vmem>>, vector<1x8x4x16xbf16>
    %3 = vector.shape_cast %2 : vector<1x8x4x16xbf16> to vector<8x4x16xbf16>
    %4 = arith.extf %3 : vector<8x4x16xbf16> to vector<8x4x16xf32>
    %c1 = arith.constant 1 : index
    %c1_6 = arith.constant 1 : index
    %c0_7 = arith.constant 0 : index
    %5 = vector.load %arg3[%c1, %c1_6, %c0_7] : memref<10x5x16xf32, #tpu.memory_space<vmem>>, vector<8x4x16xf32>
    tpu.vector_store %arg3[%c1, %c1_6, %c0_7], %4 {strides = array<i32>} : memref<10x5x16xf32, #tpu.memory_space<vmem>>, vector<8x4x16xf32>,
    %c0_8 = arith.constant 0 : index
    %c1_9 = arith.constant 1 : index
    %c0_10 = arith.constant 0 : index
    %6 = vector.load %arg3[%c0_8, %c1_9, %c0_10] : memref<10x5x16xf32, #tpu.memory_space<vmem>>, vector<10x4x8xf32>
    %c0_11 = arith.constant 0 : index
    %c1_12 = arith.constant 1 : index
    %c8 = arith.constant 8 : index
    %7 = vector.load %arg3[%c0_11, %c1_12, %c8] : memref<10x5x16xf32, #tpu.memory_space<vmem>>, vector<10x4x8xf32>
    %8 = arith.maximumf %6, %7 : vector<10x4x8xf32>
    %c0_13 = arith.constant 0 : index
    %c0_14 = arith.constant 0 : index
    %c8_15 = arith.constant 8 : index
    %9 = vector.load %arg3[%c0_13, %c0_14, %c8_15] : memref<10x5x16xf32, #tpu.memory_space<vmem>>, vector<10x4x8xf32>
    %10 = arith.maximumf %8, %9 : vector<10x4x8xf32>
    %11 = vector.shape_cast %10 : vector<10x4x8xf32> to vector<5x2x4x8xf32>
    %12 = vector.extract_strided_slice %11 {offsets = [0, 0, 0, 0], sizes = [4, 1, 4, 8], strides = [1, 1, 1, 1]} : vector<5x2x4x8xf32> to vector<4x1x4x8xf32>
    %13 = vector.shape_cast %12 : vector<4x1x4x8xf32> to vector<4x4x8xf32>
    %14 = vector.extract_strided_slice %11 {offsets = [0, 1, 0, 0], sizes = [4, 1, 4, 8], strides = [1, 1, 1, 1]} : vector<5x2x4x8xf32> to vector<4x1x4x8xf32>
    %15 = vector.shape_cast %14 : vector<4x1x4x8xf32> to vector<4x4x8xf32>
    %16 = arith.maximumf %13, %15 : vector<4x4x8xf32>
    %17 = vector.extract_strided_slice %11 {offsets = [1, 0, 0, 0], sizes = [4, 1, 4, 8], strides = [1, 1, 1, 1]} : vector<5x2x4x8xf32> to vector<4x1x4x8xf32>
    %18 = vector.shape_cast %17 : vector<4x1x4x8xf32> to vector<4x4x8xf32>
    %19 = arith.maximumf %16, %18 : vector<4x4x8xf32>
    %20 = arith.truncf %19 : vector<4x4x8xf32> to vector<4x4x8xbf16>
    %c0_16 = arith.constant 0 : index
    %c0_17 = arith.constant 0 : index
    %c0_18 = arith.constant 0 : index
    %c0_19 = arith.constant 0 : index
    %21 = vector.load %arg2[%c0_16, %c0_17, %c0_18, %c0_19] : memref<1x4x4x8xbf16, #tpu.memory_space<vmem>>, vector<1x4x4x8xbf16>
    %22 = vector.shape_cast %21 : vector<1x4x4x8xbf16> to vector<4x4x8xbf16>
    %23 = vector.shape_cast %20 : vector<4x4x8xbf16> to vector<1x4x4x8xbf16>
    tpu.vector_store %arg2[%c0_16, %c0_17, %c0_18, %c0_19], %23 {strides = array<i32>} : memref<1x4x4x8xbf16, #tpu.memory_space<vmem>>, vector<1x4x4x8xbf16>,
    return
  }
  func.func @transform_0(%arg0: i32) -> (i32, i32, i32, i32) {
    %c0_i32 = arith.constant 0 : i32
    %c0_i32_0 = arith.constant 0 : i32
    %c0_i32_1 = arith.constant 0 : i32
    %c0_i32_2 = arith.constant 0 : i32
    return %arg0, %c0_i32, %c0_i32_0, %c0_i32_1 : i32, i32, i32, i32
  }
  func.func @transform_1(%arg0: i32) -> (i32, i32, i32, i32) {
    %c0_i32 = arith.constant 0 : i32
    %c0_i32_0 = arith.constant 0 : i32
    %c0_i32_1 = arith.constant 0 : i32
    %c0_i32_2 = arith.constant 0 : i32
    return %arg0, %c0_i32, %c0_i32_0, %c0_i32_1 : i32, i32, i32, i32
  }
}

module attributes {stable_mosaic.version = 11 : i64} {
  func.func @_resblock_kernel(%arg0: i32, %arg1: memref<1x4x4x8xbf16, #tpu.memory_space<vmem>>, %arg2: memref<1x8xf32, #tpu.memory_space<vmem>>, %arg3: memref<1x8xf32, #tpu.memory_space<vmem>>, %arg4: memref<8x2xbf16, #tpu.memory_space<vmem>>, %arg5: memref<1x2xf32, #tpu.memory_space<vmem>>, %arg6: memref<1x2xf32, #tpu.memory_space<vmem>>, %arg7: memref<18x2xbf16, #tpu.memory_space<vmem>>, %arg8: memref<1x2xf32, #tpu.memory_space<vmem>>, %arg9: memref<1x2xf32, #tpu.memory_space<vmem>>, %arg10: memref<2x8xbf16, #tpu.memory_space<vmem>>, %arg11: memref<1x4x4x8xbf16, #tpu.memory_space<vmem>>, %arg12: memref<6x6x2xbf16, #tpu.memory_space<vmem>>) attributes {dimension_semantics = [#tpu.dimension_semantics<parallel>], iteration_bounds = array<i64: 2>, scalar_prefetch = 0 : i64, scratch_operands = 1 : i64, tpu.core_type = #tpu.core_type<tc>, window_params = [{transform_indices = @transform_0, window_bounds = array<i64: 1, 4, 4, 8>}, {pipeline_mode = #tpu.pipeline_mode<synchronous>, transform_indices = @transform_1, window_bounds = array<i64: 1, 8>}, {pipeline_mode = #tpu.pipeline_mode<synchronous>, transform_indices = @transform_2, window_bounds = array<i64: 1, 8>}, {pipeline_mode = #tpu.pipeline_mode<synchronous>, transform_indices = @transform_3, window_bounds = array<i64: 8, 2>}, {pipeline_mode = #tpu.pipeline_mode<synchronous>, transform_indices = @transform_4, window_bounds = array<i64: 1, 2>}, {pipeline_mode = #tpu.pipeline_mode<synchronous>, transform_indices = @transform_5, window_bounds = array<i64: 1, 2>}, {pipeline_mode = #tpu.pipeline_mode<synchronous>, transform_indices = @transform_6, window_bounds = array<i64: 18, 2>}, {pipeline_mode = #tpu.pipeline_mode<synchronous>, transform_indices = @transform_7, window_bounds = array<i64: 1, 2>}, {pipeline_mode = #tpu.pipeline_mode<synchronous>, transform_indices = @transform_8, window_bounds = array<i64: 1, 2>}, {pipeline_mode = #tpu.pipeline_mode<synchronous>, transform_indices = @transform_9, window_bounds = array<i64: 2, 8>}, {transform_indices = @transform_10, window_bounds = array<i64: 1, 4, 4, 8>}]} {
    %cst = arith.constant 0.000000e+00 : bf16
    %0 = vector.broadcast %cst : bf16 to vector<6x6x2xbf16>
    %c0 = arith.constant 0 : index
    %c0_0 = arith.constant 0 : index
    %c0_1 = arith.constant 0 : index
    %1 = vector.load %arg12[%c0, %c0_0, %c0_1] : memref<6x6x2xbf16, #tpu.memory_space<vmem>>, vector<6x6x2xbf16>
    tpu.vector_store %arg12[%c0, %c0_0, %c0_1], %0 {strides = array<i32>} : memref<6x6x2xbf16, #tpu.memory_space<vmem>>, vector<6x6x2xbf16>,
    %c0_2 = arith.constant 0 : index
    %c0_3 = arith.constant 0 : index
    %2 = vector.load %arg2[%c0_2, %c0_3] : memref<1x8xf32, #tpu.memory_space<vmem>>, vector<1x8xf32>
    %c0_4 = arith.constant 0 : index
    %c0_5 = arith.constant 0 : index
    %3 = vector.load %arg3[%c0_4, %c0_5] : memref<1x8xf32, #tpu.memory_space<vmem>>, vector<1x8xf32>
    %c0_6 = arith.constant 0 : index
    %c0_7 = arith.constant 0 : index
    %4 = vector.load %arg5[%c0_6, %c0_7] : memref<1x2xf32, #tpu.memory_space<vmem>>, vector<1x2xf32>
    %c0_8 = arith.constant 0 : index
    %c0_9 = arith.constant 0 : index
    %5 = vector.load %arg6[%c0_8, %c0_9] : memref<1x2xf32, #tpu.memory_space<vmem>>, vector<1x2xf32>
    %c0_10 = arith.constant 0 : index
    %c0_11 = arith.constant 0 : index
    %6 = vector.load %arg4[%c0_10, %c0_11] : memref<8x2xbf16, #tpu.memory_space<vmem>>, vector<8x2xbf16>
    %c0_i32 = arith.constant 0 : i32
    %c4_i32 = arith.constant 4 : i32
    %7 = arith.addi %c0_i32, %c4_i32 : i32
    %c1_i32 = arith.constant 1 : i32
    scf.for %arg13 = %c0_i32 to %7 step %c1_i32  : i32 {
      %c0_25 = arith.constant 0 : index
      %13 = arith.index_cast %arg13 : i32 to index
      %c0_26 = arith.constant 0 : index
      %c0_27 = arith.constant 0 : index
      %14 = vector.load %arg1[%c0_25, %13, %c0_26, %c0_27] : memref<1x4x4x8xbf16, #tpu.memory_space<vmem>>, vector<1x1x4x8xbf16>
      %15 = vector.shape_cast %14 : vector<1x1x4x8xbf16> to vector<4x8xbf16>
      %16 = arith.extf %15 : vector<4x8xbf16> to vector<4x8xf32>
      %17 = vector.broadcast %2 : vector<1x8xf32> to vector<4x8xf32>
      %18 = arith.mulf %16, %17 : vector<4x8xf32>
      %19 = vector.broadcast %3 : vector<1x8xf32> to vector<4x8xf32>
      %20 = arith.addf %18, %19 : vector<4x8xf32>
      %cst_28 = arith.constant 0.000000e+00 : f32
      %21 = vector.broadcast %cst_28 : f32 to vector<4x8xf32>
      %22 = arith.maximumf %20, %21 : vector<4x8xf32>
      %23 = arith.truncf %22 : vector<4x8xf32> to vector<4x8xbf16>
      %cst_29 = arith.constant dense<0.000000e+00> : vector<4x2xf32>
      %24 = tpu.matmul %23, %6, %cst_29 {dimension_numbers = #tpu.dot_dimension_numbers<[1], [0], [0], [1], [0, 0, 1, 1], [], []>} : vector<4x8xbf16>, vector<8x2xbf16>, vector<4x2xf32> -> vector<4x2xf32>
      %25 = vector.broadcast %4 : vector<1x2xf32> to vector<4x2xf32>
      %26 = arith.mulf %24, %25 : vector<4x2xf32>
      %27 = vector.broadcast %5 : vector<1x2xf32> to vector<4x2xf32>
      %28 = arith.addf %26, %27 : vector<4x2xf32>
      %cst_30 = arith.constant 0.000000e+00 : f32
      %29 = vector.broadcast %cst_30 : f32 to vector<4x2xf32>
      %30 = arith.maximumf %28, %29 : vector<4x2xf32>
      %31 = arith.truncf %30 : vector<4x2xf32> to vector<4x2xbf16>
      %c1_i32_31 = arith.constant 1 : i32
      %32 = arith.addi %arg13, %c1_i32_31 : i32
      %33 = arith.index_cast %32 : i32 to index
      %c1 = arith.constant 1 : index
      %c0_32 = arith.constant 0 : index
      %34 = vector.load %arg12[%33, %c1, %c0_32] : memref<6x6x2xbf16, #tpu.memory_space<vmem>>, vector<1x4x2xbf16>
      %35 = vector.shape_cast %34 : vector<1x4x2xbf16> to vector<4x2xbf16>
      %36 = vector.shape_cast %31 : vector<4x2xbf16> to vector<1x4x2xbf16>
      tpu.vector_store %arg12[%33, %c1, %c0_32], %36 {strides = array<i32>} : memref<6x6x2xbf16, #tpu.memory_space<vmem>>, vector<1x4x2xbf16>,
    }
    %c4_i32_12 = arith.constant 4 : i32
    %c0_13 = arith.constant 0 : index
    %c0_14 = arith.constant 0 : index
    %8 = vector.load %arg7[%c0_13, %c0_14] : memref<18x2xbf16, #tpu.memory_space<vmem>>, vector<18x2xbf16>
    %c0_15 = arith.constant 0 : index
    %c0_16 = arith.constant 0 : index
    %9 = vector.load %arg10[%c0_15, %c0_16] : memref<2x8xbf16, #tpu.memory_space<vmem>>, vector<2x8xbf16>
    %c0_17 = arith.constant 0 : index
    %c0_18 = arith.constant 0 : index
    %10 = vector.load %arg8[%c0_17, %c0_18] : memref<1x2xf32, #tpu.memory_space<vmem>>, vector<1x2xf32>
    %c0_19 = arith.constant 0 : index
    %c0_20 = arith.constant 0 : index
    %11 = vector.load %arg9[%c0_19, %c0_20] : memref<1x2xf32, #tpu.memory_space<vmem>>, vector<1x2xf32>
    %c0_i32_21 = arith.constant 0 : i32
    %c4_i32_22 = arith.constant 4 : i32
    %12 = arith.addi %c0_i32_21, %c4_i32_22 : i32
    %c1_i32_23 = arith.constant 1 : i32
    scf.for %arg13 = %c0_i32_21 to %12 step %c1_i32_23  : i32 {
      %c0_i32_25 = arith.constant 0 : i32
      %13 = arith.addi %arg13, %c0_i32_25 : i32
      %14 = arith.index_cast %13 : i32 to index
      %c0_26 = arith.constant 0 : index
      %c0_27 = arith.constant 0 : index
      %15 = vector.load %arg12[%14, %c0_26, %c0_27] : memref<6x6x2xbf16, #tpu.memory_space<vmem>>, vector<1x4x2xbf16>
      %16 = vector.shape_cast %15 : vector<1x4x2xbf16> to vector<4x2xbf16>
      %c0_i32_28 = arith.constant 0 : i32
      %17 = arith.addi %arg13, %c0_i32_28 : i32
      %18 = arith.index_cast %17 : i32 to index
      %c1 = arith.constant 1 : index
      %c0_29 = arith.constant 0 : index
      %19 = vector.load %arg12[%18, %c1, %c0_29] : memref<6x6x2xbf16, #tpu.memory_space<vmem>>, vector<1x4x2xbf16>
      %20 = vector.shape_cast %19 : vector<1x4x2xbf16> to vector<4x2xbf16>
      %c0_i32_30 = arith.constant 0 : i32
      %21 = arith.addi %arg13, %c0_i32_30 : i32
      %22 = arith.index_cast %21 : i32 to index
      %c2 = arith.constant 2 : index
      %c0_31 = arith.constant 0 : index
      %23 = vector.load %arg12[%22, %c2, %c0_31] : memref<6x6x2xbf16, #tpu.memory_space<vmem>>, vector<1x4x2xbf16>
      %24 = vector.shape_cast %23 : vector<1x4x2xbf16> to vector<4x2xbf16>
      %c1_i32_32 = arith.constant 1 : i32
      %25 = arith.addi %arg13, %c1_i32_32 : i32
      %26 = arith.index_cast %25 : i32 to index
      %c0_33 = arith.constant 0 : index
      %c0_34 = arith.constant 0 : index
      %27 = vector.load %arg12[%26, %c0_33, %c0_34] : memref<6x6x2xbf16, #tpu.memory_space<vmem>>, vector<1x4x2xbf16>
      %28 = vector.shape_cast %27 : vector<1x4x2xbf16> to vector<4x2xbf16>
      %c1_i32_35 = arith.constant 1 : i32
      %29 = arith.addi %arg13, %c1_i32_35 : i32
      %30 = arith.index_cast %29 : i32 to index
      %c1_36 = arith.constant 1 : index
      %c0_37 = arith.constant 0 : index
      %31 = vector.load %arg12[%30, %c1_36, %c0_37] : memref<6x6x2xbf16, #tpu.memory_space<vmem>>, vector<1x4x2xbf16>
      %32 = vector.shape_cast %31 : vector<1x4x2xbf16> to vector<4x2xbf16>
      %c1_i32_38 = arith.constant 1 : i32
      %33 = arith.addi %arg13, %c1_i32_38 : i32
      %34 = arith.index_cast %33 : i32 to index
      %c2_39 = arith.constant 2 : index
      %c0_40 = arith.constant 0 : index
      %35 = vector.load %arg12[%34, %c2_39, %c0_40] : memref<6x6x2xbf16, #tpu.memory_space<vmem>>, vector<1x4x2xbf16>
      %36 = vector.shape_cast %35 : vector<1x4x2xbf16> to vector<4x2xbf16>
      %c2_i32 = arith.constant 2 : i32
      %37 = arith.addi %arg13, %c2_i32 : i32
      %38 = arith.index_cast %37 : i32 to index
      %c0_41 = arith.constant 0 : index
      %c0_42 = arith.constant 0 : index
      %39 = vector.load %arg12[%38, %c0_41, %c0_42] : memref<6x6x2xbf16, #tpu.memory_space<vmem>>, vector<1x4x2xbf16>
      %40 = vector.shape_cast %39 : vector<1x4x2xbf16> to vector<4x2xbf16>
      %c2_i32_43 = arith.constant 2 : i32
      %41 = arith.addi %arg13, %c2_i32_43 : i32
      %42 = arith.index_cast %41 : i32 to index
      %c1_44 = arith.constant 1 : index
      %c0_45 = arith.constant 0 : index
      %43 = vector.load %arg12[%42, %c1_44, %c0_45] : memref<6x6x2xbf16, #tpu.memory_space<vmem>>, vector<1x4x2xbf16>
      %44 = vector.shape_cast %43 : vector<1x4x2xbf16> to vector<4x2xbf16>
      %c2_i32_46 = arith.constant 2 : i32
      %45 = arith.addi %arg13, %c2_i32_46 : i32
      %46 = arith.index_cast %45 : i32 to index
      %c2_47 = arith.constant 2 : index
      %c0_48 = arith.constant 0 : index
      %47 = vector.load %arg12[%46, %c2_47, %c0_48] : memref<6x6x2xbf16, #tpu.memory_space<vmem>>, vector<1x4x2xbf16>
      %48 = vector.shape_cast %47 : vector<1x4x2xbf16> to vector<4x2xbf16>
      %49 = tpu.concatenate %16, %20, %24, %28, %32, %36, %40, %44, %48 in 1 : vector<4x2xbf16>, vector<4x2xbf16>, vector<4x2xbf16>, vector<4x2xbf16>, vector<4x2xbf16>, vector<4x2xbf16>, vector<4x2xbf16>, vector<4x2xbf16>, vector<4x2xbf16> -> vector<4x18xbf16>
      %cst_49 = arith.constant dense<0.000000e+00> : vector<4x2xf32>
      %50 = tpu.matmul %49, %8, %cst_49 {dimension_numbers = #tpu.dot_dimension_numbers<[1], [0], [0], [1], [0, 0, 1, 1], [], []>} : vector<4x18xbf16>, vector<18x2xbf16>, vector<4x2xf32> -> vector<4x2xf32>
      %51 = vector.broadcast %10 : vector<1x2xf32> to vector<4x2xf32>
      %52 = arith.mulf %50, %51 : vector<4x2xf32>
      %53 = vector.broadcast %11 : vector<1x2xf32> to vector<4x2xf32>
      %54 = arith.addf %52, %53 : vector<4x2xf32>
      %cst_50 = arith.constant 0.000000e+00 : f32
      %55 = vector.broadcast %cst_50 : f32 to vector<4x2xf32>
      %56 = arith.maximumf %54, %55 : vector<4x2xf32>
      %57 = arith.truncf %56 : vector<4x2xf32> to vector<4x2xbf16>
      %cst_51 = arith.constant dense<0.000000e+00> : vector<4x8xf32>
      %58 = tpu.matmul %57, %9, %cst_51 {dimension_numbers = #tpu.dot_dimension_numbers<[1], [0], [0], [1], [0, 0, 1, 1], [], []>} : vector<4x2xbf16>, vector<2x8xbf16>, vector<4x8xf32> -> vector<4x8xf32>
      %c0_52 = arith.constant 0 : index
      %59 = arith.index_cast %arg13 : i32 to index
      %c0_53 = arith.constant 0 : index
      %c0_54 = arith.constant 0 : index
      %60 = vector.load %arg1[%c0_52, %59, %c0_53, %c0_54] : memref<1x4x4x8xbf16, #tpu.memory_space<vmem>>, vector<1x1x4x8xbf16>
      %61 = vector.shape_cast %60 : vector<1x1x4x8xbf16> to vector<4x8xbf16>
      %62 = arith.extf %61 : vector<4x8xbf16> to vector<4x8xf32>
      %63 = arith.addf %58, %62 : vector<4x8xf32>
      %64 = arith.truncf %63 : vector<4x8xf32> to vector<4x8xbf16>
      %c0_55 = arith.constant 0 : index
      %65 = arith.index_cast %arg13 : i32 to index
      %c0_56 = arith.constant 0 : index
      %c0_57 = arith.constant 0 : index
      %66 = vector.load %arg11[%c0_55, %65, %c0_56, %c0_57] : memref<1x4x4x8xbf16, #tpu.memory_space<vmem>>, vector<1x1x4x8xbf16>
      %67 = vector.shape_cast %66 : vector<1x1x4x8xbf16> to vector<4x8xbf16>
      %68 = vector.shape_cast %64 : vector<4x8xbf16> to vector<1x1x4x8xbf16>
      tpu.vector_store %arg11[%c0_55, %65, %c0_56, %c0_57], %68 {strides = array<i32>} : memref<1x4x4x8xbf16, #tpu.memory_space<vmem>>, vector<1x1x4x8xbf16>,
    }
    %c4_i32_24 = arith.constant 4 : i32
    return
  }
  func.func @transform_0(%arg0: i32) -> (i32, i32, i32, i32) {
    %c0_i32 = arith.constant 0 : i32
    %c0_i32_0 = arith.constant 0 : i32
    %c0_i32_1 = arith.constant 0 : i32
    %c0_i32_2 = arith.constant 0 : i32
    return %arg0, %c0_i32, %c0_i32_0, %c0_i32_1 : i32, i32, i32, i32
  }
  func.func @transform_1(%arg0: i32) -> (i32, i32) {
    %c0_i32 = arith.constant 0 : i32
    %c0_i32_0 = arith.constant 0 : i32
    %c0_i32_1 = arith.constant 0 : i32
    return %c0_i32, %c0_i32_0 : i32, i32
  }
  func.func @transform_2(%arg0: i32) -> (i32, i32) {
    %c0_i32 = arith.constant 0 : i32
    %c0_i32_0 = arith.constant 0 : i32
    %c0_i32_1 = arith.constant 0 : i32
    return %c0_i32, %c0_i32_0 : i32, i32
  }
  func.func @transform_3(%arg0: i32) -> (i32, i32) {
    %c0_i32 = arith.constant 0 : i32
    %c0_i32_0 = arith.constant 0 : i32
    %c0_i32_1 = arith.constant 0 : i32
    return %c0_i32, %c0_i32_0 : i32, i32
  }
  func.func @transform_4(%arg0: i32) -> (i32, i32) {
    %c0_i32 = arith.constant 0 : i32
    %c0_i32_0 = arith.constant 0 : i32
    %c0_i32_1 = arith.constant 0 : i32
    return %c0_i32, %c0_i32_0 : i32, i32
  }
  func.func @transform_5(%arg0: i32) -> (i32, i32) {
    %c0_i32 = arith.constant 0 : i32
    %c0_i32_0 = arith.constant 0 : i32
    %c0_i32_1 = arith.constant 0 : i32
    return %c0_i32, %c0_i32_0 : i32, i32
  }
  func.func @transform_6(%arg0: i32) -> (i32, i32) {
    %c0_i32 = arith.constant 0 : i32
    %c0_i32_0 = arith.constant 0 : i32
    %c0_i32_1 = arith.constant 0 : i32
    return %c0_i32, %c0_i32_0 : i32, i32
  }
  func.func @transform_7(%arg0: i32) -> (i32, i32) {
    %c0_i32 = arith.constant 0 : i32
    %c0_i32_0 = arith.constant 0 : i32
    %c0_i32_1 = arith.constant 0 : i32
    return %c0_i32, %c0_i32_0 : i32, i32
  }
  func.func @transform_8(%arg0: i32) -> (i32, i32) {
    %c0_i32 = arith.constant 0 : i32
    %c0_i32_0 = arith.constant 0 : i32
    %c0_i32_1 = arith.constant 0 : i32
    return %c0_i32, %c0_i32_0 : i32, i32
  }
  func.func @transform_9(%arg0: i32) -> (i32, i32) {
    %c0_i32 = arith.constant 0 : i32
    %c0_i32_0 = arith.constant 0 : i32
    %c0_i32_1 = arith.constant 0 : i32
    return %c0_i32, %c0_i32_0 : i32, i32
  }
  func.func @transform_10(%arg0: i32) -> (i32, i32, i32, i32) {
    %c0_i32 = arith.constant 0 : i32
    %c0_i32_0 = arith.constant 0 : i32
    %c0_i32_1 = arith.constant 0 : i32
    %c0_i32_2 = arith.constant 0 : i32
    return %arg0, %c0_i32, %c0_i32_0, %c0_i32_1 : i32, i32, i32, i32
  }
}

module attributes {stable_mosaic.version = 11 : i64} {
  func.func @_maxpool_kernel(%arg0: i32, %arg1: memref<1x4x2x16xbf16, #tpu.memory_space<vmem>>, %arg2: memref<1x2x2x8xbf16, #tpu.memory_space<vmem>>, %arg3: memref<6x3x16xf32, #tpu.memory_space<vmem>>) attributes {dimension_semantics = [#tpu.dimension_semantics<parallel>], iteration_bounds = array<i64: 2>, scalar_prefetch = 0 : i64, scratch_operands = 1 : i64, tpu.core_type = #tpu.core_type<tc>, window_params = [{transform_indices = @transform_0, window_bounds = array<i64: 1, 4, 2, 16>}, {transform_indices = @transform_1, window_bounds = array<i64: 1, 2, 2, 8>}]} {
    %cst = arith.constant 0xFF800000 : f32
    %0 = vector.broadcast %cst : f32 to vector<6x3x16xf32>
    %c0 = arith.constant 0 : index
    %c0_0 = arith.constant 0 : index
    %c0_1 = arith.constant 0 : index
    %1 = vector.load %arg3[%c0, %c0_0, %c0_1] : memref<6x3x16xf32, #tpu.memory_space<vmem>>, vector<6x3x16xf32>
    tpu.vector_store %arg3[%c0, %c0_0, %c0_1], %0 {strides = array<i32>} : memref<6x3x16xf32, #tpu.memory_space<vmem>>, vector<6x3x16xf32>,
    %c0_2 = arith.constant 0 : index
    %c0_3 = arith.constant 0 : index
    %c0_4 = arith.constant 0 : index
    %c0_5 = arith.constant 0 : index
    %2 = vector.load %arg1[%c0_2, %c0_3, %c0_4, %c0_5] : memref<1x4x2x16xbf16, #tpu.memory_space<vmem>>, vector<1x4x2x16xbf16>
    %3 = vector.shape_cast %2 : vector<1x4x2x16xbf16> to vector<4x2x16xbf16>
    %4 = arith.extf %3 : vector<4x2x16xbf16> to vector<4x2x16xf32>
    %c1 = arith.constant 1 : index
    %c1_6 = arith.constant 1 : index
    %c0_7 = arith.constant 0 : index
    %5 = vector.load %arg3[%c1, %c1_6, %c0_7] : memref<6x3x16xf32, #tpu.memory_space<vmem>>, vector<4x2x16xf32>
    tpu.vector_store %arg3[%c1, %c1_6, %c0_7], %4 {strides = array<i32>} : memref<6x3x16xf32, #tpu.memory_space<vmem>>, vector<4x2x16xf32>,
    %c0_8 = arith.constant 0 : index
    %c1_9 = arith.constant 1 : index
    %c0_10 = arith.constant 0 : index
    %6 = vector.load %arg3[%c0_8, %c1_9, %c0_10] : memref<6x3x16xf32, #tpu.memory_space<vmem>>, vector<6x2x8xf32>
    %c0_11 = arith.constant 0 : index
    %c1_12 = arith.constant 1 : index
    %c8 = arith.constant 8 : index
    %7 = vector.load %arg3[%c0_11, %c1_12, %c8] : memref<6x3x16xf32, #tpu.memory_space<vmem>>, vector<6x2x8xf32>
    %8 = arith.maximumf %6, %7 : vector<6x2x8xf32>
    %c0_13 = arith.constant 0 : index
    %c0_14 = arith.constant 0 : index
    %c8_15 = arith.constant 8 : index
    %9 = vector.load %arg3[%c0_13, %c0_14, %c8_15] : memref<6x3x16xf32, #tpu.memory_space<vmem>>, vector<6x2x8xf32>
    %10 = arith.maximumf %8, %9 : vector<6x2x8xf32>
    %11 = vector.shape_cast %10 : vector<6x2x8xf32> to vector<3x2x2x8xf32>
    %12 = vector.extract_strided_slice %11 {offsets = [0, 0, 0, 0], sizes = [2, 1, 2, 8], strides = [1, 1, 1, 1]} : vector<3x2x2x8xf32> to vector<2x1x2x8xf32>
    %13 = vector.shape_cast %12 : vector<2x1x2x8xf32> to vector<2x2x8xf32>
    %14 = vector.extract_strided_slice %11 {offsets = [0, 1, 0, 0], sizes = [2, 1, 2, 8], strides = [1, 1, 1, 1]} : vector<3x2x2x8xf32> to vector<2x1x2x8xf32>
    %15 = vector.shape_cast %14 : vector<2x1x2x8xf32> to vector<2x2x8xf32>
    %16 = arith.maximumf %13, %15 : vector<2x2x8xf32>
    %17 = vector.extract_strided_slice %11 {offsets = [1, 0, 0, 0], sizes = [2, 1, 2, 8], strides = [1, 1, 1, 1]} : vector<3x2x2x8xf32> to vector<2x1x2x8xf32>
    %18 = vector.shape_cast %17 : vector<2x1x2x8xf32> to vector<2x2x8xf32>
    %19 = arith.maximumf %16, %18 : vector<2x2x8xf32>
    %20 = arith.truncf %19 : vector<2x2x8xf32> to vector<2x2x8xbf16>
    %c0_16 = arith.constant 0 : index
    %c0_17 = arith.constant 0 : index
    %c0_18 = arith.constant 0 : index
    %c0_19 = arith.constant 0 : index
    %21 = vector.load %arg2[%c0_16, %c0_17, %c0_18, %c0_19] : memref<1x2x2x8xbf16, #tpu.memory_space<vmem>>, vector<1x2x2x8xbf16>
    %22 = vector.shape_cast %21 : vector<1x2x2x8xbf16> to vector<2x2x8xbf16>
    %23 = vector.shape_cast %20 : vector<2x2x8xbf16> to vector<1x2x2x8xbf16>
    tpu.vector_store %arg2[%c0_16, %c0_17, %c0_18, %c0_19], %23 {strides = array<i32>} : memref<1x2x2x8xbf16, #tpu.memory_space<vmem>>, vector<1x2x2x8xbf16>,
    return
  }
  func.func @transform_0(%arg0: i32) -> (i32, i32, i32, i32) {
    %c0_i32 = arith.constant 0 : i32
    %c0_i32_0 = arith.constant 0 : i32
    %c0_i32_1 = arith.constant 0 : i32
    %c0_i32_2 = arith.constant 0 : i32
    return %arg0, %c0_i32, %c0_i32_0, %c0_i32_1 : i32, i32, i32, i32
  }
  func.func @transform_1(%arg0: i32) -> (i32, i32, i32, i32) {
    %c0_i32 = arith.constant 0 : i32
    %c0_i32_0 = arith.constant 0 : i32
    %c0_i32_1 = arith.constant 0 : i32
    %c0_i32_2 = arith.constant 0 : i32
    return %arg0, %c0_i32, %c0_i32_0, %c0_i32_1 : i32, i32, i32, i32
  }
}

module attributes {stable_mosaic.version = 11 : i64} {
  func.func @_resblock_kernel(%arg0: i32, %arg1: memref<1x2x2x8xbf16, #tpu.memory_space<vmem>>, %arg2: memref<1x8xf32, #tpu.memory_space<vmem>>, %arg3: memref<1x8xf32, #tpu.memory_space<vmem>>, %arg4: memref<8x2xbf16, #tpu.memory_space<vmem>>, %arg5: memref<1x2xf32, #tpu.memory_space<vmem>>, %arg6: memref<1x2xf32, #tpu.memory_space<vmem>>, %arg7: memref<18x2xbf16, #tpu.memory_space<vmem>>, %arg8: memref<1x2xf32, #tpu.memory_space<vmem>>, %arg9: memref<1x2xf32, #tpu.memory_space<vmem>>, %arg10: memref<2x8xbf16, #tpu.memory_space<vmem>>, %arg11: memref<1x2x2x8xbf16, #tpu.memory_space<vmem>>, %arg12: memref<4x4x2xbf16, #tpu.memory_space<vmem>>) attributes {dimension_semantics = [#tpu.dimension_semantics<parallel>], iteration_bounds = array<i64: 2>, scalar_prefetch = 0 : i64, scratch_operands = 1 : i64, tpu.core_type = #tpu.core_type<tc>, window_params = [{transform_indices = @transform_0, window_bounds = array<i64: 1, 2, 2, 8>}, {pipeline_mode = #tpu.pipeline_mode<synchronous>, transform_indices = @transform_1, window_bounds = array<i64: 1, 8>}, {pipeline_mode = #tpu.pipeline_mode<synchronous>, transform_indices = @transform_2, window_bounds = array<i64: 1, 8>}, {pipeline_mode = #tpu.pipeline_mode<synchronous>, transform_indices = @transform_3, window_bounds = array<i64: 8, 2>}, {pipeline_mode = #tpu.pipeline_mode<synchronous>, transform_indices = @transform_4, window_bounds = array<i64: 1, 2>}, {pipeline_mode = #tpu.pipeline_mode<synchronous>, transform_indices = @transform_5, window_bounds = array<i64: 1, 2>}, {pipeline_mode = #tpu.pipeline_mode<synchronous>, transform_indices = @transform_6, window_bounds = array<i64: 18, 2>}, {pipeline_mode = #tpu.pipeline_mode<synchronous>, transform_indices = @transform_7, window_bounds = array<i64: 1, 2>}, {pipeline_mode = #tpu.pipeline_mode<synchronous>, transform_indices = @transform_8, window_bounds = array<i64: 1, 2>}, {pipeline_mode = #tpu.pipeline_mode<synchronous>, transform_indices = @transform_9, window_bounds = array<i64: 2, 8>}, {transform_indices = @transform_10, window_bounds = array<i64: 1, 2, 2, 8>}]} {
    %cst = arith.constant 0.000000e+00 : bf16
    %0 = vector.broadcast %cst : bf16 to vector<4x4x2xbf16>
    %c0 = arith.constant 0 : index
    %c0_0 = arith.constant 0 : index
    %c0_1 = arith.constant 0 : index
    %1 = vector.load %arg12[%c0, %c0_0, %c0_1] : memref<4x4x2xbf16, #tpu.memory_space<vmem>>, vector<4x4x2xbf16>
    tpu.vector_store %arg12[%c0, %c0_0, %c0_1], %0 {strides = array<i32>} : memref<4x4x2xbf16, #tpu.memory_space<vmem>>, vector<4x4x2xbf16>,
    %c0_2 = arith.constant 0 : index
    %c0_3 = arith.constant 0 : index
    %2 = vector.load %arg2[%c0_2, %c0_3] : memref<1x8xf32, #tpu.memory_space<vmem>>, vector<1x8xf32>
    %c0_4 = arith.constant 0 : index
    %c0_5 = arith.constant 0 : index
    %3 = vector.load %arg3[%c0_4, %c0_5] : memref<1x8xf32, #tpu.memory_space<vmem>>, vector<1x8xf32>
    %c0_6 = arith.constant 0 : index
    %c0_7 = arith.constant 0 : index
    %4 = vector.load %arg5[%c0_6, %c0_7] : memref<1x2xf32, #tpu.memory_space<vmem>>, vector<1x2xf32>
    %c0_8 = arith.constant 0 : index
    %c0_9 = arith.constant 0 : index
    %5 = vector.load %arg6[%c0_8, %c0_9] : memref<1x2xf32, #tpu.memory_space<vmem>>, vector<1x2xf32>
    %c0_10 = arith.constant 0 : index
    %c0_11 = arith.constant 0 : index
    %6 = vector.load %arg4[%c0_10, %c0_11] : memref<8x2xbf16, #tpu.memory_space<vmem>>, vector<8x2xbf16>
    %c0_i32 = arith.constant 0 : i32
    %c2_i32 = arith.constant 2 : i32
    %7 = arith.addi %c0_i32, %c2_i32 : i32
    %c1_i32 = arith.constant 1 : i32
    scf.for %arg13 = %c0_i32 to %7 step %c1_i32  : i32 {
      %c0_25 = arith.constant 0 : index
      %13 = arith.index_cast %arg13 : i32 to index
      %c0_26 = arith.constant 0 : index
      %c0_27 = arith.constant 0 : index
      %14 = vector.load %arg1[%c0_25, %13, %c0_26, %c0_27] : memref<1x2x2x8xbf16, #tpu.memory_space<vmem>>, vector<1x1x2x8xbf16>
      %15 = vector.shape_cast %14 : vector<1x1x2x8xbf16> to vector<2x8xbf16>
      %16 = arith.extf %15 : vector<2x8xbf16> to vector<2x8xf32>
      %17 = vector.broadcast %2 : vector<1x8xf32> to vector<2x8xf32>
      %18 = arith.mulf %16, %17 : vector<2x8xf32>
      %19 = vector.broadcast %3 : vector<1x8xf32> to vector<2x8xf32>
      %20 = arith.addf %18, %19 : vector<2x8xf32>
      %cst_28 = arith.constant 0.000000e+00 : f32
      %21 = vector.broadcast %cst_28 : f32 to vector<2x8xf32>
      %22 = arith.maximumf %20, %21 : vector<2x8xf32>
      %23 = arith.truncf %22 : vector<2x8xf32> to vector<2x8xbf16>
      %cst_29 = arith.constant dense<0.000000e+00> : vector<2x2xf32>
      %24 = tpu.matmul %23, %6, %cst_29 {dimension_numbers = #tpu.dot_dimension_numbers<[1], [0], [0], [1], [0, 0, 1, 1], [], []>} : vector<2x8xbf16>, vector<8x2xbf16>, vector<2x2xf32> -> vector<2x2xf32>
      %25 = vector.broadcast %4 : vector<1x2xf32> to vector<2x2xf32>
      %26 = arith.mulf %24, %25 : vector<2x2xf32>
      %27 = vector.broadcast %5 : vector<1x2xf32> to vector<2x2xf32>
      %28 = arith.addf %26, %27 : vector<2x2xf32>
      %cst_30 = arith.constant 0.000000e+00 : f32
      %29 = vector.broadcast %cst_30 : f32 to vector<2x2xf32>
      %30 = arith.maximumf %28, %29 : vector<2x2xf32>
      %31 = arith.truncf %30 : vector<2x2xf32> to vector<2x2xbf16>
      %c1_i32_31 = arith.constant 1 : i32
      %32 = arith.addi %arg13, %c1_i32_31 : i32
      %33 = arith.index_cast %32 : i32 to index
      %c1 = arith.constant 1 : index
      %c0_32 = arith.constant 0 : index
      %34 = vector.load %arg12[%33, %c1, %c0_32] : memref<4x4x2xbf16, #tpu.memory_space<vmem>>, vector<1x2x2xbf16>
      %35 = vector.shape_cast %34 : vector<1x2x2xbf16> to vector<2x2xbf16>
      %36 = vector.shape_cast %31 : vector<2x2xbf16> to vector<1x2x2xbf16>
      tpu.vector_store %arg12[%33, %c1, %c0_32], %36 {strides = array<i32>} : memref<4x4x2xbf16, #tpu.memory_space<vmem>>, vector<1x2x2xbf16>,
    }
    %c2_i32_12 = arith.constant 2 : i32
    %c0_13 = arith.constant 0 : index
    %c0_14 = arith.constant 0 : index
    %8 = vector.load %arg7[%c0_13, %c0_14] : memref<18x2xbf16, #tpu.memory_space<vmem>>, vector<18x2xbf16>
    %c0_15 = arith.constant 0 : index
    %c0_16 = arith.constant 0 : index
    %9 = vector.load %arg10[%c0_15, %c0_16] : memref<2x8xbf16, #tpu.memory_space<vmem>>, vector<2x8xbf16>
    %c0_17 = arith.constant 0 : index
    %c0_18 = arith.constant 0 : index
    %10 = vector.load %arg8[%c0_17, %c0_18] : memref<1x2xf32, #tpu.memory_space<vmem>>, vector<1x2xf32>
    %c0_19 = arith.constant 0 : index
    %c0_20 = arith.constant 0 : index
    %11 = vector.load %arg9[%c0_19, %c0_20] : memref<1x2xf32, #tpu.memory_space<vmem>>, vector<1x2xf32>
    %c0_i32_21 = arith.constant 0 : i32
    %c2_i32_22 = arith.constant 2 : i32
    %12 = arith.addi %c0_i32_21, %c2_i32_22 : i32
    %c1_i32_23 = arith.constant 1 : i32
    scf.for %arg13 = %c0_i32_21 to %12 step %c1_i32_23  : i32 {
      %c0_i32_25 = arith.constant 0 : i32
      %13 = arith.addi %arg13, %c0_i32_25 : i32
      %14 = arith.index_cast %13 : i32 to index
      %c0_26 = arith.constant 0 : index
      %c0_27 = arith.constant 0 : index
      %15 = vector.load %arg12[%14, %c0_26, %c0_27] : memref<4x4x2xbf16, #tpu.memory_space<vmem>>, vector<1x2x2xbf16>
      %16 = vector.shape_cast %15 : vector<1x2x2xbf16> to vector<2x2xbf16>
      %c0_i32_28 = arith.constant 0 : i32
      %17 = arith.addi %arg13, %c0_i32_28 : i32
      %18 = arith.index_cast %17 : i32 to index
      %c1 = arith.constant 1 : index
      %c0_29 = arith.constant 0 : index
      %19 = vector.load %arg12[%18, %c1, %c0_29] : memref<4x4x2xbf16, #tpu.memory_space<vmem>>, vector<1x2x2xbf16>
      %20 = vector.shape_cast %19 : vector<1x2x2xbf16> to vector<2x2xbf16>
      %c0_i32_30 = arith.constant 0 : i32
      %21 = arith.addi %arg13, %c0_i32_30 : i32
      %22 = arith.index_cast %21 : i32 to index
      %c2 = arith.constant 2 : index
      %c0_31 = arith.constant 0 : index
      %23 = vector.load %arg12[%22, %c2, %c0_31] : memref<4x4x2xbf16, #tpu.memory_space<vmem>>, vector<1x2x2xbf16>
      %24 = vector.shape_cast %23 : vector<1x2x2xbf16> to vector<2x2xbf16>
      %c1_i32_32 = arith.constant 1 : i32
      %25 = arith.addi %arg13, %c1_i32_32 : i32
      %26 = arith.index_cast %25 : i32 to index
      %c0_33 = arith.constant 0 : index
      %c0_34 = arith.constant 0 : index
      %27 = vector.load %arg12[%26, %c0_33, %c0_34] : memref<4x4x2xbf16, #tpu.memory_space<vmem>>, vector<1x2x2xbf16>
      %28 = vector.shape_cast %27 : vector<1x2x2xbf16> to vector<2x2xbf16>
      %c1_i32_35 = arith.constant 1 : i32
      %29 = arith.addi %arg13, %c1_i32_35 : i32
      %30 = arith.index_cast %29 : i32 to index
      %c1_36 = arith.constant 1 : index
      %c0_37 = arith.constant 0 : index
      %31 = vector.load %arg12[%30, %c1_36, %c0_37] : memref<4x4x2xbf16, #tpu.memory_space<vmem>>, vector<1x2x2xbf16>
      %32 = vector.shape_cast %31 : vector<1x2x2xbf16> to vector<2x2xbf16>
      %c1_i32_38 = arith.constant 1 : i32
      %33 = arith.addi %arg13, %c1_i32_38 : i32
      %34 = arith.index_cast %33 : i32 to index
      %c2_39 = arith.constant 2 : index
      %c0_40 = arith.constant 0 : index
      %35 = vector.load %arg12[%34, %c2_39, %c0_40] : memref<4x4x2xbf16, #tpu.memory_space<vmem>>, vector<1x2x2xbf16>
      %36 = vector.shape_cast %35 : vector<1x2x2xbf16> to vector<2x2xbf16>
      %c2_i32_41 = arith.constant 2 : i32
      %37 = arith.addi %arg13, %c2_i32_41 : i32
      %38 = arith.index_cast %37 : i32 to index
      %c0_42 = arith.constant 0 : index
      %c0_43 = arith.constant 0 : index
      %39 = vector.load %arg12[%38, %c0_42, %c0_43] : memref<4x4x2xbf16, #tpu.memory_space<vmem>>, vector<1x2x2xbf16>
      %40 = vector.shape_cast %39 : vector<1x2x2xbf16> to vector<2x2xbf16>
      %c2_i32_44 = arith.constant 2 : i32
      %41 = arith.addi %arg13, %c2_i32_44 : i32
      %42 = arith.index_cast %41 : i32 to index
      %c1_45 = arith.constant 1 : index
      %c0_46 = arith.constant 0 : index
      %43 = vector.load %arg12[%42, %c1_45, %c0_46] : memref<4x4x2xbf16, #tpu.memory_space<vmem>>, vector<1x2x2xbf16>
      %44 = vector.shape_cast %43 : vector<1x2x2xbf16> to vector<2x2xbf16>
      %c2_i32_47 = arith.constant 2 : i32
      %45 = arith.addi %arg13, %c2_i32_47 : i32
      %46 = arith.index_cast %45 : i32 to index
      %c2_48 = arith.constant 2 : index
      %c0_49 = arith.constant 0 : index
      %47 = vector.load %arg12[%46, %c2_48, %c0_49] : memref<4x4x2xbf16, #tpu.memory_space<vmem>>, vector<1x2x2xbf16>
      %48 = vector.shape_cast %47 : vector<1x2x2xbf16> to vector<2x2xbf16>
      %49 = tpu.concatenate %16, %20, %24, %28, %32, %36, %40, %44, %48 in 1 : vector<2x2xbf16>, vector<2x2xbf16>, vector<2x2xbf16>, vector<2x2xbf16>, vector<2x2xbf16>, vector<2x2xbf16>, vector<2x2xbf16>, vector<2x2xbf16>, vector<2x2xbf16> -> vector<2x18xbf16>
      %cst_50 = arith.constant dense<0.000000e+00> : vector<2x2xf32>
      %50 = tpu.matmul %49, %8, %cst_50 {dimension_numbers = #tpu.dot_dimension_numbers<[1], [0], [0], [1], [0, 0, 1, 1], [], []>} : vector<2x18xbf16>, vector<18x2xbf16>, vector<2x2xf32> -> vector<2x2xf32>
      %51 = vector.broadcast %10 : vector<1x2xf32> to vector<2x2xf32>
      %52 = arith.mulf %50, %51 : vector<2x2xf32>
      %53 = vector.broadcast %11 : vector<1x2xf32> to vector<2x2xf32>
      %54 = arith.addf %52, %53 : vector<2x2xf32>
      %cst_51 = arith.constant 0.000000e+00 : f32
      %55 = vector.broadcast %cst_51 : f32 to vector<2x2xf32>
      %56 = arith.maximumf %54, %55 : vector<2x2xf32>
      %57 = arith.truncf %56 : vector<2x2xf32> to vector<2x2xbf16>
      %cst_52 = arith.constant dense<0.000000e+00> : vector<2x8xf32>
      %58 = tpu.matmul %57, %9, %cst_52 {dimension_numbers = #tpu.dot_dimension_numbers<[1], [0], [0], [1], [0, 0, 1, 1], [], []>} : vector<2x2xbf16>, vector<2x8xbf16>, vector<2x8xf32> -> vector<2x8xf32>
      %c0_53 = arith.constant 0 : index
      %59 = arith.index_cast %arg13 : i32 to index
      %c0_54 = arith.constant 0 : index
      %c0_55 = arith.constant 0 : index
      %60 = vector.load %arg1[%c0_53, %59, %c0_54, %c0_55] : memref<1x2x2x8xbf16, #tpu.memory_space<vmem>>, vector<1x1x2x8xbf16>
      %61 = vector.shape_cast %60 : vector<1x1x2x8xbf16> to vector<2x8xbf16>
      %62 = arith.extf %61 : vector<2x8xbf16> to vector<2x8xf32>
      %63 = arith.addf %58, %62 : vector<2x8xf32>
      %64 = arith.truncf %63 : vector<2x8xf32> to vector<2x8xbf16>
      %c0_56 = arith.constant 0 : index
      %65 = arith.index_cast %arg13 : i32 to index
      %c0_57 = arith.constant 0 : index
      %c0_58 = arith.constant 0 : index
      %66 = vector.load %arg11[%c0_56, %65, %c0_57, %c0_58] : memref<1x2x2x8xbf16, #tpu.memory_space<vmem>>, vector<1x1x2x8xbf16>
      %67 = vector.shape_cast %66 : vector<1x1x2x8xbf16> to vector<2x8xbf16>
      %68 = vector.shape_cast %64 : vector<2x8xbf16> to vector<1x1x2x8xbf16>
      tpu.vector_store %arg11[%c0_56, %65, %c0_57, %c0_58], %68 {strides = array<i32>} : memref<1x2x2x8xbf16, #tpu.memory_space<vmem>>, vector<1x1x2x8xbf16>,
    }
    %c2_i32_24 = arith.constant 2 : i32
    return
  }
  func.func @transform_0(%arg0: i32) -> (i32, i32, i32, i32) {
    %c0_i32 = arith.constant 0 : i32
    %c0_i32_0 = arith.constant 0 : i32
    %c0_i32_1 = arith.constant 0 : i32
    %c0_i32_2 = arith.constant 0 : i32
    return %arg0, %c0_i32, %c0_i32_0, %c0_i32_1 : i32, i32, i32, i32
  }
  func.func @transform_1(%arg0: i32) -> (i32, i32) {
    %c0_i32 = arith.constant 0 : i32
    %c0_i32_0 = arith.constant 0 : i32
    %c0_i32_1 = arith.constant 0 : i32
    return %c0_i32, %c0_i32_0 : i32, i32
  }
  func.func @transform_2(%arg0: i32) -> (i32, i32) {
    %c0_i32 = arith.constant 0 : i32
    %c0_i32_0 = arith.constant 0 : i32
    %c0_i32_1 = arith.constant 0 : i32
    return %c0_i32, %c0_i32_0 : i32, i32
  }
  func.func @transform_3(%arg0: i32) -> (i32, i32) {
    %c0_i32 = arith.constant 0 : i32
    %c0_i32_0 = arith.constant 0 : i32
    %c0_i32_1 = arith.constant 0 : i32
    return %c0_i32, %c0_i32_0 : i32, i32
  }
  func.func @transform_4(%arg0: i32) -> (i32, i32) {
    %c0_i32 = arith.constant 0 : i32
    %c0_i32_0 = arith.constant 0 : i32
    %c0_i32_1 = arith.constant 0 : i32
    return %c0_i32, %c0_i32_0 : i32, i32
  }
  func.func @transform_5(%arg0: i32) -> (i32, i32) {
    %c0_i32 = arith.constant 0 : i32
    %c0_i32_0 = arith.constant 0 : i32
    %c0_i32_1 = arith.constant 0 : i32
    return %c0_i32, %c0_i32_0 : i32, i32
  }
  func.func @transform_6(%arg0: i32) -> (i32, i32) {
    %c0_i32 = arith.constant 0 : i32
    %c0_i32_0 = arith.constant 0 : i32
    %c0_i32_1 = arith.constant 0 : i32
    return %c0_i32, %c0_i32_0 : i32, i32
  }
  func.func @transform_7(%arg0: i32) -> (i32, i32) {
    %c0_i32 = arith.constant 0 : i32
    %c0_i32_0 = arith.constant 0 : i32
    %c0_i32_1 = arith.constant 0 : i32
    return %c0_i32, %c0_i32_0 : i32, i32
  }
  func.func @transform_8(%arg0: i32) -> (i32, i32) {
    %c0_i32 = arith.constant 0 : i32
    %c0_i32_0 = arith.constant 0 : i32
    %c0_i32_1 = arith.constant 0 : i32
    return %c0_i32, %c0_i32_0 : i32, i32
  }
  func.func @transform_9(%arg0: i32) -> (i32, i32) {
    %c0_i32 = arith.constant 0 : i32
    %c0_i32_0 = arith.constant 0 : i32
    %c0_i32_1 = arith.constant 0 : i32
    return %c0_i32, %c0_i32_0 : i32, i32
  }
  func.func @transform_10(%arg0: i32) -> (i32, i32, i32, i32) {
    %c0_i32 = arith.constant 0 : i32
    %c0_i32_0 = arith.constant 0 : i32
    %c0_i32_1 = arith.constant 0 : i32
    %c0_i32_2 = arith.constant 0 : i32
    return %arg0, %c0_i32, %c0_i32_0, %c0_i32_1 : i32, i32, i32, i32
  }
}

module attributes {stable_mosaic.version = 11 : i64} {
  func.func @_maxpool_kernel(%arg0: i32, %arg1: memref<1x2x1x16xbf16, #tpu.memory_space<vmem>>, %arg2: memref<1x1x1x8xbf16, #tpu.memory_space<vmem>>, %arg3: memref<4x2x16xf32, #tpu.memory_space<vmem>>) attributes {dimension_semantics = [#tpu.dimension_semantics<parallel>], iteration_bounds = array<i64: 2>, scalar_prefetch = 0 : i64, scratch_operands = 1 : i64, tpu.core_type = #tpu.core_type<tc>, window_params = [{transform_indices = @transform_0, window_bounds = array<i64: 1, 2, 1, 16>}, {transform_indices = @transform_1, window_bounds = array<i64: 1, 1, 1, 8>}]} {
    %cst = arith.constant 0xFF800000 : f32
    %0 = vector.broadcast %cst : f32 to vector<4x2x16xf32>
    %c0 = arith.constant 0 : index
    %c0_0 = arith.constant 0 : index
    %c0_1 = arith.constant 0 : index
    %1 = vector.load %arg3[%c0, %c0_0, %c0_1] : memref<4x2x16xf32, #tpu.memory_space<vmem>>, vector<4x2x16xf32>
    tpu.vector_store %arg3[%c0, %c0_0, %c0_1], %0 {strides = array<i32>} : memref<4x2x16xf32, #tpu.memory_space<vmem>>, vector<4x2x16xf32>,
    %c0_2 = arith.constant 0 : index
    %c0_3 = arith.constant 0 : index
    %c0_4 = arith.constant 0 : index
    %c0_5 = arith.constant 0 : index
    %2 = vector.load %arg1[%c0_2, %c0_3, %c0_4, %c0_5] : memref<1x2x1x16xbf16, #tpu.memory_space<vmem>>, vector<1x2x1x16xbf16>
    %3 = vector.shape_cast %2 : vector<1x2x1x16xbf16> to vector<2x1x16xbf16>
    %4 = arith.extf %3 : vector<2x1x16xbf16> to vector<2x1x16xf32>
    %c1 = arith.constant 1 : index
    %c1_6 = arith.constant 1 : index
    %c0_7 = arith.constant 0 : index
    %5 = vector.load %arg3[%c1, %c1_6, %c0_7] : memref<4x2x16xf32, #tpu.memory_space<vmem>>, vector<2x1x16xf32>
    tpu.vector_store %arg3[%c1, %c1_6, %c0_7], %4 {strides = array<i32>} : memref<4x2x16xf32, #tpu.memory_space<vmem>>, vector<2x1x16xf32>,
    %c0_8 = arith.constant 0 : index
    %c1_9 = arith.constant 1 : index
    %c0_10 = arith.constant 0 : index
    %6 = vector.load %arg3[%c0_8, %c1_9, %c0_10] : memref<4x2x16xf32, #tpu.memory_space<vmem>>, vector<4x1x8xf32>
    %c0_11 = arith.constant 0 : index
    %c1_12 = arith.constant 1 : index
    %c8 = arith.constant 8 : index
    %7 = vector.load %arg3[%c0_11, %c1_12, %c8] : memref<4x2x16xf32, #tpu.memory_space<vmem>>, vector<4x1x8xf32>
    %8 = arith.maximumf %6, %7 : vector<4x1x8xf32>
    %c0_13 = arith.constant 0 : index
    %c0_14 = arith.constant 0 : index
    %c8_15 = arith.constant 8 : index
    %9 = vector.load %arg3[%c0_13, %c0_14, %c8_15] : memref<4x2x16xf32, #tpu.memory_space<vmem>>, vector<4x1x8xf32>
    %10 = arith.maximumf %8, %9 : vector<4x1x8xf32>
    %11 = vector.shape_cast %10 : vector<4x1x8xf32> to vector<2x2x1x8xf32>
    %12 = vector.extract_strided_slice %11 {offsets = [0, 0, 0, 0], sizes = [1, 1, 1, 8], strides = [1, 1, 1, 1]} : vector<2x2x1x8xf32> to vector<1x1x1x8xf32>
    %13 = vector.shape_cast %12 : vector<1x1x1x8xf32> to vector<1x1x8xf32>
    %14 = vector.extract_strided_slice %11 {offsets = [0, 1, 0, 0], sizes = [1, 1, 1, 8], strides = [1, 1, 1, 1]} : vector<2x2x1x8xf32> to vector<1x1x1x8xf32>
    %15 = vector.shape_cast %14 : vector<1x1x1x8xf32> to vector<1x1x8xf32>
    %16 = arith.maximumf %13, %15 : vector<1x1x8xf32>
    %17 = vector.extract_strided_slice %11 {offsets = [1, 0, 0, 0], sizes = [1, 1, 1, 8], strides = [1, 1, 1, 1]} : vector<2x2x1x8xf32> to vector<1x1x1x8xf32>
    %18 = vector.shape_cast %17 : vector<1x1x1x8xf32> to vector<1x1x8xf32>
    %19 = arith.maximumf %16, %18 : vector<1x1x8xf32>
    %20 = arith.truncf %19 : vector<1x1x8xf32> to vector<1x1x8xbf16>
    %c0_16 = arith.constant 0 : index
    %c0_17 = arith.constant 0 : index
    %c0_18 = arith.constant 0 : index
    %c0_19 = arith.constant 0 : index
    %21 = vector.load %arg2[%c0_16, %c0_17, %c0_18, %c0_19] : memref<1x1x1x8xbf16, #tpu.memory_space<vmem>>, vector<1x1x1x8xbf16>
    %22 = vector.shape_cast %21 : vector<1x1x1x8xbf16> to vector<1x1x8xbf16>
    %23 = vector.shape_cast %20 : vector<1x1x8xbf16> to vector<1x1x1x8xbf16>
    tpu.vector_store %arg2[%c0_16, %c0_17, %c0_18, %c0_19], %23 {strides = array<i32>} : memref<1x1x1x8xbf16, #tpu.memory_space<vmem>>, vector<1x1x1x8xbf16>,
    return
  }
  func.func @transform_0(%arg0: i32) -> (i32, i32, i32, i32) {
    %c0_i32 = arith.constant 0 : i32
    %c0_i32_0 = arith.constant 0 : i32
    %c0_i32_1 = arith.constant 0 : i32
    %c0_i32_2 = arith.constant 0 : i32
    return %arg0, %c0_i32, %c0_i32_0, %c0_i32_1 : i32, i32, i32, i32
  }
  func.func @transform_1(%arg0: i32) -> (i32, i32, i32, i32) {
    %c0_i32 = arith.constant 0 : i32
    %c0_i32_0 = arith.constant 0 : i32
    %c0_i32_1 = arith.constant 0 : i32
    %c0_i32_2 = arith.constant 0 : i32
    return %arg0, %c0_i32, %c0_i32_0, %c0_i32_1 : i32, i32, i32, i32
  }
}

module attributes {stable_mosaic.version = 11 : i64} {
  func.func @_resblock_kernel(%arg0: i32, %arg1: memref<1x1x1x8xbf16, #tpu.memory_space<vmem>>, %arg2: memref<1x8xf32, #tpu.memory_space<vmem>>, %arg3: memref<1x8xf32, #tpu.memory_space<vmem>>, %arg4: memref<8x2xbf16, #tpu.memory_space<vmem>>, %arg5: memref<1x2xf32, #tpu.memory_space<vmem>>, %arg6: memref<1x2xf32, #tpu.memory_space<vmem>>, %arg7: memref<18x2xbf16, #tpu.memory_space<vmem>>, %arg8: memref<1x2xf32, #tpu.memory_space<vmem>>, %arg9: memref<1x2xf32, #tpu.memory_space<vmem>>, %arg10: memref<2x8xbf16, #tpu.memory_space<vmem>>, %arg11: memref<1x1x1x8xbf16, #tpu.memory_space<vmem>>, %arg12: memref<3x3x2xbf16, #tpu.memory_space<vmem>>) attributes {dimension_semantics = [#tpu.dimension_semantics<parallel>], iteration_bounds = array<i64: 2>, scalar_prefetch = 0 : i64, scratch_operands = 1 : i64, tpu.core_type = #tpu.core_type<tc>, window_params = [{transform_indices = @transform_0, window_bounds = array<i64: 1, 1, 1, 8>}, {pipeline_mode = #tpu.pipeline_mode<synchronous>, transform_indices = @transform_1, window_bounds = array<i64: 1, 8>}, {pipeline_mode = #tpu.pipeline_mode<synchronous>, transform_indices = @transform_2, window_bounds = array<i64: 1, 8>}, {pipeline_mode = #tpu.pipeline_mode<synchronous>, transform_indices = @transform_3, window_bounds = array<i64: 8, 2>}, {pipeline_mode = #tpu.pipeline_mode<synchronous>, transform_indices = @transform_4, window_bounds = array<i64: 1, 2>}, {pipeline_mode = #tpu.pipeline_mode<synchronous>, transform_indices = @transform_5, window_bounds = array<i64: 1, 2>}, {pipeline_mode = #tpu.pipeline_mode<synchronous>, transform_indices = @transform_6, window_bounds = array<i64: 18, 2>}, {pipeline_mode = #tpu.pipeline_mode<synchronous>, transform_indices = @transform_7, window_bounds = array<i64: 1, 2>}, {pipeline_mode = #tpu.pipeline_mode<synchronous>, transform_indices = @transform_8, window_bounds = array<i64: 1, 2>}, {pipeline_mode = #tpu.pipeline_mode<synchronous>, transform_indices = @transform_9, window_bounds = array<i64: 2, 8>}, {transform_indices = @transform_10, window_bounds = array<i64: 1, 1, 1, 8>}]} {
    %cst = arith.constant 0.000000e+00 : bf16
    %0 = vector.broadcast %cst : bf16 to vector<3x3x2xbf16>
    %c0 = arith.constant 0 : index
    %c0_0 = arith.constant 0 : index
    %c0_1 = arith.constant 0 : index
    %1 = vector.load %arg12[%c0, %c0_0, %c0_1] : memref<3x3x2xbf16, #tpu.memory_space<vmem>>, vector<3x3x2xbf16>
    tpu.vector_store %arg12[%c0, %c0_0, %c0_1], %0 {strides = array<i32>} : memref<3x3x2xbf16, #tpu.memory_space<vmem>>, vector<3x3x2xbf16>,
    %c0_2 = arith.constant 0 : index
    %c0_3 = arith.constant 0 : index
    %2 = vector.load %arg2[%c0_2, %c0_3] : memref<1x8xf32, #tpu.memory_space<vmem>>, vector<1x8xf32>
    %c0_4 = arith.constant 0 : index
    %c0_5 = arith.constant 0 : index
    %3 = vector.load %arg3[%c0_4, %c0_5] : memref<1x8xf32, #tpu.memory_space<vmem>>, vector<1x8xf32>
    %c0_6 = arith.constant 0 : index
    %c0_7 = arith.constant 0 : index
    %4 = vector.load %arg5[%c0_6, %c0_7] : memref<1x2xf32, #tpu.memory_space<vmem>>, vector<1x2xf32>
    %c0_8 = arith.constant 0 : index
    %c0_9 = arith.constant 0 : index
    %5 = vector.load %arg6[%c0_8, %c0_9] : memref<1x2xf32, #tpu.memory_space<vmem>>, vector<1x2xf32>
    %c0_10 = arith.constant 0 : index
    %c0_11 = arith.constant 0 : index
    %6 = vector.load %arg4[%c0_10, %c0_11] : memref<8x2xbf16, #tpu.memory_space<vmem>>, vector<8x2xbf16>
    %c0_i32 = arith.constant 0 : i32
    %c0_12 = arith.constant 0 : index
    %7 = arith.index_cast %c0_i32 : i32 to index
    %c0_13 = arith.constant 0 : index
    %c0_14 = arith.constant 0 : index
    %8 = vector.load %arg1[%c0_12, %7, %c0_13, %c0_14] : memref<1x1x1x8xbf16, #tpu.memory_space<vmem>>, vector<1x1x1x8xbf16>
    %9 = vector.shape_cast %8 : vector<1x1x1x8xbf16> to vector<1x8xbf16>
    %10 = arith.extf %9 : vector<1x8xbf16> to vector<1x8xf32>
    %11 = arith.mulf %10, %2 : vector<1x8xf32>
    %12 = arith.addf %11, %3 : vector<1x8xf32>
    %cst_15 = arith.constant 0.000000e+00 : f32
    %13 = vector.broadcast %cst_15 : f32 to vector<1x8xf32>
    %14 = arith.maximumf %12, %13 : vector<1x8xf32>
    %15 = arith.truncf %14 : vector<1x8xf32> to vector<1x8xbf16>
    %cst_16 = arith.constant dense<0.000000e+00> : vector<1x2xf32>
    %16 = tpu.matmul %15, %6, %cst_16 {dimension_numbers = #tpu.dot_dimension_numbers<[1], [0], [0], [1], [0, 0, 1, 1], [], []>} : vector<1x8xbf16>, vector<8x2xbf16>, vector<1x2xf32> -> vector<1x2xf32>
    %17 = arith.mulf %16, %4 : vector<1x2xf32>
    %18 = arith.addf %17, %5 : vector<1x2xf32>
    %cst_17 = arith.constant 0.000000e+00 : f32
    %19 = vector.broadcast %cst_17 : f32 to vector<1x2xf32>
    %20 = arith.maximumf %18, %19 : vector<1x2xf32>
    %21 = arith.truncf %20 : vector<1x2xf32> to vector<1x2xbf16>
    %c1_i32 = arith.constant 1 : i32
    %22 = arith.addi %c0_i32, %c1_i32 : i32
    %23 = arith.index_cast %22 : i32 to index
    %c1 = arith.constant 1 : index
    %c0_18 = arith.constant 0 : index
    %24 = vector.load %arg12[%23, %c1, %c0_18] : memref<3x3x2xbf16, #tpu.memory_space<vmem>>, vector<1x1x2xbf16>
    %25 = vector.shape_cast %24 : vector<1x1x2xbf16> to vector<1x2xbf16>
    %26 = vector.shape_cast %21 : vector<1x2xbf16> to vector<1x1x2xbf16>
    tpu.vector_store %arg12[%23, %c1, %c0_18], %26 {strides = array<i32>} : memref<3x3x2xbf16, #tpu.memory_space<vmem>>, vector<1x1x2xbf16>,
    %c1_i32_19 = arith.constant 1 : i32
    %c0_20 = arith.constant 0 : index
    %c0_21 = arith.constant 0 : index
    %27 = vector.load %arg7[%c0_20, %c0_21] : memref<18x2xbf16, #tpu.memory_space<vmem>>, vector<18x2xbf16>
    %c0_22 = arith.constant 0 : index
    %c0_23 = arith.constant 0 : index
    %28 = vector.load %arg10[%c0_22, %c0_23] : memref<2x8xbf16, #tpu.memory_space<vmem>>, vector<2x8xbf16>
    %c0_24 = arith.constant 0 : index
    %c0_25 = arith.constant 0 : index
    %29 = vector.load %arg8[%c0_24, %c0_25] : memref<1x2xf32, #tpu.memory_space<vmem>>, vector<1x2xf32>
    %c0_26 = arith.constant 0 : index
    %c0_27 = arith.constant 0 : index
    %30 = vector.load %arg9[%c0_26, %c0_27] : memref<1x2xf32, #tpu.memory_space<vmem>>, vector<1x2xf32>
    %c0_i32_28 = arith.constant 0 : i32
    %c0_i32_29 = arith.constant 0 : i32
    %31 = arith.addi %c0_i32_28, %c0_i32_29 : i32
    %32 = arith.index_cast %31 : i32 to index
    %c0_30 = arith.constant 0 : index
    %c0_31 = arith.constant 0 : index
    %33 = vector.load %arg12[%32, %c0_30, %c0_31] : memref<3x3x2xbf16, #tpu.memory_space<vmem>>, vector<1x1x2xbf16>
    %34 = vector.shape_cast %33 : vector<1x1x2xbf16> to vector<1x2xbf16>
    %c0_i32_32 = arith.constant 0 : i32
    %35 = arith.addi %c0_i32_28, %c0_i32_32 : i32
    %36 = arith.index_cast %35 : i32 to index
    %c1_33 = arith.constant 1 : index
    %c0_34 = arith.constant 0 : index
    %37 = vector.load %arg12[%36, %c1_33, %c0_34] : memref<3x3x2xbf16, #tpu.memory_space<vmem>>, vector<1x1x2xbf16>
    %38 = vector.shape_cast %37 : vector<1x1x2xbf16> to vector<1x2xbf16>
    %c0_i32_35 = arith.constant 0 : i32
    %39 = arith.addi %c0_i32_28, %c0_i32_35 : i32
    %40 = arith.index_cast %39 : i32 to index
    %c2 = arith.constant 2 : index
    %c0_36 = arith.constant 0 : index
    %41 = vector.load %arg12[%40, %c2, %c0_36] : memref<3x3x2xbf16, #tpu.memory_space<vmem>>, vector<1x1x2xbf16>
    %42 = vector.shape_cast %41 : vector<1x1x2xbf16> to vector<1x2xbf16>
    %c1_i32_37 = arith.constant 1 : i32
    %43 = arith.addi %c0_i32_28, %c1_i32_37 : i32
    %44 = arith.index_cast %43 : i32 to index
    %c0_38 = arith.constant 0 : index
    %c0_39 = arith.constant 0 : index
    %45 = vector.load %arg12[%44, %c0_38, %c0_39] : memref<3x3x2xbf16, #tpu.memory_space<vmem>>, vector<1x1x2xbf16>
    %46 = vector.shape_cast %45 : vector<1x1x2xbf16> to vector<1x2xbf16>
    %c1_i32_40 = arith.constant 1 : i32
    %47 = arith.addi %c0_i32_28, %c1_i32_40 : i32
    %48 = arith.index_cast %47 : i32 to index
    %c1_41 = arith.constant 1 : index
    %c0_42 = arith.constant 0 : index
    %49 = vector.load %arg12[%48, %c1_41, %c0_42] : memref<3x3x2xbf16, #tpu.memory_space<vmem>>, vector<1x1x2xbf16>
    %50 = vector.shape_cast %49 : vector<1x1x2xbf16> to vector<1x2xbf16>
    %c1_i32_43 = arith.constant 1 : i32
    %51 = arith.addi %c0_i32_28, %c1_i32_43 : i32
    %52 = arith.index_cast %51 : i32 to index
    %c2_44 = arith.constant 2 : index
    %c0_45 = arith.constant 0 : index
    %53 = vector.load %arg12[%52, %c2_44, %c0_45] : memref<3x3x2xbf16, #tpu.memory_space<vmem>>, vector<1x1x2xbf16>
    %54 = vector.shape_cast %53 : vector<1x1x2xbf16> to vector<1x2xbf16>
    %c2_i32 = arith.constant 2 : i32
    %55 = arith.addi %c0_i32_28, %c2_i32 : i32
    %56 = arith.index_cast %55 : i32 to index
    %c0_46 = arith.constant 0 : index
    %c0_47 = arith.constant 0 : index
    %57 = vector.load %arg12[%56, %c0_46, %c0_47] : memref<3x3x2xbf16, #tpu.memory_space<vmem>>, vector<1x1x2xbf16>
    %58 = vector.shape_cast %57 : vector<1x1x2xbf16> to vector<1x2xbf16>
    %c2_i32_48 = arith.constant 2 : i32
    %59 = arith.addi %c0_i32_28, %c2_i32_48 : i32
    %60 = arith.index_cast %59 : i32 to index
    %c1_49 = arith.constant 1 : index
    %c0_50 = arith.constant 0 : index
    %61 = vector.load %arg12[%60, %c1_49, %c0_50] : memref<3x3x2xbf16, #tpu.memory_space<vmem>>, vector<1x1x2xbf16>
    %62 = vector.shape_cast %61 : vector<1x1x2xbf16> to vector<1x2xbf16>
    %c2_i32_51 = arith.constant 2 : i32
    %63 = arith.addi %c0_i32_28, %c2_i32_51 : i32
    %64 = arith.index_cast %63 : i32 to index
    %c2_52 = arith.constant 2 : index
    %c0_53 = arith.constant 0 : index
    %65 = vector.load %arg12[%64, %c2_52, %c0_53] : memref<3x3x2xbf16, #tpu.memory_space<vmem>>, vector<1x1x2xbf16>
    %66 = vector.shape_cast %65 : vector<1x1x2xbf16> to vector<1x2xbf16>
    %67 = tpu.concatenate %34, %38, %42, %46, %50, %54, %58, %62, %66 in 1 : vector<1x2xbf16>, vector<1x2xbf16>, vector<1x2xbf16>, vector<1x2xbf16>, vector<1x2xbf16>, vector<1x2xbf16>, vector<1x2xbf16>, vector<1x2xbf16>, vector<1x2xbf16> -> vector<1x18xbf16>
    %cst_54 = arith.constant dense<0.000000e+00> : vector<1x2xf32>
    %68 = tpu.matmul %67, %27, %cst_54 {dimension_numbers = #tpu.dot_dimension_numbers<[1], [0], [0], [1], [0, 0, 1, 1], [], []>} : vector<1x18xbf16>, vector<18x2xbf16>, vector<1x2xf32> -> vector<1x2xf32>
    %69 = arith.mulf %68, %29 : vector<1x2xf32>
    %70 = arith.addf %69, %30 : vector<1x2xf32>
    %cst_55 = arith.constant 0.000000e+00 : f32
    %71 = vector.broadcast %cst_55 : f32 to vector<1x2xf32>
    %72 = arith.maximumf %70, %71 : vector<1x2xf32>
    %73 = arith.truncf %72 : vector<1x2xf32> to vector<1x2xbf16>
    %cst_56 = arith.constant dense<0.000000e+00> : vector<1x8xf32>
    %74 = tpu.matmul %73, %28, %cst_56 {dimension_numbers = #tpu.dot_dimension_numbers<[1], [0], [0], [1], [0, 0, 1, 1], [], []>} : vector<1x2xbf16>, vector<2x8xbf16>, vector<1x8xf32> -> vector<1x8xf32>
    %c0_57 = arith.constant 0 : index
    %75 = arith.index_cast %c0_i32_28 : i32 to index
    %c0_58 = arith.constant 0 : index
    %c0_59 = arith.constant 0 : index
    %76 = vector.load %arg1[%c0_57, %75, %c0_58, %c0_59] : memref<1x1x1x8xbf16, #tpu.memory_space<vmem>>, vector<1x1x1x8xbf16>
    %77 = vector.shape_cast %76 : vector<1x1x1x8xbf16> to vector<1x8xbf16>
    %78 = arith.extf %77 : vector<1x8xbf16> to vector<1x8xf32>
    %79 = arith.addf %74, %78 : vector<1x8xf32>
    %80 = arith.truncf %79 : vector<1x8xf32> to vector<1x8xbf16>
    %c0_60 = arith.constant 0 : index
    %81 = arith.index_cast %c0_i32_28 : i32 to index
    %c0_61 = arith.constant 0 : index
    %c0_62 = arith.constant 0 : index
    %82 = vector.load %arg11[%c0_60, %81, %c0_61, %c0_62] : memref<1x1x1x8xbf16, #tpu.memory_space<vmem>>, vector<1x1x1x8xbf16>
    %83 = vector.shape_cast %82 : vector<1x1x1x8xbf16> to vector<1x8xbf16>
    %84 = vector.shape_cast %80 : vector<1x8xbf16> to vector<1x1x1x8xbf16>
    tpu.vector_store %arg11[%c0_60, %81, %c0_61, %c0_62], %84 {strides = array<i32>} : memref<1x1x1x8xbf16, #tpu.memory_space<vmem>>, vector<1x1x1x8xbf16>,
    %c1_i32_63 = arith.constant 1 : i32
    return
  }
  func.func @transform_0(%arg0: i32) -> (i32, i32, i32, i32) {
    %c0_i32 = arith.constant 0 : i32
    %c0_i32_0 = arith.constant 0 : i32
    %c0_i32_1 = arith.constant 0 : i32
    %c0_i32_2 = arith.constant 0 : i32
    return %arg0, %c0_i32, %c0_i32_0, %c0_i32_1 : i32, i32, i32, i32
  }
  func.func @transform_1(%arg0: i32) -> (i32, i32) {
    %c0_i32 = arith.constant 0 : i32
    %c0_i32_0 = arith.constant 0 : i32
    %c0_i32_1 = arith.constant 0 : i32
    return %c0_i32, %c0_i32_0 : i32, i32
  }
  func.func @transform_2(%arg0: i32) -> (i32, i32) {
    %c0_i32 = arith.constant 0 : i32
    %c0_i32_0 = arith.constant 0 : i32
    %c0_i32_1 = arith.constant 0 : i32
    return %c0_i32, %c0_i32_0 : i32, i32
  }
  func.func @transform_3(%arg0: i32) -> (i32, i32) {
    %c0_i32 = arith.constant 0 : i32
    %c0_i32_0 = arith.constant 0 : i32
    %c0_i32_1 = arith.constant 0 : i32
    return %c0_i32, %c0_i32_0 : i32, i32
  }
  func.func @transform_4(%arg0: i32) -> (i32, i32) {
    %c0_i32 = arith.constant 0 : i32
    %c0_i32_0 = arith.constant 0 : i32
    %c0_i32_1 = arith.constant 0 : i32
    return %c0_i32, %c0_i32_0 : i32, i32
  }
  func.func @transform_5(%arg0: i32) -> (i32, i32) {
    %c0_i32 = arith.constant 0 : i32
    %c0_i32_0 = arith.constant 0 : i32
    %c0_i32_1 = arith.constant 0 : i32
    return %c0_i32, %c0_i32_0 : i32, i32
  }
  func.func @transform_6(%arg0: i32) -> (i32, i32) {
    %c0_i32 = arith.constant 0 : i32
    %c0_i32_0 = arith.constant 0 : i32
    %c0_i32_1 = arith.constant 0 : i32
    return %c0_i32, %c0_i32_0 : i32, i32
  }
  func.func @transform_7(%arg0: i32) -> (i32, i32) {
    %c0_i32 = arith.constant 0 : i32
    %c0_i32_0 = arith.constant 0 : i32
    %c0_i32_1 = arith.constant 0 : i32
    return %c0_i32, %c0_i32_0 : i32, i32
  }
  func.func @transform_8(%arg0: i32) -> (i32, i32) {
    %c0_i32 = arith.constant 0 : i32
    %c0_i32_0 = arith.constant 0 : i32
    %c0_i32_1 = arith.constant 0 : i32
    return %c0_i32, %c0_i32_0 : i32, i32
  }
  func.func @transform_9(%arg0: i32) -> (i32, i32) {
    %c0_i32 = arith.constant 0 : i32
    %c0_i32_0 = arith.constant 0 : i32
    %c0_i32_1 = arith.constant 0 : i32
    return %c0_i32, %c0_i32_0 : i32, i32
  }
  func.func @transform_10(%arg0: i32) -> (i32, i32, i32, i32) {
    %c0_i32 = arith.constant 0 : i32
    %c0_i32_0 = arith.constant 0 : i32
    %c0_i32_1 = arith.constant 0 : i32
    %c0_i32_2 = arith.constant 0 : i32
    return %arg0, %c0_i32, %c0_i32_0, %c0_i32_1 : i32, i32, i32, i32
  }
}

module attributes {stable_mosaic.version = 11 : i64} {
  func.func @_combine_kernel(%arg0: i32, %arg1: i32, %arg2: memref<2xi32, #tpu.memory_space<smem>>, %arg3: memref<2xi32, #tpu.memory_space<smem>>, %arg4: memref<1x1x1x8xbf16, #tpu.memory_space<vmem>>, %arg5: memref<4x1xf32, #tpu.memory_space<vmem>>, %arg6: memref<1x4x8xbf16, #tpu.memory_space<vmem>>, %arg7: memref<1x4x8xbf16, #tpu.memory_space<vmem>>, %arg8: memref<2x1xf32, #tpu.memory_space<vmem>>, %arg9: memref<1x4x8xbf16, #tpu.memory_space<vmem>>, %arg10: memref<4x8xf32, #tpu.memory_space<vmem>>, %arg11: memref<4x8xf32, #tpu.memory_space<vmem>>) attributes {dimension_semantics = [#tpu.dimension_semantics<parallel>, #tpu.dimension_semantics<parallel>], iteration_bounds = array<i64: 2, 1>, scalar_prefetch = 2 : i64, scratch_operands = 2 : i64, tpu.core_type = #tpu.core_type<tc>, window_params = [{transform_indices = @transform_0, window_bounds = array<i64: 1, 1, 1, 8>}, {transform_indices = @transform_1, window_bounds = array<i64: 4, 1>}, {transform_indices = @transform_2, window_bounds = array<i64: 1, 4, 8>}, {transform_indices = @transform_3, window_bounds = array<i64: 1, 4, 8>}, {pipeline_mode = #tpu.pipeline_mode<synchronous>, transform_indices = @transform_4, window_bounds = array<i64: 2, 1>}, {transform_indices = @transform_5, window_bounds = array<i64: 1, 4, 8>}]} {
    %c0 = arith.constant 0 : index
    %c0_0 = arith.constant 0 : index
    %0 = vector.load %arg8[%c0, %c0_0] : memref<2x1xf32, #tpu.memory_space<vmem>>, vector<2x1xf32>
    %c0_i32 = arith.constant 0 : i32
    %c2_i32 = arith.constant 2 : i32
    %1 = arith.addi %c0_i32, %c2_i32 : i32
    %c1_i32 = arith.constant 1 : i32
    scf.for %arg12 = %c0_i32 to %1 step %c1_i32  : i32 {
      %c2_i32_17 = arith.constant 2 : i32
      %21 = arith.muli %arg1, %c2_i32_17 : i32
      %22 = arith.addi %21, %arg12 : i32
      %23 = arith.index_cast %22 : i32 to index
      %24 = memref.load %arg2[%23] : memref<2xi32, #tpu.memory_space<smem>>
      %25 = arith.index_cast %22 : i32 to index
      %26 = memref.load %arg3[%25] : memref<2xi32, #tpu.memory_space<smem>>
      %c2_i32_18 = arith.constant 2 : i32
      %27 = arith.muli %arg12, %c2_i32_18 : i32
      %28 = tpu.assume_multiple %27, 2 : i32
      %c0_19 = arith.constant 0 : index
      %29 = arith.index_cast %24 : i32 to index
      %c0_20 = arith.constant 0 : index
      %c0_21 = arith.constant 0 : index
      %30 = vector.load %arg4[%c0_19, %29, %c0_20, %c0_21] : memref<1x1x1x8xbf16, #tpu.memory_space<vmem>>, vector<1x1x1x8xbf16>
      %31 = vector.shape_cast %30 : vector<1x1x1x8xbf16> to vector<1x8xbf16>
      %32 = arith.extf %31 : vector<1x8xbf16> to vector<1x8xf32>
      %cst = arith.constant dense<0.000000e+00> : vector<2x8xf32>
      %33 = tpu.matmul %0, %32, %cst {dimension_numbers = #tpu.dot_dimension_numbers<[1], [0], [0], [1], [0, 0, 1, 1], [], []>} : vector<2x1xf32>, vector<1x8xf32>, vector<2x8xf32> -> vector<2x8xf32>
      %34 = arith.index_cast %28 : i32 to index
      %c0_22 = arith.constant 0 : index
      %35 = vector.load %arg10[%34, %c0_22] : memref<4x8xf32, #tpu.memory_space<vmem>>, vector<2x8xf32>
      tpu.vector_store %arg10[%34, %c0_22], %33 {strides = array<i32>} : memref<4x8xf32, #tpu.memory_space<vmem>>, vector<2x8xf32>,
      %c0_23 = arith.constant 0 : index
      %36 = arith.index_cast %26 : i32 to index
      %c0_24 = arith.constant 0 : index
      %c0_25 = arith.constant 0 : index
      %37 = vector.load %arg4[%c0_23, %36, %c0_24, %c0_25] : memref<1x1x1x8xbf16, #tpu.memory_space<vmem>>, vector<1x1x1x8xbf16>
      %38 = vector.shape_cast %37 : vector<1x1x1x8xbf16> to vector<1x8xbf16>
      %39 = arith.extf %38 : vector<1x8xbf16> to vector<1x8xf32>
      %cst_26 = arith.constant dense<0.000000e+00> : vector<2x8xf32>
      %40 = tpu.matmul %0, %39, %cst_26 {dimension_numbers = #tpu.dot_dimension_numbers<[1], [0], [0], [1], [0, 0, 1, 1], [], []>} : vector<2x1xf32>, vector<1x8xf32>, vector<2x8xf32> -> vector<2x8xf32>
      %41 = arith.index_cast %28 : i32 to index
      %c0_27 = arith.constant 0 : index
      %42 = vector.load %arg11[%41, %c0_27] : memref<4x8xf32, #tpu.memory_space<vmem>>, vector<2x8xf32>
      tpu.vector_store %arg11[%41, %c0_27], %40 {strides = array<i32>} : memref<4x8xf32, #tpu.memory_space<vmem>>, vector<2x8xf32>,
    }
    %c2_i32_1 = arith.constant 2 : i32
    %c0_2 = arith.constant 0 : index
    %c0_3 = arith.constant 0 : index
    %2 = vector.load %arg5[%c0_2, %c0_3] : memref<4x1xf32, #tpu.memory_space<vmem>>, vector<4x1xf32>
    %c0_4 = arith.constant 0 : index
    %c0_5 = arith.constant 0 : index
    %3 = vector.load %arg10[%c0_4, %c0_5] : memref<4x8xf32, #tpu.memory_space<vmem>>, vector<4x8xf32>
    %c0_6 = arith.constant 0 : index
    %c0_7 = arith.constant 0 : index
    %4 = vector.load %arg11[%c0_6, %c0_7] : memref<4x8xf32, #tpu.memory_space<vmem>>, vector<4x8xf32>
    %5 = arith.subf %4, %3 : vector<4x8xf32>
    %6 = vector.broadcast %2 : vector<4x1xf32> to vector<4x8xf32>
    %7 = arith.mulf %6, %5 : vector<4x8xf32>
    %8 = arith.addf %3, %7 : vector<4x8xf32>
    %c0_8 = arith.constant 0 : index
    %c0_9 = arith.constant 0 : index
    %c0_10 = arith.constant 0 : index
    %9 = vector.load %arg6[%c0_8, %c0_9, %c0_10] : memref<1x4x8xbf16, #tpu.memory_space<vmem>>, vector<1x4x8xbf16>
    %10 = vector.shape_cast %9 : vector<1x4x8xbf16> to vector<4x8xbf16>
    %11 = arith.extf %10 : vector<4x8xbf16> to vector<4x8xf32>
    %12 = arith.addf %8, %11 : vector<4x8xf32>
    %c0_11 = arith.constant 0 : index
    %c0_12 = arith.constant 0 : index
    %c0_13 = arith.constant 0 : index
    %13 = vector.load %arg7[%c0_11, %c0_12, %c0_13] : memref<1x4x8xbf16, #tpu.memory_space<vmem>>, vector<1x4x8xbf16>
    %14 = vector.shape_cast %13 : vector<1x4x8xbf16> to vector<4x8xbf16>
    %15 = arith.extf %14 : vector<4x8xbf16> to vector<4x8xf32>
    %16 = arith.addf %12, %15 : vector<4x8xf32>
    %17 = arith.truncf %16 : vector<4x8xf32> to vector<4x8xbf16>
    %c0_14 = arith.constant 0 : index
    %c0_15 = arith.constant 0 : index
    %c0_16 = arith.constant 0 : index
    %18 = vector.load %arg9[%c0_14, %c0_15, %c0_16] : memref<1x4x8xbf16, #tpu.memory_space<vmem>>, vector<1x4x8xbf16>
    %19 = vector.shape_cast %18 : vector<1x4x8xbf16> to vector<4x8xbf16>
    %20 = vector.shape_cast %17 : vector<4x8xbf16> to vector<1x4x8xbf16>
    tpu.vector_store %arg9[%c0_14, %c0_15, %c0_16], %20 {strides = array<i32>} : memref<1x4x8xbf16, #tpu.memory_space<vmem>>, vector<1x4x8xbf16>,
    return
  }
  func.func @transform_0(%arg0: i32, %arg1: i32, %arg2: memref<2xi32, #tpu.memory_space<smem>>, %arg3: memref<2xi32, #tpu.memory_space<smem>>) -> (i32, i32, i32, i32) {
    %c0_i32 = arith.constant 0 : i32
    %c0_i32_0 = arith.constant 0 : i32
    %c0_i32_1 = arith.constant 0 : i32
    %c0_i32_2 = arith.constant 0 : i32
    return %arg0, %c0_i32, %c0_i32_0, %c0_i32_1 : i32, i32, i32, i32
  }
  func.func @transform_1(%arg0: i32, %arg1: i32, %arg2: memref<2xi32, #tpu.memory_space<smem>>, %arg3: memref<2xi32, #tpu.memory_space<smem>>) -> (i32, i32) {
    %c0_i32 = arith.constant 0 : i32
    %c0_i32_0 = arith.constant 0 : i32
    return %arg1, %c0_i32 : i32, i32
  }
  func.func @transform_2(%arg0: i32, %arg1: i32, %arg2: memref<2xi32, #tpu.memory_space<smem>>, %arg3: memref<2xi32, #tpu.memory_space<smem>>) -> (i32, i32, i32) {
    %c0_i32 = arith.constant 0 : i32
    %c0_i32_0 = arith.constant 0 : i32
    return %arg0, %arg1, %c0_i32 : i32, i32, i32
  }
  func.func @transform_3(%arg0: i32, %arg1: i32, %arg2: memref<2xi32, #tpu.memory_space<smem>>, %arg3: memref<2xi32, #tpu.memory_space<smem>>) -> (i32, i32, i32) {
    %c0_i32 = arith.constant 0 : i32
    %c0_i32_0 = arith.constant 0 : i32
    return %arg0, %arg1, %c0_i32 : i32, i32, i32
  }
  func.func @transform_4(%arg0: i32, %arg1: i32, %arg2: memref<2xi32, #tpu.memory_space<smem>>, %arg3: memref<2xi32, #tpu.memory_space<smem>>) -> (i32, i32) {
    %c0_i32 = arith.constant 0 : i32
    %c0_i32_0 = arith.constant 0 : i32
    %c0_i32_1 = arith.constant 0 : i32
    return %c0_i32, %c0_i32_0 : i32, i32
  }
  func.func @transform_5(%arg0: i32, %arg1: i32, %arg2: memref<2xi32, #tpu.memory_space<smem>>, %arg3: memref<2xi32, #tpu.memory_space<smem>>) -> (i32, i32, i32) {
    %c0_i32 = arith.constant 0 : i32
    %c0_i32_0 = arith.constant 0 : i32
    return %arg0, %arg1, %c0_i32 : i32, i32, i32
  }
}

module attributes {stable_mosaic.version = 11 : i64} {
  func.func @_combine_kernel(%arg0: i32, %arg1: i32, %arg2: memref<4xi32, #tpu.memory_space<smem>>, %arg3: memref<4xi32, #tpu.memory_space<smem>>, %arg4: memref<1x2x2x8xbf16, #tpu.memory_space<vmem>>, %arg5: memref<16x1xf32, #tpu.memory_space<vmem>>, %arg6: memref<1x16x8xbf16, #tpu.memory_space<vmem>>, %arg7: memref<1x16x8xbf16, #tpu.memory_space<vmem>>, %arg8: memref<4x2xf32, #tpu.memory_space<vmem>>, %arg9: memref<1x16x8xbf16, #tpu.memory_space<vmem>>, %arg10: memref<16x8xf32, #tpu.memory_space<vmem>>, %arg11: memref<16x8xf32, #tpu.memory_space<vmem>>) attributes {dimension_semantics = [#tpu.dimension_semantics<parallel>, #tpu.dimension_semantics<parallel>], iteration_bounds = array<i64: 2, 1>, scalar_prefetch = 2 : i64, scratch_operands = 2 : i64, tpu.core_type = #tpu.core_type<tc>, window_params = [{transform_indices = @transform_0, window_bounds = array<i64: 1, 2, 2, 8>}, {transform_indices = @transform_1, window_bounds = array<i64: 16, 1>}, {transform_indices = @transform_2, window_bounds = array<i64: 1, 16, 8>}, {transform_indices = @transform_3, window_bounds = array<i64: 1, 16, 8>}, {pipeline_mode = #tpu.pipeline_mode<synchronous>, transform_indices = @transform_4, window_bounds = array<i64: 4, 2>}, {transform_indices = @transform_5, window_bounds = array<i64: 1, 16, 8>}]} {
    %c0 = arith.constant 0 : index
    %c0_0 = arith.constant 0 : index
    %0 = vector.load %arg8[%c0, %c0_0] : memref<4x2xf32, #tpu.memory_space<vmem>>, vector<4x2xf32>
    %c0_i32 = arith.constant 0 : i32
    %c4_i32 = arith.constant 4 : i32
    %1 = arith.addi %c0_i32, %c4_i32 : i32
    %c1_i32 = arith.constant 1 : i32
    scf.for %arg12 = %c0_i32 to %1 step %c1_i32  : i32 {
      %c4_i32_17 = arith.constant 4 : i32
      %21 = arith.muli %arg1, %c4_i32_17 : i32
      %22 = arith.addi %21, %arg12 : i32
      %23 = arith.index_cast %22 : i32 to index
      %24 = memref.load %arg2[%23] : memref<4xi32, #tpu.memory_space<smem>>
      %25 = arith.index_cast %22 : i32 to index
      %26 = memref.load %arg3[%25] : memref<4xi32, #tpu.memory_space<smem>>
      %c4_i32_18 = arith.constant 4 : i32
      %27 = arith.muli %arg12, %c4_i32_18 : i32
      %28 = tpu.assume_multiple %27, 4 : i32
      %c0_19 = arith.constant 0 : index
      %29 = arith.index_cast %24 : i32 to index
      %c0_20 = arith.constant 0 : index
      %c0_21 = arith.constant 0 : index
      %30 = vector.load %arg4[%c0_19, %29, %c0_20, %c0_21] : memref<1x2x2x8xbf16, #tpu.memory_space<vmem>>, vector<1x1x2x8xbf16>
      %31 = vector.shape_cast %30 : vector<1x1x2x8xbf16> to vector<2x8xbf16>
      %32 = arith.extf %31 : vector<2x8xbf16> to vector<2x8xf32>
      %cst = arith.constant dense<0.000000e+00> : vector<4x8xf32>
      %33 = tpu.matmul %0, %32, %cst {dimension_numbers = #tpu.dot_dimension_numbers<[1], [0], [0], [1], [0, 0, 1, 1], [], []>} : vector<4x2xf32>, vector<2x8xf32>, vector<4x8xf32> -> vector<4x8xf32>
      %34 = arith.index_cast %28 : i32 to index
      %c0_22 = arith.constant 0 : index
      %35 = vector.load %arg10[%34, %c0_22] : memref<16x8xf32, #tpu.memory_space<vmem>>, vector<4x8xf32>
      tpu.vector_store %arg10[%34, %c0_22], %33 {strides = array<i32>} : memref<16x8xf32, #tpu.memory_space<vmem>>, vector<4x8xf32>,
      %c0_23 = arith.constant 0 : index
      %36 = arith.index_cast %26 : i32 to index
      %c0_24 = arith.constant 0 : index
      %c0_25 = arith.constant 0 : index
      %37 = vector.load %arg4[%c0_23, %36, %c0_24, %c0_25] : memref<1x2x2x8xbf16, #tpu.memory_space<vmem>>, vector<1x1x2x8xbf16>
      %38 = vector.shape_cast %37 : vector<1x1x2x8xbf16> to vector<2x8xbf16>
      %39 = arith.extf %38 : vector<2x8xbf16> to vector<2x8xf32>
      %cst_26 = arith.constant dense<0.000000e+00> : vector<4x8xf32>
      %40 = tpu.matmul %0, %39, %cst_26 {dimension_numbers = #tpu.dot_dimension_numbers<[1], [0], [0], [1], [0, 0, 1, 1], [], []>} : vector<4x2xf32>, vector<2x8xf32>, vector<4x8xf32> -> vector<4x8xf32>
      %41 = arith.index_cast %28 : i32 to index
      %c0_27 = arith.constant 0 : index
      %42 = vector.load %arg11[%41, %c0_27] : memref<16x8xf32, #tpu.memory_space<vmem>>, vector<4x8xf32>
      tpu.vector_store %arg11[%41, %c0_27], %40 {strides = array<i32>} : memref<16x8xf32, #tpu.memory_space<vmem>>, vector<4x8xf32>,
    }
    %c4_i32_1 = arith.constant 4 : i32
    %c0_2 = arith.constant 0 : index
    %c0_3 = arith.constant 0 : index
    %2 = vector.load %arg5[%c0_2, %c0_3] : memref<16x1xf32, #tpu.memory_space<vmem>>, vector<16x1xf32>
    %c0_4 = arith.constant 0 : index
    %c0_5 = arith.constant 0 : index
    %3 = vector.load %arg10[%c0_4, %c0_5] : memref<16x8xf32, #tpu.memory_space<vmem>>, vector<16x8xf32>
    %c0_6 = arith.constant 0 : index
    %c0_7 = arith.constant 0 : index
    %4 = vector.load %arg11[%c0_6, %c0_7] : memref<16x8xf32, #tpu.memory_space<vmem>>, vector<16x8xf32>
    %5 = arith.subf %4, %3 : vector<16x8xf32>
    %6 = vector.broadcast %2 : vector<16x1xf32> to vector<16x8xf32>
    %7 = arith.mulf %6, %5 : vector<16x8xf32>
    %8 = arith.addf %3, %7 : vector<16x8xf32>
    %c0_8 = arith.constant 0 : index
    %c0_9 = arith.constant 0 : index
    %c0_10 = arith.constant 0 : index
    %9 = vector.load %arg6[%c0_8, %c0_9, %c0_10] : memref<1x16x8xbf16, #tpu.memory_space<vmem>>, vector<1x16x8xbf16>
    %10 = vector.shape_cast %9 : vector<1x16x8xbf16> to vector<16x8xbf16>
    %11 = arith.extf %10 : vector<16x8xbf16> to vector<16x8xf32>
    %12 = arith.addf %8, %11 : vector<16x8xf32>
    %c0_11 = arith.constant 0 : index
    %c0_12 = arith.constant 0 : index
    %c0_13 = arith.constant 0 : index
    %13 = vector.load %arg7[%c0_11, %c0_12, %c0_13] : memref<1x16x8xbf16, #tpu.memory_space<vmem>>, vector<1x16x8xbf16>
    %14 = vector.shape_cast %13 : vector<1x16x8xbf16> to vector<16x8xbf16>
    %15 = arith.extf %14 : vector<16x8xbf16> to vector<16x8xf32>
    %16 = arith.addf %12, %15 : vector<16x8xf32>
    %17 = arith.truncf %16 : vector<16x8xf32> to vector<16x8xbf16>
    %c0_14 = arith.constant 0 : index
    %c0_15 = arith.constant 0 : index
    %c0_16 = arith.constant 0 : index
    %18 = vector.load %arg9[%c0_14, %c0_15, %c0_16] : memref<1x16x8xbf16, #tpu.memory_space<vmem>>, vector<1x16x8xbf16>
    %19 = vector.shape_cast %18 : vector<1x16x8xbf16> to vector<16x8xbf16>
    %20 = vector.shape_cast %17 : vector<16x8xbf16> to vector<1x16x8xbf16>
    tpu.vector_store %arg9[%c0_14, %c0_15, %c0_16], %20 {strides = array<i32>} : memref<1x16x8xbf16, #tpu.memory_space<vmem>>, vector<1x16x8xbf16>,
    return
  }
  func.func @transform_0(%arg0: i32, %arg1: i32, %arg2: memref<4xi32, #tpu.memory_space<smem>>, %arg3: memref<4xi32, #tpu.memory_space<smem>>) -> (i32, i32, i32, i32) {
    %c0_i32 = arith.constant 0 : i32
    %c0_i32_0 = arith.constant 0 : i32
    %c0_i32_1 = arith.constant 0 : i32
    %c0_i32_2 = arith.constant 0 : i32
    return %arg0, %c0_i32, %c0_i32_0, %c0_i32_1 : i32, i32, i32, i32
  }
  func.func @transform_1(%arg0: i32, %arg1: i32, %arg2: memref<4xi32, #tpu.memory_space<smem>>, %arg3: memref<4xi32, #tpu.memory_space<smem>>) -> (i32, i32) {
    %c0_i32 = arith.constant 0 : i32
    %c0_i32_0 = arith.constant 0 : i32
    return %arg1, %c0_i32 : i32, i32
  }
  func.func @transform_2(%arg0: i32, %arg1: i32, %arg2: memref<4xi32, #tpu.memory_space<smem>>, %arg3: memref<4xi32, #tpu.memory_space<smem>>) -> (i32, i32, i32) {
    %c0_i32 = arith.constant 0 : i32
    %c0_i32_0 = arith.constant 0 : i32
    return %arg0, %arg1, %c0_i32 : i32, i32, i32
  }
  func.func @transform_3(%arg0: i32, %arg1: i32, %arg2: memref<4xi32, #tpu.memory_space<smem>>, %arg3: memref<4xi32, #tpu.memory_space<smem>>) -> (i32, i32, i32) {
    %c0_i32 = arith.constant 0 : i32
    %c0_i32_0 = arith.constant 0 : i32
    return %arg0, %arg1, %c0_i32 : i32, i32, i32
  }
  func.func @transform_4(%arg0: i32, %arg1: i32, %arg2: memref<4xi32, #tpu.memory_space<smem>>, %arg3: memref<4xi32, #tpu.memory_space<smem>>) -> (i32, i32) {
    %c0_i32 = arith.constant 0 : i32
    %c0_i32_0 = arith.constant 0 : i32
    %c0_i32_1 = arith.constant 0 : i32
    return %c0_i32, %c0_i32_0 : i32, i32
  }
  func.func @transform_5(%arg0: i32, %arg1: i32, %arg2: memref<4xi32, #tpu.memory_space<smem>>, %arg3: memref<4xi32, #tpu.memory_space<smem>>) -> (i32, i32, i32) {
    %c0_i32 = arith.constant 0 : i32
    %c0_i32_0 = arith.constant 0 : i32
    return %arg0, %arg1, %c0_i32 : i32, i32, i32
  }
}

module attributes {stable_mosaic.version = 11 : i64} {
  func.func @_combine_kernel(%arg0: i32, %arg1: i32, %arg2: memref<8xi32, #tpu.memory_space<smem>>, %arg3: memref<8xi32, #tpu.memory_space<smem>>, %arg4: memref<1x4x4x8xbf16, #tpu.memory_space<vmem>>, %arg5: memref<64x1xf32, #tpu.memory_space<vmem>>, %arg6: memref<1x64x8xbf16, #tpu.memory_space<vmem>>, %arg7: memref<1x64x8xbf16, #tpu.memory_space<vmem>>, %arg8: memref<8x4xf32, #tpu.memory_space<vmem>>, %arg9: memref<1x64x8xbf16, #tpu.memory_space<vmem>>, %arg10: memref<64x8xf32, #tpu.memory_space<vmem>>, %arg11: memref<64x8xf32, #tpu.memory_space<vmem>>) attributes {dimension_semantics = [#tpu.dimension_semantics<parallel>, #tpu.dimension_semantics<parallel>], iteration_bounds = array<i64: 2, 1>, scalar_prefetch = 2 : i64, scratch_operands = 2 : i64, tpu.core_type = #tpu.core_type<tc>, window_params = [{transform_indices = @transform_0, window_bounds = array<i64: 1, 4, 4, 8>}, {transform_indices = @transform_1, window_bounds = array<i64: 64, 1>}, {transform_indices = @transform_2, window_bounds = array<i64: 1, 64, 8>}, {transform_indices = @transform_3, window_bounds = array<i64: 1, 64, 8>}, {pipeline_mode = #tpu.pipeline_mode<synchronous>, transform_indices = @transform_4, window_bounds = array<i64: 8, 4>}, {transform_indices = @transform_5, window_bounds = array<i64: 1, 64, 8>}]} {
    %c0 = arith.constant 0 : index
    %c0_0 = arith.constant 0 : index
    %0 = vector.load %arg8[%c0, %c0_0] : memref<8x4xf32, #tpu.memory_space<vmem>>, vector<8x4xf32>
    %c0_i32 = arith.constant 0 : i32
    %c8_i32 = arith.constant 8 : i32
    %1 = arith.addi %c0_i32, %c8_i32 : i32
    %c1_i32 = arith.constant 1 : i32
    scf.for %arg12 = %c0_i32 to %1 step %c1_i32  : i32 {
      %c8_i32_17 = arith.constant 8 : i32
      %21 = arith.muli %arg1, %c8_i32_17 : i32
      %22 = arith.addi %21, %arg12 : i32
      %23 = arith.index_cast %22 : i32 to index
      %24 = memref.load %arg2[%23] : memref<8xi32, #tpu.memory_space<smem>>
      %25 = arith.index_cast %22 : i32 to index
      %26 = memref.load %arg3[%25] : memref<8xi32, #tpu.memory_space<smem>>
      %c8_i32_18 = arith.constant 8 : i32
      %27 = arith.muli %arg12, %c8_i32_18 : i32
      %28 = tpu.assume_multiple %27, 8 : i32
      %c0_19 = arith.constant 0 : index
      %29 = arith.index_cast %24 : i32 to index
      %c0_20 = arith.constant 0 : index
      %c0_21 = arith.constant 0 : index
      %30 = vector.load %arg4[%c0_19, %29, %c0_20, %c0_21] : memref<1x4x4x8xbf16, #tpu.memory_space<vmem>>, vector<1x1x4x8xbf16>
      %31 = vector.shape_cast %30 : vector<1x1x4x8xbf16> to vector<4x8xbf16>
      %32 = arith.extf %31 : vector<4x8xbf16> to vector<4x8xf32>
      %cst = arith.constant dense<0.000000e+00> : vector<8x8xf32>
      %33 = tpu.matmul %0, %32, %cst {dimension_numbers = #tpu.dot_dimension_numbers<[1], [0], [0], [1], [0, 0, 1, 1], [], []>} : vector<8x4xf32>, vector<4x8xf32>, vector<8x8xf32> -> vector<8x8xf32>
      %34 = arith.index_cast %28 : i32 to index
      %c0_22 = arith.constant 0 : index
      %35 = vector.load %arg10[%34, %c0_22] : memref<64x8xf32, #tpu.memory_space<vmem>>, vector<8x8xf32>
      tpu.vector_store %arg10[%34, %c0_22], %33 {strides = array<i32>} : memref<64x8xf32, #tpu.memory_space<vmem>>, vector<8x8xf32>,
      %c0_23 = arith.constant 0 : index
      %36 = arith.index_cast %26 : i32 to index
      %c0_24 = arith.constant 0 : index
      %c0_25 = arith.constant 0 : index
      %37 = vector.load %arg4[%c0_23, %36, %c0_24, %c0_25] : memref<1x4x4x8xbf16, #tpu.memory_space<vmem>>, vector<1x1x4x8xbf16>
      %38 = vector.shape_cast %37 : vector<1x1x4x8xbf16> to vector<4x8xbf16>
      %39 = arith.extf %38 : vector<4x8xbf16> to vector<4x8xf32>
      %cst_26 = arith.constant dense<0.000000e+00> : vector<8x8xf32>
      %40 = tpu.matmul %0, %39, %cst_26 {dimension_numbers = #tpu.dot_dimension_numbers<[1], [0], [0], [1], [0, 0, 1, 1], [], []>} : vector<8x4xf32>, vector<4x8xf32>, vector<8x8xf32> -> vector<8x8xf32>
      %41 = arith.index_cast %28 : i32 to index
      %c0_27 = arith.constant 0 : index
      %42 = vector.load %arg11[%41, %c0_27] : memref<64x8xf32, #tpu.memory_space<vmem>>, vector<8x8xf32>
      tpu.vector_store %arg11[%41, %c0_27], %40 {strides = array<i32>} : memref<64x8xf32, #tpu.memory_space<vmem>>, vector<8x8xf32>,
    }
    %c8_i32_1 = arith.constant 8 : i32
    %c0_2 = arith.constant 0 : index
    %c0_3 = arith.constant 0 : index
    %2 = vector.load %arg5[%c0_2, %c0_3] : memref<64x1xf32, #tpu.memory_space<vmem>>, vector<64x1xf32>
    %c0_4 = arith.constant 0 : index
    %c0_5 = arith.constant 0 : index
    %3 = vector.load %arg10[%c0_4, %c0_5] : memref<64x8xf32, #tpu.memory_space<vmem>>, vector<64x8xf32>
    %c0_6 = arith.constant 0 : index
    %c0_7 = arith.constant 0 : index
    %4 = vector.load %arg11[%c0_6, %c0_7] : memref<64x8xf32, #tpu.memory_space<vmem>>, vector<64x8xf32>
    %5 = arith.subf %4, %3 : vector<64x8xf32>
    %6 = vector.broadcast %2 : vector<64x1xf32> to vector<64x8xf32>
    %7 = arith.mulf %6, %5 : vector<64x8xf32>
    %8 = arith.addf %3, %7 : vector<64x8xf32>
    %c0_8 = arith.constant 0 : index
    %c0_9 = arith.constant 0 : index
    %c0_10 = arith.constant 0 : index
    %9 = vector.load %arg6[%c0_8, %c0_9, %c0_10] : memref<1x64x8xbf16, #tpu.memory_space<vmem>>, vector<1x64x8xbf16>
    %10 = vector.shape_cast %9 : vector<1x64x8xbf16> to vector<64x8xbf16>
    %11 = arith.extf %10 : vector<64x8xbf16> to vector<64x8xf32>
    %12 = arith.addf %8, %11 : vector<64x8xf32>
    %c0_11 = arith.constant 0 : index
    %c0_12 = arith.constant 0 : index
    %c0_13 = arith.constant 0 : index
    %13 = vector.load %arg7[%c0_11, %c0_12, %c0_13] : memref<1x64x8xbf16, #tpu.memory_space<vmem>>, vector<1x64x8xbf16>
    %14 = vector.shape_cast %13 : vector<1x64x8xbf16> to vector<64x8xbf16>
    %15 = arith.extf %14 : vector<64x8xbf16> to vector<64x8xf32>
    %16 = arith.addf %12, %15 : vector<64x8xf32>
    %17 = arith.truncf %16 : vector<64x8xf32> to vector<64x8xbf16>
    %c0_14 = arith.constant 0 : index
    %c0_15 = arith.constant 0 : index
    %c0_16 = arith.constant 0 : index
    %18 = vector.load %arg9[%c0_14, %c0_15, %c0_16] : memref<1x64x8xbf16, #tpu.memory_space<vmem>>, vector<1x64x8xbf16>
    %19 = vector.shape_cast %18 : vector<1x64x8xbf16> to vector<64x8xbf16>
    %20 = vector.shape_cast %17 : vector<64x8xbf16> to vector<1x64x8xbf16>
    tpu.vector_store %arg9[%c0_14, %c0_15, %c0_16], %20 {strides = array<i32>} : memref<1x64x8xbf16, #tpu.memory_space<vmem>>, vector<1x64x8xbf16>,
    return
  }
  func.func @transform_0(%arg0: i32, %arg1: i32, %arg2: memref<8xi32, #tpu.memory_space<smem>>, %arg3: memref<8xi32, #tpu.memory_space<smem>>) -> (i32, i32, i32, i32) {
    %c0_i32 = arith.constant 0 : i32
    %c0_i32_0 = arith.constant 0 : i32
    %c0_i32_1 = arith.constant 0 : i32
    %c0_i32_2 = arith.constant 0 : i32
    return %arg0, %c0_i32, %c0_i32_0, %c0_i32_1 : i32, i32, i32, i32
  }
  func.func @transform_1(%arg0: i32, %arg1: i32, %arg2: memref<8xi32, #tpu.memory_space<smem>>, %arg3: memref<8xi32, #tpu.memory_space<smem>>) -> (i32, i32) {
    %c0_i32 = arith.constant 0 : i32
    %c0_i32_0 = arith.constant 0 : i32
    return %arg1, %c0_i32 : i32, i32
  }
  func.func @transform_2(%arg0: i32, %arg1: i32, %arg2: memref<8xi32, #tpu.memory_space<smem>>, %arg3: memref<8xi32, #tpu.memory_space<smem>>) -> (i32, i32, i32) {
    %c0_i32 = arith.constant 0 : i32
    %c0_i32_0 = arith.constant 0 : i32
    return %arg0, %arg1, %c0_i32 : i32, i32, i32
  }
  func.func @transform_3(%arg0: i32, %arg1: i32, %arg2: memref<8xi32, #tpu.memory_space<smem>>, %arg3: memref<8xi32, #tpu.memory_space<smem>>) -> (i32, i32, i32) {
    %c0_i32 = arith.constant 0 : i32
    %c0_i32_0 = arith.constant 0 : i32
    return %arg0, %arg1, %c0_i32 : i32, i32, i32
  }
  func.func @transform_4(%arg0: i32, %arg1: i32, %arg2: memref<8xi32, #tpu.memory_space<smem>>, %arg3: memref<8xi32, #tpu.memory_space<smem>>) -> (i32, i32) {
    %c0_i32 = arith.constant 0 : i32
    %c0_i32_0 = arith.constant 0 : i32
    %c0_i32_1 = arith.constant 0 : i32
    return %c0_i32, %c0_i32_0 : i32, i32
  }
  func.func @transform_5(%arg0: i32, %arg1: i32, %arg2: memref<8xi32, #tpu.memory_space<smem>>, %arg3: memref<8xi32, #tpu.memory_space<smem>>) -> (i32, i32, i32) {
    %c0_i32 = arith.constant 0 : i32
    %c0_i32_0 = arith.constant 0 : i32
    return %arg0, %arg1, %c0_i32 : i32, i32, i32
  }
}

module attributes {stable_mosaic.version = 11 : i64} {
  func.func @_final_mask_kernel(%arg0: i32, %arg1: i32, %arg2: memref<16xi32, #tpu.memory_space<smem>>, %arg3: memref<16xi32, #tpu.memory_space<smem>>, %arg4: memref<1x8x8x8xbf16, #tpu.memory_space<vmem>>, %arg5: memref<128x1xf32, #tpu.memory_space<vmem>>, %arg6: memref<1x128x8xbf16, #tpu.memory_space<vmem>>, %arg7: memref<16x8xf32, #tpu.memory_space<vmem>>, %arg8: memref<1x8xf32, #tpu.memory_space<vmem>>, %arg9: memref<1x8xf32, #tpu.memory_space<vmem>>, %arg10: memref<8x8xbf16, #tpu.memory_space<vmem>>, %arg11: memref<1x8xf32, #tpu.memory_space<vmem>>, %arg12: memref<1x8xf32, #tpu.memory_space<vmem>>, %arg13: memref<8x8xbf16, #tpu.memory_space<vmem>>, %arg14: memref<1x128x8xbf16, #tpu.memory_space<vmem>>, %arg15: memref<128x8xf32, #tpu.memory_space<vmem>>, %arg16: memref<128x8xf32, #tpu.memory_space<vmem>>) attributes {dimension_semantics = [#tpu.dimension_semantics<parallel>, #tpu.dimension_semantics<parallel>], iteration_bounds = array<i64: 2, 2>, scalar_prefetch = 2 : i64, scratch_operands = 2 : i64, tpu.core_type = #tpu.core_type<tc>, window_params = [{transform_indices = @transform_0, window_bounds = array<i64: 1, 8, 8, 8>}, {transform_indices = @transform_1, window_bounds = array<i64: 128, 1>}, {transform_indices = @transform_2, window_bounds = array<i64: 1, 128, 8>}, {pipeline_mode = #tpu.pipeline_mode<synchronous>, transform_indices = @transform_3, window_bounds = array<i64: 16, 8>}, {pipeline_mode = #tpu.pipeline_mode<synchronous>, transform_indices = @transform_4, window_bounds = array<i64: 1, 8>}, {pipeline_mode = #tpu.pipeline_mode<synchronous>, transform_indices = @transform_5, window_bounds = array<i64: 1, 8>}, {pipeline_mode = #tpu.pipeline_mode<synchronous>, transform_indices = @transform_6, window_bounds = array<i64: 8, 8>}, {pipeline_mode = #tpu.pipeline_mode<synchronous>, transform_indices = @transform_7, window_bounds = array<i64: 1, 8>}, {pipeline_mode = #tpu.pipeline_mode<synchronous>, transform_indices = @transform_8, window_bounds = array<i64: 1, 8>}, {pipeline_mode = #tpu.pipeline_mode<synchronous>, transform_indices = @transform_9, window_bounds = array<i64: 8, 8>}, {transform_indices = @transform_10, window_bounds = array<i64: 1, 128, 8>}]} {
    %c0 = arith.constant 0 : index
    %c0_0 = arith.constant 0 : index
    %0 = vector.load %arg7[%c0, %c0_0] : memref<16x8xf32, #tpu.memory_space<vmem>>, vector<16x8xf32>
    %c0_i32 = arith.constant 0 : i32
    %c8_i32 = arith.constant 8 : i32
    %1 = arith.addi %c0_i32, %c8_i32 : i32
    %c1_i32 = arith.constant 1 : i32
    scf.for %arg17 = %c0_i32 to %1 step %c1_i32  : i32 {
      %c8_i32_31 = arith.constant 8 : i32
      %47 = arith.muli %arg1, %c8_i32_31 : i32
      %48 = arith.addi %47, %arg17 : i32
      %49 = arith.index_cast %48 : i32 to index
      %50 = memref.load %arg2[%49] : memref<16xi32, #tpu.memory_space<smem>>
      %51 = arith.index_cast %48 : i32 to index
      %52 = memref.load %arg3[%51] : memref<16xi32, #tpu.memory_space<smem>>
      %c16_i32 = arith.constant 16 : i32
      %53 = arith.muli %arg17, %c16_i32 : i32
      %54 = tpu.assume_multiple %53, 16 : i32
      %c0_32 = arith.constant 0 : index
      %55 = arith.index_cast %50 : i32 to index
      %c0_33 = arith.constant 0 : index
      %c0_34 = arith.constant 0 : index
      %56 = vector.load %arg4[%c0_32, %55, %c0_33, %c0_34] : memref<1x8x8x8xbf16, #tpu.memory_space<vmem>>, vector<1x1x8x8xbf16>
      %57 = vector.shape_cast %56 : vector<1x1x8x8xbf16> to vector<8x8xbf16>
      %58 = arith.extf %57 : vector<8x8xbf16> to vector<8x8xf32>
      %cst_35 = arith.constant dense<0.000000e+00> : vector<16x8xf32>
      %59 = tpu.matmul %0, %58, %cst_35 {dimension_numbers = #tpu.dot_dimension_numbers<[1], [0], [0], [1], [0, 0, 1, 1], [], []>} : vector<16x8xf32>, vector<8x8xf32>, vector<16x8xf32> -> vector<16x8xf32>
      %60 = arith.index_cast %54 : i32 to index
      %c0_36 = arith.constant 0 : index
      %61 = vector.load %arg15[%60, %c0_36] : memref<128x8xf32, #tpu.memory_space<vmem>>, vector<16x8xf32>
      tpu.vector_store %arg15[%60, %c0_36], %59 {strides = array<i32>} : memref<128x8xf32, #tpu.memory_space<vmem>>, vector<16x8xf32>,
      %c0_37 = arith.constant 0 : index
      %62 = arith.index_cast %52 : i32 to index
      %c0_38 = arith.constant 0 : index
      %c0_39 = arith.constant 0 : index
      %63 = vector.load %arg4[%c0_37, %62, %c0_38, %c0_39] : memref<1x8x8x8xbf16, #tpu.memory_space<vmem>>, vector<1x1x8x8xbf16>
      %64 = vector.shape_cast %63 : vector<1x1x8x8xbf16> to vector<8x8xbf16>
      %65 = arith.extf %64 : vector<8x8xbf16> to vector<8x8xf32>
      %cst_40 = arith.constant dense<0.000000e+00> : vector<16x8xf32>
      %66 = tpu.matmul %0, %65, %cst_40 {dimension_numbers = #tpu.dot_dimension_numbers<[1], [0], [0], [1], [0, 0, 1, 1], [], []>} : vector<16x8xf32>, vector<8x8xf32>, vector<16x8xf32> -> vector<16x8xf32>
      %67 = arith.index_cast %54 : i32 to index
      %c0_41 = arith.constant 0 : index
      %68 = vector.load %arg16[%67, %c0_41] : memref<128x8xf32, #tpu.memory_space<vmem>>, vector<16x8xf32>
      tpu.vector_store %arg16[%67, %c0_41], %66 {strides = array<i32>} : memref<128x8xf32, #tpu.memory_space<vmem>>, vector<16x8xf32>,
    }
    %c8_i32_1 = arith.constant 8 : i32
    %c0_2 = arith.constant 0 : index
    %c0_3 = arith.constant 0 : index
    %2 = vector.load %arg5[%c0_2, %c0_3] : memref<128x1xf32, #tpu.memory_space<vmem>>, vector<128x1xf32>
    %c0_4 = arith.constant 0 : index
    %c0_5 = arith.constant 0 : index
    %3 = vector.load %arg15[%c0_4, %c0_5] : memref<128x8xf32, #tpu.memory_space<vmem>>, vector<128x8xf32>
    %c0_6 = arith.constant 0 : index
    %c0_7 = arith.constant 0 : index
    %4 = vector.load %arg16[%c0_6, %c0_7] : memref<128x8xf32, #tpu.memory_space<vmem>>, vector<128x8xf32>
    %c0_8 = arith.constant 0 : index
    %c0_9 = arith.constant 0 : index
    %c0_10 = arith.constant 0 : index
    %5 = vector.load %arg6[%c0_8, %c0_9, %c0_10] : memref<1x128x8xbf16, #tpu.memory_space<vmem>>, vector<1x128x8xbf16>
    %6 = vector.shape_cast %5 : vector<1x128x8xbf16> to vector<128x8xbf16>
    %7 = arith.extf %6 : vector<128x8xbf16> to vector<128x8xf32>
    %8 = arith.subf %4, %3 : vector<128x8xf32>
    %9 = vector.broadcast %2 : vector<128x1xf32> to vector<128x8xf32>
    %10 = arith.mulf %9, %8 : vector<128x8xf32>
    %11 = arith.addf %3, %10 : vector<128x8xf32>
    %12 = arith.addf %11, %7 : vector<128x8xf32>
    %c0_11 = arith.constant 0 : index
    %c0_12 = arith.constant 0 : index
    %13 = vector.load %arg8[%c0_11, %c0_12] : memref<1x8xf32, #tpu.memory_space<vmem>>, vector<1x8xf32>
    %14 = vector.broadcast %13 : vector<1x8xf32> to vector<128x8xf32>
    %15 = arith.mulf %12, %14 : vector<128x8xf32>
    %c0_13 = arith.constant 0 : index
    %c0_14 = arith.constant 0 : index
    %16 = vector.load %arg9[%c0_13, %c0_14] : memref<1x8xf32, #tpu.memory_space<vmem>>, vector<1x8xf32>
    %17 = vector.broadcast %16 : vector<1x8xf32> to vector<128x8xf32>
    %18 = arith.addf %15, %17 : vector<128x8xf32>
    %cst = arith.constant 0.000000e+00 : f32
    %19 = vector.broadcast %cst : f32 to vector<128x8xf32>
    %20 = arith.maximumf %18, %19 : vector<128x8xf32>
    %21 = arith.truncf %20 : vector<128x8xf32> to vector<128x8xbf16>
    %c0_15 = arith.constant 0 : index
    %c0_16 = arith.constant 0 : index
    %22 = vector.load %arg10[%c0_15, %c0_16] : memref<8x8xbf16, #tpu.memory_space<vmem>>, vector<8x8xbf16>
    %cst_17 = arith.constant dense<0.000000e+00> : vector<128x8xf32>
    %23 = tpu.matmul %21, %22, %cst_17 {dimension_numbers = #tpu.dot_dimension_numbers<[1], [0], [0], [1], [0, 0, 1, 1], [], []>} : vector<128x8xbf16>, vector<8x8xbf16>, vector<128x8xf32> -> vector<128x8xf32>
    %c0_18 = arith.constant 0 : index
    %c0_19 = arith.constant 0 : index
    %24 = vector.load %arg11[%c0_18, %c0_19] : memref<1x8xf32, #tpu.memory_space<vmem>>, vector<1x8xf32>
    %25 = vector.broadcast %24 : vector<1x8xf32> to vector<128x8xf32>
    %26 = arith.mulf %23, %25 : vector<128x8xf32>
    %c0_20 = arith.constant 0 : index
    %c0_21 = arith.constant 0 : index
    %27 = vector.load %arg12[%c0_20, %c0_21] : memref<1x8xf32, #tpu.memory_space<vmem>>, vector<1x8xf32>
    %28 = vector.broadcast %27 : vector<1x8xf32> to vector<128x8xf32>
    %29 = arith.addf %26, %28 : vector<128x8xf32>
    %cst_22 = arith.constant 0.000000e+00 : f32
    %30 = vector.broadcast %cst_22 : f32 to vector<128x8xf32>
    %31 = arith.maximumf %29, %30 : vector<128x8xf32>
    %32 = arith.truncf %31 : vector<128x8xf32> to vector<128x8xbf16>
    %c0_23 = arith.constant 0 : index
    %c0_24 = arith.constant 0 : index
    %33 = vector.load %arg13[%c0_23, %c0_24] : memref<8x8xbf16, #tpu.memory_space<vmem>>, vector<8x8xbf16>
    %cst_25 = arith.constant dense<0.000000e+00> : vector<128x8xf32>
    %34 = tpu.matmul %32, %33, %cst_25 {dimension_numbers = #tpu.dot_dimension_numbers<[1], [0], [0], [1], [0, 0, 1, 1], [], []>} : vector<128x8xbf16>, vector<8x8xbf16>, vector<128x8xf32> -> vector<128x8xf32>
    %35 = arith.negf %34 : vector<128x8xf32>
    %36 = math.exp %35 : vector<128x8xf32>
    %cst_26 = arith.constant 1.000000e+00 : f32
    %37 = vector.broadcast %cst_26 : f32 to vector<128x8xf32>
    %38 = arith.addf %37, %36 : vector<128x8xf32>
    %39 = arith.divf %37, %38 : vector<128x8xf32>
    %cst_27 = arith.constant 1.000000e+00 : f32
    %40 = vector.broadcast %cst_27 : f32 to vector<128x8xf32>
    %41 = arith.addf %40, %39 : vector<128x8xf32>
    %42 = arith.mulf %41, %7 : vector<128x8xf32>
    %43 = arith.truncf %42 : vector<128x8xf32> to vector<128x8xbf16>
    %c0_28 = arith.constant 0 : index
    %c0_29 = arith.constant 0 : index
    %c0_30 = arith.constant 0 : index
    %44 = vector.load %arg14[%c0_28, %c0_29, %c0_30] : memref<1x128x8xbf16, #tpu.memory_space<vmem>>, vector<1x128x8xbf16>
    %45 = vector.shape_cast %44 : vector<1x128x8xbf16> to vector<128x8xbf16>
    %46 = vector.shape_cast %43 : vector<128x8xbf16> to vector<1x128x8xbf16>
    tpu.vector_store %arg14[%c0_28, %c0_29, %c0_30], %46 {strides = array<i32>} : memref<1x128x8xbf16, #tpu.memory_space<vmem>>, vector<1x128x8xbf16>,
    return
  }
  func.func @transform_0(%arg0: i32, %arg1: i32, %arg2: memref<16xi32, #tpu.memory_space<smem>>, %arg3: memref<16xi32, #tpu.memory_space<smem>>) -> (i32, i32, i32, i32) {
    %c0_i32 = arith.constant 0 : i32
    %c0_i32_0 = arith.constant 0 : i32
    %c0_i32_1 = arith.constant 0 : i32
    %c0_i32_2 = arith.constant 0 : i32
    return %arg0, %c0_i32, %c0_i32_0, %c0_i32_1 : i32, i32, i32, i32
  }
  func.func @transform_1(%arg0: i32, %arg1: i32, %arg2: memref<16xi32, #tpu.memory_space<smem>>, %arg3: memref<16xi32, #tpu.memory_space<smem>>) -> (i32, i32) {
    %c0_i32 = arith.constant 0 : i32
    %c0_i32_0 = arith.constant 0 : i32
    return %arg1, %c0_i32 : i32, i32
  }
  func.func @transform_2(%arg0: i32, %arg1: i32, %arg2: memref<16xi32, #tpu.memory_space<smem>>, %arg3: memref<16xi32, #tpu.memory_space<smem>>) -> (i32, i32, i32) {
    %c0_i32 = arith.constant 0 : i32
    %c0_i32_0 = arith.constant 0 : i32
    return %arg0, %arg1, %c0_i32 : i32, i32, i32
  }
  func.func @transform_3(%arg0: i32, %arg1: i32, %arg2: memref<16xi32, #tpu.memory_space<smem>>, %arg3: memref<16xi32, #tpu.memory_space<smem>>) -> (i32, i32) {
    %c0_i32 = arith.constant 0 : i32
    %c0_i32_0 = arith.constant 0 : i32
    %c0_i32_1 = arith.constant 0 : i32
    return %c0_i32, %c0_i32_0 : i32, i32
  }
  func.func @transform_4(%arg0: i32, %arg1: i32, %arg2: memref<16xi32, #tpu.memory_space<smem>>, %arg3: memref<16xi32, #tpu.memory_space<smem>>) -> (i32, i32) {
    %c0_i32 = arith.constant 0 : i32
    %c0_i32_0 = arith.constant 0 : i32
    %c0_i32_1 = arith.constant 0 : i32
    return %c0_i32, %c0_i32_0 : i32, i32
  }
  func.func @transform_5(%arg0: i32, %arg1: i32, %arg2: memref<16xi32, #tpu.memory_space<smem>>, %arg3: memref<16xi32, #tpu.memory_space<smem>>) -> (i32, i32) {
    %c0_i32 = arith.constant 0 : i32
    %c0_i32_0 = arith.constant 0 : i32
    %c0_i32_1 = arith.constant 0 : i32
    return %c0_i32, %c0_i32_0 : i32, i32
  }
  func.func @transform_6(%arg0: i32, %arg1: i32, %arg2: memref<16xi32, #tpu.memory_space<smem>>, %arg3: memref<16xi32, #tpu.memory_space<smem>>) -> (i32, i32) {
    %c0_i32 = arith.constant 0 : i32
    %c0_i32_0 = arith.constant 0 : i32
    %c0_i32_1 = arith.constant 0 : i32
    return %c0_i32, %c0_i32_0 : i32, i32
  }
  func.func @transform_7(%arg0: i32, %arg1: i32, %arg2: memref<16xi32, #tpu.memory_space<smem>>, %arg3: memref<16xi32, #tpu.memory_space<smem>>) -> (i32, i32) {
    %c0_i32 = arith.constant 0 : i32
    %c0_i32_0 = arith.constant 0 : i32
    %c0_i32_1 = arith.constant 0 : i32
    return %c0_i32, %c0_i32_0 : i32, i32
  }
  func.func @transform_8(%arg0: i32, %arg1: i32, %arg2: memref<16xi32, #tpu.memory_space<smem>>, %arg3: memref<16xi32, #tpu.memory_space<smem>>) -> (i32, i32) {
    %c0_i32 = arith.constant 0 : i32
    %c0_i32_0 = arith.constant 0 : i32
    %c0_i32_1 = arith.constant 0 : i32
    return %c0_i32, %c0_i32_0 : i32, i32
  }
  func.func @transform_9(%arg0: i32, %arg1: i32, %arg2: memref<16xi32, #tpu.memory_space<smem>>, %arg3: memref<16xi32, #tpu.memory_space<smem>>) -> (i32, i32) {
    %c0_i32 = arith.constant 0 : i32
    %c0_i32_0 = arith.constant 0 : i32
    %c0_i32_1 = arith.constant 0 : i32
    return %c0_i32, %c0_i32_0 : i32, i32
  }
  func.func @transform_10(%arg0: i32, %arg1: i32, %arg2: memref<16xi32, #tpu.memory_space<smem>>, %arg3: memref<16xi32, #tpu.memory_space<smem>>) -> (i32, i32, i32) {
    %c0_i32 = arith.constant 0 : i32
    %c0_i32_0 = arith.constant 0 : i32
    return %arg0, %arg1, %c0_i32 : i32, i32, i32
  }
}

</mosaic_0001>

<bundles_post_ra>
// kernel: _lambda_.23
= control target key start
LH: loop header
LB: loop body
LE: loop exit
PB: predicated region body
PF: predicated region fallthrough
CT: control target
= control target key end

     0   :  { %s1183_s13 = smov 0   ;;  %s1403_s0 = inlined_call_operand.vmem [shape: bf16[2,16,16,8], index: 0, kind: input, shape index: {}]   ;;  %s1404_s1 = inlined_call_operand.vmem [shape: f32[1,8], index: 1, kind: input, shape index: {}]   ;;  %s1405_s2 = inlined_call_operand.vmem [shape: f32[1,8], index: 2, kind: input, shape index: {}]   ;;  %s1406_s3 = inlined_call_operand.vmem [shape: bf16[8,2], index: 3, kind: input, shape index: {}]   ;;  %s1407_s4 = inlined_call_operand.vmem [shape: f32[1,2], index: 4, kind: input, shape index: {}]   ;;  %s1408_s5 = inlined_call_operand.vmem [shape: f32[1,2], index: 5, kind: input, shape index: {}]   ;;  %s1409_s6 = inlined_call_operand.vmem [shape: bf16[18,2], index: 6, kind: input, shape index: {}]   ;;  %s1410_s7 = inlined_call_operand.vmem [shape: f32[1,2], index: 7, kind: input, shape index: {}]   ;;  %s1411_s8 = inlined_call_operand.vmem [shape: f32[1,2], index: 8, kind: input, shape index: {}]   ;;  %s1412_s9 = inlined_call_operand.vmem [shape: bf16[2,8], index: 9, kind: input, shape index: {}]   ;;  %s1413_s10 = inlined_call_operand.vmem [shape: bf16[2,16,16,8], index: 10, kind: output, shape index: {}]  }
   0x1 LB: > { %s946_s14 = sadd.s32 4294967295, %s1105_s13   ;;  %p950_p0 = scmp.ge.s32.totalorder %s1105_s13, 1  ;;  %s1105_s13 = sphi %s1183_s13, %s20_s13  }
   0x2   : > { %p312_p1 = scmp.lt.s32.totalorder %s1105_s13, 3 }
   0x4   : > { %p313_p2 = pnand %p950_p0, %p312_p1 }
   0x5   : > { %p1193_p3 = scmp.lt.s32.totalorder (!%p313_p2), %s946_s14, 1  ;;  %vm361_vm0 = vcmask (!%p313_p2), 11264   ;;  %v1200_v0 = vld [vmem:[%s1404_s1] ss:$0 sm:$0xff] (!%p313_p2)  ;;  %vm364_vm1 = vcmask (!%p313_p2), 8192   ;;  %v1115_v1 = vmov (!%p313_p2), 0  }
   0x6   : > { %316 = sbr.rel (%p313_p2) target bundleno = 860 (0x35c), region = 60  ;;  %362 = vst.msk [vmem:[#allocation2] sm:$0xf] (!%p313_p2), %vm361_vm0, %v1115_v1  ;;  %363 = vst.msk [vmem:[#allocation2 + $0x4] sm:$0xf] (!%p313_p2), %vm361_vm0, %v1115_v1  ;;  %s1290_s16 = smov (!%p313_p2), 0  }
   0x7   : > { %366 = vst.msk [vmem:[#allocation2 + $0xc] sm:$0xf] (!%p313_p2), %vm361_vm0, %v1115_v1  ;;  %367 = vst.msk [vmem:[#allocation2 + $0x10] sm:$0xf] (!%p313_p2), %vm361_vm0, %v1115_v1  ;;  %v1241_v2 = vld [vmem:[%s1405_s2] ss:$0 sm:$0xff] (!%p313_p2) }
   0x8   : > { %369 = vst.msk [vmem:[#allocation2 + $0x18] sm:$0xf] (!%p313_p2), %vm361_vm0, %v1115_v1  ;;  %370 = vst.msk [vmem:[#allocation2 + $0x1c] sm:$0xf] (!%p313_p2), %vm361_vm0, %v1115_v1  ;;  %v1246_v3 = vld [vmem:[%s1407_s4] ss:$0 sm:$0xff] (!%p313_p2) }
   0x9   : > { %372 = vst.msk [vmem:[#allocation2 + $0x24] sm:$0xf] (!%p313_p2), %vm361_vm0, %v1115_v1  ;;  %373 = vst.msk [vmem:[#allocation2 + $0x28] sm:$0xf] (!%p313_p2), %vm361_vm0, %v1115_v1  ;;  %v1251_v4 = vld [vmem:[%s1408_s5] ss:$0 sm:$0xff] (!%p313_p2) }
   0xa   : > { %375 = vst.msk [vmem:[#allocation2 + $0x30] sm:$0xf] (!%p313_p2), %vm361_vm0, %v1115_v1  ;;  %376 = vst.msk [vmem:[#allocation2 + $0x34] sm:$0xf] (!%p313_p2), %vm361_vm0, %v1115_v1  ;;  %v1278_v5 = vld [vmem:[%s1406_s3] sm:$0xf] (!%p313_p2) }
   0xb   : > { %378 = vst.msk [vmem:[#allocation2 + $0x3c] sm:$0xf] (!%p313_p2), %vm361_vm0, %v1115_v1  ;;  %379 = vst.msk [vmem:[#allocation2 + $0x40] sm:$0xf] (!%p313_p2), %vm361_vm0, %v1115_v1 }
   0xc   : > { %381 = vst.msk [vmem:[#allocation2 + $0x48] sm:$0xf] (!%p313_p2), %vm361_vm0, %v1115_v1  ;;  %382 = vst.msk [vmem:[#allocation2 + $0x4c] sm:$0xf] (!%p313_p2), %vm361_vm0, %v1115_v1 }
   0xd   : > { %384 = vst.msk [vmem:[#allocation2 + $0x54] sm:$0xf] %vm361_vm0, %v1115_v1  ;;  %385 = vst.msk [vmem:[#allocation2 + $0x58] sm:$0xf] %vm361_vm0, %v1115_v1  ;;  %s1416_s14 = smov (!%p1193_p3, %s946_s14), 1 }
   0xe   : > { %387 = vst.msk [vmem:[#allocation2 + $0x60] sm:$0xf] %vm361_vm0, %v1115_v1  ;;  %388 = vst.msk [vmem:[#allocation2 + $0x64] sm:$0xf] %vm361_vm0, %v1115_v1  ;;  %s1000_s26 = sshll.u32 %s1416_s14, 7 }
   0xf   : > { %390 = vst.msk [vmem:[#allocation2 + $0x6c] sm:$0xf] %vm361_vm0, %v1115_v1  ;;  %391 = vst.msk [vmem:[#allocation2 + $0x70] sm:$0xf] %vm361_vm0, %v1115_v1  ;;  %s1283_s29 = scalar_lea.vmem %s1403_s0, %s1000_s26  ;;  %s1288_s12 = scalar_lea.vmem %s1413_s10, %s1000_s26 }
  0x10   : > { %393 = vst.msk [vmem:[#allocation2 + $0x78] sm:$0xf] %vm361_vm0, %v1115_v1  ;;  %394 = vst.msk [vmem:[#allocation2 + $0x7c] sm:$0xf] %vm361_vm0, %v1115_v1 }
  0x11   : > { %396 = vst.msk [vmem:[#allocation2 + $0x84] sm:$0xf] %vm361_vm0, %v1115_v1  ;;  %397 = vst.msk [vmem:[#allocation2 + $0x88] sm:$0xf] %vm361_vm0, %v1115_v1 }
  0x12   : > { %399 = vst.msk [vmem:[#allocation2 + $0x90] sm:$0xf] %vm361_vm0, %v1115_v1  ;;  %400 = vst.msk [vmem:[#allocation2 + $0x94] sm:$0xf] %vm361_vm0, %v1115_v1 }
  0x13   : > { %402 = vst.msk [vmem:[#allocation2 + $0x9c] sm:$0xf] %vm361_vm0, %v1115_v1  ;;  %403 = vst.msk [vmem:[#allocation2 + $0xa0] sm:$0xf] %vm361_vm0, %v1115_v1 }
  0x14   : > { %405 = vst.msk [vmem:[#allocation2 + $0xa8] sm:$0xf] %vm361_vm0, %v1115_v1  ;;  %406 = vst.msk [vmem:[#allocation2 + $0xac] sm:$0xf] %vm361_vm0, %v1115_v1 }
  0x15   : > { %408 = vst.msk [vmem:[#allocation2 + $0xb4] sm:$0xf] %vm361_vm0, %v1115_v1  ;;  %409 = vst.msk [vmem:[#allocation2 + $0xb8] sm:$0xf] %vm361_vm0, %v1115_v1 }
  0x16   : > { %411 = vst.msk [vmem:[#allocation2 + $0xc0] sm:$0xf] %vm361_vm0, %v1115_v1  ;;  %412 = vst.msk [vmem:[#allocation2 + $0xc4] sm:$0xf] %vm361_vm0, %v1115_v1 }
  0x17   : > { %414 = vst.msk [vmem:[#allocation2 + $0xcc] sm:$0xf] %vm361_vm0, %v1115_v1  ;;  %415 = vst.msk [vmem:[#allocation2 + $0xd0] sm:$0xf] %vm361_vm0, %v1115_v1 }
  0x18   : > { %365 = vst.msk [vmem:[#allocation2 + $0x8] sm:$0x1] %vm364_vm1, %v1115_v1  ;;  %368 = vst.msk [vmem:[#allocation2 + $0x14] sm:$0x1] %vm364_vm1, %v1115_v1 }
  0x19   : > { %371 = vst.msk [vmem:[#allocation2 + $0x20] sm:$0x1] %vm364_vm1, %v1115_v1  ;;  %374 = vst.msk [vmem:[#allocation2 + $0x2c] sm:$0x1] %vm364_vm1, %v1115_v1 }
  0x1a   : > { %377 = vst.msk [vmem:[#allocation2 + $0x38] sm:$0x1] %vm364_vm1, %v1115_v1  ;;  %380 = vst.msk [vmem:[#allocation2 + $0x44] sm:$0x1] %vm364_vm1, %v1115_v1 }
  0x1b   : > { %383 = vst.msk [vmem:[#allocation2 + $0x50] sm:$0x1] %vm364_vm1, %v1115_v1  ;;  %386 = vst.msk [vmem:[#allocation2 + $0x5c] sm:$0x1] %vm364_vm1, %v1115_v1 }
  0x1c   : > { %389 = vst.msk [vmem:[#allocation2 + $0x68] sm:$0x1] %vm364_vm1, %v1115_v1  ;;  %392 = vst.msk [vmem:[#allocation2 + $0x74] sm:$0x1] %vm364_vm1, %v1115_v1 }
  0x1d   : > { %395 = vst.msk [vmem:[#allocation2 + $0x80] sm:$0x1] %vm364_vm1, %v1115_v1  ;;  %398 = vst.msk [vmem:[#allocation2 + $0x8c] sm:$0x1] %vm364_vm1, %v1115_v1 }
  0x1e   : > { %401 = vst.msk [vmem:[#allocation2 + $0x98] sm:$0x1] %vm364_vm1, %v1115_v1  ;;  %404 = vst.msk [vmem:[#allocation2 + $0xa4] sm:$0x1] %vm364_vm1, %v1115_v1 }
  0x1f   : > { %407 = vst.msk [vmem:[#allocation2 + $0xb0] sm:$0x1] %vm364_vm1, %v1115_v1  ;;  %410 = vst.msk [vmem:[#allocation2 + $0xbc] sm:$0x1] %vm364_vm1, %v1115_v1 }
  0x20   : > { %413 = vst.msk [vmem:[#allocation2 + $0xc8] sm:$0x1] %vm364_vm1, %v1115_v1  ;;  %416 = vst.msk [vmem:[#allocation2 + $0xd4] sm:$0x1] %vm364_vm1, %v1115_v1 }
  0x21 LB: >> { %vm458_vm2 = vcmask 1043456   ;;  %v1116_v6 = vmov 0.0   ;;  %vm1117_vm3 = vmmov 0   ;;  %s1002_s14 = sshll.u32 %s1109_s16, 3  ;;  %vm454_vm4 = vcmask 64512   ;;  %s897_s17 = smul.u32 12, %s1109_s16  ;;  %s1109_s16 = sphi %s1290_s16, %s427_s16  }
  0x22   : >> { %1025 = vmatprep.subr.bf16.mxu0 %v1116_v6  ;;  %v460_v7 = vsel %vm458_vm2, %v1278_v5, 0  ;;  %1027 = vmatprep.mubr.msk.bf16.mxu0 %vm1117_vm3, %v1116_v6  ;;  %s430_s15 = scalar_lea.vmem %s1283_s29, %s1002_s14  ;;  %vm555_vm5 = vsmask.f32 7938  ;;  %vm528_vm6 = vsmask.f32 256  ;;  %s427_s16 = sadd.s32 1, %s1109_s16  }
  0x23   : >> { %1026 = vmatpush3.bf16.msra.mxu0 %v460_v7  ;;  %v1011_v8 = vld [vmem:[%s430_s15] sm:$0xff]   ;;  %vm529_vm7 = vsmask.f32 4368  ;;  %vm556_vm8 = vmand %vm361_vm0, %vm555_vm5  ;;  %s898_s18 = scalar_lea.vmem [#allocation2], %s897_s17  ;;  %p424_p4 = scmp.ge.s32.totalorder %s427_s16, 16  }
  0x24   : >> { %v1012_v9 = vunpack.c.l.bf16 %v1011_v8  ;;  %v1013_v10 = vunpack.c.h.bf16 %v1011_v8  ;;  %vm530_vm9 = vmor %vm528_vm6, %vm529_vm7  ;;  %v1317_v45 = vld [vmem:[%s1409_s6] sm:$0xf] (%p424_p4)  ;;  %v1322_v46 = vld [vmem:[%s1409_s6 + $0x4] sm:$0xf] (%p424_p4)  ;;  %s1344_s16 = smov (%p424_p4), 0  }
  0x25   : >> { %vm562_vm10 = vmand %vm364_vm1, %vm528_vm6  ;;  %v1327_v47 = vld [vmem:[%s1409_s6 + $0x8] sm:$0x1] (%p424_p4)  ;;  %v1332_v48 = vld [vmem:[%s1412_s9] sm:$0x1] (%p424_p4) }
  0x26   : >> { %v441_v11 = vmul.f32 %v1012_v9, %v1200_v0  ;;  %v442_v12 = vmul.f32 %v1013_v10, %v1200_v0  ;;  %v1337_v49 = vld [vmem:[%s1410_s7] ss:$0 sm:$0xff] (%p424_p4) }
  0x27   : >> { %v964_v34 = vld [vmem:[%s898_s18 + $0xc] sm:$0xf]  ;;  %v967_v38 = vld [vmem:[%s898_s18 + $0x14] sm:$0x1]  ;;  %v1342_v50 = vld [vmem:[%s1411_s8] ss:$0 sm:$0xff] (%p424_p4) }
  0x28   : >> { %v449_v13 = vadd.f32 %v1241_v2, %v441_v11  ;;  %v450_v14 = vadd.f32 %v1241_v2, %v442_v12 }
  0x2a   : >> { %v451_v15 = vmax.f32 %v449_v13, 0.0  ;;  %v452_v16 = vmax.f32 %v450_v14, 0.0 }
  0x2c   : >> { %v453_v17 = vpack.c.bf16 %v452_v16, %v451_v15 }
  0x2e   : >> { %1028 = vmatmul.mubr.msk.bf16.vlgmr.msra.gmra.mrb[0].mxu0 %vm454_vm4, %v453_v17 }
 0x101   : >> { %v496_v18 = vpop.f32.mrb[0].mxu0 }
 0x102   : >> { %v509_v19 = vmul.f32 %v1246_v3, %v496_v18  ;;  %v1029_v20 = vpop.f32.mrb[1].mxu0 }
 0x103   : >> { %v499_v21 = vpop.f32.mrb[2].mxu0 }
 0x104   : >> { %v517_v22 = vadd.f32 %v1251_v4, %v509_v19  ;;  %v510_v23 = vmul.f32 %v1246_v3, %v499_v21  ;;  %v1030_v24 = vpop.f32.mrb[3].mxu0 }
 0x106   : >> { %v519_v25 = vmax.f32 %v517_v22, 0.0  ;;  %v518_v26 = vadd.f32 %v1251_v4, %v510_v23 }
 0x108   : >> { %v1003_v27 = vpack.c.bf16 %v519_v25, %v519_v25  ;;  %v520_v28 = vmax.f32 %v518_v26, 0.0 }
 0x10a   : >> { %v532_v29 = vshrl.u32 %v1003_v27, 16  ;;  %v1004_v30 = vpack.c.bf16 %v520_v28, %v520_v28  ;;  %v535_v32 = vshll.u32 %v1003_v27, 16 }
 0x10c   : >> { %v534_v31 = vrot.slane %v532_v29, 7  ;;  %v540_v33 = vshrl.u32 %v1004_v30, 16  ;;  %v543_v37 = vshll.u32 %v1004_v30, 16 }
 0x10d   : > { %426 = sbr.rel (!%p424_p4) target bundleno = 33 (0x21), region = 111 }
 0x10e   : >> { %v537_v35 = vor.u32 %v535_v32, %v534_v31  ;;  %v542_v36 = vrot.slane %v540_v33, 7  ;;  %v538_v39 = vrot.slane %v534_v31, 4 }
 0x110   : >> { %v558_v40 = vsel %vm556_vm8, %v537_v35, %v964_v34  ;;  %v545_v41 = vor.u32 %v543_v37, %v542_v36  ;;  %v547_v42 = vrot.slane %v542_v36, 4 }
 0x111   : >> { %965 = vst [vmem:[%s898_s18 + $0xc] sm:$0xf] %v558_v40 }
 0x112   : >> { %v546_v43 = vsel %vm530_vm9, %v538_v39, %v545_v41  ;;  %v564_v44 = vsel %vm562_vm10, %v547_v42, %v967_v38 }
 0x113   : >> { %966 = vst.msk [vmem:[%s898_s18 + $0x10] sm:$0xf] %vm361_vm0, %v546_v43  ;;  %968 = vst [vmem:[%s898_s18 + $0x14] sm:$0x1] %v564_v44 }
 0x114 LB: >> { %s1005_s14 = smul.u32 12, %s1113_s16  ;;  %vm627_vm11 = vcmask 1046528   ;;  %vm609_vm12 = vsmask.f32 7424  ;;  %v1118_v54 = vmov 0.0   ;;  %v987_v55 = vcombine.low %v1317_v45, %v1322_v46  ;;  %s1119_s17 = smov 6   ;;  %s1113_s16 = sphi %s1344_s16, %s577_s16  }
 0x115   : >> { %1031 = vmatprep.subr.bf16.mxu0 %v1118_v54  ;;  %1039 = vmatprep.subr.bf16.mxu1 %v1118_v54  ;;  %s1120_s18 = smov 4   ;;  %s1121_s19 = smov 12   ;;  %v988_v19 = vcombine.low %v1327_v47, %v1327_v47  ;;  %vm733_vm13 = vcmask 1040384   ;;  %vm1124_vm14 = vmmov 0   ;;  %vm697_vm15 = vcmask 15360  }
 0x116   : >> { %s1350_s15 = scalar_lea.vmem [#allocation2], %s1005_s14  ;;  %1032 = vmatpush3.bf16.msra.mxu0 %v987_v55  ;;  %s1122_s20 = smov 2   ;;  %1035 = vmatprep.mubr.msk.bf16.mxu0 %vm1124_vm14, %v1118_v54  ;;  %vm700_vm0 = vcmask 31744   ;;  %vm703_vm1 = vcmask 48128   ;;  %vm709_vm2 = vcmask 80896   ;;  %vm712_vm3 = vcmask 97280  }
 0x117   : >> { %1033 = vmatprep.subr.bf16.mxu0 %v1118_v54  ;;  %v735_v33 = vsel %vm733_vm13, %v988_v19, 0  ;;  %s1123_s21 = smov 8   ;;  %1041 = vmatprep.mubr.msk.bf16.mxu1 %vm1124_vm14, %v1118_v54  ;;  %s1125_s22 = smov 10   ;;  %vm715_vm5 = vcmask 113664   ;;  %vm718_vm6 = vcmask 130048   ;;  %vm730_vm7 = vcmask 146432  }
 0x118   : >> { %s1126_s23 = smov 16   ;;  %s1127_s24 = smov 14   ;;  %vm861_vm8 = vcmask 60416  }
 0x119   : >> { %s1006_s25 = sshll.u32 %s1113_s16, 3  ;;  %s577_s16 = sadd.s32 1, %s1113_s16  }
 0x11a   : >> { %v970_v51 = vld [vmem:[%s1350_s15 + $0xc] sm:$0xf]  ;;  %v971_v52 = vld [vmem:[%s1350_s15 + $0x10] sm:$0xf]  ;;  %v582_v57 = vld [vmem:[%s1350_s15 + $0x4] sm:$0xf]  ;;  %1034 = vmatpush3.bf16.msra.mxu0 %v735_v33  ;;  %s799_s26 = scalar_lea.vmem %s1283_s29, %s1006_s25  ;;  %s860_s27 = scalar_lea.vmem %s1288_s12, %s1006_s25 }
 0x11b   : >> { %v973_v53 = vld [vmem:[%s1350_s15 + $0xc] sm:$0xe]  ;;  %v981_v56 = vcombine.low %v970_v51, %v971_v52  ;;  %v584_v58 = vld [vmem:[%s1350_s15] sm:$0xe]  ;;  %v974_v1 = vld [vmem:[%s1350_s15 + $0x18] sm:$0xf] }
 0x11c   : >> { %v1084_v59 = vld [vmem:[%s1350_s15 + $0x8] ss:$0 sps:$4 sm:$0x11]   ;;  %v980_v60 = vcombine.low %v584_v58, %v582_v57  ;;  %v581_v61 = vld [vmem:[%s1350_s15] sm:$0xf]  ;;  %v983_v62 = vcombine.low %v973_v53, %v971_v52  ;;  %p574_p5 = scmp.ge.s32.totalorder %s577_s16, 16  }
 0x11d   : >> { %638 = vrot.lane.b32.xlu1 %v981_v56, %s1119_s17  ;;  %v646_v63 = vshll.u32 %v981_v56, 16  ;;  %v1363_v0 = vcombine.low %v581_v61, %v582_v57  ;;  %v975_v2 = vld [vmem:[%s1350_s15 + $0x1c] sm:$0xf]  ;;  %v644_v3 = vshrl.u32 %v981_v56, 16  ;;  %v629_v5 = vrot.slane %v1084_v59, 1 }
 0x11e   : >> { %v628_v4 = vrot.slane %v980_v60, 1  ;;  %v977_v6 = vld [vmem:[%s1350_s15 + $0x18] sm:$0xe]  ;;  %v984_v7 = vcombine.low %v974_v1, %v975_v2  ;;  %v618_v8 = vshll.u32 %v1084_v59, 16  ;;  %v660_v22 = vrot.slane %v983_v62, 1 }
 0x11f   : >> { %v611_v9 = vshrl.u32 %v1363_v0, 16  ;;  %v613_v10 = vshll.u32 %v1363_v0, 16  ;;  %v648_v11 = vrot.slane %v646_v63, 1  ;;  %v986_v14 = vcombine.low %v977_v6, %v975_v2  ;;  %v1089_v16 = vld [vmem:[%s1350_s15 + $0x14] ss:$0 sps:$4 sm:$0x11]  }
 0x120   : >> { %v630_v12 = vsel %vm627_vm11, %v628_v4, %v629_v5  ;;  %v678_v13 = vshll.u32 %v984_v7, 16  ;;  %v620_v15 = vrot.slane %v618_v8, 1  ;;  %v1090_v18 = vld [vmem:[%s1350_s15 + $0x20] ss:$0 sps:$4 sm:$0x11]   ;;  %v651_v21 = vshll.u32 %v1089_v16, 16 }
 0x121   : >> { %631 = vrot.lane.b32.xlu0 %v630_v12, %s1120_s18  ;;  %670 = vrot.lane.b32.xlu1 %v984_v7, %s1121_s19  ;;  %v615_v17 = vrot.slane %v613_v10, 1  ;;  %v649_v20 = vor.u32 %v648_v11, %v644_v3  ;;  %v661_v23 = vrot.slane %v1089_v16, 1  ;;  %v676_v25 = vshrl.u32 %v984_v7, 16 }
 0x122   : >> { %v680_v26 = vrot.slane %v678_v13, 1  ;;  %v683_v27 = vshll.u32 %v1090_v18, 16  ;;  %v653_v28 = vrot.slane %v651_v21, 1  ;;  %v692_v29 = vrot.slane %v986_v14, 1 }
 0x123   : >> { %v616_v24 = vor.u32 %v615_v17, %v611_v9  ;;  %v693_v30 = vrot.slane %v1090_v18, 1  ;;  %v662_v34 = vsel %vm627_vm11, %v660_v22, %v661_v23  ;;  %v808_v61 = vsel %vm733_vm13, %v1332_v48, 0  ;;  %v1015_v9 = vld [vmem:[%s799_s26] sm:$0xff]  }
 0x124   : >> { %v654_v32 = vsel %vm609_vm12, %v649_v20, %v653_v28  ;;  %v681_v35 = vor.u32 %v680_v26, %v676_v25  ;;  %v685_v36 = vrot.slane %v683_v27, 1  ;;  %1040 = vmatpush3.bf16.msra.mxu1 %v808_v61  ;;  %v1016_v10 = vunpack.c.l.bf16 %v1015_v9 }
 0x125   : >> { %v621_v31 = vsel %vm609_vm12, %v616_v24, %v620_v15  ;;  %655 = vrot.lane.b32.xlu1 %v654_v32, %s1123_s21  ;;  %v694_v37 = vsel %vm627_vm11, %v692_v29, %v693_v30  ;;  %v1017_v11 = vunpack.c.h.bf16 %v1015_v9 }
 0x126   : >> { %622 = vrot.lane.b32.xlu0 %v621_v31, %s1122_s20  ;;  %v686_v38 = vsel %vm609_vm12, %v681_v35, %v685_v36 }
 0x129   : >> { %695 = vrot.lane.b32.xlu1 %v694_v37, %s1126_s23 }
 0x12a   : >> { %663 = vrot.lane.b32.xlu0 %v662_v34, %s1125_s22 }
 0x12e   : >> { %687 = vrot.lane.b32.xlu0 %v686_v38, %s1127_s24 }
 0x18f   : >> { %v639_v39 = vpop.permute.xlu1 %638 }
 0x193   : >> { %v632_v40 = vpop.permute.xlu0 %631  ;;  %v671_v41 = vpop.permute.xlu1 %670 }
 0x197   : >> { %v656_v44 = vpop.permute.xlu1 %655 }
 0x198   : >> { %v623_v42 = vpop.permute.xlu0 %622 }
 0x199   : >> { %v699_v43 = vsel %vm697_vm15, %v1363_v0, %v623_v42 }
 0x19a   : >> { %v702_v51 = vsel %vm700_vm0, %v699_v43, %v632_v40 }
 0x19b   : >> { %v705_v52 = vsel %vm703_vm1, %v702_v51, %v639_v39  ;;  %v696_v56 = vpop.permute.xlu1 %695 }
 0x19c   : >> { %v708_v53 = vsel %vm454_vm4, %v705_v52, %v656_v44  ;;  %v664_v54 = vpop.permute.xlu0 %663 }
 0x19d   : >> { %v711_v55 = vsel %vm709_vm2, %v708_v53, %v664_v54 }
 0x19e   : >> { %v714_v57 = vsel %vm712_vm3, %v711_v55, %v671_v41 }
 0x1a0   : >> { %v688_v58 = vpop.permute.xlu0 %687 }
 0x1a1   : >> { %v717_v59 = vsel %vm715_vm5, %v714_v57, %v688_v58 }
 0x1a2   : >> { %v720_v60 = vsel %vm718_vm6, %v717_v59, %v696_v56 }
 0x1a3   : >> { %1036 = vmatmul.mubr.msk.bf16.vlgmr.msra.gmra.mrb[0].mxu0 %vm730_vm7, %v720_v60 }
 0x276   : >> { %v771_v62 = vpop.f32.mrb[0].mxu0 }
 0x277   : >> { %v784_v63 = vmul.f32 %v1337_v49, %v771_v62  ;;  %v1037_v0 = vpop.f32.mrb[1].mxu0 }
 0x278   : >> { %v774_v1 = vpop.f32.mrb[2].mxu0 }
 0x279   : >> { %v792_v2 = vadd.f32 %v1342_v50, %v784_v63  ;;  %v785_v3 = vmul.f32 %v1337_v49, %v774_v1  ;;  %v1038_v4 = vpop.f32.mrb[3].mxu0 }
 0x27b   : >> { %v793_v5 = vadd.f32 %v1342_v50, %v785_v3  ;;  %v794_v6 = vmax.f32 %v792_v2, 0.0 }
 0x27d   : >> { %v795_v7 = vmax.f32 %v793_v5, 0.0 }
 0x27f   : >> { %v796_v8 = vpack.c.bf16 %v795_v7, %v794_v6 }
 0x281   : >> { %1042 = vmatmul.mubr.msk.bf16.vlgmr.msra.gmra.mrb[0].mxu1 %vm697_vm15, %v796_v8 }
 0x354   : >> { %v844_v12 = vpop.f32.mrb[0].mxu1 }
 0x355   : >> { %v845_v13 = vadd.f32 %v1016_v10, %v844_v12  ;;  %v1043_v14 = vpop.f32.mrb[1].mxu1  ;;  %576 = sbr.rel (!%p574_p5) target bundleno = 276 (0x114), region = 122 }
 0x356   : >> { %v847_v15 = vpop.f32.mrb[2].mxu1 }
 0x357   : >> { %v1007_v16 = vpack.c.bf16 %v845_v13, %v845_v13  ;;  %v848_v17 = vadd.f32 %v1017_v11, %v847_v15  ;;  %v1044_v18 = vpop.f32.mrb[3].mxu1 }
 0x359   : >> { %862 = vst.msk [vmem:[%s860_s27] sm:$0xf] %vm861_vm8, %v1007_v16  ;;  %v1008_v19 = vpack.c.bf16 %v848_v17, %v848_v17 }
 0x35b   : >> { %863 = vst.msk [vmem:[%s860_s27 + $0x4] sm:$0xf] %vm861_vm8, %v1008_v19 }
 0x35c PF: > { %s20_s13 = sadd.s32 1, %s1105_s13  }
 0x35d   : > { %p17_p6 = scmp.ge.s32.totalorder %s20_s13, 4  }
 0x35f   :  { %19 = sbr.rel (!%p17_p6) target bundleno = 1 (0x1), region = 133 }

// kernel: _lambda_.26
= control target key start
LH: loop header
LB: loop body
LE: loop exit
PB: predicated region body
PF: predicated region fallthrough
CT: control target
= control target key end

     0   :  { %s658_s6 = smov 0   ;;  %s855_s0 = inlined_call_operand.vmem [shape: bf16[2,16,8,16], index: 0, kind: input, shape index: {}]   ;;  %s856_s1 = inlined_call_operand.vmem [shape: bf16[2,8,8,8], index: 1, kind: output, shape index: {}]  }
   0x1 LB: > { %s496_s7 = sadd.s32 4294967295, %s644_s6   ;;  %p500_p0 = scmp.ge.s32.totalorder %s644_s6, 1  ;;  %s644_s6 = sphi %s658_s6, %s11_s6  }
   0x2   : > { %p87_p1 = scmp.lt.s32.totalorder %s644_s6, 3 }
   0x4   : > { %p88_p2 = pnand %p500_p0, %p87_p1 }
   0x5   : > { %p668_p3 = scmp.lt.s32.totalorder (!%p88_p2), %s496_s7, 1  ;;  %vm117_vm0 = vcmask (!%p88_p2), 130048   ;;  %vm119_vm1 = vcmask (!%p88_p2), 122880   ;;  %v646_v0 = vmov (!%p88_p2), -inf   ;;  %s647_s13 = smov (!%p88_p2), 120   ;;  %vm432_vm2 = vcmask (!%p88_p2), 60416  }
   0x6   : > { %91 = sbr.rel (%p88_p2) target bundleno = 191 (0xbf), region = 24  ;;  %127 = vst.msk [vmem:[#allocation2 + $0x40] sm:$0xff] (!%p88_p2), %vm117_vm0, %v646_v0  ;;  %129 = vst.msk [vmem:[#allocation2 + $0x50] sm:$0xff] (!%p88_p2), %vm117_vm0, %v646_v0 }
   0x7   : > { %128 = vst.msk [vmem:[#allocation2 + $0x48] sm:$0x1] (!%p88_p2), %vm119_vm1, %v646_v0  ;;  %130 = vst.msk [vmem:[#allocation2 + $0x58] sm:$0x1] (!%p88_p2), %vm119_vm1, %v646_v0 }
   0x8   : > { %118 = vst.msk [vmem:[#allocation2] sm:$0xff] (!%p88_p2), %vm117_vm0, %v646_v0  ;;  %121 = vst.msk [vmem:[#allocation2 + $0x10] sm:$0xff] (!%p88_p2), %vm117_vm0, %v646_v0 }
   0x9   : > { %120 = vst.msk [vmem:[#allocation2 + $0x8] sm:$0x1] (!%p88_p2), %vm119_vm1, %v646_v0  ;;  %122 = vst.msk [vmem:[#allocation2 + $0x18] sm:$0x1] (!%p88_p2), %vm119_vm1, %v646_v0 }
   0xa   : > { %123 = vst.msk [vmem:[#allocation2 + $0x20] sm:$0xff] (!%p88_p2), %vm117_vm0, %v646_v0  ;;  %125 = vst.msk [vmem:[#allocation2 + $0x30] sm:$0xff] (!%p88_p2), %vm117_vm0, %v646_v0 }
   0xb   : > { %124 = vst.msk [vmem:[#allocation2 + $0x28] sm:$0x1] (!%p88_p2), %vm119_vm1, %v646_v0  ;;  %126 = vst.msk [vmem:[#allocation2 + $0x38] sm:$0x1] (!%p88_p2), %vm119_vm1, %v646_v0 }
   0xc   : > { %131 = vst.msk [vmem:[#allocation2 + $0x60] sm:$0xff] (!%p88_p2), %vm117_vm0, %v646_v0  ;;  %133 = vst.msk [vmem:[#allocation2 + $0x70] sm:$0xff] (!%p88_p2), %vm117_vm0, %v646_v0 }
   0xd   : > { %132 = vst.msk [vmem:[#allocation2 + $0x68] sm:$0x1] %vm119_vm1, %v646_v0  ;;  %134 = vst.msk [vmem:[#allocation2 + $0x78] sm:$0x1] %vm119_vm1, %v646_v0  ;;  %s859_s7 = smov (!%p668_p3, %s496_s7), 1 }
   0xe   : > { %135 = vst.msk [vmem:[#allocation2 + $0x80] sm:$0xff] %vm117_vm0, %v646_v0  ;;  %137 = vst.msk [vmem:[#allocation2 + $0x90] sm:$0xff] %vm117_vm0, %v646_v0  ;;  %s507_s9 = sshll.u32 %s859_s7, 6  ;;  %s508_s14 = sshll.u32 %s859_s7, 5 }
   0xf   : > { %136 = vst.msk [vmem:[#allocation2 + $0x88] sm:$0x1] %vm119_vm1, %v646_v0  ;;  %138 = vst.msk [vmem:[#allocation2 + $0x98] sm:$0x1] %vm119_vm1, %v646_v0  ;;  %s111_s12 = scalar_lea.vmem %s855_s0, %s507_s9  ;;  %v306_v52 = vld [vmem:[#allocation2] sm:$0xff]  ;;  %s827_s17 = scalar_lea.vmem %s856_s1, %s508_s14 }
  0x10   : > { %139 = vst.msk [vmem:[#allocation2 + $0xa0] sm:$0xff] %vm117_vm0, %v646_v0  ;;  %141 = vst.msk [vmem:[#allocation2 + $0xb0] sm:$0xff] %vm117_vm0, %v646_v0  ;;  %v541_v1 = vld [vmem:[%s111_s12 + $0x8] sm:$0xff]   ;;  %v542_v2 = vld [vmem:[%s111_s12 + $0x10] sm:$0xff]  }
  0x11   : > { %140 = vst.msk [vmem:[#allocation2 + $0xa8] sm:$0x1] %vm119_vm1, %v646_v0  ;;  %142 = vst.msk [vmem:[#allocation2 + $0xb8] sm:$0x1] %vm119_vm1, %v646_v0  ;;  %v510_v3 = vld [vmem:[%s111_s12] sm:$0xff]   ;;  %v516_v4 = vunpack.c.h.bf16 %v541_v1  ;;  %v519_v5 = vunpack.c.l.bf16 %v542_v2  ;;  %v520_v6 = vunpack.c.h.bf16 %v542_v2  ;;  %v515_v7 = vunpack.c.l.bf16 %v541_v1  ;;  %v543_v8 = vld [vmem:[%s111_s12 + $0x18] sm:$0xff]  }
  0x12   : > { %143 = vst.msk [vmem:[#allocation2 + $0xc0] sm:$0xff] %vm117_vm0, %v646_v0  ;;  %145 = vst.msk [vmem:[#allocation2 + $0xd0] sm:$0xff] %vm117_vm0, %v646_v0  ;;  %v544_v9 = vld [vmem:[%s111_s12 + $0x20] sm:$0xff]   ;;  %v545_v10 = vld [vmem:[%s111_s12 + $0x28] sm:$0xff]   ;;  %v511_v11 = vunpack.c.l.bf16 %v510_v3  ;;  %v512_v12 = vunpack.c.h.bf16 %v510_v3  ;;  %v523_v13 = vunpack.c.l.bf16 %v543_v8  ;;  %v524_v18 = vunpack.c.h.bf16 %v543_v8 }
  0x13   : > { %144 = vst.msk [vmem:[#allocation2 + $0xc8] sm:$0x1] %vm119_vm1, %v646_v0  ;;  %146 = vst.msk [vmem:[#allocation2 + $0xd8] sm:$0x1] %vm119_vm1, %v646_v0  ;;  %v528_v14 = vunpack.c.h.bf16 %v544_v9  ;;  %v546_v15 = vld [vmem:[%s111_s12 + $0x30] sm:$0xff]   ;;  %v547_v16 = vld [vmem:[%s111_s12 + $0x38] sm:$0xff]   ;;  %v531_v17 = vunpack.c.l.bf16 %v545_v10  ;;  %v527_v19 = vunpack.c.l.bf16 %v544_v9  ;;  %v532_v22 = vunpack.c.h.bf16 %v545_v10 }
  0x14   : > { %147 = vst.msk [vmem:[#allocation2 + $0xe0] sm:$0xff] %vm117_vm0, %v646_v0  ;;  %149 = vst.msk [vmem:[#allocation2 + $0xf0] sm:$0xff] %vm117_vm0, %v646_v0  ;;  %v536_v20 = vunpack.c.h.bf16 %v546_v15  ;;  %v539_v21 = vunpack.c.l.bf16 %v547_v16  ;;  %v535_v23 = vunpack.c.l.bf16 %v546_v15  ;;  %v540_v24 = vunpack.c.h.bf16 %v547_v16  ;;  %v732_v25 = vld [vmem:[#allocation2 + $0x1] sm:$0xff] }
  0x15   : > { %148 = vst.msk [vmem:[#allocation2 + $0xe8] sm:$0x1] %vm119_vm1, %v646_v0  ;;  %150 = vst.msk [vmem:[#allocation2 + $0xf8] sm:$0x1] %vm119_vm1, %v646_v0 }
  0x16   : > { %151 = vst.msk [vmem:[#allocation2 + $0x100] sm:$0xff] %vm117_vm0, %v646_v0  ;;  %191 = vst.msk [vmem:[#allocation2 + $0x41] sm:$0xff] %vm117_vm0, %v516_v4 }
  0x17   : > { %152 = vst.msk [vmem:[#allocation2 + $0x108] sm:$0x1] %vm119_vm1, %v646_v0 }
  0x18   : > { %192 = vst.msk [vmem:[#allocation2 + $0x51] sm:$0xff] %vm117_vm0, %v519_v5  ;;  %190 = vst.msk [vmem:[#allocation2 + $0x31] sm:$0xff] %vm117_vm0, %v515_v7 }
  0x19   : > { %193 = vst.msk [vmem:[#allocation2 + $0x61] sm:$0xff] %vm117_vm0, %v520_v6  ;;  %188 = vst.msk [vmem:[#allocation2 + $0x11] sm:$0xff] %vm117_vm0, %v511_v11 }
  0x1a   : > { %189 = vst.msk [vmem:[#allocation2 + $0x21] sm:$0xff] %vm117_vm0, %v512_v12  ;;  %194 = vst.msk [vmem:[#allocation2 + $0x71] sm:$0xff] %vm117_vm0, %v523_v13 }
  0x1b   : > { %197 = vst.msk [vmem:[#allocation2 + $0xa1] sm:$0xff] %vm117_vm0, %v528_v14  ;;  %198 = vst.msk [vmem:[#allocation2 + $0xb1] sm:$0xff] %vm117_vm0, %v531_v17 }
  0x1c   : > { %195 = vst.msk [vmem:[#allocation2 + $0x81] sm:$0xff] %vm117_vm0, %v524_v18  ;;  %196 = vst.msk [vmem:[#allocation2 + $0x91] sm:$0xff] %vm117_vm0, %v527_v19 }
  0x1d   : > { %201 = vst.msk [vmem:[#allocation2 + $0xe1] sm:$0xff] %vm117_vm0, %v536_v20  ;;  %202 = vst.msk [vmem:[#allocation2 + $0xf1] sm:$0xff] %vm117_vm0, %v539_v21  ;;  %v734_v26 = vld [vmem:[#allocation2 + $0x41] sm:$0xff] }
  0x1e   : > { %199 = vst.msk [vmem:[#allocation2 + $0xc1] sm:$0xff] %vm117_vm0, %v532_v22  ;;  %200 = vst.msk [vmem:[#allocation2 + $0xd1] sm:$0xff] %vm117_vm0, %v535_v23  ;;  %v310_v58 = vld [vmem:[#allocation2 + $0x40] sm:$0xff] }
  0x1f   : > { %203 = vst.msk [vmem:[#allocation2 + $0x101] sm:$0xff] %vm117_vm0, %v540_v24  ;;  %v736_v27 = vld [vmem:[#allocation2 + $0x51] sm:$0xff] }
  0x20   : > { %v738_v28 = vld [vmem:[#allocation2 + $0x61] sm:$0xff]  ;;  %v568_v29 = vpack.i.bf16 %v736_v27, %v734_v26  ;;  %v742_v30 = vld [vmem:[#allocation2 + $0x11] sm:$0xff] }
  0x21   : > { %v744_v31 = vld [vmem:[#allocation2 + $0x71] sm:$0xff]  ;;  %v746_v32 = vld [vmem:[#allocation2 + $0x21] sm:$0xff]  ;;  %v558_v33 = vpack.i.bf16 %v742_v30, %v732_v25 }
  0x22   : > { %v750_v34 = vld [vmem:[#allocation2 + $0x31] sm:$0xff]  ;;  %569 = vrot.lane.b32.xlu1 %v568_v29, %s647_s13  ;;  %v573_v35 = vpack.i.bf16 %v744_v31, %v738_v28  ;;  %v758_v37 = vld [vmem:[#allocation2 + $0xa1] sm:$0xff] }
  0x23   : > { %559 = vrot.lane.b32.xlu0 %v558_v33, %s647_s13  ;;  %v563_v36 = vpack.i.bf16 %v750_v34, %v746_v32  ;;  %v760_v38 = vld [vmem:[#allocation2 + $0xb1] sm:$0xff]  ;;  %v762_v39 = vld [vmem:[#allocation2 + $0x81] sm:$0xff] }
  0x24   : > { %v764_v40 = vld [vmem:[#allocation2 + $0x91] sm:$0xff]  ;;  %v583_v41 = vpack.i.bf16 %v760_v38, %v758_v37  ;;  %v772_v43 = vld [vmem:[#allocation2 + $0xe1] sm:$0xff] }
  0x25   : > { %v578_v42 = vpack.i.bf16 %v764_v40, %v762_v39  ;;  %v774_v44 = vld [vmem:[#allocation2 + $0xf1] sm:$0xff]  ;;  %v776_v45 = vld [vmem:[#allocation2 + $0xc1] sm:$0xff] }
  0x26   : > { %574 = vrot.lane.b32.xlu1 %v573_v35, %s647_s13  ;;  %v778_v46 = vld [vmem:[#allocation2 + $0xd1] sm:$0xff]  ;;  %v593_v47 = vpack.i.bf16 %v774_v44, %v772_v43  ;;  %v308_v50 = vld [vmem:[#allocation2 + $0x20] sm:$0xff] }
  0x27   : > { %564 = vrot.lane.b32.xlu0 %v563_v36, %s647_s13  ;;  %v588_v48 = vpack.i.bf16 %v778_v46, %v776_v45  ;;  %v307_v49 = vld [vmem:[#allocation2 + $0x10] sm:$0xff]  ;;  %v786_v51 = vld [vmem:[#allocation2 + $0x101] sm:$0xff] }
  0x28   : > { %v603_v53 = vpack.i.bf16 %v308_v50, %v307_v49  ;;  %v598_v54 = vpack.i.bf16 %v306_v52, %v786_v51  ;;  %v311_v55 = vld [vmem:[#allocation2 + $0x50] sm:$0xff]  ;;  %v312_v56 = vld [vmem:[#allocation2 + $0x60] sm:$0xff] }
  0x29   : > { %v309_v57 = vld [vmem:[#allocation2 + $0x30] sm:$0xff]  ;;  %v613_v59 = vpack.i.bf16 %v312_v56, %v311_v55  ;;  %v316_v62 = vld [vmem:[#allocation2 + $0xa0] sm:$0xff] }
  0x2a   : > { %584 = vrot.lane.b32.xlu1 %v583_v41, %s647_s13  ;;  %v608_v60 = vpack.i.bf16 %v310_v58, %v309_v57  ;;  %v315_v61 = vld [vmem:[#allocation2 + $0x90] sm:$0xff]  ;;  %v314_v0 = vld [vmem:[#allocation2 + $0x80] sm:$0xff] }
  0x2b   : > { %579 = vrot.lane.b32.xlu0 %v578_v42, %s647_s13  ;;  %v313_v63 = vld [vmem:[#allocation2 + $0x70] sm:$0xff]  ;;  %v623_v1 = vpack.i.bf16 %v316_v62, %v315_v61  ;;  %v320_v4 = vld [vmem:[#allocation2 + $0xe0] sm:$0xff] }
  0x2c   : > { %v618_v2 = vpack.i.bf16 %v314_v0, %v313_v63  ;;  %v319_v3 = vld [vmem:[#allocation2 + $0xd0] sm:$0xff]  ;;  %v318_v6 = vld [vmem:[#allocation2 + $0xc0] sm:$0xff] }
  0x2d   : > { %v317_v5 = vld [vmem:[#allocation2 + $0xb0] sm:$0xff]  ;;  %v633_v7 = vpack.i.bf16 %v320_v4, %v319_v3  ;;  %v322_v9 = vld [vmem:[#allocation2 + $0x100] sm:$0xff] }
  0x2e   : > { %594 = vrot.lane.b32.xlu1 %v593_v47, %s647_s13  ;;  %v628_v8 = vpack.i.bf16 %v318_v6, %v317_v5  ;;  %v321_v10 = vld [vmem:[#allocation2 + $0xf0] sm:$0xff] }
  0x2f   : > { %589 = vrot.lane.b32.xlu0 %v588_v48, %s647_s13 }
  0x32   : > { %604 = vrot.lane.b32.xlu1 %v603_v53, %s647_s13 }
  0x33   : > { %599 = vrot.lane.b32.xlu0 %v598_v54, %s647_s13 }
  0x36   : > { %614 = vrot.lane.b32.xlu1 %v613_v59, %s647_s13 }
  0x37   : > { %609 = vrot.lane.b32.xlu0 %v608_v60, %s647_s13 }
  0x3a   : > { %624 = vrot.lane.b32.xlu1 %v623_v1, %s647_s13 }
  0x3b   : > { %619 = vrot.lane.b32.xlu0 %v618_v2, %s647_s13 }
  0x3e   : > { %634 = vrot.lane.b32.xlu1 %v633_v7, %s647_s13 }
  0x3f   : > { %629 = vrot.lane.b32.xlu0 %v628_v8, %s647_s13 }
  0x42   : > { %372 = vrot.lane.b32.xlu1 %v322_v9, %s647_s13 }
  0x43   : > { %370 = vrot.lane.b32.xlu0 %v321_v10, %s647_s13 }
  0x94   : > { %v570_v11 = vpop.permute.xlu1 %569 }
  0x95   : > { %v560_v12 = vpop.permute.xlu0 %559  ;;  %v572_v17 = vunpack.i.h.bf16 %v570_v11  ;;  %v571_v21 = vunpack.i.l.bf16 %v570_v11 }
  0x96   : > { %v562_v19 = vunpack.i.h.bf16 %v560_v12  ;;  %v561_v22 = vunpack.i.l.bf16 %v560_v12 }
  0x97   : > { %v294_v29 = vmax.f32 %v736_v27, %v572_v17  ;;  %v293_v50 = vmax.f32 %v734_v26, %v571_v21 }
  0x98   : > { %v575_v13 = vpop.permute.xlu1 %574  ;;  %v290_v41 = vmax.f32 %v742_v30, %v562_v19  ;;  %v289_v52 = vmax.f32 %v732_v25, %v561_v22 }
  0x99   : > { %v565_v14 = vpop.permute.xlu0 %564  ;;  %v577_v23 = vunpack.i.h.bf16 %v575_v13  ;;  %v576_v24 = vunpack.i.l.bf16 %v575_v13 }
  0x9a   : > { %v567_v33 = vunpack.i.h.bf16 %v565_v14  ;;  %v566_v35 = vunpack.i.l.bf16 %v565_v14 }
  0x9b   : > { %v296_v27 = vmax.f32 %v744_v31, %v577_v23  ;;  %v295_v55 = vmax.f32 %v738_v28, %v576_v24 }
  0x9c   : > { %v801_v15 = vpop.permute.xlu1 %584  ;;  %v292_v57 = vmax.f32 %v750_v34, %v567_v33  ;;  %v291_v58 = vmax.f32 %v746_v32, %v566_v35 }
  0x9d   : > { %v580_v16 = vpop.permute.xlu0 %579  ;;  %v586_v42 = vunpack.i.l.bf16 %v801_v15  ;;  %v587_v59 = vunpack.i.h.bf16 %v801_v15 }
  0x9e   : > { %v582_v47 = vunpack.i.h.bf16 %v580_v16  ;;  %v581_v30 = vunpack.i.l.bf16 %v580_v16 }
  0x9f   : > { %v299_v25 = vmax.f32 %v758_v37, %v586_v42 }
  0xa0   : > { %v803_v18 = vpop.permute.xlu1 %594  ;;  %v298_v61 = vmax.f32 %v764_v40, %v582_v47  ;;  %v297_v34 = vmax.f32 %v762_v39, %v581_v30 }
  0xa1   : > { %v590_v20 = vpop.permute.xlu0 %589  ;;  %v597_v5 = vunpack.i.h.bf16 %v803_v18  ;;  %v596_v40 = vunpack.i.l.bf16 %v803_v18 }
  0xa2   : > { %v592_v3 = vunpack.i.h.bf16 %v590_v20  ;;  %v591_v32 = vunpack.i.l.bf16 %v590_v20 }
  0xa4   : > { %v605_v36 = vpop.permute.xlu1 %604  ;;  %v302_v16 = vmax.f32 %v778_v46, %v592_v3  ;;  %v301_v17 = vmax.f32 %v776_v45, %v591_v32 }
  0xa5   : > { %v606_v48 = vunpack.i.l.bf16 %v605_v36  ;;  %v808_v49 = vpop.permute.xlu0 %599  ;;  %v607_v53 = vunpack.i.h.bf16 %v605_v36 }
  0xa6   : > { %v602_v54 = vunpack.i.h.bf16 %v808_v49  ;;  %v601_v20 = vunpack.i.l.bf16 %v808_v49 }
  0xa7   : > { %v392_v56 = vmax.f32 %v290_v41, %v606_v48  ;;  %v393_v31 = vmax.f32 %v291_v58, %v607_v53  ;;  %v300_v48 = vmax.f32 %v760_v38, %v587_v59  ;;  %v303_v53 = vmax.f32 %v772_v43, %v596_v40 }
  0xa8   : > { %v391_v60 = vmax.f32 %v289_v52, %v602_v54  ;;  %v615_v26 = vpop.permute.xlu1 %614  ;;  %v305_v38 = vmax.f32 %v786_v51, %v601_v20 }
  0xa9   : > { %v617_v62 = vunpack.i.h.bf16 %v615_v26  ;;  %v616_v63 = vunpack.i.l.bf16 %v615_v26  ;;  %v610_v0 = vpop.permute.xlu0 %609 }
  0xaa   : > { %v408_v28 = vmax.f32 %v391_v60, %v392_v56  ;;  %v612_v1 = vunpack.i.h.bf16 %v610_v0  ;;  %v611_v2 = vunpack.i.l.bf16 %v610_v0 }
  0xab   : > { %v396_v4 = vmax.f32 %v294_v29, %v616_v63  ;;  %v397_v9 = vmax.f32 %v295_v55, %v617_v62  ;;  %v304_v55 = vmax.f32 %v774_v44, %v597_v5 }
  0xac   : > { %v416_v6 = vmax.f32 %v408_v28, %v393_v31  ;;  %v395_v7 = vmax.f32 %v293_v50, %v612_v1  ;;  %v394_v37 = vmax.f32 %v292_v57, %v611_v2  ;;  %v625_v8 = vpop.permute.xlu1 %624 }
  0xad   : > { %v627_v10 = vunpack.i.h.bf16 %v625_v8  ;;  %v626_v39 = vunpack.i.l.bf16 %v625_v8  ;;  %v620_v11 = vpop.permute.xlu0 %619 }
  0xae   : > { %v424_v12 = vpack.c.bf16 %v416_v6, %v416_v6  ;;  %v410_v13 = vmax.f32 %v395_v7, %v396_v4  ;;  %v409_v14 = vmax.f32 %v393_v31, %v394_v37  ;;  %v622_v15 = vunpack.i.h.bf16 %v620_v11 }
  0xaf   : > { %v400_v19 = vmax.f32 %v298_v61, %v626_v39  ;;  %v621_v18 = vunpack.i.l.bf16 %v620_v11  ;;  %v401_v29 = vmax.f32 %v299_v25, %v627_v10 }
  0xb0   : > { %433 = vst.msk [vmem:[%s827_s17] sm:$0xf] %vm432_vm2, %v424_v12  ;;  %v418_v21 = vmax.f32 %v410_v13, %v397_v9  ;;  %v417_v22 = vmax.f32 %v409_v14, %v395_v7  ;;  %v399_v23 = vmax.f32 %v297_v34, %v622_v15  ;;  %v635_v24 = vpop.permute.xlu1 %634 }
  0xb1   : > { %v398_v33 = vmax.f32 %v296_v27, %v621_v18  ;;  %v637_v35 = vunpack.i.h.bf16 %v635_v24  ;;  %v636_v36 = vunpack.i.l.bf16 %v635_v24  ;;  %v630_v41 = vpop.permute.xlu0 %629 }
  0xb2   : > { %v426_v46 = vpack.c.bf16 %v418_v21, %v418_v21  ;;  %v425_v42 = vpack.c.bf16 %v417_v22, %v417_v22  ;;  %v412_v45 = vmax.f32 %v399_v23, %v400_v19  ;;  %v632_v47 = vunpack.i.h.bf16 %v630_v41 }
  0xb3   : > { %v411_v49 = vmax.f32 %v397_v9, %v398_v33  ;;  %v404_v50 = vmax.f32 %v302_v16, %v636_v36  ;;  %v631_v52 = vunpack.i.l.bf16 %v630_v41  ;;  %v405_v60 = vmax.f32 %v303_v53, %v637_v35 }
  0xb4   : > { %435 = vst.msk [vmem:[%s827_s17 + $0x8] sm:$0xf] %vm432_vm2, %v426_v46  ;;  %434 = vst.msk [vmem:[%s827_s17 + $0x4] sm:$0xf] %vm432_vm2, %v425_v42  ;;  %v420_v54 = vmax.f32 %v412_v45, %v401_v29  ;;  %v403_v27 = vmax.f32 %v301_v17, %v632_v47  ;;  %v373_v57 = vpop.permute.xlu1 %372 }
  0xb5   : > { %v419_v30 = vmax.f32 %v411_v49, %v399_v23  ;;  %v402_v56 = vmax.f32 %v300_v48, %v631_v52  ;;  %v371_v58 = vpop.permute.xlu0 %370  ;;  %v407_v44 = vmax.f32 %v305_v38, %v373_v57 }
  0xb6   : > { %v428_v59 = vpack.c.bf16 %v420_v54, %v420_v54  ;;  %v414_v43 = vmax.f32 %v403_v27, %v404_v50  ;;  %v406_v26 = vmax.f32 %v304_v55, %v371_v58 }
  0xb7   : > { %v427_v25 = vpack.c.bf16 %v419_v30, %v419_v30  ;;  %v413_v61 = vmax.f32 %v401_v29, %v402_v56 }
  0xb8   : > { %437 = vst.msk [vmem:[%s827_s17 + $0x10] sm:$0xf] %vm432_vm2, %v428_v59  ;;  %v422_v62 = vmax.f32 %v414_v43, %v405_v60  ;;  %v415_v63 = vmax.f32 %v405_v60, %v406_v26 }
  0xb9   : > { %436 = vst.msk [vmem:[%s827_s17 + $0xc] sm:$0xf] %vm432_vm2, %v427_v25  ;;  %v421_v0 = vmax.f32 %v413_v61, %v403_v27 }
  0xba   : > { %v430_v31 = vpack.c.bf16 %v422_v62, %v422_v62  ;;  %v423_v51 = vmax.f32 %v415_v63, %v407_v44 }
  0xbb   : > { %v429_v28 = vpack.c.bf16 %v421_v0, %v421_v0 }
  0xbc   : > { %439 = vst.msk [vmem:[%s827_s17 + $0x18] sm:$0xf] %vm432_vm2, %v430_v31  ;;  %v431_v1 = vpack.c.bf16 %v423_v51, %v423_v51 }
  0xbd   : > { %438 = vst.msk [vmem:[%s827_s17 + $0x14] sm:$0xf] %vm432_vm2, %v429_v28 }
  0xbe   : > { %440 = vst.msk [vmem:[%s827_s17 + $0x1c] sm:$0xf] %vm432_vm2, %v431_v1 }
  0xbf PF: > { %s11_s6 = sadd.s32 1, %s644_s6  }
  0xc0   : > { %p8_p4 = scmp.ge.s32.totalorder %s11_s6, 4  }
  0xc2   :  { %10 = sbr.rel (!%p8_p4) target bundleno = 1 (0x1), region = 55 }

// kernel: _lambda_.27
= control target key start
LH: loop header
LB: loop body
LE: loop exit
PB: predicated region body
PF: predicated region fallthrough
CT: control target
= control target key end

     0   :  { %s1056_s13 = smov 0   ;;  %s1193_s0 = inlined_call_operand.vmem [shape: bf16[2,8,8,8], index: 0, kind: input, shape index: {}]   ;;  %s1194_s1 = inlined_call_operand.vmem [shape: f32[1,8], index: 1, kind: input, shape index: {}]   ;;  %s1195_s2 = inlined_call_operand.vmem [shape: f32[1,8], index: 2, kind: input, shape index: {}]   ;;  %s1196_s3 = inlined_call_operand.vmem [shape: bf16[8,2], index: 3, kind: input, shape index: {}]   ;;  %s1197_s4 = inlined_call_operand.vmem [shape: f32[1,2], index: 4, kind: input, shape index: {}]   ;;  %s1198_s5 = inlined_call_operand.vmem [shape: f32[1,2], index: 5, kind: input, shape index: {}]   ;;  %s1199_s6 = inlined_call_operand.vmem [shape: bf16[18,2], index: 6, kind: input, shape index: {}]   ;;  %s1200_s7 = inlined_call_operand.vmem [shape: f32[1,2], index: 7, kind: input, shape index: {}]   ;;  %s1201_s8 = inlined_call_operand.vmem [shape: f32[1,2], index: 8, kind: input, shape index: {}]   ;;  %s1202_s9 = inlined_call_operand.vmem [shape: bf16[2,8], index: 9, kind: input, shape index: {}]   ;;  %s1203_s10 = inlined_call_operand.vmem [shape: bf16[2,8,8,8], index: 10, kind: output, shape index: {}]  }
   0x1 LB: > { %s839_s14 = sadd.s32 4294967295, %s978_s13   ;;  %p843_p0 = scmp.ge.s32.totalorder %s978_s13, 1  ;;  %s978_s13 = sphi %s1056_s13, %s20_s13  }
   0x2   : > { %p312_p1 = scmp.lt.s32.totalorder %s978_s13, 3 }
   0x4   : > { %p313_p2 = pnand %p843_p0, %p312_p1 }
   0x5   : > { %p1066_p3 = scmp.lt.s32.totalorder (!%p313_p2), %s839_s14, 1  ;;  %vm361_vm0 = vcmask (!%p313_p2), 11264   ;;  %vm363_vm1 = vcmask (!%p313_p2), 8192   ;;  %v1073_v0 = vld [vmem:[%s1194_s1] ss:$0 sm:$0xff] (!%p313_p2)  ;;  %v988_v1 = vmov (!%p313_p2), 0  }
   0x6   : > { %316 = sbr.rel (%p313_p2) target bundleno = 836 (0x344), region = 60  ;;  %362 = vst.msk [vmem:[#allocation2] sm:$0xf] (!%p313_p2), %vm361_vm0, %v988_v1  ;;  %365 = vst.msk [vmem:[#allocation2 + $0x8] sm:$0xf] (!%p313_p2), %vm361_vm0, %v988_v1  ;;  %s1121_s16 = smov (!%p313_p2), 0  }
   0x7   : > { %367 = vst.msk [vmem:[#allocation2 + $0x10] sm:$0xf] (!%p313_p2), %vm361_vm0, %v988_v1  ;;  %369 = vst.msk [vmem:[#allocation2 + $0x18] sm:$0xf] (!%p313_p2), %vm361_vm0, %v988_v1  ;;  %v850_v2 = vld [vmem:[%s1195_s2] ss:$0 sm:$0xff] (!%p313_p2) }
   0x8   : > { %371 = vst.msk [vmem:[#allocation2 + $0x20] sm:$0xf] (!%p313_p2), %vm361_vm0, %v988_v1  ;;  %373 = vst.msk [vmem:[#allocation2 + $0x28] sm:$0xf] (!%p313_p2), %vm361_vm0, %v988_v1  ;;  %v852_v3 = vld [vmem:[%s1197_s4] ss:$0 sm:$0xff] (!%p313_p2) }
   0x9   : > { %375 = vst.msk [vmem:[#allocation2 + $0x30] sm:$0xf] (!%p313_p2), %vm361_vm0, %v988_v1  ;;  %377 = vst.msk [vmem:[#allocation2 + $0x38] sm:$0xf] (!%p313_p2), %vm361_vm0, %v988_v1  ;;  %v853_v4 = vld [vmem:[%s1198_s5] ss:$0 sm:$0xff] (!%p313_p2) }
   0xa   : > { %379 = vst.msk [vmem:[#allocation2 + $0x40] sm:$0xf] (!%p313_p2), %vm361_vm0, %v988_v1  ;;  %381 = vst.msk [vmem:[#allocation2 + $0x48] sm:$0xf] (!%p313_p2), %vm361_vm0, %v988_v1  ;;  %v387_v5 = vld [vmem:[%s1196_s3] sm:$0xf] (!%p313_p2) }
   0xb   : > { %364 = vst.msk [vmem:[#allocation2 + $0x4] sm:$0x1] (!%p313_p2), %vm363_vm1, %v988_v1  ;;  %366 = vst.msk [vmem:[#allocation2 + $0xc] sm:$0x1] (!%p313_p2), %vm363_vm1, %v988_v1 }
   0xc   : > { %368 = vst.msk [vmem:[#allocation2 + $0x14] sm:$0x1] (!%p313_p2), %vm363_vm1, %v988_v1  ;;  %370 = vst.msk [vmem:[#allocation2 + $0x1c] sm:$0x1] (!%p313_p2), %vm363_vm1, %v988_v1 }
   0xd   : > { %372 = vst.msk [vmem:[#allocation2 + $0x24] sm:$0x1] %vm363_vm1, %v988_v1  ;;  %374 = vst.msk [vmem:[#allocation2 + $0x2c] sm:$0x1] %vm363_vm1, %v988_v1  ;;  %s1206_s14 = smov (!%p1066_p3, %s839_s14), 1 }
   0xe   : > { %376 = vst.msk [vmem:[#allocation2 + $0x34] sm:$0x1] %vm363_vm1, %v988_v1  ;;  %378 = vst.msk [vmem:[#allocation2 + $0x3c] sm:$0x1] %vm363_vm1, %v988_v1  ;;  %s888_s26 = sshll.u32 %s1206_s14, 5 }
   0xf   : > { %380 = vst.msk [vmem:[#allocation2 + $0x44] sm:$0x1] %vm363_vm1, %v988_v1  ;;  %382 = vst.msk [vmem:[#allocation2 + $0x4c] sm:$0x1] %vm363_vm1, %v988_v1  ;;  %s1114_s29 = scalar_lea.vmem %s1193_s0, %s888_s26  ;;  %s1119_s12 = scalar_lea.vmem %s1203_s10, %s888_s26 }
  0x10 LB: >> { %vm418_vm2 = vcmask 1043456   ;;  %v989_v6 = vmov 0.0   ;;  %vm990_vm3 = vmmov 0   ;;  %s848_s14 = sshll.u32 %s982_s16, 2  ;;  %vm414_vm4 = vcmask 64512   ;;  %s855_s17 = sshll.u32 %s982_s16, 3  ;;  %s982_s16 = sphi %s1121_s16, %s393_s16  }
  0x11   : >> { %899 = vmatprep.subr.bf16.mxu0 %v989_v6  ;;  %v420_v7 = vsel %vm418_vm2, %v387_v5, 0  ;;  %901 = vmatprep.mubr.msk.bf16.mxu0 %vm990_vm3, %v989_v6  ;;  %s395_s15 = scalar_lea.vmem %s1114_s29, %s848_s14  ;;  %vm496_vm5 = vsmask.f32 7938  ;;  %vm502_vm6 = vsmask.f32 256  ;;  %s791_s18 = scalar_lea.vmem [#allocation2], %s855_s17 }
  0x12   : >> { %900 = vmatpush3.bf16.msra.mxu0 %v420_v7  ;;  %v396_v8 = vld [vmem:[%s395_s15] sm:$0xf]  ;;  %vm497_vm7 = vmand %vm361_vm0, %vm496_vm5  ;;  %s393_s16 = sadd.s32 1, %s982_s16  }
  0x13   : >> { %v397_v9 = vunpack.c.l.bf16 %v396_v8  ;;  %vm503_vm8 = vmand %vm363_vm1, %vm502_vm6  ;;  %p390_p4 = scmp.ge.s32.totalorder %s393_s16, 8  }
  0x14   : > { %v1139_v31 = vld [vmem:[%s1199_s6] sm:$0xf] (%p390_p4)  ;;  %v1144_v32 = vld [vmem:[%s1199_s6 + $0x4] sm:$0xf] (%p390_p4)  ;;  %v1149_v33 = vld [vmem:[%s1199_s6 + $0x8] sm:$0x1] (%p390_p4) }
  0x15   : >> { %v404_v10 = vmul.f32 %v1073_v0, %v397_v9  ;;  %v1154_v34 = vld [vmem:[%s1202_s9] sm:$0x1] (%p390_p4)  ;;  %s1166_s16 = smov (%p390_p4), 0  }
  0x16   : >> { %v856_v25 = vld [vmem:[%s791_s18 + $0x8] sm:$0xf]  ;;  %v858_v26 = vld [vmem:[%s791_s18 + $0xc] sm:$0x1]  ;;  %v1159_v35 = vld [vmem:[%s1200_s7] ss:$0 sm:$0xff] (%p390_p4) }
  0x17   : >> { %v411_v11 = vadd.f32 %v850_v2, %v404_v10  ;;  %v1164_v36 = vld [vmem:[%s1201_s8] ss:$0 sm:$0xff] (%p390_p4) }
  0x19   : >> { %v412_v12 = vmax.f32 %v411_v11, 0.0 }
  0x1b   : >> { %v413_v13 = vpack.c.bf16 %v412_v12, %v412_v12 }
  0x1d   : >> { %902 = vmatmul.mubr.msk.bf16.vlgmr.msra.gmra.mrb[0].mxu0 %vm414_vm4, %v413_v13 }
  0xf0   : >> { %v456_v14 = vpop.f32.mrb[0].mxu0 }
  0xf1   : >> { %v468_v15 = vmul.f32 %v852_v3, %v456_v14  ;;  %v903_v16 = vpop.f32.mrb[1].mxu0 }
  0xf2   : >> { %v459_v17 = vpop.f32.mrb[2].mxu0 }
  0xf3   : >> { %v475_v18 = vadd.f32 %v853_v4, %v468_v15  ;;  %v904_v19 = vpop.f32.mrb[3].mxu0 }
  0xf5   : >> { %v476_v20 = vmax.f32 %v475_v18, 0.0 }
  0xf7   : >> { %v890_v21 = vpack.c.bf16 %v476_v20, %v476_v20 }
  0xf9   : >> { %v483_v22 = vshrl.u32 %v890_v21, 16  ;;  %v486_v24 = vshll.u32 %v890_v21, 16 }
  0xfa   : > { %392 = sbr.rel (!%p390_p4) target bundleno = 16 (0x10), region = 111 }
  0xfb   : >> { %v485_v23 = vrot.slane %v483_v22, 7 }
  0xfd   : >> { %v488_v27 = vor.u32 %v486_v24, %v485_v23  ;;  %v489_v28 = vrot.slane %v485_v23, 4 }
  0xff   : >> { %v499_v29 = vsel %vm497_vm7, %v488_v27, %v856_v25  ;;  %v505_v30 = vsel %vm503_vm8, %v489_v28, %v858_v26 }
 0x100   : >> { %857 = vst [vmem:[%s791_s18 + $0x8] sm:$0xf] %v499_v29  ;;  %859 = vst [vmem:[%s791_s18 + $0xc] sm:$0x1] %v505_v30 }
 0x101 LB: >> { %s891_s14 = sshll.u32 %s986_s16, 3  ;;  %v991_v37 = vmov 0.0   ;;  %v878_v38 = vcombine.low %v1139_v31, %v1144_v32  ;;  %v879_v50 = vcombine.low %v1149_v33, %v1149_v33  ;;  %s992_s17 = smov 6   ;;  %vm642_vm9 = vcmask 1040384   ;;  %s986_s16 = sphi %s1166_s16, %s518_s16  }
 0x102   : >> { %905 = vmatprep.subr.bf16.mxu0 %v991_v37  ;;  %913 = vmatprep.subr.bf16.mxu1 %v991_v37  ;;  %s521_s15 = scalar_lea.vmem [#allocation2], %s891_s14  ;;  %s993_s18 = smov 4   ;;  %vm995_vm10 = vmmov 0   ;;  %vm605_vm11 = vcmask 15360   ;;  %vm609_vm12 = vcmask 31744   ;;  %vm612_vm13 = vcmask 48128  }
 0x103   : >> { %906 = vmatpush3.bf16.msra.mxu0 %v878_v38  ;;  %s994_s19 = smov 12   ;;  %v644_v2 = vsel %vm642_vm9, %v879_v50, 0  ;;  %909 = vmatprep.mubr.msk.bf16.mxu0 %vm995_vm10, %v991_v37  ;;  %s996_s20 = smov 2   ;;  %vm618_vm14 = vcmask 80896   ;;  %vm621_vm15 = vcmask 97280   ;;  %vm624_vm0 = vcmask 113664  }
 0x104   : >> { %907 = vmatprep.subr.bf16.mxu0 %v991_v37  ;;  %915 = vmatprep.mubr.msk.bf16.mxu1 %vm995_vm10, %v991_v37  ;;  %s997_s21 = smov 8   ;;  %s998_s22 = smov 10   ;;  %vm627_vm1 = vcmask 130048   ;;  %vm639_vm2 = vcmask 146432   ;;  %v710_v25 = vsel %vm642_vm9, %v1154_v34, 0  ;;  %vm755_vm3 = vcmask 60416  }
 0x105   : >> { %s999_s23 = smov 16   ;;  %s1000_s24 = smov 14   ;;  %914 = vmatpush3.bf16.msra.mxu1 %v710_v25 }
 0x106   : >> { %s883_s25 = sshll.u32 %s986_s16, 2  ;;  %s518_s16 = sadd.s32 1, %s986_s16  }
 0x107   : >> { %v863_v39 = vld [vmem:[%s521_s15 + $0x8] sm:$0xf]  ;;  %v864_v40 = vld [vmem:[%s521_s15 + $0xc] sm:$0x1]  ;;  %v523_v41 = vld [vmem:[%s521_s15 + $0x4] sm:$0x1]  ;;  %908 = vmatpush3.bf16.msra.mxu0 %v644_v2  ;;  %s703_s26 = scalar_lea.vmem %s1114_s29, %s883_s25  ;;  %s754_s27 = scalar_lea.vmem %s1119_s12, %s883_s25 }
 0x108   : >> { %v872_v42 = vcombine.low %v863_v39, %v863_v39  ;;  %v873_v43 = vcombine.low %v863_v39, %v864_v40  ;;  %v524_v44 = vld [vmem:[%s521_s15] sm:$0xe]  ;;  %v867_v46 = vld [vmem:[%s521_s15 + $0x10] sm:$0xf]  ;;  %v868_v49 = vld [vmem:[%s521_s15 + $0x14] sm:$0x1] }
 0x109   : >> { %v522_v45 = vld [vmem:[%s521_s15] sm:$0xf]  ;;  %v871_v47 = vcombine.low %v524_v44, %v523_v41  ;;  %v875_v53 = vcombine.low %v867_v46, %v867_v46  ;;  %v876_v54 = vcombine.low %v867_v46, %v868_v49  ;;  %v865_v55 = vld [vmem:[%s521_s15 + $0x8] sm:$0xe]  ;;  %v869_v59 = vld [vmem:[%s521_s15 + $0x10] sm:$0xe] }
 0x10a   : >> { %v870_v48 = vcombine.low %v522_v45, %v523_v41  ;;  %v568_v51 = vshrl.u32 %v873_v43, 16  ;;  %v570_v52 = vshll.u32 %v873_v43, 16  ;;  %562 = vrot.lane.b32.xlu1 %v872_v42, %s992_s17  ;;  %v874_v62 = vcombine.low %v865_v55, %v864_v40  ;;  %v704_v40 = vld [vmem:[%s703_s26] sm:$0xf]  ;;  %p515_p5 = scmp.ge.s32.totalorder %s518_s16, 8  }
 0x10b   : >> { %v556_v56 = vrot.slane %v871_v47, 1  ;;  %v593_v63 = vshll.u32 %v876_v54, 16  ;;  %v877_v1 = vcombine.low %v869_v59, %v868_v49  ;;  %v591_v5 = vshrl.u32 %v876_v54, 16 }
 0x10c   : >> { %v547_v57 = vshll.u32 %v870_v48, 16  ;;  %v545_v58 = vshrl.u32 %v870_v48, 16  ;;  %v572_v60 = vrot.slane %v570_v52, 1  ;;  %v579_v4 = vrot.slane %v874_v62, 1 }
 0x10d   : >> { %557 = vrot.lane.b32.xlu0 %v556_v56, %s993_s18  ;;  %v595_v6 = vrot.slane %v593_v63, 1  ;;  %v602_v7 = vrot.slane %v877_v1, 1  ;;  %v705_v41 = vunpack.c.l.bf16 %v704_v40 }
 0x10e   : >> { %v549_v61 = vrot.slane %v547_v57, 1  ;;  %585 = vrot.lane.b32.xlu1 %v875_v53, %s994_s19  ;;  %v573_v0 = vor.u32 %v572_v60, %v568_v51 }
 0x10f   : >> { %v596_v8 = vor.u32 %v595_v6, %v591_v5 }
 0x110   : >> { %v550_v3 = vor.u32 %v549_v61, %v545_v58 }
 0x112   : >> { %551 = vrot.lane.b32.xlu0 %v550_v3, %s996_s20  ;;  %574 = vrot.lane.b32.xlu1 %v573_v0, %s997_s21 }
 0x116   : >> { %580 = vrot.lane.b32.xlu0 %v579_v4, %s998_s22  ;;  %603 = vrot.lane.b32.xlu1 %v602_v7, %s999_s23 }
 0x11a   : >> { %597 = vrot.lane.b32.xlu0 %v596_v8, %s1000_s24 }
 0x17c   : >> { %v563_v9 = vpop.permute.xlu1 %562 }
 0x17f   : >> { %v558_v10 = vpop.permute.xlu0 %557 }
 0x180   : >> { %v586_v11 = vpop.permute.xlu1 %585 }
 0x184   : >> { %v552_v12 = vpop.permute.xlu0 %551  ;;  %v575_v14 = vpop.permute.xlu1 %574 }
 0x185   : >> { %v608_v13 = vsel %vm605_vm11, %v522_v45, %v552_v12 }
 0x186   : >> { %v611_v15 = vsel %vm609_vm12, %v608_v13, %v558_v10 }
 0x187   : >> { %v614_v16 = vsel %vm612_vm13, %v611_v15, %v563_v9 }
 0x188   : >> { %v617_v17 = vsel %vm414_vm4, %v614_v16, %v575_v14  ;;  %v581_v18 = vpop.permute.xlu0 %580  ;;  %v604_v20 = vpop.permute.xlu1 %603 }
 0x189   : >> { %v620_v19 = vsel %vm618_vm14, %v617_v17, %v581_v18 }
 0x18a   : >> { %v623_v21 = vsel %vm621_vm15, %v620_v19, %v586_v11 }
 0x18c   : >> { %v598_v22 = vpop.permute.xlu0 %597 }
 0x18d   : >> { %v626_v23 = vsel %vm624_vm0, %v623_v21, %v598_v22 }
 0x18e   : >> { %v629_v24 = vsel %vm627_vm1, %v626_v23, %v604_v20 }
 0x18f   : >> { %910 = vmatmul.mubr.msk.bf16.vlgmr.msra.gmra.mrb[0].mxu0 %vm639_vm2, %v629_v24 }
 0x262   : >> { %v680_v26 = vpop.f32.mrb[0].mxu0 }
 0x263   : >> { %v692_v27 = vmul.f32 %v1159_v35, %v680_v26  ;;  %v911_v28 = vpop.f32.mrb[1].mxu0 }
 0x264   : >> { %v683_v29 = vpop.f32.mrb[2].mxu0 }
 0x265   : >> { %v699_v30 = vadd.f32 %v1164_v36, %v692_v27  ;;  %v912_v37 = vpop.f32.mrb[3].mxu0 }
 0x267   : >> { %v700_v38 = vmax.f32 %v699_v30, 0.0 }
 0x269   : >> { %v701_v39 = vpack.c.bf16 %v700_v38, %v700_v38 }
 0x26b   : >> { %916 = vmatmul.mubr.msk.bf16.vlgmr.msra.gmra.mrb[0].mxu1 %vm605_vm11, %v701_v39 }
 0x33d   : > { %517 = sbr.rel (!%p515_p5) target bundleno = 257 (0x101), region = 122 }
 0x33e   : >> { %v746_v42 = vpop.f32.mrb[0].mxu1 }
 0x33f   : >> { %v747_v43 = vadd.f32 %v746_v42, %v705_v41  ;;  %v917_v44 = vpop.f32.mrb[1].mxu1 }
 0x340   : >> { %v749_v45 = vpop.f32.mrb[2].mxu1 }
 0x341   : >> { %v752_v46 = vpack.c.bf16 %v747_v43, %v747_v43  ;;  %v918_v47 = vpop.f32.mrb[3].mxu1 }
 0x343   : >> { %756 = vst.msk [vmem:[%s754_s27] sm:$0xf] %vm755_vm3, %v752_v46 }
 0x344 PF: > { %s20_s13 = sadd.s32 1, %s978_s13  }
 0x345   : > { %p17_p6 = scmp.ge.s32.totalorder %s20_s13, 4  }
 0x347   :  { %19 = sbr.rel (!%p17_p6) target bundleno = 1 (0x1), region = 133 }

// kernel: _lambda_.29
= control target key start
LH: loop header
LB: loop body
LE: loop exit
PB: predicated region body
PF: predicated region fallthrough
CT: control target
= control target key end

     0   :  { %s417_s6 = smov 0   ;;  %s462_s0 = inlined_call_operand.vmem [shape: bf16[2,8,4,16], index: 0, kind: input, shape index: {}]   ;;  %s463_s1 = inlined_call_operand.vmem [shape: bf16[2,4,4,8], index: 1, kind: output, shape index: {}]  }
   0x1 LB: > { %s334_s7 = sadd.s32 4294967295, %s403_s6   ;;  %p338_p0 = scmp.ge.s32.totalorder %s403_s6, 1  ;;  %s403_s6 = sphi %s417_s6, %s11_s6  }
   0x2   : > { %p87_p1 = scmp.lt.s32.totalorder %s403_s6, 3 }
   0x4   : > { %p88_p2 = pnand %p338_p0, %p87_p1 }
   0x5   : > { %p107_p3 = scmp.lt.s32.totalorder (!%p88_p2), %s334_s7, 1  ;;  %vm117_vm0 = vcmask (!%p88_p2), 126976   ;;  %v405_v0 = vmov (!%p88_p2), -inf   ;;  %vm145_vm1 = vcmask (!%p88_p2), 125952   ;;  %s406_s12 = smov (!%p88_p2), 120   ;;  %vm274_vm2 = vcmask (!%p88_p2), 58368  }
   0x6   : > { %91 = sbr.rel (%p88_p2) target bundleno = 170 (0xaa), region = 24  ;;  %122 = vst.msk [vmem:[#allocation2 + $0x20] sm:$0x1f] (!%p88_p2), %vm117_vm0, %v405_v0  ;;  %123 = vst.msk [vmem:[#allocation2 + $0x28] sm:$0x1f] (!%p88_p2), %vm117_vm0, %v405_v0 }
   0x7   : > { %118 = vst.msk [vmem:[#allocation2] sm:$0x1f] (!%p88_p2), %vm117_vm0, %v405_v0  ;;  %119 = vst.msk [vmem:[#allocation2 + $0x8] sm:$0x1f] (!%p88_p2), %vm117_vm0, %v405_v0 }
   0x8   : > { %120 = vst.msk [vmem:[#allocation2 + $0x10] sm:$0x1f] (!%p88_p2), %vm117_vm0, %v405_v0  ;;  %121 = vst.msk [vmem:[#allocation2 + $0x18] sm:$0x1f] (!%p88_p2), %vm117_vm0, %v405_v0 }
   0x9   : > { %124 = vst.msk [vmem:[#allocation2 + $0x30] sm:$0x1f] (!%p88_p2), %vm117_vm0, %v405_v0  ;;  %125 = vst.msk [vmem:[#allocation2 + $0x38] sm:$0x1f] (!%p88_p2), %vm117_vm0, %v405_v0 }
   0xa   : > { %126 = vst.msk [vmem:[#allocation2 + $0x40] sm:$0x1f] (!%p88_p2), %vm117_vm0, %v405_v0 }
   0xd   : > { %s465_s7 = smov (!%p107_p3, %s334_s7), 1 }
   0xe   : > { %s345_s8 = sshll.u32 %s465_s7, 4  ;;  %v154_v17 = vld [vmem:[#allocation2 + $0x1] sm:$0xf]  ;;  %s346_s13 = sshll.u32 %s465_s7, 3 }
   0xf   : > { %s111_s11 = scalar_lea.vmem %s462_s0, %s345_s8  ;;  %v208_v29 = vld [vmem:[#allocation2] sm:$0xf]  ;;  %s116_s16 = scalar_lea.vmem %s463_s1, %s346_s13 }
  0x10   : > { %v131_v1 = vld [vmem:[%s111_s11 + $0x6] sm:$0x3]  ;;  %v132_v2 = vld [vmem:[%s111_s11 + $0x8] sm:$0x3]  ;;  %v128_v3 = vld [vmem:[%s111_s11] sm:$0x3] }
  0x11   : > { %v139_v4 = vunpack.c.l.bf16 %v131_v1  ;;  %v140_v5 = vunpack.c.l.bf16 %v132_v2  ;;  %v136_v6 = vunpack.c.l.bf16 %v128_v3  ;;  %v133_v7 = vld [vmem:[%s111_s11 + $0xa] sm:$0x3]  ;;  %v134_v8 = vld [vmem:[%s111_s11 + $0xc] sm:$0x3]  ;;  %v129_v9 = vld [vmem:[%s111_s11 + $0x2] sm:$0x3] }
  0x12   : > { %v141_v10 = vunpack.c.l.bf16 %v133_v7  ;;  %v142_v11 = vunpack.c.l.bf16 %v134_v8  ;;  %v130_v12 = vld [vmem:[%s111_s11 + $0x4] sm:$0x3]  ;;  %v137_v13 = vunpack.c.l.bf16 %v129_v9  ;;  %v135_v14 = vld [vmem:[%s111_s11 + $0xe] sm:$0x3] }
  0x13   : > { %149 = vst.msk [vmem:[#allocation2 + $0x21] sm:$0xf] %vm145_vm1, %v139_v4  ;;  %150 = vst.msk [vmem:[#allocation2 + $0x29] sm:$0xf] %vm145_vm1, %v140_v5  ;;  %v138_v15 = vunpack.c.l.bf16 %v130_v12  ;;  %v143_v16 = vunpack.c.l.bf16 %v135_v14 }
  0x14   : > { %146 = vst.msk [vmem:[#allocation2 + $0x9] sm:$0xf] %vm145_vm1, %v136_v6  ;;  %151 = vst.msk [vmem:[#allocation2 + $0x31] sm:$0xf] %vm145_vm1, %v141_v10 }
  0x15   : > { %152 = vst.msk [vmem:[#allocation2 + $0x39] sm:$0xf] %vm145_vm1, %v142_v11  ;;  %147 = vst.msk [vmem:[#allocation2 + $0x11] sm:$0xf] %vm145_vm1, %v137_v13 }
  0x16   : > { %148 = vst.msk [vmem:[#allocation2 + $0x19] sm:$0xf] %vm145_vm1, %v138_v15  ;;  %153 = vst.msk [vmem:[#allocation2 + $0x41] sm:$0xf] %vm145_vm1, %v143_v16 }
  0x1a   : > { %v158_v18 = vld [vmem:[#allocation2 + $0x21] sm:$0xf]  ;;  %v159_v19 = vld [vmem:[#allocation2 + $0x29] sm:$0xf] }
  0x1b   : > { %v155_v20 = vld [vmem:[#allocation2 + $0x9] sm:$0xf]  ;;  %v367_v21 = vpack.i.bf16 %v159_v19, %v158_v18  ;;  %v439_v23 = vld [vmem:[#allocation2 + $0x31] sm:$0xf]  ;;  %v212_v38 = vld [vmem:[#allocation2 + $0x20] sm:$0xf] }
  0x1c   : > { %v357_v22 = vpack.i.bf16 %v155_v20, %v154_v17  ;;  %v441_v24 = vld [vmem:[#allocation2 + $0x39] sm:$0xf]  ;;  %v156_v25 = vld [vmem:[#allocation2 + $0x11] sm:$0xf]  ;;  %v209_v30 = vld [vmem:[#allocation2 + $0x8] sm:$0xf] }
  0x1d   : > { %v157_v26 = vld [vmem:[#allocation2 + $0x19] sm:$0xf]  ;;  %368 = vrot.lane.b32.xlu1 %v367_v21, %s406_s12  ;;  %v372_v27 = vpack.i.bf16 %v441_v24, %v439_v23  ;;  %v210_v31 = vld [vmem:[#allocation2 + $0x10] sm:$0xf]  ;;  %v445_v32 = vld [vmem:[#allocation2 + $0x41] sm:$0xf] }
  0x1e   : > { %358 = vrot.lane.b32.xlu0 %v357_v22, %s406_s12  ;;  %v362_v28 = vpack.i.bf16 %v157_v26, %v156_v25  ;;  %v382_v33 = vpack.i.bf16 %v210_v31, %v209_v30  ;;  %v377_v34 = vpack.i.bf16 %v208_v29, %v445_v32  ;;  %v213_v35 = vld [vmem:[#allocation2 + $0x28] sm:$0xf]  ;;  %v214_v36 = vld [vmem:[#allocation2 + $0x30] sm:$0xf]  ;;  %v211_v37 = vld [vmem:[#allocation2 + $0x18] sm:$0xf] }
  0x1f   : > { %v392_v39 = vpack.i.bf16 %v214_v36, %v213_v35  ;;  %v387_v40 = vpack.i.bf16 %v212_v38, %v211_v37  ;;  %v216_v41 = vld [vmem:[#allocation2 + $0x40] sm:$0xf]  ;;  %v215_v42 = vld [vmem:[#allocation2 + $0x38] sm:$0xf] }
  0x21   : > { %373 = vrot.lane.b32.xlu1 %v372_v27, %s406_s12 }
  0x22   : > { %363 = vrot.lane.b32.xlu0 %v362_v28, %s406_s12 }
  0x25   : > { %383 = vrot.lane.b32.xlu1 %v382_v33, %s406_s12 }
  0x26   : > { %378 = vrot.lane.b32.xlu0 %v377_v34, %s406_s12 }
  0x29   : > { %393 = vrot.lane.b32.xlu1 %v392_v39, %s406_s12 }
  0x2a   : > { %388 = vrot.lane.b32.xlu0 %v387_v40, %s406_s12 }
  0x2d   : > { %242 = vrot.lane.b32.xlu1 %v216_v41, %s406_s12 }
  0x2e   : > { %240 = vrot.lane.b32.xlu0 %v215_v42, %s406_s12 }
  0x8f   : > { %v369_v43 = vpop.permute.xlu1 %368 }
  0x90   : > { %v359_v44 = vpop.permute.xlu0 %358  ;;  %v371_v50 = vunpack.i.h.bf16 %v369_v43  ;;  %v370_v51 = vunpack.i.l.bf16 %v369_v43 }
  0x91   : > { %v361_v45 = vunpack.i.h.bf16 %v359_v44  ;;  %v360_v48 = vunpack.i.l.bf16 %v359_v44 }
  0x92   : > { %v204_v1 = vmax.f32 %v159_v19, %v371_v50  ;;  %v203_v2 = vmax.f32 %v158_v18, %v370_v51 }
  0x93   : > { %v374_v46 = vpop.permute.xlu1 %373  ;;  %v200_v52 = vmax.f32 %v155_v20, %v361_v45  ;;  %v199_v55 = vmax.f32 %v154_v17, %v360_v48 }
  0x94   : > { %v364_v47 = vpop.permute.xlu0 %363  ;;  %v375_v59 = vunpack.i.l.bf16 %v374_v46  ;;  %v376_v62 = vunpack.i.h.bf16 %v374_v46 }
  0x95   : > { %v365_v49 = vunpack.i.l.bf16 %v364_v47  ;;  %v366_v60 = vunpack.i.h.bf16 %v364_v47 }
  0x96   : > { %v205_v11 = vmax.f32 %v439_v23, %v375_v59  ;;  %v206_v17 = vmax.f32 %v441_v24, %v376_v62 }
  0x97   : > { %v384_v53 = vpop.permute.xlu1 %383  ;;  %v201_v61 = vmax.f32 %v156_v25, %v365_v49  ;;  %v202_v12 = vmax.f32 %v157_v26, %v366_v60 }
  0x98   : > { %v379_v54 = vpop.permute.xlu0 %378  ;;  %v386_v56 = vunpack.i.h.bf16 %v384_v53  ;;  %v385_v57 = vunpack.i.l.bf16 %v384_v53 }
  0x99   : > { %v381_v58 = vunpack.i.h.bf16 %v379_v54  ;;  %v380_v4 = vunpack.i.l.bf16 %v379_v54 }
  0x9a   : > { %v254_v63 = vmax.f32 %v200_v52, %v385_v57  ;;  %v255_v3 = vmax.f32 %v201_v61, %v386_v56 }
  0x9b   : > { %v253_v0 = vmax.f32 %v199_v55, %v381_v58  ;;  %v394_v5 = vpop.permute.xlu1 %393  ;;  %v207_v20 = vmax.f32 %v445_v32, %v380_v4 }
  0x9c   : > { %v389_v6 = vpop.permute.xlu0 %388  ;;  %v396_v8 = vunpack.i.h.bf16 %v394_v5  ;;  %v395_v9 = vunpack.i.l.bf16 %v394_v5 }
  0x9d   : > { %v262_v7 = vmax.f32 %v253_v0, %v254_v63  ;;  %v391_v10 = vunpack.i.h.bf16 %v389_v6  ;;  %v390_v13 = vunpack.i.l.bf16 %v389_v6 }
  0x9e   : > { %v258_v15 = vmax.f32 %v204_v1, %v395_v9  ;;  %v259_v25 = vmax.f32 %v205_v11, %v396_v8 }
  0x9f   : > { %v266_v14 = vmax.f32 %v262_v7, %v255_v3  ;;  %v257_v16 = vmax.f32 %v203_v2, %v391_v10  ;;  %v256_v18 = vmax.f32 %v202_v12, %v390_v13  ;;  %v243_v19 = vpop.permute.xlu1 %242 }
  0xa0   : > { %v241_v21 = vpop.permute.xlu0 %240  ;;  %v261_v29 = vmax.f32 %v207_v20, %v243_v19 }
  0xa1   : > { %v270_v22 = vpack.c.bf16 %v266_v14, %v266_v14  ;;  %v264_v23 = vmax.f32 %v257_v16, %v258_v15  ;;  %v260_v26 = vmax.f32 %v206_v17, %v241_v21  ;;  %v263_v27 = vmax.f32 %v255_v3, %v256_v18 }
  0xa3   : > { %275 = vst.msk [vmem:[%s116_s16] sm:$0x3] %vm274_vm2, %v270_v22  ;;  %v268_v28 = vmax.f32 %v264_v23, %v259_v25  ;;  %v265_v24 = vmax.f32 %v259_v25, %v260_v26  ;;  %v267_v30 = vmax.f32 %v263_v27, %v257_v16 }
  0xa5   : > { %v272_v31 = vpack.c.bf16 %v268_v28, %v268_v28  ;;  %v269_v33 = vmax.f32 %v265_v24, %v261_v29  ;;  %v271_v34 = vpack.c.bf16 %v267_v30, %v267_v30 }
  0xa7   : > { %277 = vst.msk [vmem:[%s116_s16 + $0x4] sm:$0x3] %vm274_vm2, %v272_v31  ;;  %v273_v35 = vpack.c.bf16 %v269_v33, %v269_v33  ;;  %276 = vst.msk [vmem:[%s116_s16 + $0x2] sm:$0x3] %vm274_vm2, %v271_v34 }
  0xa9   : > { %278 = vst.msk [vmem:[%s116_s16 + $0x6] sm:$0x3] %vm274_vm2, %v273_v35 }
  0xaa PF: > { %s11_s6 = sadd.s32 1, %s403_s6  }
  0xab   : > { %p8_p4 = scmp.ge.s32.totalorder %s11_s6, 4  }
  0xad   :  { %10 = sbr.rel (!%p8_p4) target bundleno = 1 (0x1), region = 55 }

// kernel: _lambda_.32
= control target key start
LH: loop header
LB: loop body
LE: loop exit
PB: predicated region body
PF: predicated region fallthrough
CT: control target
= control target key end

     0   :  { %s314_s6 = smov 0   ;;  %s335_s0 = inlined_call_operand.vmem [shape: bf16[2,4,2,16], index: 0, kind: input, shape index: {}]   ;;  %s336_s1 = inlined_call_operand.vmem [shape: bf16[2,2,2,8], index: 1, kind: output, shape index: {}]  }
   0x1 LB: > { %s255_s7 = sadd.s32 4294967295, %s300_s6   ;;  %p259_p0 = scmp.ge.s32.totalorder %s300_s6, 1  ;;  %s300_s6 = sphi %s314_s6, %s11_s6  }
   0x2   : > { %p86_p1 = scmp.lt.s32.totalorder %s300_s6, 3 }
   0x4   : > { %p87_p2 = pnand %p259_p0, %p86_p1 }
   0x5   : > { %p104_p3 = scmp.lt.s32.totalorder (!%p87_p2), %s255_s7, 1  ;;  %vm112_vm0 = vcmask (!%p87_p2), 124928   ;;  %v302_v0 = vmov (!%p87_p2), -inf   ;;  %vm128_vm1 = vcmask (!%p87_p2), 123904   ;;  %s303_s12 = smov (!%p87_p2), 120   ;;  %vm199_vm2 = vcmask (!%p87_p2), 57344  }
   0x6   : > { %90 = sbr.rel (%p87_p2) target bundleno = 161 (0xa1), region = 24  ;;  %113 = vst.msk [vmem:[#allocation2] sm:$0x7] (!%p87_p2), %vm112_vm0, %v302_v0  ;;  %117 = vst.msk [vmem:[#allocation2 + $0x10] sm:$0x7] (!%p87_p2), %vm112_vm0, %v302_v0 }
   0x7   : > { %114 = vst.msk [vmem:[#allocation2 + $0x4] sm:$0x7] (!%p87_p2), %vm112_vm0, %v302_v0  ;;  %115 = vst.msk [vmem:[#allocation2 + $0x8] sm:$0x7] (!%p87_p2), %vm112_vm0, %v302_v0 }
   0x8   : > { %116 = vst.msk [vmem:[#allocation2 + $0xc] sm:$0x7] (!%p87_p2), %vm112_vm0, %v302_v0 }
   0xd   : > { %s338_s7 = smov (!%p104_p3, %s255_s7), 1  ;;  %v163_v9 = vld [vmem:[#allocation2] sm:$0x3] }
   0xe   : > { %s260_s8 = sshll.u32 %s338_s7, 2  ;;  %v133_v10 = vld [vmem:[#allocation2 + $0x1] sm:$0x3]  ;;  %s261_s13 = sshll.u32 %s338_s7, 1 }
   0xf   : > { %s107_s11 = scalar_lea.vmem %s335_s0, %s260_s8  ;;  %s111_s16 = scalar_lea.vmem %s336_s1, %s261_s13 }
  0x10   : > { %v122_v1 = vld [vmem:[%s107_s11 + $0x3] sm:$0x1]  ;;  %v119_v2 = vld [vmem:[%s107_s11] sm:$0x1]  ;;  %v120_v3 = vld [vmem:[%s107_s11 + $0x1] sm:$0x1] }
  0x11   : > { %v126_v4 = vunpack.c.l.bf16 %v122_v1  ;;  %v123_v5 = vunpack.c.l.bf16 %v119_v2  ;;  %v124_v6 = vunpack.c.l.bf16 %v120_v3  ;;  %v121_v7 = vld [vmem:[%s107_s11 + $0x2] sm:$0x1] }
  0x12   : > { %v125_v8 = vunpack.c.l.bf16 %v121_v7 }
  0x13   : > { %132 = vst.msk [vmem:[#allocation2 + $0x11] sm:$0x3] %vm128_vm1, %v126_v4  ;;  %129 = vst.msk [vmem:[#allocation2 + $0x5] sm:$0x3] %vm128_vm1, %v123_v5 }
  0x14   : > { %130 = vst.msk [vmem:[#allocation2 + $0x9] sm:$0x3] %vm128_vm1, %v124_v6  ;;  %131 = vst.msk [vmem:[#allocation2 + $0xd] sm:$0x3] %vm128_vm1, %v125_v8 }
  0x1a   : > { %v137_v11 = vld [vmem:[#allocation2 + $0x11] sm:$0x3]  ;;  %v134_v12 = vld [vmem:[#allocation2 + $0x5] sm:$0x3] }
  0x1b   : > { %v164_v13 = vld [vmem:[#allocation2 + $0x4] sm:$0x3]  ;;  %v284_v14 = vpack.i.bf16 %v163_v9, %v137_v11  ;;  %v274_v15 = vpack.i.bf16 %v134_v12, %v133_v10  ;;  %v165_v16 = vld [vmem:[#allocation2 + $0x8] sm:$0x3]  ;;  %v136_v18 = vld [vmem:[#allocation2 + $0xd] sm:$0x3] }
  0x1c   : > { %v135_v17 = vld [vmem:[#allocation2 + $0x9] sm:$0x3]  ;;  %v289_v19 = vpack.i.bf16 %v165_v16, %v164_v13  ;;  %v167_v21 = vld [vmem:[#allocation2 + $0x10] sm:$0x3]  ;;  %v166_v22 = vld [vmem:[#allocation2 + $0xc] sm:$0x3] }
  0x1d   : > { %285 = vrot.lane.b32.xlu1 %v284_v14, %s303_s12  ;;  %275 = vrot.lane.b32.xlu0 %v274_v15, %s303_s12  ;;  %v279_v20 = vpack.i.bf16 %v136_v18, %v135_v17 }
  0x21   : > { %290 = vrot.lane.b32.xlu1 %v289_v19, %s303_s12  ;;  %280 = vrot.lane.b32.xlu0 %v279_v20, %s303_s12 }
  0x25   : > { %181 = vrot.lane.b32.xlu1 %v167_v21, %s303_s12  ;;  %179 = vrot.lane.b32.xlu0 %v166_v22, %s303_s12 }
  0x8f   : > { %v286_v23 = vpop.permute.xlu1 %285  ;;  %v276_v24 = vpop.permute.xlu0 %275 }
  0x90   : > { %v278_v25 = vunpack.i.h.bf16 %v276_v24  ;;  %v277_v26 = vunpack.i.l.bf16 %v276_v24  ;;  %v288_v27 = vunpack.i.h.bf16 %v286_v23  ;;  %v287_v34 = vunpack.i.l.bf16 %v286_v23 }
  0x92   : > { %v158_v28 = vmax.f32 %v133_v10, %v277_v26  ;;  %v159_v31 = vmax.f32 %v134_v12, %v278_v25  ;;  %v162_v45 = vmax.f32 %v137_v11, %v287_v34 }
  0x93   : > { %v291_v29 = vpop.permute.xlu1 %290  ;;  %v281_v30 = vpop.permute.xlu0 %280 }
  0x94   : > { %v292_v32 = vunpack.i.l.bf16 %v291_v29  ;;  %v283_v33 = vunpack.i.h.bf16 %v281_v30  ;;  %v293_v35 = vunpack.i.h.bf16 %v291_v29  ;;  %v282_v36 = vunpack.i.l.bf16 %v281_v30 }
  0x95   : > { %v188_v37 = vmax.f32 %v158_v28, %v288_v27 }
  0x96   : > { %v189_v38 = vmax.f32 %v159_v31, %v292_v32  ;;  %v161_v39 = vmax.f32 %v136_v18, %v283_v33  ;;  %v160_v40 = vmax.f32 %v135_v17, %v282_v36 }
  0x97   : > { %v180_v41 = vpop.permute.xlu0 %179  ;;  %v182_v43 = vpop.permute.xlu1 %181 }
  0x98   : > { %v193_v42 = vmax.f32 %v188_v37, %v189_v38  ;;  %v191_v44 = vmax.f32 %v161_v39, %v180_v41  ;;  %v190_v46 = vmax.f32 %v160_v40, %v293_v35  ;;  %v192_v47 = vmax.f32 %v162_v45, %v182_v43 }
  0x9a   : > { %v194_v48 = vmax.f32 %v190_v46, %v191_v44  ;;  %v195_v49 = vmax.f32 %v193_v42, %v190_v46 }
  0x9c   : > { %v196_v50 = vmax.f32 %v194_v48, %v192_v47  ;;  %v197_v51 = vpack.c.bf16 %v195_v49, %v195_v49 }
  0x9e   : > { %v198_v52 = vpack.c.bf16 %v196_v50, %v196_v50  ;;  %200 = vst.msk [vmem:[%s111_s16] sm:$0x1] %vm199_vm2, %v197_v51 }
  0xa0   : > { %201 = vst.msk [vmem:[%s111_s16 + $0x1] sm:$0x1] %vm199_vm2, %v198_v52 }
  0xa1 PF: > { %s11_s6 = sadd.s32 1, %s300_s6  }
  0xa2   : > { %p8_p4 = scmp.ge.s32.totalorder %s11_s6, 4  }
  0xa4   :  { %10 = sbr.rel (!%p8_p4) target bundleno = 1 (0x1), region = 55 }

// kernel: _lambda_.30
= control target key start
LH: loop header
LB: loop body
LE: loop exit
PB: predicated region body
PF: predicated region fallthrough
CT: control target
= control target key end

     0   :  { %s1023_s13 = smov 0   ;;  %s1143_s0 = inlined_call_operand.vmem [shape: bf16[2,4,4,8], index: 0, kind: input, shape index: {}]   ;;  %s1144_s1 = inlined_call_operand.vmem [shape: f32[1,8], index: 1, kind: input, shape index: {}]   ;;  %s1145_s2 = inlined_call_operand.vmem [shape: f32[1,8], index: 2, kind: input, shape index: {}]   ;;  %s1146_s3 = inlined_call_operand.vmem [shape: bf16[8,2], index: 3, kind: input, shape index: {}]   ;;  %s1147_s4 = inlined_call_operand.vmem [shape: f32[1,2], index: 4, kind: input, shape index: {}]   ;;  %s1148_s5 = inlined_call_operand.vmem [shape: f32[1,2], index: 5, kind: input, shape index: {}]   ;;  %s1149_s6 = inlined_call_operand.vmem [shape: bf16[18,2], index: 6, kind: input, shape index: {}]   ;;  %s1150_s7 = inlined_call_operand.vmem [shape: f32[1,2], index: 7, kind: input, shape index: {}]   ;;  %s1151_s8 = inlined_call_operand.vmem [shape: f32[1,2], index: 8, kind: input, shape index: {}]   ;;  %s1152_s9 = inlined_call_operand.vmem [shape: bf16[2,8], index: 9, kind: input, shape index: {}]   ;;  %s1153_s10 = inlined_call_operand.vmem [shape: bf16[2,4,4,8], index: 10, kind: output, shape index: {}]  }
   0x1 LB: > { %s810_s14 = sadd.s32 4294967295, %s945_s13   ;;  %p814_p0 = scmp.ge.s32.totalorder %s945_s13, 1  ;;  %s945_s13 = sphi %s1023_s13, %s20_s13  }
   0x2   : > { %p312_p1 = scmp.lt.s32.totalorder %s945_s13, 3 }
   0x4   : > { %p313_p2 = pnand %p814_p0, %p312_p1 }
   0x5   : > { %p350_p3 = scmp.lt.s32.totalorder (!%p313_p2), %s810_s14, 1  ;;  %vm361_vm0 = vcmask (!%p313_p2), 10240   ;;  %v820_v0 = vld [vmem:[%s1144_s1] ss:$0 sm:$0xff] (!%p313_p2)  ;;  %v955_v1 = vmov (!%p313_p2), 0   ;;  %s1062_s12 = smov (!%p313_p2), 0  }
   0x6   : > { %316 = sbr.rel (%p313_p2) target bundleno = 834 (0x342), region = 60  ;;  %362 = vst.msk [vmem:[#allocation2] sm:$0x7] (!%p313_p2), %vm361_vm0, %v955_v1  ;;  %363 = vst.msk [vmem:[#allocation2 + $0x4] sm:$0x7] (!%p313_p2), %vm361_vm0, %v955_v1 }
   0x7   : > { %364 = vst.msk [vmem:[#allocation2 + $0x8] sm:$0x7] (!%p313_p2), %vm361_vm0, %v955_v1  ;;  %365 = vst.msk [vmem:[#allocation2 + $0xc] sm:$0x7] (!%p313_p2), %vm361_vm0, %v955_v1  ;;  %v821_v2 = vld [vmem:[%s1145_s2] ss:$0 sm:$0xff] (!%p313_p2) }
   0x8   : > { %366 = vst.msk [vmem:[#allocation2 + $0x10] sm:$0x7] (!%p313_p2), %vm361_vm0, %v955_v1  ;;  %367 = vst.msk [vmem:[#allocation2 + $0x14] sm:$0x7] (!%p313_p2), %vm361_vm0, %v955_v1  ;;  %v823_v3 = vld [vmem:[%s1147_s4] ss:$0 sm:$0xff] (!%p313_p2) }
   0x9   : > { %v824_v4 = vld [vmem:[%s1148_s5] ss:$0 sm:$0xff] (!%p313_p2) }
   0xa   : > { %v372_v5 = vld [vmem:[%s1146_s3] sm:$0xf] (!%p313_p2) }
   0xd   : > { %s1155_s14 = smov (!%p350_p3, %s810_s14), 1 }
   0xe   : > { %s856_s25 = sshll.u32 %s1155_s14, 3 }
   0xf   : > { %s1055_s28 = scalar_lea.vmem %s1143_s0, %s856_s25  ;;  %s1060_s11 = scalar_lea.vmem %s1153_s10, %s856_s25 }
  0x10 LB: >> { %vm403_vm1 = vcmask 1043456   ;;  %v956_v6 = vmov 0.0   ;;  %vm957_vm2 = vmmov 0   ;;  %s819_s14 = sshll.u32 %s949_s12, 1  ;;  %vm399_vm3 = vcmask 64512   ;;  %s826_s16 = sshll.u32 %s949_s12, 2  ;;  %s949_s12 = sphi %s1062_s12, %s378_s12  }
  0x11   : >> { %866 = vmatprep.subr.bf16.mxu0 %v956_v6  ;;  %v405_v7 = vsel %vm403_vm1, %v372_v5, 0  ;;  %868 = vmatprep.mubr.msk.bf16.mxu0 %vm957_vm2, %v956_v6  ;;  %s380_s15 = scalar_lea.vmem %s1055_s28, %s819_s14  ;;  %vm478_vm4 = vsmask.f32 2306  ;;  %s762_s17 = scalar_lea.vmem [#allocation2], %s826_s16 }
  0x12   : >> { %867 = vmatpush3.bf16.msra.mxu0 %v405_v7  ;;  %v381_v8 = vld [vmem:[%s380_s15] sm:$0x3]  ;;  %vm479_vm5 = vmand %vm361_vm0, %vm478_vm4  ;;  %v827_v25 = vld [vmem:[%s762_s17 + $0x4] sm:$0x7]  ;;  %s378_s12 = sadd.s32 1, %s949_s12  }
  0x13   : >> { %v382_v9 = vunpack.c.l.bf16 %v381_v8  ;;  %p375_p4 = scmp.ge.s32.totalorder %s378_s12, 4  }
  0x14   : > { %v1078_v28 = vld [vmem:[%s1149_s6] sm:$0xf] (%p375_p4)  ;;  %v1083_v29 = vld [vmem:[%s1149_s6 + $0x4] sm:$0xf] (%p375_p4)  ;;  %v1088_v30 = vld [vmem:[%s1149_s6 + $0x8] sm:$0x1] (%p375_p4) }
  0x15   : >> { %v389_v10 = vmul.f32 %v820_v0, %v382_v9  ;;  %v1093_v31 = vld [vmem:[%s1152_s9] sm:$0x1] (%p375_p4)  ;;  %s1105_s12 = smov (%p375_p4), 0  }
  0x16   : > { %v1098_v32 = vld [vmem:[%s1150_s7] ss:$0 sm:$0xff] (%p375_p4) }
  0x17   : >> { %v396_v11 = vadd.f32 %v821_v2, %v389_v10  ;;  %v1103_v33 = vld [vmem:[%s1151_s8] ss:$0 sm:$0xff] (%p375_p4) }
  0x19   : >> { %v397_v12 = vmax.f32 %v396_v11, 0.0 }
  0x1b   : >> { %v398_v13 = vpack.c.bf16 %v397_v12, %v397_v12 }
  0x1d   : >> { %869 = vmatmul.mubr.msk.bf16.vlgmr.msra.gmra.mrb[0].mxu0 %vm399_vm3, %v398_v13 }
  0xf0   : >> { %v441_v14 = vpop.f32.mrb[0].mxu0 }
  0xf1   : >> { %v453_v15 = vmul.f32 %v823_v3, %v441_v14  ;;  %v870_v16 = vpop.f32.mrb[1].mxu0 }
  0xf2   : >> { %v444_v17 = vpop.f32.mrb[2].mxu0 }
  0xf3   : >> { %v460_v18 = vadd.f32 %v824_v4, %v453_v15  ;;  %v871_v19 = vpop.f32.mrb[3].mxu0 }
  0xf5   : >> { %v461_v20 = vmax.f32 %v460_v18, 0.0 }
  0xf7   : >> { %v858_v21 = vpack.c.bf16 %v461_v20, %v461_v20 }
  0xf9   : >> { %v468_v22 = vshrl.u32 %v858_v21, 16  ;;  %v471_v24 = vshll.u32 %v858_v21, 16 }
  0xfa   : > { %377 = sbr.rel (!%p375_p4) target bundleno = 16 (0x10), region = 111 }
  0xfb   : >> { %v470_v23 = vrot.slane %v468_v22, 7 }
  0xfd   : >> { %v473_v26 = vor.u32 %v471_v24, %v470_v23 }
  0xff   : >> { %v481_v27 = vsel %vm479_vm5, %v473_v26, %v827_v25 }
 0x100   : >> { %828 = vst [vmem:[%s762_s17 + $0x4] sm:$0x7] %v481_v27 }
 0x101 LB: >> { %s829_s14 = sshll.u32 %s953_s12, 2  ;;  %v958_v34 = vmov 0.0   ;;  %v846_v35 = vcombine.low %v1078_v28, %v1083_v29  ;;  %s959_s16 = smov 6   ;;  %v847_v44 = vcombine.low %v1088_v30, %v1088_v30  ;;  %vm613_vm6 = vcmask 1040384   ;;  %s953_s12 = sphi %s1105_s12, %s494_s12  }
 0x102   : >> { %872 = vmatprep.subr.bf16.mxu0 %v958_v34  ;;  %880 = vmatprep.subr.bf16.mxu1 %v958_v34  ;;  %s1113_s15 = scalar_lea.vmem [#allocation2], %s829_s14  ;;  %s960_s17 = smov 4   ;;  %vm964_vm7 = vmmov 0   ;;  %vm576_vm8 = vcmask 15360   ;;  %vm580_vm9 = vcmask 31744   ;;  %vm583_vm10 = vcmask 48128  }
 0x103   : >> { %873 = vmatpush3.bf16.msra.mxu0 %v846_v35  ;;  %s961_s18 = smov 12   ;;  %v615_v54 = vsel %vm613_vm6, %v847_v44, 0  ;;  %s962_s19 = smov 2   ;;  %876 = vmatprep.mubr.msk.bf16.mxu0 %vm964_vm7, %v958_v34  ;;  %vm589_vm11 = vcmask 80896   ;;  %vm592_vm12 = vcmask 97280   ;;  %vm595_vm13 = vcmask 113664  }
 0x104   : >> { %874 = vmatprep.subr.bf16.mxu0 %v958_v34  ;;  %s963_s20 = smov 8   ;;  %882 = vmatprep.mubr.msk.bf16.mxu1 %vm964_vm7, %v958_v34  ;;  %s965_s21 = smov 10   ;;  %vm598_vm14 = vcmask 130048   ;;  %vm610_vm15 = vcmask 146432   ;;  %v681_v14 = vsel %vm613_vm6, %v1093_v31, 0  ;;  %vm726_vm0 = vcmask 58368  }
 0x105   : >> { %s966_s22 = smov 16   ;;  %s967_s23 = smov 14   ;;  %881 = vmatpush3.bf16.msra.mxu1 %v681_v14 }
 0x106   : >> { %s851_s24 = sshll.u32 %s953_s12, 1  ;;  %s494_s12 = sadd.s32 1, %s953_s12  }
 0x107   : >> { %v923_v36 = vld [vmem:[%s1113_s15 + $0x4] ss:$0 sps:$4 sm:$0x33]   ;;  %v924_v37 = vld [vmem:[%s1113_s15] ss:$0 sps:$4 sm:$0x66]   ;;  %875 = vmatpush3.bf16.msra.mxu0 %v615_v54  ;;  %s674_s25 = scalar_lea.vmem %s1055_s28, %s851_s24  ;;  %s725_s26 = scalar_lea.vmem %s1060_s11, %s851_s24 }
 0x108   : >> { %533 = vrot.lane.b32.xlu1 %v923_v36, %s959_s16  ;;  %v925_v38 = vld [vmem:[%s1113_s15 + $0x8] ss:$0 sps:$4 sm:$0x33]   ;;  %v527_v39 = vrot.slane %v924_v37, 1  ;;  %v497_v0 = vld [vmem:[%s1113_s15] sm:$0x3] }
 0x109   : >> { %v926_v40 = vld [vmem:[%s1113_s15] ss:$0 sps:$4 sm:$0x77]   ;;  %v927_v41 = vld [vmem:[%s1113_s15 + $0x4] ss:$0 sps:$4 sm:$0x77]  }
 0x10a   : >> { %528 = vrot.lane.b32.xlu0 %v527_v39, %s960_s17  ;;  %v516_v42 = vshrl.u32 %v926_v40, 16  ;;  %v518_v43 = vshll.u32 %v926_v40, 16  ;;  %v539_v45 = vshrl.u32 %v927_v41, 16  ;;  %v541_v46 = vshll.u32 %v927_v41, 16  ;;  %v675_v23 = vld [vmem:[%s674_s25] sm:$0x3] }
 0x10b   : >> { %v928_v47 = vld [vmem:[%s1113_s15 + $0x4] ss:$0 sps:$4 sm:$0x66]   ;;  %v929_v49 = vld [vmem:[%s1113_s15 + $0x8] ss:$0 sps:$4 sm:$0x77]   ;;  %v676_v24 = vunpack.c.l.bf16 %v675_v23 }
 0x10c   : >> { %556 = vrot.lane.b32.xlu1 %v925_v38, %s961_s18  ;;  %v520_v48 = vrot.slane %v518_v43, 1  ;;  %v543_v50 = vrot.slane %v541_v46, 1  ;;  %v930_v51 = vld [vmem:[%s1113_s15 + $0x8] ss:$0 sps:$4 sm:$0x66]   ;;  %v564_v53 = vshll.u32 %v929_v49, 16 }
 0x10d   : >> { %v550_v56 = vrot.slane %v928_v47, 1  ;;  %v562_v57 = vshrl.u32 %v929_v49, 16  ;;  %v573_v59 = vrot.slane %v930_v51, 1  ;;  %p491_p5 = scmp.ge.s32.totalorder %s494_s12, 4  }
 0x10e   : >> { %v521_v52 = vor.u32 %v520_v48, %v516_v42  ;;  %v544_v55 = vor.u32 %v543_v50, %v539_v45  ;;  %v566_v58 = vrot.slane %v564_v53, 1 }
 0x110   : >> { %522 = vrot.lane.b32.xlu0 %v521_v52, %s962_s19  ;;  %545 = vrot.lane.b32.xlu1 %v544_v55, %s963_s20  ;;  %v567_v60 = vor.u32 %v566_v58, %v562_v57 }
 0x114   : >> { %551 = vrot.lane.b32.xlu0 %v550_v56, %s965_s21  ;;  %574 = vrot.lane.b32.xlu1 %v573_v59, %s966_s22 }
 0x118   : >> { %568 = vrot.lane.b32.xlu0 %v567_v60, %s967_s23 }
 0x17a   : >> { %v534_v61 = vpop.permute.xlu1 %533 }
 0x17c   : >> { %v529_v62 = vpop.permute.xlu0 %528 }
 0x17e   : >> { %v557_v63 = vpop.permute.xlu1 %556 }
 0x182   : >> { %v523_v1 = vpop.permute.xlu0 %522  ;;  %v546_v3 = vpop.permute.xlu1 %545 }
 0x183   : >> { %v579_v2 = vsel %vm576_vm8, %v497_v0, %v523_v1 }
 0x184   : >> { %v582_v4 = vsel %vm580_vm9, %v579_v2, %v529_v62 }
 0x185   : >> { %v585_v5 = vsel %vm583_vm10, %v582_v4, %v534_v61 }
 0x186   : >> { %v588_v6 = vsel %vm399_vm3, %v585_v5, %v546_v3  ;;  %v552_v7 = vpop.permute.xlu0 %551  ;;  %v575_v9 = vpop.permute.xlu1 %574 }
 0x187   : >> { %v591_v8 = vsel %vm589_vm11, %v588_v6, %v552_v7 }
 0x188   : >> { %v594_v11 = vsel %vm592_vm12, %v591_v8, %v557_v63 }
 0x18a   : >> { %v569_v10 = vpop.permute.xlu0 %568 }
 0x18b   : >> { %v597_v12 = vsel %vm595_vm13, %v594_v11, %v569_v10 }
 0x18c   : >> { %v600_v13 = vsel %vm598_vm14, %v597_v12, %v575_v9 }
 0x18d   : >> { %877 = vmatmul.mubr.msk.bf16.vlgmr.msra.gmra.mrb[0].mxu0 %vm610_vm15, %v600_v13 }
 0x260   : >> { %v651_v15 = vpop.f32.mrb[0].mxu0 }
 0x261   : >> { %v663_v16 = vmul.f32 %v1098_v32, %v651_v15  ;;  %v878_v17 = vpop.f32.mrb[1].mxu0 }
 0x262   : >> { %v654_v18 = vpop.f32.mrb[2].mxu0 }
 0x263   : >> { %v670_v19 = vadd.f32 %v1103_v33, %v663_v16  ;;  %v879_v20 = vpop.f32.mrb[3].mxu0 }
 0x265   : >> { %v671_v21 = vmax.f32 %v670_v19, 0.0 }
 0x267   : >> { %v672_v22 = vpack.c.bf16 %v671_v21, %v671_v21 }
 0x269   : >> { %883 = vmatmul.mubr.msk.bf16.vlgmr.msra.gmra.mrb[0].mxu1 %vm576_vm8, %v672_v22 }
 0x33b   : > { %493 = sbr.rel (!%p491_p5) target bundleno = 257 (0x101), region = 122 }
 0x33c   : >> { %v717_v25 = vpop.f32.mrb[0].mxu1 }
 0x33d   : >> { %v718_v26 = vadd.f32 %v717_v25, %v676_v24  ;;  %v884_v27 = vpop.f32.mrb[1].mxu1 }
 0x33e   : >> { %v720_v34 = vpop.f32.mrb[2].mxu1 }
 0x33f   : >> { %v723_v35 = vpack.c.bf16 %v718_v26, %v718_v26  ;;  %v885_v36 = vpop.f32.mrb[3].mxu1 }
 0x341   : >> { %727 = vst.msk [vmem:[%s725_s26] sm:$0x3] %vm726_vm0, %v723_v35 }
 0x342 PF: > { %s20_s13 = sadd.s32 1, %s945_s13  }
 0x343   : > { %p17_p6 = scmp.ge.s32.totalorder %s20_s13, 4  }
 0x345   :  { %19 = sbr.rel (!%p17_p6) target bundleno = 1 (0x1), region = 133 }

// kernel: _lambda_.35
= control target key start
LH: loop header
LB: loop body
LE: loop exit
PB: predicated region body
PF: predicated region fallthrough
CT: control target
= control target key end

     0   :  { %s263_s6 = smov 0   ;;  %s284_s0 = inlined_call_operand.vmem [shape: bf16[2,2,1,16], index: 0, kind: input, shape index: {}]   ;;  %s285_s1 = inlined_call_operand.vmem [shape: bf16[2,1,1,8], index: 1, kind: output, shape index: {}]  }
   0x1 LB: > { %s215_s7 = sadd.s32 4294967295, %s249_s6   ;;  %p219_p0 = scmp.ge.s32.totalorder %s249_s6, 1  ;;  %s249_s6 = sphi %s263_s6, %s11_s6  }
   0x2   : > { %p86_p1 = scmp.lt.s32.totalorder %s249_s6, 3 }
   0x4   : > { %p87_p2 = pnand %p219_p0, %p86_p1 }
   0x5   : > { %p103_p3 = scmp.lt.s32.totalorder (!%p87_p2), %s215_s7, 1  ;;  %vm110_vm0 = vcmask (!%p87_p2), 123904   ;;  %v251_v0 = vmov (!%p87_p2), -inf   ;;  %vm120_vm1 = vcmask (!%p87_p2), 122880   ;;  %s252_s12 = smov (!%p87_p2), 120   ;;  %vm162_vm2 = vcmask (!%p87_p2), 57344  }
   0x6   : > { %90 = sbr.rel (%p87_p2) target bundleno = 160 (0xa0), region = 24  ;;  %111 = vst.msk [vmem:[#allocation2] sm:$0x3] (!%p87_p2), %vm110_vm0, %v251_v0  ;;  %112 = vst.msk [vmem:[#allocation2 + $0x2] sm:$0x3] (!%p87_p2), %vm110_vm0, %v251_v0 }
   0x7   : > { %113 = vst.msk [vmem:[#allocation2 + $0x4] sm:$0x3] (!%p87_p2), %vm110_vm0, %v251_v0  ;;  %vm163_vm3 = vsmask.f32 (!%p87_p2), 256 }
   0x8   : > { %vm164_vm4 = vmand (!%p87_p2), %vm162_vm2, %vm163_vm3 }
   0xd   : > { %s287_s7 = smov (!%p103_p3, %s215_s7), 1  ;;  %v142_v5 = vld [vmem:[#allocation2 + $0x2] sm:$0x1]  ;;  %v123_v7 = vld [vmem:[#allocation2 + $0x1] sm:$0x1] }
   0xe   : > { %s220_s8 = sshll.u32 %s287_s7, 1  ;;  %149 = vrot.lane.b32.xlu1 %v142_v5, %s252_s12  ;;  %v143_v6 = vld [vmem:[#allocation2 + $0x4] sm:$0x1]  ;;  %v141_v10 = vld [vmem:[#allocation2] sm:$0x1]  ;;  %s109_s15 = scalar_lea.vmem %s285_s1, %s287_s7 }
   0xf   : > { %s106_s11 = scalar_lea.vmem %s284_s0, %s220_s8  ;;  %v165_v29 = vld [vmem:[%s109_s15] sm:$0x1] }
  0x10   : > { %v115_v1 = vld [vmem:[%s106_s11] sm:$0x1]  ;;  %v116_v2 = vld [vmem:[%s106_s11 + $0x1] sm:$0x1] }
  0x11   : > { %v117_v3 = vunpack.c.l.bf16 %v115_v1  ;;  %v118_v4 = vunpack.c.l.bf16 %v116_v2 }
  0x12   : > { %151 = vrot.lane.b32.xlu1 %v143_v6, %s252_s12 }
  0x13   : > { %121 = vst.msk [vmem:[#allocation2 + $0x3] sm:$0x1] %vm120_vm1, %v117_v3  ;;  %122 = vst.msk [vmem:[#allocation2 + $0x5] sm:$0x1] %vm120_vm1, %v118_v4 }
  0x1a   : > { %v124_v8 = vld [vmem:[#allocation2 + $0x3] sm:$0x1]  ;;  %v125_v9 = vld [vmem:[#allocation2 + $0x5] sm:$0x1] }
  0x1b   : > { %v233_v11 = vpack.i.bf16 %v124_v8, %v123_v7  ;;  %v238_v12 = vpack.i.bf16 %v141_v10, %v125_v9 }
  0x1d   : > { %234 = vrot.lane.b32.xlu0 %v233_v11, %s252_s12 }
  0x21   : > { %239 = vrot.lane.b32.xlu0 %v238_v12, %s252_s12 }
  0x80   : > { %v150_v14 = vpop.permute.xlu1 %149 }
  0x84   : > { %v152_v22 = vpop.permute.xlu1 %151 }
  0x8f   : > { %v235_v13 = vpop.permute.xlu0 %234 }
  0x90   : > { %v237_v15 = vunpack.i.h.bf16 %v235_v13  ;;  %v236_v16 = vunpack.i.l.bf16 %v235_v13 }
  0x92   : > { %v139_v17 = vmax.f32 %v124_v8, %v237_v15  ;;  %v138_v19 = vmax.f32 %v123_v7, %v236_v16 }
  0x93   : > { %v240_v18 = vpop.permute.xlu0 %239 }
  0x94   : > { %v242_v20 = vunpack.i.h.bf16 %v240_v18  ;;  %v241_v21 = vunpack.i.l.bf16 %v240_v18  ;;  %v157_v23 = vmax.f32 %v139_v17, %v150_v14 }
  0x96   : > { %v156_v24 = vmax.f32 %v138_v19, %v242_v20  ;;  %v140_v25 = vmax.f32 %v125_v9, %v241_v21 }
  0x98   : > { %v158_v26 = vmax.f32 %v140_v25, %v152_v22  ;;  %v159_v27 = vmax.f32 %v156_v24, %v157_v23 }
  0x9a   : > { %v160_v28 = vmax.f32 %v159_v27, %v158_v26 }
  0x9c   : > { %v161_v30 = vpack.c.bf16 %v160_v28, %v160_v28 }
  0x9e   : > { %v166_v31 = vsel %vm164_vm4, %v161_v30, %v165_v29 }
  0x9f   : > { %167 = vst [vmem:[%s109_s15] sm:$0x1] %v166_v31 }
  0xa0 PF: > { %s11_s6 = sadd.s32 1, %s249_s6  }
  0xa1   : > { %p8_p4 = scmp.ge.s32.totalorder %s11_s6, 4  }
  0xa3   :  { %10 = sbr.rel (!%p8_p4) target bundleno = 1 (0x1), region = 55 }

// kernel: _lambda_.33
= control target key start
LH: loop header
LB: loop body
LE: loop exit
PB: predicated region body
PF: predicated region fallthrough
CT: control target
= control target key end

     0   :  { %s1038_s13 = smov 0   ;;  %s1160_s0 = inlined_call_operand.vmem [shape: bf16[2,2,2,8], index: 0, kind: input, shape index: {}]   ;;  %s1161_s1 = inlined_call_operand.vmem [shape: f32[1,8], index: 1, kind: input, shape index: {}]   ;;  %s1162_s2 = inlined_call_operand.vmem [shape: f32[1,8], index: 2, kind: input, shape index: {}]   ;;  %s1163_s3 = inlined_call_operand.vmem [shape: bf16[8,2], index: 3, kind: input, shape index: {}]   ;;  %s1164_s4 = inlined_call_operand.vmem [shape: f32[1,2], index: 4, kind: input, shape index: {}]   ;;  %s1165_s5 = inlined_call_operand.vmem [shape: f32[1,2], index: 5, kind: input, shape index: {}]   ;;  %s1166_s6 = inlined_call_operand.vmem [shape: bf16[18,2], index: 6, kind: input, shape index: {}]   ;;  %s1167_s7 = inlined_call_operand.vmem [shape: f32[1,2], index: 7, kind: input, shape index: {}]   ;;  %s1168_s8 = inlined_call_operand.vmem [shape: f32[1,2], index: 8, kind: input, shape index: {}]   ;;  %s1169_s9 = inlined_call_operand.vmem [shape: bf16[2,8], index: 9, kind: input, shape index: {}]   ;;  %s1170_s10 = inlined_call_operand.vmem [shape: bf16[2,2,2,8], index: 10, kind: output, shape index: {}]  }
   0x1 LB: > { %s840_s14 = sadd.s32 4294967295, %s959_s13   ;;  %p844_p0 = scmp.ge.s32.totalorder %s959_s13, 1  ;;  %s959_s13 = sphi %s1038_s13, %s20_s13  }
   0x2   : > { %p311_p1 = scmp.lt.s32.totalorder %s959_s13, 3 }
   0x4   : > { %p312_p2 = pnand %p844_p0, %p311_p1 }
   0x5   : > { %p347_p3 = scmp.lt.s32.totalorder (!%p312_p2), %s840_s14, 1  ;;  %vm356_vm0 = vcmask (!%p312_p2), 9216   ;;  %v1049_v0 = vld [vmem:[%s1161_s1] ss:$0 sm:$0xff] (!%p312_p2)  ;;  %v969_v1 = vmov (!%p312_p2), 0   ;;  %s1077_s12 = smov (!%p312_p2), 0  }
   0x6   : > { %315 = sbr.rel (%p312_p2) target bundleno = 836 (0x344), region = 60  ;;  %357 = vst.msk [vmem:[#allocation2] sm:$0x3] (!%p312_p2), %vm356_vm0, %v969_v1  ;;  %358 = vst.msk [vmem:[#allocation2 + $0x2] sm:$0x3] (!%p312_p2), %vm356_vm0, %v969_v1 }
   0x7   : > { %359 = vst.msk [vmem:[#allocation2 + $0x4] sm:$0x3] (!%p312_p2), %vm356_vm0, %v969_v1  ;;  %360 = vst.msk [vmem:[#allocation2 + $0x6] sm:$0x3] (!%p312_p2), %vm356_vm0, %v969_v1  ;;  %v848_v2 = vld [vmem:[%s1162_s2] ss:$0 sm:$0xff] (!%p312_p2) }
   0x8   : > { %v850_v3 = vld [vmem:[%s1164_s4] ss:$0 sm:$0xff] (!%p312_p2) }
   0x9   : > { %v851_v4 = vld [vmem:[%s1165_s5] ss:$0 sm:$0xff] (!%p312_p2) }
   0xa   : > { %v365_v5 = vld [vmem:[%s1163_s3] sm:$0xf] (!%p312_p2) }
   0xd   : > { %s1172_s14 = smov (!%p347_p3, %s840_s14), 1 }
   0xe   : > { %s845_s25 = sshll.u32 %s1172_s14, 1 }
   0xf   : > { %s1070_s28 = scalar_lea.vmem %s1160_s0, %s845_s25  ;;  %s1075_s11 = scalar_lea.vmem %s1170_s10, %s845_s25 }
  0x10 LB: >> { %vm395_vm1 = vcmask 1043456   ;;  %v970_v6 = vmov 0.0   ;;  %vm971_vm2 = vmmov 0   ;;  %s372_s14 = scalar_lea.vmem %s1070_s28, %s963_s12  ;;  %vm391_vm3 = vcmask 64512   ;;  %s852_s15 = sshll.u32 %s963_s12, 1  ;;  %s963_s12 = sphi %s1077_s12, %s371_s12  }
  0x11   : >> { %887 = vmatprep.subr.bf16.mxu0 %v970_v6  ;;  %v397_v7 = vsel %vm395_vm1, %v365_v5, 0  ;;  %889 = vmatprep.mubr.msk.bf16.mxu0 %vm971_vm2, %v970_v6  ;;  %v373_v8 = vld [vmem:[%s372_s14] sm:$0x1]  ;;  %v972_v14 = vmov 1983009808   ;;  %v460_v16 = vlaneseq  ;;  %s794_s16 = scalar_lea.vmem [#allocation2], %s852_s15 }
  0x12   : >> { %888 = vmatpush3.bf16.msra.mxu0 %v397_v7  ;;  %v374_v9 = vunpack.c.l.bf16 %v373_v8  ;;  %v458_v15 = vunpack.c.l.s4 %v972_v14  ;;  %vm475_vm4 = vsmask.f32 1282  ;;  %v853_v32 = vld [vmem:[%s794_s16 + $0x2] sm:$0x3]  ;;  %s371_s12 = sadd.s32 1, %s963_s12  }
  0x13   : >> { %v461_v20 = vshrl.u32 %v460_v16, 7  ;;  %vm476_vm5 = vmand %vm356_vm0, %vm475_vm4  ;;  %p368_p4 = scmp.ge.s32.totalorder %s371_s12, 2  }
  0x14   : >> { %v381_v10 = vmul.f32 %v1049_v0, %v374_v9  ;;  %v459_v19 = vunpack.c.0.s8 %v458_v15  ;;  %v1094_v35 = vld [vmem:[%s1166_s6] sm:$0xf] (%p368_p4)  ;;  %v1099_v36 = vld [vmem:[%s1166_s6 + $0x4] sm:$0xf] (%p368_p4)  ;;  %v1104_v37 = vld [vmem:[%s1166_s6 + $0x8] sm:$0x1] (%p368_p4) }
  0x15   : > { %v1109_v38 = vld [vmem:[%s1169_s9] sm:$0x1] (%p368_p4)  ;;  %s1121_s30 = smov (%p368_p4), 0  }
  0x16   : >> { %v388_v11 = vadd.f32 %v848_v2, %v381_v10  ;;  %v462_v26 = vsub.s32 %v459_v19, %v461_v20  ;;  %v1114_v39 = vld [vmem:[%s1167_s7] ss:$0 sm:$0xff] (%p368_p4) }
  0x17   : > { %v1119_v40 = vld [vmem:[%s1168_s8] ss:$0 sm:$0xff] (%p368_p4) }
  0x18   : >> { %v389_v12 = vmax.f32 %v388_v11, 0.0 }
  0x1a   : >> { %v390_v13 = vpack.c.bf16 %v389_v12, %v389_v12 }
  0x1c   : >> { %890 = vmatmul.mubr.msk.bf16.vlgmr.msra.gmra.mrb[0].mxu0 %vm391_vm3, %v390_v13 }
  0xef   : >> { %v433_v17 = vpop.f32.mrb[0].mxu0 }
  0xf0   : >> { %v445_v18 = vmul.f32 %v850_v3, %v433_v17  ;;  %v891_v21 = vpop.f32.mrb[1].mxu0 }
  0xf1   : >> { %v436_v22 = vpop.f32.mrb[2].mxu0 }
  0xf2   : >> { %v452_v23 = vadd.f32 %v851_v4, %v445_v18  ;;  %v892_v24 = vpop.f32.mrb[3].mxu0 }
  0xf4   : >> { %v453_v25 = vmax.f32 %v452_v23, 0.0 }
  0xf6   : >> { %v454_v27 = vpack.c.bf16 %v453_v25, %v453_v25 }
  0xf8   : >> { %v463_v28 = vrot.slane %v454_v27, %v462_v26 }
  0xfa   : >> { %v465_v29 = vshrl.u32 %v463_v28, 16  ;;  %v468_v31 = vshll.u32 %v463_v28, 16 }
  0xfb   : > { %370 = sbr.rel (!%p368_p4) target bundleno = 16 (0x10), region = 111 }
  0xfc   : >> { %v467_v30 = vrot.slane %v465_v29, 7 }
  0xfe   : >> { %v470_v33 = vor.u32 %v468_v31, %v467_v30 }
 0x100   : >> { %v478_v34 = vsel %vm476_vm5, %v470_v33, %v853_v32 }
 0x101   : >> { %854 = vst [vmem:[%s794_s16 + $0x2] sm:$0x3] %v478_v34 }
 0x102 LB: >> { %s855_s12 = sshll.u32 %s967_s30, 1  ;;  %v973_v41 = vmov 0.0   ;;  %v872_v42 = vcombine.low %v1094_v35, %v1099_v36  ;;  %s974_s15 = smov 6   ;;  %v873_v51 = vcombine.low %v1104_v37, %v1104_v37  ;;  %vm650_vm6 = vcmask 1040384   ;;  %s967_s30 = sphi %s1121_s30, %s491_s30  }
 0x103   : >> { %893 = vmatprep.subr.bf16.mxu0 %v973_v41  ;;  %901 = vmatprep.subr.bf16.mxu1 %v973_v41  ;;  %s1129_s14 = scalar_lea.vmem [#allocation2], %s855_s12  ;;  %s975_s16 = smov 4   ;;  %vm979_vm7 = vmmov 0   ;;  %vm613_vm8 = vcmask 15360   ;;  %vm617_vm9 = vcmask 31744   ;;  %vm620_vm10 = vcmask 48128  }
 0x104   : >> { %894 = vmatpush3.bf16.msra.mxu0 %v872_v42  ;;  %s976_s17 = smov 12   ;;  %v652_v61 = vsel %vm650_vm6, %v873_v51, 0  ;;  %s977_s18 = smov 2   ;;  %897 = vmatprep.mubr.msk.bf16.mxu0 %vm979_vm7, %v973_v41  ;;  %vm626_vm11 = vcmask 80896   ;;  %vm629_vm12 = vcmask 97280   ;;  %vm632_vm13 = vcmask 113664  }
 0x105   : >> { %895 = vmatprep.subr.bf16.mxu0 %v973_v41  ;;  %s978_s19 = smov 8   ;;  %903 = vmatprep.mubr.msk.bf16.mxu1 %vm979_vm7, %v973_v41  ;;  %s980_s20 = smov 10   ;;  %vm635_vm14 = vcmask 130048   ;;  %vm647_vm15 = vcmask 146432   ;;  %v717_v21 = vsel %vm650_vm6, %v1109_v38, 0  ;;  %vm761_vm0 = vcmask 57344  }
 0x106   : >> { %s981_s21 = smov 16   ;;  %s982_s22 = smov 14   ;;  %902 = vmatpush3.bf16.msra.mxu1 %v717_v21 }
 0x107   : >> { %s710_s23 = scalar_lea.vmem %s1070_s28, %s967_s30  ;;  %s760_s24 = scalar_lea.vmem %s1075_s11, %s967_s30 }
 0x108   : >> { %v866_v43 = vld.sshfl [vmem:[%s1129_s14 + $0x2] sm:$0x1 pattern:$0x76325410]  ;;  %896 = vmatpush3.bf16.msra.mxu0 %v652_v61  ;;  %v494_v7 = vld [vmem:[%s1129_s14] sm:$0x1] }
 0x109   : >> { %545 = vrot.lane.b32.xlu1 %v866_v43, %s974_s15  ;;  %v865_v44 = vld.sshfl [vmem:[%s1129_s14] sm:$0x2 pattern:$0x76325410]  ;;  %v711_v30 = vld [vmem:[%s710_s23] sm:$0x1] }
 0x10a   : >> { %v534_v45 = vrot.slane %v865_v44, 1  ;;  %v869_v46 = vld.sshfl [vmem:[%s1129_s14 + $0x4] sm:$0x1 pattern:$0x76325410]  ;;  %v712_v31 = vunpack.c.l.bf16 %v711_v30  ;;  %s491_s30 = sadd.s32 1, %s967_s30  }
 0x10b   : >> { %v864_v47 = vld.sshfl [vmem:[%s1129_s14] sm:$0x3 pattern:$0x76325410]  ;;  %p488_p5 = scmp.ge.s32.totalorder %s491_s30, 2  }
 0x10c   : >> { %535 = vrot.lane.b32.xlu0 %v534_v45, %s975_s16  ;;  %v518_v48 = vshrl.u32 %v864_v47, 16  ;;  %v520_v49 = vshll.u32 %v864_v47, 16  ;;  %v867_v50 = vld.sshfl [vmem:[%s1129_s14 + $0x2] sm:$0x3 pattern:$0x76325410] }
 0x10d   : >> { %583 = vrot.lane.b32.xlu1 %v869_v46, %s976_s17  ;;  %v556_v52 = vshrl.u32 %v867_v50, 16  ;;  %v558_v53 = vshll.u32 %v867_v50, 16  ;;  %v868_v54 = vld.sshfl [vmem:[%s1129_s14 + $0x2] sm:$0x2 pattern:$0x76325410] }
 0x10e   : >> { %v522_v55 = vrot.slane %v520_v49, 1  ;;  %v870_v56 = vld.sshfl [vmem:[%s1129_s14 + $0x4] sm:$0x3 pattern:$0x76325410]  ;;  %v572_v63 = vrot.slane %v868_v54, 1 }
 0x10f   : >> { %v560_v57 = vrot.slane %v558_v53, 1  ;;  %v596_v58 = vshll.u32 %v870_v56, 16  ;;  %v871_v60 = vld.sshfl [vmem:[%s1129_s14 + $0x4] sm:$0x2 pattern:$0x76325410] }
 0x110   : >> { %v523_v59 = vor.u32 %v522_v55, %v518_v48  ;;  %v594_v0 = vshrl.u32 %v870_v56, 16  ;;  %v610_v2 = vrot.slane %v871_v60, 1 }
 0x111   : >> { %v561_v62 = vor.u32 %v560_v57, %v556_v52  ;;  %v598_v1 = vrot.slane %v596_v58, 1 }
 0x112   : >> { %524 = vrot.lane.b32.xlu0 %v523_v59, %s977_s18 }
 0x113   : >> { %562 = vrot.lane.b32.xlu1 %v561_v62, %s978_s19  ;;  %v599_v3 = vor.u32 %v598_v1, %v594_v0 }
 0x116   : >> { %573 = vrot.lane.b32.xlu0 %v572_v63, %s980_s20 }
 0x117   : >> { %611 = vrot.lane.b32.xlu1 %v610_v2, %s981_s21 }
 0x11a   : >> { %600 = vrot.lane.b32.xlu0 %v599_v3, %s982_s22 }
 0x17b   : >> { %v546_v4 = vpop.permute.xlu1 %545 }
 0x17e   : >> { %v536_v5 = vpop.permute.xlu0 %535 }
 0x17f   : >> { %v584_v6 = vpop.permute.xlu1 %583 }
 0x184   : >> { %v525_v8 = vpop.permute.xlu0 %524 }
 0x185   : >> { %v616_v9 = vsel %vm613_vm8, %v494_v7, %v525_v8  ;;  %v563_v10 = vpop.permute.xlu1 %562 }
 0x186   : >> { %v619_v11 = vsel %vm617_vm9, %v616_v9, %v536_v5 }
 0x187   : >> { %v622_v12 = vsel %vm620_vm10, %v619_v11, %v546_v4 }
 0x188   : >> { %v625_v13 = vsel %vm391_vm3, %v622_v12, %v563_v10  ;;  %v574_v14 = vpop.permute.xlu0 %573 }
 0x189   : >> { %v628_v15 = vsel %vm626_vm11, %v625_v13, %v574_v14  ;;  %v612_v16 = vpop.permute.xlu1 %611 }
 0x18a   : >> { %v631_v18 = vsel %vm629_vm12, %v628_v15, %v584_v6 }
 0x18c   : >> { %v601_v17 = vpop.permute.xlu0 %600 }
 0x18d   : >> { %v634_v19 = vsel %vm632_vm13, %v631_v18, %v601_v17 }
 0x18e   : >> { %v637_v20 = vsel %vm635_vm14, %v634_v19, %v612_v16 }
 0x18f   : >> { %898 = vmatmul.mubr.msk.bf16.vlgmr.msra.gmra.mrb[0].mxu0 %vm647_vm15, %v637_v20 }
 0x262   : >> { %v688_v22 = vpop.f32.mrb[0].mxu0 }
 0x263   : >> { %v700_v23 = vmul.f32 %v1114_v39, %v688_v22  ;;  %v899_v24 = vpop.f32.mrb[1].mxu0 }
 0x264   : >> { %v691_v25 = vpop.f32.mrb[2].mxu0 }
 0x265   : >> { %v707_v26 = vadd.f32 %v1119_v40, %v700_v23  ;;  %v900_v27 = vpop.f32.mrb[3].mxu0 }
 0x267   : >> { %v708_v28 = vmax.f32 %v707_v26, 0.0 }
 0x269   : >> { %v709_v29 = vpack.c.bf16 %v708_v28, %v708_v28 }
 0x26b   : >> { %904 = vmatmul.mubr.msk.bf16.vlgmr.msra.gmra.mrb[0].mxu1 %vm613_vm8, %v709_v29 }
 0x33d   : > { %490 = sbr.rel (!%p488_p5) target bundleno = 258 (0x102), region = 122 }
 0x33e   : >> { %v753_v32 = vpop.f32.mrb[0].mxu1 }
 0x33f   : >> { %v754_v33 = vadd.f32 %v753_v32, %v712_v31  ;;  %v905_v34 = vpop.f32.mrb[1].mxu1 }
 0x340   : >> { %v756_v41 = vpop.f32.mrb[2].mxu1 }
 0x341   : >> { %v759_v42 = vpack.c.bf16 %v754_v33, %v754_v33  ;;  %v906_v43 = vpop.f32.mrb[3].mxu1 }
 0x343   : >> { %762 = vst.msk [vmem:[%s760_s24] sm:$0x1] %vm761_vm0, %v759_v42 }
 0x344 PF: > { %s20_s13 = sadd.s32 1, %s959_s13  }
 0x345   : > { %p17_p6 = scmp.ge.s32.totalorder %s20_s13, 4  }
 0x347   :  { %19 = sbr.rel (!%p17_p6) target bundleno = 1 (0x1), region = 133 }

// kernel: _lambda_.38
= control target key start
LH: loop header
LB: loop body
LE: loop exit
PB: predicated region body
PF: predicated region fallthrough
CT: control target
= control target key end

     0   :  { %s901_s0 = inlined_call_operand.vmem [shape: s32[2], index: 0, kind: input, shape index: {}, may-alias: {0,1}]   ;;  %s902_s2 = inlined_call_operand.vmem [shape: bf16[2,1,1,8], index: 2, kind: input, shape index: {}]   ;;  %s903_s3 = inlined_call_operand.vmem [shape: f32[4,1], index: 3, kind: input, shape index: {}]   ;;  %s904_s4 = inlined_call_operand.vmem [shape: bf16[2,4,8], index: 4, kind: input, shape index: {}]   ;;  %s905_s5 = inlined_call_operand.vmem [shape: bf16[2,4,8], index: 5, kind: input, shape index: {}]   ;;  %s906_s6 = inlined_call_operand.vmem [shape: f32[2,1], index: 6, kind: input, shape index: {}]   ;;  %s907_s7 = inlined_call_operand.vmem [shape: bf16[2,4,8], index: 7, kind: output, shape index: {}]   ;;  %s908_s1 = inlined_call_operand.vmem [shape: s32[2], index: 1, kind: input, shape index: {}, may-alias: {0,1}]  }
   0x1   :  { %s12_s26 = sshll.u32 %s901_s0, 4  ;;  %s16_s29 = sshll.u32 %s908_s1, 4  ;;  %s13_s26 = int_to_ptr.vmem [resolvable:$true] %s12_s26  ;;  %s17_s29 = int_to_ptr.vmem [resolvable:$true] %s16_s29 }
   0x2   :  { %s709_s30 = scalar_lea.vmem %s13_s26, 16  ;;  %p714_p1 = scmp.lt.s32.totalorder %s13_s26, %s13_s26 }
   0x3   :  { %p710_p0 = scmp.ne.s32.totalorder %s13_s26, %s709_s30  ;;  %p715_p2 = scmp.lt.s32.totalorder %s709_s30, %s709_s30 }
   0x5   :  { %p716_p3 = por %p715_p2, %p714_p1 }
   0x7   :  { %p717_p4 = pnand %p716_p3, %p710_p0 }
   0x9   :  { %720 = shalt.err (!%p717_p4)  }
   0xa   :  { %s767_s8 = smov [#allocation5]   ;;  %s721_s9 = scalar_lea.vmem %s17_s29, 16 }
   0xb   :  { %15 = dma.vmem_to_smem %s13_s26, 16, %s767_s8, [#allocation4] }
   0xc   :  { %p722_p5 = scmp.ne.s32.totalorder %s17_s29, %s721_s9  ;;  %p726_p6 = scmp.lt.s32.totalorder %s17_s29, %s17_s29 }
   0xd   :  { %p727_p7 = scmp.lt.s32.totalorder %s721_s9, %s721_s9 }
   0xf   :  { %p728_p8 = por %p727_p7, %p726_p6 }
  0x11   :  { %p729_p9 = pnand %p728_p8, %p722_p5 }
  0x13   :  { %732 = shalt.err (!%p729_p9)  }
  0x14   :  { %s768_s0 = smov [#allocation6]  }
  0x15   :  { %19 = dma.vmem_to_smem %s17_s29, 16, %s768_s0, [#allocation4] }
  0x16   :  { %749 = dma.done.wait [#allocation4], 32 }
  0x17   :  { %750 = vsyncadd [#allocation4], 4294967264 }
  0x18   :  { %21 = sfence }
  0x19   :  { %s818_s1 = smov 0   ;;  %s820_s10 = smov 0  }
  0x1a   :  { %s822_s11 = smov 0  }
  0x1b LB: > { %s39_s12 = sadd.s32 1, %s757_s10  ;;  %p646_p10 = scmp.ge.s32.totalorder %s761_s11, 1  ;;  %s761_s11 = sphi %s822_s11, %s27_s11   ;;  %s757_s10 = sphi %s820_s10, %s910_s10   ;;  %s753_s1 = sphi %s818_s1, %s909_s1  }
  0x1c   : > { %p41_p11 = scmp.ge.s32.totalorder %s39_s12, 2  ;;  %p248_p12 = scmp.lt.s32.totalorder %s761_s11, 3 }
  0x1e   : > { %s912_s12 = smov (%p41_p11, %s39_s12), 0  ;;  %p249_p13 = pnand %p646_p10, %p248_p12 }
  0x1f   : > { %p294_p0 = scmp.lt.s32.totalorder (!%p249_p13), %s753_s1, 1  ;;  %v322_v0 = vld [vmem:[%s906_s6] sm:$0x3] (!%p249_p13)  ;;  %s858_s28 = smov (!%p249_p13), 0  }
  0x20   : > { %252 = sbr.rel (%p249_p13) target bundleno = 288 (0x120), region = 40 }
  0x27   : > { %s914_s1 = smov (!%p294_p0, %s753_s1), 1 }
  0x28   : > { %s842_s17 = scalar_lea.vmem %s902_s2, %s914_s1  ;;  %s844_s18 = sshll.u32 %s914_s1, 1 }
  0x29   : > { %s307_s21 = scalar_lea.vmem %s904_s4, %s844_s18  ;;  %s314_s24 = scalar_lea.vmem %s905_s5, %s844_s18 }
  0x2a   : > { %s321_s27 = scalar_lea.vmem %s907_s7, %s844_s18 }
  0x2b LB: >> { %v769_v1 = vmov 0.0   ;;  %s331_s29 = sld [smem:[#allocation5 + %s765_s28]]  ;;  %vm770_vm0 = vmmov 0   ;;  %vm341_vm1 = vcmask 1040384   ;;  %vm337_vm2 = vcmask 7168   ;;  %s650_s0 = sshll.u32 %s765_s28, 1  ;;  %s765_s28 = sphi %s858_s28, %s328_s28  }
  0x2c   : >> { %661 = vmatprep.subr.mxu0 %v769_v1  ;;  %666 = vmatprep.subr.mxu1 %v769_v1  ;;  %s332_s30 = sld [smem:[#allocation6 + %s765_s28]]  ;;  %vm416_vm3 = vcmask 58368   ;;  %s415_s1 = scalar_lea.vmem [#allocation2], %s650_s0 }
  0x2d   : >> { %663 = vmatprep.mubr.msk.f32.mxu0 %vm770_vm0, %v769_v1  ;;  %668 = vmatprep.mubr.msk.f32.mxu1 %vm770_vm0, %v769_v1  ;;  %s494_s13 = scalar_lea.vmem [#allocation3], %s650_s0  ;;  %s328_s28 = sadd.s32 1, %s765_s28  }
  0x2e   : >> { %p325_p1 = scmp.ge.s32.totalorder %s328_s28, 2  }
  0x2f   : > { %v496_v10 = vld [vmem:[%s903_s3] sm:$0xf] (%p325_p1)  ;;  %v771_v11 = vmov (%p325_p1), 0  }
  0x30   : > { %708 = vset.pattern.permute.xlu0 (%p325_p1), %v771_v11  ;;  %v507_v15 = vld [vmem:[%s307_s21] sm:$0x3] (%p325_p1) }
  0x31   : >> { %s334_s8 = scalar_lea.vmem %s842_s17, %s331_s29  ;;  %502 = vperm.xlu0 (%p325_p1), %708, %v496_v10   ;;  %v510_v16 = vld [vmem:[%s314_s24] sm:$0x3] (%p325_p1)  ;;  %v508_v18 = vunpack.c.l.bf16 (%p325_p1), %v507_v15 }
  0x32   : >> { %s418_s9 = scalar_lea.vmem %s842_s17, %s332_s30  ;;  %v335_v2 = vld [vmem:[%s334_s8] sm:$0x1]  ;;  %v511_v20 = vunpack.c.l.bf16 (%p325_p1), %v510_v16 }
  0x33   : >> { %v419_v3 = vld [vmem:[%s418_s9] sm:$0x1]  ;;  %v336_v4 = vunpack.c.l.bf16 %v335_v2 }
  0x34   : >> { %v420_v5 = vunpack.c.l.bf16 %v419_v3 }
  0x35   : >> { %662 = vmatpush3.msk.msra.mxu0 %vm341_vm1, %v336_v4 }
  0x36   : >> { %667 = vmatpush3.msk.msra.mxu1 %vm341_vm1, %v420_v5  ;;  %664 = vmatmul.mubr.msk.f32.vlgmr.msra.gmra.mrb[0].mxu0 %vm337_vm2, %v322_v0 }
  0x37   : >> { %669 = vmatmul.mubr.msk.f32.vlgmr.msra.gmra.mrb[0].mxu1 %vm337_vm2, %v322_v0 }
  0xb0   : > { %v503_v17 = vpop.permute.xlu0 (%p325_p1), %502 }
 0x105   : > { %327 = sbr.rel (!%p325_p1) target bundleno = 43 (0x2b), region = 90 }
 0x109   : >> { %v411_v6 = vpop.f32.mrb[0].mxu0 }
 0x10a   : >> { %v490_v7 = vpop.f32.mrb[0].mxu1  ;;  %417 = vst.msk [vmem:[%s415_s1] sm:$0x3] %vm416_vm3, %v411_v6  ;;  %v665_v8 = vpop.f32.mrb[1].mxu0 }
 0x10b   : >> { %495 = vst.msk [vmem:[%s494_s13] sm:$0x3] %vm416_vm3, %v490_v7  ;;  %v670_v9 = vpop.f32.mrb[1].mxu1 }
 0x111   : > { %v497_v12 = vld [vmem:[#allocation2] sm:$0xf] }
 0x112   : > { %v498_v13 = vld [vmem:[#allocation3] sm:$0xf] }
 0x113   : > { %v499_v14 = vsub.f32 %v498_v13, %v497_v12 }
 0x115   : > { %v505_v19 = vmul.f32 %v503_v17, %v499_v14 }
 0x117   : > { %v506_v21 = vadd.f32 %v505_v19, %v497_v12 }
 0x119   : > { %v509_v22 = vadd.f32 %v508_v18, %v506_v21 }
 0x11b   : > { %v512_v23 = vadd.f32 %v511_v20, %v509_v22 }
 0x11d   : > { %v513_v24 = vpack.c.bf16 %v512_v23, %v512_v23 }
 0x11f   : > { %515 = vst.msk [vmem:[%s321_s27] sm:$0x3] %vm416_vm3, %v513_v24 }
 0x120 PF: > { %s27_s11 = sadd.s32 1, %s761_s11   ;;  %s909_s1 = smov %s757_s10 }
 0x121   : > { %p24_p2 = scmp.ge.s32.totalorder %s27_s11, 4   ;;  %s910_s10 = smov %s912_s12 }
 0x123   :  { %26 = sbr.rel (!%p24_p2) target bundleno = 27 (0x1b), region = 101 }

// kernel: _lambda_.36
= control target key start
LH: loop header
LB: loop body
LE: loop exit
PB: predicated region body
PF: predicated region fallthrough
CT: control target
= control target key end

     0   :  { %s856_s13 = smov 0   ;;  %s927_s0 = inlined_call_operand.vmem [shape: bf16[2,1,1,8], index: 0, kind: input, shape index: {}]   ;;  %s928_s1 = inlined_call_operand.vmem [shape: f32[1,8], index: 1, kind: input, shape index: {}]   ;;  %s929_s2 = inlined_call_operand.vmem [shape: f32[1,8], index: 2, kind: input, shape index: {}]   ;;  %s930_s3 = inlined_call_operand.vmem [shape: bf16[8,2], index: 3, kind: input, shape index: {}]   ;;  %s931_s4 = inlined_call_operand.vmem [shape: f32[1,2], index: 4, kind: input, shape index: {}]   ;;  %s932_s5 = inlined_call_operand.vmem [shape: f32[1,2], index: 5, kind: input, shape index: {}]   ;;  %s933_s6 = inlined_call_operand.vmem [shape: bf16[18,2], index: 6, kind: input, shape index: {}]   ;;  %s934_s7 = inlined_call_operand.vmem [shape: f32[1,2], index: 7, kind: input, shape index: {}]   ;;  %s935_s8 = inlined_call_operand.vmem [shape: f32[1,2], index: 8, kind: input, shape index: {}]   ;;  %s936_s9 = inlined_call_operand.vmem [shape: bf16[2,8], index: 9, kind: input, shape index: {}]   ;;  %s937_s10 = inlined_call_operand.vmem [shape: bf16[2,1,1,8], index: 10, kind: output, shape index: {}]  }
   0x1 LB: > { %s717_s14 = sadd.s32 4294967295, %s788_s13   ;;  %p721_p0 = scmp.ge.s32.totalorder %s788_s13, 1  ;;  %s788_s13 = sphi %s856_s13, %s20_s13  }
   0x2   : > { %p310_p1 = scmp.lt.s32.totalorder %s788_s13, 3 }
   0x4   : > { %p311_p2 = pnand %p721_p0, %p310_p1 }
   0x5   : > { %v367_v0 = vld [vmem:[%s930_s3] sm:$0xf] (!%p311_p2)  ;;  %vm378_vm0 = vcmask (!%p311_p2), 1043456   ;;  %p344_p3 = scmp.lt.s32.totalorder (!%p311_p2), %s717_s14, 1  ;;  %v790_v1 = vmov (!%p311_p2), 0.0   ;;  %vm791_vm1 = vmmov (!%p311_p2), 0   ;;  %v430_v19 = vlaneseq (!%p311_p2) }
   0x6   : > { %314 = sbr.rel (%p311_p2) target bundleno = 821 (0x335), region = 60  ;;  %741 = vmatprep.subr.bf16.mxu0 (!%p311_p2), %v790_v1  ;;  %v380_v2 = vsel (!%p311_p2), %vm378_vm0, %v367_v0, 0  ;;  %743 = vmatprep.mubr.msk.bf16.mxu0 (!%p311_p2), %vm791_vm1, %v790_v1  ;;  %vm351_vm2 = vcmask (!%p311_p2), 9216   ;;  %vm352_vm3 = vsmask.f32 (!%p311_p2), 1280  ;;  %vm374_vm5 = vcmask (!%p311_p2), 64512  }
   0x7   : > { %742 = vmatpush3.bf16.msra.mxu0 (!%p311_p2), %v380_v2  ;;  %v354_v3 = vld [vmem:[#allocation2] sm:$0x3] (!%p311_p2)  ;;  %747 = vmatprep.subr.bf16.mxu1 (!%p311_p2), %v790_v1  ;;  %vm353_vm4 = vmand (!%p311_p2), %vm351_vm2, %vm352_vm3  ;;  %v357_v4 = vld [vmem:[#allocation2 + $0x2] sm:$0x3] (!%p311_p2)  ;;  %v792_v17 = vmov (!%p311_p2), 1983009808  }
   0x8   : > { %v360_v5 = vld [vmem:[#allocation2 + $0x4] sm:$0x3] (!%p311_p2)  ;;  %751 = vmatprep.mubr.msk.bf16.mxu1 (!%p311_p2), %vm791_vm1, %v790_v1  ;;  %755 = vmatprep.subr.bf16.mxu0 (!%p311_p2), %v790_v1  ;;  %v355_v6 = vsel (!%p311_p2), %vm353_vm4, 0, %v354_v3  ;;  %v358_v7 = vsel (!%p311_p2), %vm353_vm4, 0, %v357_v4  ;;  %v363_v9 = vld [vmem:[%s928_s1] sm:$0x1] (!%p311_p2)  ;;  %v428_v18 = vunpack.c.l.s4 (!%p311_p2), %v792_v17 }
   0x9   : > { %v361_v8 = vsel (!%p311_p2), %vm353_vm4, 0, %v360_v5  ;;  %356 = vst [vmem:[#allocation2] sm:$0x3] (!%p311_p2), %v355_v6  ;;  %359 = vst [vmem:[#allocation2 + $0x2] sm:$0x3] (!%p311_p2), %v358_v7  ;;  %v431_v21 = vshrl.u32 (!%p311_p2), %v430_v19, 7 }
   0xa   : > { %362 = vst [vmem:[#allocation2 + $0x4] sm:$0x3] (!%p311_p2), %v361_v8  ;;  %v364_v12 = vld [vmem:[%s929_s2] sm:$0x1] (!%p311_p2)  ;;  %v429_v20 = vunpack.c.0.s8 (!%p311_p2), %v428_v18  ;;  %s793_s24 = smov (!%p311_p2), 4   ;;  %s794_s25 = smov (!%p311_p2), 12  }
   0xb   : > { %s795_s26 = smov (!%p311_p2), 2   ;;  %s796_s27 = smov (!%p311_p2), 10   ;;  %v365_v32 = vld [vmem:[%s931_s4] sm:$0x1] (!%p311_p2)  ;;  %vm439_vm6 = vcmask (!%p311_p2), 8192   ;;  %vm570_vm9 = vcmask (!%p311_p2), 1040384  }
   0xc   : > { %v432_v24 = vsub.s32 (!%p311_p2), %v429_v20, %v431_v21  ;;  %s797_s28 = smov (!%p311_p2), 14   ;;  %v366_v33 = vld [vmem:[%s932_s5] sm:$0x1] (!%p311_p2)  ;;  %vm440_vm7 = vsmask.f32 (!%p311_p2), 7938  ;;  %s798_s20 = smov (!%p311_p2), 6  }
   0xd   : > { %s939_s14 = smov (!%p344_p3, %s717_s14), 1  ;;  %v780_v43 = vld [vmem:[%s933_s6] sm:$0xff]   ;;  %vm441_vm8 = vmand %vm439_vm6, %vm440_vm7  ;;  %v781_v46 = vld [vmem:[%s933_s6 + $0x8] ss:$0 sps:$4 sm:$0x11]   ;;  %s799_s21 = smov 8  }
   0xe   : > { %s880_s19 = scalar_lea.vmem %s927_s0, %s939_s14  ;;  %748 = vmatpush3.bf16.msra.mxu1 %v780_v43  ;;  %v572_v48 = vsel %vm570_vm9, %v781_v46, 0  ;;  %s800_s22 = smov 16   ;;  %vm534_vm10 = vcmask 15360   ;;  %vm538_vm11 = vcmask 31744   ;;  %vm541_vm12 = vcmask 48128  }
   0xf   : > { %v368_v10 = vld [vmem:[%s880_s19] sm:$0x1]  ;;  %749 = vmatprep.subr.bf16.mxu1 %v790_v1  ;;  %vm546_vm13 = vcmask 80896   ;;  %vm549_vm14 = vcmask 97280   ;;  %vm552_vm15 = vcmask 113664   ;;  %vm555_vm0 = vcmask 130048   ;;  %s349_s11 = scalar_lea.vmem %s937_s10, %s939_s14 }
  0x10   : > { %v369_v11 = vunpack.c.l.bf16 %v368_v10  ;;  %v723_v22 = vld.sshfl [vmem:[#allocation2] sm:$0x2 pattern:$0x76325410]  ;;  %v451_v25 = vld [vmem:[#allocation2] sm:$0x1] }
  0x11   : > { %v479_v23 = vrot.slane %v723_v22, 1  ;;  %v465_v26 = vrot.slane %v451_v25, %v432_v24  ;;  %v726_v27 = vld.sshfl [vmem:[#allocation2 + $0x4] sm:$0x1 pattern:$0x76325410]  ;;  %vm667_vm2 = vcmask 57344  }
  0x12   : > { %v370_v13 = vmul.f32 %v369_v11, %v363_v9  ;;  %516 = vrot.lane.b32.xlu1 %v726_v27, %s794_s25  ;;  %v725_v29 = vld.sshfl [vmem:[#allocation2 + $0x2] sm:$0x2 pattern:$0x76325410]  ;;  %v519_v31 = vshrl.u32 %v726_v27, 16  ;;  %750 = vmatpush3.bf16.msra.mxu1 %v572_v48 }
  0x13   : > { %480 = vrot.lane.b32.xlu0 %v479_v23, %s793_s24  ;;  %v467_v28 = vshrl.u32 %v465_v26, 16  ;;  %v505_v30 = vrot.slane %v725_v29, 1  ;;  %v442_v44 = vld [vmem:[#allocation2 + $0x2] sm:$0x1]  ;;  %v448_v5 = vld [vmem:[%s936_s9] sm:$0x1] }
  0x14   : > { %v371_v14 = vadd.f32 %v370_v13, %v364_v12  ;;  %v727_v50 = vld.sshfl [vmem:[#allocation2 + $0x4] sm:$0x2 pattern:$0x76325410]  ;;  %v624_v6 = vsel %vm570_vm9, %v448_v5, 0 }
  0x15   : > { %v531_v52 = vrot.slane %v727_v50, 1  ;;  %v449_v7 = vld [vmem:[%s934_s7] sm:$0x1]  ;;  %vm668_vm3 = vsmask.f32 256 }
  0x16   : > { %v372_v15 = vmax.f32 %v371_v14, 0.0  ;;  %v450_v8 = vld [vmem:[%s935_s8] sm:$0x1]  ;;  %vm669_vm4 = vmand %vm667_vm2, %vm668_vm3 }
  0x17   : > { %469 = vrot.lane.b32.xlu0 %v467_v28, %s795_s26  ;;  %v618_v17 = vld [vmem:[%s880_s19] sm:$0x1] }
  0x18   : > { %v373_v16 = vpack.c.bf16 %v372_v15, %v372_v15  ;;  %v619_v18 = vunpack.c.l.bf16 %v618_v17  ;;  %v670_v22 = vld [vmem:[%s349_s11] sm:$0x1] }
  0x1a   : > { %744 = vmatmul.mubr.msk.bf16.vlgmr.msra.gmra.mrb[0].mxu0 %vm374_vm5, %v373_v16 }
  0x1b   : > { %757 = vmatprep.mubr.msk.bf16.mxu0 %vm791_vm1, %v790_v1  ;;  %506 = vrot.lane.b32.xlu0 %v505_v30, %s796_s27  ;;  %vm567_vm1 = vcmask 146432  }
  0x1c   : > { %756 = vmatpush3.bf16.msra.mxu0 %v624_v6 }
  0x1f   : > { %521 = vrot.lane.b32.xlu0 %v519_v31, %s797_s28 }
  0x84   : > { %v517_v54 = vpop.permute.xlu1 %516 }
  0x85   : > { %v481_v53 = vpop.permute.xlu0 %480 }
  0x89   : > { %v470_v55 = vpop.permute.xlu0 %469 }
  0x8a   : > { %v537_v57 = vsel %vm534_vm10, %v451_v25, %v470_v55 }
  0x8b   : > { %v540_v59 = vsel %vm538_vm11, %v537_v57, %v481_v53 }
  0x8d   : > { %v507_v56 = vpop.permute.xlu0 %506 }
  0x91   : > { %v522_v63 = vpop.permute.xlu0 %521 }
  0xed   : > { %v416_v34 = vpop.f32.mrb[0].mxu0 }
  0xee   : > { %v422_v35 = vmul.f32 %v416_v34, %v365_v32  ;;  %v745_v36 = vpop.f32.mrb[1].mxu0 }
  0xef   : > { %v419_v37 = vpop.f32.mrb[2].mxu0 }
  0xf0   : > { %v423_v38 = vadd.f32 %v422_v35, %v366_v33  ;;  %v746_v39 = vpop.f32.mrb[3].mxu0 }
  0xf2   : > { %v424_v40 = vmax.f32 %v423_v38, 0.0 }
  0xf4   : > { %v425_v41 = vpack.c.bf16 %v424_v40, %v424_v40 }
  0xf6   : > { %v433_v42 = vrot.slane %v425_v41, %v432_v24 }
  0xf8   : > { %v435_v45 = vshll.u32 %v433_v42, 16 }
  0xfa   : > { %v443_v47 = vsel %vm441_vm8, %v435_v45, %v442_v44 }
  0xfb   : > { %444 = vst [vmem:[#allocation2 + $0x2] sm:$0x1] %v443_v47 }
 0x102   : > { %v724_v49 = vld.sshfl [vmem:[#allocation2 + $0x2] sm:$0x1 pattern:$0x76325410] }
 0x103   : > { %490 = vrot.lane.b32.xlu1 %v724_v49, %s798_s20  ;;  %v493_v51 = vshrl.u32 %v724_v49, 16 }
 0x107   : > { %495 = vrot.lane.b32.xlu1 %v493_v51, %s799_s21 }
 0x10b   : > { %532 = vrot.lane.b32.xlu1 %v531_v52, %s800_s22 }
 0x175   : > { %v491_v58 = vpop.permute.xlu1 %490 }
 0x176   : > { %v543_v60 = vsel %vm541_vm12, %v540_v59, %v491_v58 }
 0x179   : > { %v496_v61 = vpop.permute.xlu1 %495 }
 0x17a   : > { %v545_v62 = vsel %vm374_vm5, %v543_v60, %v496_v61 }
 0x17b   : > { %v548_v0 = vsel %vm546_vm13, %v545_v62, %v507_v56 }
 0x17c   : > { %v551_v1 = vsel %vm549_vm14, %v548_v0, %v517_v54 }
 0x17d   : > { %v554_v2 = vsel %vm552_vm15, %v551_v1, %v522_v63  ;;  %v533_v3 = vpop.permute.xlu1 %532 }
 0x17e   : > { %v557_v4 = vsel %vm555_vm0, %v554_v2, %v533_v3 }
 0x17f   : > { %752 = vmatmul.mubr.msk.bf16.vlgmr.msra.gmra.mrb[0].mxu1 %vm567_vm1, %v557_v4 }
 0x252   : > { %v608_v9 = vpop.f32.mrb[0].mxu1 }
 0x253   : > { %v614_v10 = vmul.f32 %v608_v9, %v449_v7  ;;  %v753_v11 = vpop.f32.mrb[1].mxu1 }
 0x254   : > { %v611_v12 = vpop.f32.mrb[2].mxu1 }
 0x255   : > { %v615_v13 = vadd.f32 %v614_v10, %v450_v8  ;;  %v754_v14 = vpop.f32.mrb[3].mxu1 }
 0x257   : > { %v616_v15 = vmax.f32 %v615_v13, 0.0 }
 0x259   : > { %v617_v16 = vpack.c.bf16 %v616_v15, %v616_v15 }
 0x25b   : > { %758 = vmatmul.mubr.msk.bf16.vlgmr.msra.gmra.mrb[4].mxu0 %vm534_vm10, %v617_v16 }
 0x32e   : > { %v660_v19 = vpop.f32.mrb[4].mxu0 }
 0x32f   : > { %v661_v20 = vadd.f32 %v660_v19, %v619_v18  ;;  %v759_v21 = vpop.f32.mrb[5].mxu0 }
 0x330   : > { %v663_v23 = vpop.f32.mrb[6].mxu0 }
 0x331   : > { %v666_v24 = vpack.c.bf16 %v661_v20, %v661_v20  ;;  %v760_v25 = vpop.f32.mrb[7].mxu0 }
 0x333   : > { %v671_v26 = vsel %vm669_vm4, %v666_v24, %v670_v22 }
 0x334   : > { %672 = vst [vmem:[%s349_s11] sm:$0x1] %v671_v26 }
 0x335 PF: > { %s20_s13 = sadd.s32 1, %s788_s13  }
 0x336   : > { %p17_p4 = scmp.ge.s32.totalorder %s20_s13, 4  }
 0x338   :  { %19 = sbr.rel (!%p17_p4) target bundleno = 1 (0x1), region = 92 }

// kernel: _lambda_.40
= control target key start
LH: loop header
LB: loop body
LE: loop exit
PB: predicated region body
PF: predicated region fallthrough
CT: control target
= control target key end

     0   :  { %s995_s0 = inlined_call_operand.vmem [shape: s32[4], index: 0, kind: input, shape index: {}]   ;;  %s996_s2 = inlined_call_operand.vmem [shape: bf16[2,2,2,8], index: 2, kind: input, shape index: {}]   ;;  %s997_s3 = inlined_call_operand.vmem [shape: f32[16,1], index: 3, kind: input, shape index: {}]   ;;  %s998_s4 = inlined_call_operand.vmem [shape: bf16[2,16,8], index: 4, kind: input, shape index: {}]   ;;  %s999_s5 = inlined_call_operand.vmem [shape: bf16[2,16,8], index: 5, kind: input, shape index: {}]   ;;  %s1000_s6 = inlined_call_operand.vmem [shape: f32[4,2], index: 6, kind: input, shape index: {}]   ;;  %s1001_s7 = inlined_call_operand.vmem [shape: bf16[2,16,8], index: 7, kind: output, shape index: {}]   ;;  %s1002_s1 = inlined_call_operand.vmem [shape: s32[4], index: 1, kind: input, shape index: {}]  }
   0x1   :  { %s12_s26 = sshll.u32 %s995_s0, 4  ;;  %s16_s29 = sshll.u32 %s1002_s1, 4  ;;  %s13_s26 = int_to_ptr.vmem [resolvable:$true] %s12_s26  ;;  %s17_s29 = int_to_ptr.vmem [resolvable:$true] %s16_s29 }
   0x2   :  { %s800_s30 = scalar_lea.vmem %s13_s26, 16  ;;  %p805_p1 = scmp.lt.s32.totalorder %s13_s26, %s13_s26 }
   0x3   :  { %p801_p0 = scmp.ne.s32.totalorder %s13_s26, %s800_s30  ;;  %p806_p2 = scmp.lt.s32.totalorder %s800_s30, %s800_s30 }
   0x5   :  { %p807_p3 = por %p806_p2, %p805_p1 }
   0x7   :  { %p808_p4 = pnand %p807_p3, %p801_p0 }
   0x9   :  { %811 = shalt.err (!%p808_p4)  }
   0xa   :  { %s858_s8 = smov [#allocation5]   ;;  %s812_s9 = scalar_lea.vmem %s17_s29, 16 }
   0xb   :  { %15 = dma.vmem_to_smem %s13_s26, 16, %s858_s8, [#allocation4] }
   0xc   :  { %p813_p5 = scmp.ne.s32.totalorder %s17_s29, %s812_s9  ;;  %p817_p6 = scmp.lt.s32.totalorder %s17_s29, %s17_s29 }
   0xd   :  { %p818_p7 = scmp.lt.s32.totalorder %s812_s9, %s812_s9 }
   0xf   :  { %p819_p8 = por %p818_p7, %p817_p6 }
  0x11   :  { %p820_p9 = pnand %p819_p8, %p813_p5 }
  0x13   :  { %823 = shalt.err (!%p820_p9)  }
  0x14   :  { %s859_s0 = smov [#allocation6]  }
  0x15   :  { %19 = dma.vmem_to_smem %s17_s29, 16, %s859_s0, [#allocation4] }
  0x16   :  { %840 = dma.done.wait [#allocation4], 32 }
  0x17   :  { %841 = vsyncadd [#allocation4], 4294967264 }
  0x18   :  { %21 = sfence }
  0x19   :  { %s909_s1 = smov 0   ;;  %s911_s10 = smov 0  }
  0x1a   :  { %s913_s11 = smov 0  }
  0x1b LB: > { %s39_s12 = sadd.s32 1, %s848_s10  ;;  %p718_p10 = scmp.ge.s32.totalorder %s852_s11, 1  ;;  %s852_s11 = sphi %s913_s11, %s27_s11   ;;  %s848_s10 = sphi %s911_s10, %s1004_s10   ;;  %s844_s1 = sphi %s909_s1, %s1003_s1  }
  0x1c   : > { %p41_p11 = scmp.ge.s32.totalorder %s39_s12, 2  ;;  %p257_p12 = scmp.lt.s32.totalorder %s852_s11, 3 }
  0x1e   : > { %s1006_s12 = smov (%p41_p11, %s39_s12), 0  ;;  %p258_p13 = pnand %p718_p10, %p257_p12 }
  0x1f   : > { %p311_p0 = scmp.lt.s32.totalorder (!%p258_p13), %s844_s1, 1  ;;  %v351_v0 = vld [vmem:[%s1000_s6] sm:$0xf] (!%p258_p13)  ;;  %s951_s29 = smov (!%p258_p13), 0  }
  0x20   : > { %261 = sbr.rel (%p258_p13) target bundleno = 288 (0x120), region = 40 }
  0x27   : > { %s1008_s1 = smov (!%p311_p0, %s844_s1), 1 }
  0x28   : > { %s719_s15 = sshll.u32 %s1008_s1, 1  ;;  %s930_s16 = sshll.u32 %s1008_s1, 3 }
  0x29   : > { %s935_s19 = scalar_lea.vmem %s996_s2, %s719_s15  ;;  %s329_s22 = scalar_lea.vmem %s998_s4, %s930_s16 }
  0x2a   : > { %s339_s25 = scalar_lea.vmem %s999_s5, %s930_s16  ;;  %s949_s28 = scalar_lea.vmem %s1001_s7, %s930_s16 }
  0x2b LB: >> { %v860_v1 = vmov 0.0   ;;  %s360_s30 = sld [smem:[#allocation5 + %s856_s29]]  ;;  %vm861_vm0 = vmmov 0   ;;  %vm370_vm1 = vcmask 1041408   ;;  %vm366_vm2 = vcmask 15360   ;;  %s726_s1 = sshll.u32 %s856_s29, 2  ;;  %s856_s29 = sphi %s951_s29, %s357_s29  }
  0x2c   : >> { %752 = vmatprep.subr.mxu0 %v860_v1  ;;  %757 = vmatprep.subr.mxu1 %v860_v1  ;;  %s361_s8 = sld [smem:[#allocation6 + %s856_s29]]  ;;  %vm445_vm3 = vcmask 60416   ;;  %s444_s13 = scalar_lea.vmem [#allocation2], %s726_s1 }
  0x2d   : >> { %754 = vmatprep.mubr.msk.f32.mxu0 %vm861_vm0, %v860_v1  ;;  %759 = vmatprep.mubr.msk.f32.mxu1 %vm861_vm0, %v860_v1  ;;  %s523_s14 = scalar_lea.vmem [#allocation3], %s726_s1  ;;  %s357_s29 = sadd.s32 1, %s856_s29  }
  0x2e   : >> { %p354_p1 = scmp.ge.s32.totalorder %s357_s29, 4  }
  0x2f   : > { %v525_v10 = vld [vmem:[%s997_s3] sm:$0xff] (%p354_p1)  ;;  %v862_v11 = vmov (%p354_p1), 0   ;;  %v526_v12 = vld [vmem:[%s997_s3 + $0x8] sm:$0xff] (%p354_p1) }
  0x30   : > { %799 = vset.pattern.permute.xlu0 (%p354_p1), %v862_v11  ;;  %v741_v16 = vld [vmem:[%s329_s22] sm:$0xff] (%p354_p1)  }
  0x31   : >> { %s363_s9 = scalar_lea.vmem %s935_s19, %s360_s30  ;;  %535 = vperm.xlu0 (%p354_p1), %799, %v525_v10   ;;  %v745_v19 = vld [vmem:[%s339_s25] sm:$0xff] (%p354_p1)   ;;  %v742_v21 = vunpack.c.l.bf16 (%p354_p1), %v741_v16  ;;  %v743_v28 = vunpack.c.h.bf16 (%p354_p1), %v741_v16 }
  0x32   : >> { %s447_s0 = scalar_lea.vmem %s935_s19, %s361_s8  ;;  %v364_v2 = vld [vmem:[%s363_s9] sm:$0x1]  ;;  %v746_v24 = vunpack.c.l.bf16 (%p354_p1), %v745_v19  ;;  %v747_v31 = vunpack.c.h.bf16 (%p354_p1), %v745_v19 }
  0x33   : >> { %v448_v3 = vld [vmem:[%s447_s0] sm:$0x1]  ;;  %v365_v4 = vunpack.c.l.bf16 %v364_v2 }
  0x34   : >> { %v449_v5 = vunpack.c.l.bf16 %v448_v3 }
  0x35   : >> { %753 = vmatpush3.msk.msra.mxu0 %vm370_vm1, %v365_v4  ;;  %540 = vperm.xlu0 (%p354_p1), %799, %v526_v12  }
  0x36   : >> { %758 = vmatpush3.msk.msra.mxu1 %vm370_vm1, %v449_v5  ;;  %755 = vmatmul.mubr.msk.f32.vlgmr.msra.gmra.mrb[0].mxu0 %vm366_vm2, %v351_v0 }
  0x37   : >> { %760 = vmatmul.mubr.msk.f32.vlgmr.msra.gmra.mrb[0].mxu1 %vm366_vm2, %v351_v0 }
  0xb0   : > { %v536_v20 = vpop.permute.xlu0 (%p354_p1), %535 }
  0xb4   : > { %v541_v26 = vpop.permute.xlu0 (%p354_p1), %540 }
 0x105   : > { %356 = sbr.rel (!%p354_p1) target bundleno = 43 (0x2b), region = 90 }
 0x109   : >> { %v440_v6 = vpop.f32.mrb[0].mxu0 }
 0x10a   : >> { %v519_v7 = vpop.f32.mrb[0].mxu1  ;;  %446 = vst.msk [vmem:[%s444_s13] sm:$0xf] %vm445_vm3, %v440_v6  ;;  %v756_v8 = vpop.f32.mrb[1].mxu0 }
 0x10b   : >> { %524 = vst.msk [vmem:[%s523_s14] sm:$0xf] %vm445_vm3, %v519_v7  ;;  %v761_v9 = vpop.f32.mrb[1].mxu1 }
 0x111   : > { %v527_v13 = vld [vmem:[#allocation2] sm:$0xff]  ;;  %v528_v17 = vld [vmem:[#allocation2 + $0x8] sm:$0xff] }
 0x112   : > { %v529_v14 = vld [vmem:[#allocation3] sm:$0xff]  ;;  %v530_v18 = vld [vmem:[#allocation3 + $0x8] sm:$0xff] }
 0x113   : > { %v531_v15 = vsub.f32 %v529_v14, %v527_v13  ;;  %v532_v23 = vsub.f32 %v530_v18, %v528_v17 }
 0x115   : > { %v543_v22 = vmul.f32 %v536_v20, %v531_v15  ;;  %v544_v29 = vmul.f32 %v541_v26, %v532_v23 }
 0x117   : > { %v545_v25 = vadd.f32 %v543_v22, %v527_v13  ;;  %v546_v32 = vadd.f32 %v544_v29, %v528_v17 }
 0x119   : > { %v551_v27 = vadd.f32 %v742_v21, %v545_v25  ;;  %v552_v34 = vadd.f32 %v743_v28, %v546_v32 }
 0x11b   : > { %v557_v30 = vadd.f32 %v746_v24, %v551_v27  ;;  %v558_v35 = vadd.f32 %v747_v31, %v552_v34 }
 0x11d   : > { %v738_v33 = vpack.c.bf16 %v557_v30, %v557_v30  ;;  %v739_v36 = vpack.c.bf16 %v558_v35, %v558_v35 }
 0x11f   : > { %568 = vst.msk [vmem:[%s949_s28] sm:$0xf] %vm445_vm3, %v738_v33  ;;  %569 = vst.msk [vmem:[%s949_s28 + $0x4] sm:$0xf] %vm445_vm3, %v739_v36 }
 0x120 PF: > { %s27_s11 = sadd.s32 1, %s852_s11   ;;  %s1003_s1 = smov %s848_s10 }
 0x121   : > { %p24_p2 = scmp.ge.s32.totalorder %s27_s11, 4   ;;  %s1004_s10 = smov %s1006_s12 }
 0x123   :  { %26 = sbr.rel (!%p24_p2) target bundleno = 27 (0x1b), region = 101 }

// kernel: _lambda_.42
= control target key start
LH: loop header
LB: loop body
LE: loop exit
PB: predicated region body
PF: predicated region fallthrough
CT: control target
= control target key end

     0   :  { %s1206_s0 = inlined_call_operand.vmem [shape: s32[8], index: 0, kind: input, shape index: {}]   ;;  %s1207_s2 = inlined_call_operand.vmem [shape: bf16[2,4,4,8], index: 2, kind: input, shape index: {}]   ;;  %s1208_s3 = inlined_call_operand.vmem [shape: f32[64,1], index: 3, kind: input, shape index: {}]   ;;  %s1209_s4 = inlined_call_operand.vmem [shape: bf16[2,64,8], index: 4, kind: input, shape index: {}]   ;;  %s1210_s5 = inlined_call_operand.vmem [shape: bf16[2,64,8], index: 5, kind: input, shape index: {}]   ;;  %s1211_s6 = inlined_call_operand.vmem [shape: f32[8,4], index: 6, kind: input, shape index: {}]   ;;  %s1212_s7 = inlined_call_operand.vmem [shape: bf16[2,64,8], index: 7, kind: output, shape index: {}]   ;;  %s1213_s1 = inlined_call_operand.vmem [shape: s32[8], index: 1, kind: input, shape index: {}]  }
   0x1   :  { %s12_s26 = sshll.u32 %s1206_s0, 4  ;;  %s16_s29 = sshll.u32 %s1213_s1, 4  ;;  %s13_s26 = int_to_ptr.vmem [resolvable:$true] %s12_s26  ;;  %s17_s29 = int_to_ptr.vmem [resolvable:$true] %s16_s29 }
   0x2   :  { %s986_s30 = scalar_lea.vmem %s13_s26, 16  ;;  %p991_p1 = scmp.lt.s32.totalorder %s13_s26, %s13_s26 }
   0x3   :  { %p987_p0 = scmp.ne.s32.totalorder %s13_s26, %s986_s30  ;;  %p992_p2 = scmp.lt.s32.totalorder %s986_s30, %s986_s30 }
   0x5   :  { %p993_p3 = por %p992_p2, %p991_p1 }
   0x7   :  { %p994_p4 = pnand %p993_p3, %p987_p0 }
   0x9   :  { %997 = shalt.err (!%p994_p4)  }
   0xa   :  { %s1044_s8 = smov [#allocation5]   ;;  %s998_s9 = scalar_lea.vmem %s17_s29, 16 }
   0xb   :  { %15 = dma.vmem_to_smem %s13_s26, 16, %s1044_s8, [#allocation4] }
   0xc   :  { %p999_p5 = scmp.ne.s32.totalorder %s17_s29, %s998_s9  ;;  %p1003_p6 = scmp.lt.s32.totalorder %s17_s29, %s17_s29 }
   0xd   :  { %p1004_p7 = scmp.lt.s32.totalorder %s998_s9, %s998_s9 }
   0xf   :  { %p1005_p8 = por %p1004_p7, %p1003_p6 }
  0x11   :  { %p1006_p9 = pnand %p1005_p8, %p999_p5 }
  0x13   :  { %1009 = shalt.err (!%p1006_p9)  }
  0x14   :  { %s1045_s0 = smov [#allocation6]  }
  0x15   :  { %19 = dma.vmem_to_smem %s17_s29, 16, %s1045_s0, [#allocation4] }
  0x16   :  { %1026 = dma.done.wait [#allocation4], 32 }
  0x17   :  { %1027 = vsyncadd [#allocation4], 4294967264 }
  0x18   :  { %21 = sfence }
  0x19   :  { %s1095_s1 = smov 0   ;;  %s1097_s10 = smov 0  }
  0x1a   :  { %s1099_s11 = smov 0  }
  0x1b LB: > { %s39_s12 = sadd.s32 1, %s1034_s10  ;;  %p857_p10 = scmp.ge.s32.totalorder %s1038_s11, 1  ;;  %s1038_s11 = sphi %s1099_s11, %s27_s11   ;;  %s1034_s10 = sphi %s1097_s10, %s1215_s10   ;;  %s1030_s1 = sphi %s1095_s1, %s1214_s1  }
  0x1c   : > { %p41_p11 = scmp.ge.s32.totalorder %s39_s12, 2  ;;  %p258_p12 = scmp.lt.s32.totalorder %s1038_s11, 3 }
  0x1e   : > { %s1217_s12 = smov (%p41_p11, %s39_s12), 0  ;;  %p259_p13 = pnand %p857_p10, %p258_p12 }
  0x1f   : > { %p313_p0 = scmp.lt.s32.totalorder (!%p259_p13), %s1030_s1, 1  ;;  %v354_v0 = vld [vmem:[%s1211_s6] sm:$0xff] (!%p259_p13)  ;;  %s1136_s29 = smov (!%p259_p13), 0  }
  0x20   : > { %262 = sbr.rel (%p259_p13) target bundleno = 296 (0x128), region = 40 }
  0x27   : > { %s1219_s1 = smov (!%p313_p0, %s1030_s1), 1 }
  0x28   : > { %s883_s15 = sshll.u32 %s1219_s1, 3  ;;  %s884_s16 = sshll.u32 %s1219_s1, 5 }
  0x29   : > { %s1119_s19 = scalar_lea.vmem %s1207_s2, %s883_s15  ;;  %s1124_s22 = scalar_lea.vmem %s1209_s4, %s884_s16 }
  0x2a   : > { %s1129_s25 = scalar_lea.vmem %s1210_s5, %s884_s16  ;;  %s1134_s28 = scalar_lea.vmem %s1212_s7, %s884_s16 }
  0x2b LB: >> { %v1046_v1 = vmov 0.0   ;;  %s363_s30 = sld [smem:[#allocation5 + %s1042_s29]]  ;;  %vm1047_vm0 = vmmov 0   ;;  %vm374_vm1 = vcmask 1043456   ;;  %vm370_vm2 = vcmask 31744   ;;  %s866_s14 = sshll.u32 %s1042_s29, 3  ;;  %s1042_s29 = sphi %s1136_s29, %s360_s29  }
  0x2c   : >> { %937 = vmatprep.subr.mxu0 %v1046_v1  ;;  %942 = vmatprep.subr.mxu1 %v1046_v1  ;;  %s364_s8 = sld [smem:[#allocation6 + %s1042_s29]]  ;;  %vm449_vm3 = vcmask 64512   ;;  %s448_s15 = scalar_lea.vmem [#allocation2], %s866_s14 }
  0x2d   : >> { %939 = vmatprep.mubr.msk.f32.mxu0 %vm1047_vm0, %v1046_v1  ;;  %944 = vmatprep.mubr.msk.f32.mxu1 %vm1047_vm0, %v1046_v1  ;;  %s528_s16 = scalar_lea.vmem [#allocation3], %s866_s14  ;;  %s360_s29 = sadd.s32 1, %s1042_s29  }
  0x2e   : >> { %p357_p1 = scmp.ge.s32.totalorder %s360_s29, 8  }
  0x2f   : > { %v532_v10 = vld [vmem:[%s1208_s3 + $0x10] sm:$0xff] (%p357_p1)  ;;  %v530_v11 = vld [vmem:[%s1208_s3] sm:$0xff] (%p357_p1)  ;;  %v1048_v12 = vmov (%p357_p1), 0   ;;  %v533_v13 = vld [vmem:[%s1208_s3 + $0x18] sm:$0xff] (%p357_p1)  ;;  %vm698_vm4 = vcmask (%p357_p1), 60416  }
  0x30   : > { %985 = vset.pattern.permute.xlu1 (%p357_p1), %v1048_v12  ;;  %984 = vset.pattern.permute.xlu0 (%p357_p1), %v1048_v12  ;;  %v531_v14 = vld [vmem:[%s1208_s3 + $0x8] sm:$0xff] (%p357_p1)  ;;  %v534_v16 = vld [vmem:[%s1208_s3 + $0x20] sm:$0xff] (%p357_p1)  ;;  %v537_v17 = vld [vmem:[%s1208_s3 + $0x38] sm:$0xff] (%p357_p1) }
  0x31   : >> { %s867_s9 = sshll.u32 %s363_s30, 1  ;;  %574 = vperm.xlu1 (%p357_p1), %985, %v532_v10   ;;  %564 = vperm.xlu0 (%p357_p1), %984, %v530_v11   ;;  %v535_v15 = vld [vmem:[%s1208_s3 + $0x28] sm:$0xff] (%p357_p1)  ;;  %v536_v18 = vld [vmem:[%s1208_s3 + $0x30] sm:$0xff] (%p357_p1)  ;;  %v896_v26 = vld [vmem:[%s1124_s22] sm:$0xff] (%p357_p1)  }
  0x32   : >> { %s870_s0 = sshll.u32 %s364_s8, 1  ;;  %s367_s1 = scalar_lea.vmem %s1119_s19, %s867_s9  ;;  %v927_v24 = vld [vmem:[%s1124_s22 + $0x8] sm:$0xff] (%p357_p1)   ;;  %v897_v34 = vunpack.c.l.bf16 (%p357_p1), %v896_v26  ;;  %v912_v35 = vld [vmem:[%s1129_s25] sm:$0xff] (%p357_p1)   ;;  %v898_v51 = vunpack.c.h.bf16 (%p357_p1), %v896_v26 }
  0x33   : >> { %s452_s13 = scalar_lea.vmem %s1119_s19, %s870_s0  ;;  %v368_v2 = vld [vmem:[%s367_s1] sm:$0x3]  ;;  %v901_v31 = vunpack.c.l.bf16 (%p357_p1), %v927_v24  ;;  %v930_v32 = vld [vmem:[%s1129_s25 + $0x8] sm:$0xff] (%p357_p1)   ;;  %v913_v44 = vunpack.c.l.bf16 (%p357_p1), %v912_v35  ;;  %v902_v49 = vunpack.c.h.bf16 (%p357_p1), %v927_v24  ;;  %v914_v62 = vunpack.c.h.bf16 (%p357_p1), %v912_v35 }
  0x34   : >> { %v453_v3 = vld [vmem:[%s452_s13] sm:$0x3]  ;;  %v369_v4 = vunpack.c.l.bf16 %v368_v2  ;;  %v917_v42 = vunpack.c.l.bf16 (%p357_p1), %v930_v32  ;;  %v918_v61 = vunpack.c.h.bf16 (%p357_p1), %v930_v32 }
  0x35   : >> { %v454_v5 = vunpack.c.l.bf16 %v453_v3  ;;  %579 = vperm.xlu1 (%p357_p1), %985, %v533_v13   ;;  %569 = vperm.xlu0 (%p357_p1), %984, %v531_v14  }
  0x36   : >> { %938 = vmatpush3.msk.msra.mxu0 %vm374_vm1, %v369_v4 }
  0x37   : >> { %943 = vmatpush3.msk.msra.mxu1 %vm374_vm1, %v454_v5  ;;  %940 = vmatmul.mubr.msk.f32.vlgmr.msra.gmra.mrb[0].mxu0 %vm370_vm2, %v354_v0  ;;  %v928_v5 = vld [vmem:[%s1124_s22 + $0x10] sm:$0xff] (%p357_p1)  }
  0x38   : >> { %945 = vmatmul.mubr.msk.f32.vlgmr.msra.gmra.mrb[0].mxu1 %vm370_vm2, %v354_v0 }
  0x39   : > { %589 = vperm.xlu1 (%p357_p1), %985, %v535_v15   ;;  %584 = vperm.xlu0 (%p357_p1), %984, %v534_v16   ;;  %v929_v15 = vld [vmem:[%s1124_s22 + $0x18] sm:$0xff] (%p357_p1)   ;;  %v906_v16 = vunpack.c.h.bf16 (%p357_p1), %v928_v5 }
  0x3a   : > { %v910_v26 = vunpack.c.h.bf16 (%p357_p1), %v929_v15 }
  0x3d   : > { %599 = vperm.xlu1 (%p357_p1), %985, %v537_v17   ;;  %594 = vperm.xlu0 (%p357_p1), %984, %v536_v18   ;;  %v905_v18 = vunpack.c.l.bf16 (%p357_p1), %v928_v5 }
  0xb0   : > { %v575_v33 = vpop.permute.xlu1 (%p357_p1), %574  ;;  %v565_v36 = vpop.permute.xlu0 (%p357_p1), %564 }
  0xb4   : > { %v580_v50 = vpop.permute.xlu1 (%p357_p1), %579  ;;  %v570_v52 = vpop.permute.xlu0 (%p357_p1), %569 }
 0x106   : > { %359 = sbr.rel (!%p357_p1) target bundleno = 43 (0x2b), region = 90 }
 0x10a   : >> { %v444_v6 = vpop.f32.mrb[0].mxu0 }
 0x10b   : >> { %v524_v7 = vpop.f32.mrb[0].mxu1  ;;  %450 = vst.msk [vmem:[%s448_s15] sm:$0xff] %vm449_vm3, %v444_v6  ;;  %v941_v8 = vpop.f32.mrb[1].mxu0  ;;  %v931_v6 = vld [vmem:[%s1129_s25 + $0x10] sm:$0xff] (%p357_p1)  }
 0x10c   : >> { %529 = vst.msk [vmem:[%s528_s16] sm:$0xff] %vm449_vm3, %v524_v7  ;;  %v946_v9 = vpop.f32.mrb[1].mxu1  ;;  %v590_v7 = vpop.permute.xlu1 (%p357_p1), %589 }
 0x10d   : > { %v585_v8 = vpop.permute.xlu0 %584 }
 0x112   : > { %v540_v19 = vld [vmem:[#allocation2 + $0x10] sm:$0xff]  ;;  %v538_v21 = vld [vmem:[#allocation2] sm:$0xff]  ;;  %v541_v27 = vld [vmem:[#allocation2 + $0x18] sm:$0xff] }
 0x113   : > { %v548_v20 = vld [vmem:[#allocation3 + $0x10] sm:$0xff]  ;;  %v546_v22 = vld [vmem:[#allocation3] sm:$0xff]  ;;  %v549_v28 = vld [vmem:[#allocation3 + $0x18] sm:$0xff] }
 0x114   : > { %v556_v23 = vsub.f32 %v548_v20, %v540_v19  ;;  %v554_v25 = vsub.f32 %v546_v22, %v538_v21  ;;  %v539_v29 = vld [vmem:[#allocation2 + $0x8] sm:$0xff]  ;;  %v557_v39 = vsub.f32 %v549_v28, %v541_v27  ;;  %v542_v47 = vld [vmem:[#allocation2 + $0x20] sm:$0xff]  ;;  %v545_v53 = vld [vmem:[#allocation2 + $0x38] sm:$0xff]  ;;  %v922_v22 = vunpack.c.h.bf16 %v931_v6  ;;  %v600_v28 = vpop.permute.xlu1 %599 }
 0x115   : > { %v547_v30 = vld [vmem:[#allocation3 + $0x8] sm:$0xff]  ;;  %v550_v48 = vld [vmem:[#allocation3 + $0x20] sm:$0xff]  ;;  %v553_v58 = vld [vmem:[#allocation3 + $0x38] sm:$0xff] }
 0x116   : > { %v604_v37 = vmul.f32 %v575_v33, %v556_v23  ;;  %v602_v38 = vmul.f32 %v565_v36, %v554_v25  ;;  %v555_v40 = vsub.f32 %v547_v30, %v539_v29  ;;  %v543_v41 = vld [vmem:[#allocation2 + $0x28] sm:$0xff]  ;;  %v605_v56 = vmul.f32 %v580_v50, %v557_v39  ;;  %v544_v59 = vld [vmem:[#allocation2 + $0x30] sm:$0xff]  ;;  %v595_v30 = vpop.permute.xlu0 %594 }
 0x117   : > { %v551_v46 = vld [vmem:[#allocation3 + $0x28] sm:$0xff]  ;;  %v552_v60 = vld [vmem:[#allocation3 + $0x30] sm:$0xff]  ;;  %v558_v0 = vsub.f32 %v550_v48, %v542_v47  ;;  %v561_v9 = vsub.f32 %v553_v58, %v545_v53  ;;  %v921_v23 = vunpack.c.l.bf16 %v931_v6 }
 0x118   : > { %v612_v43 = vadd.f32 %v604_v37, %v540_v19  ;;  %v610_v45 = vadd.f32 %v602_v38, %v538_v21  ;;  %v603_v57 = vmul.f32 %v570_v52, %v555_v40  ;;  %v559_v63 = vsub.f32 %v551_v46, %v543_v41 }
 0x119   : > { %v613_v3 = vadd.f32 %v605_v56, %v541_v27  ;;  %v560_v10 = vsub.f32 %v552_v60, %v544_v59  ;;  %v606_v19 = vmul.f32 %v585_v8, %v558_v0  ;;  %v932_v27 = vld [vmem:[%s1129_s25 + $0x18] sm:$0xff]   ;;  %v609_v33 = vmul.f32 %v600_v28, %v561_v9 }
 0x11a   : > { %v636_v54 = vadd.f32 %v901_v31, %v612_v43  ;;  %v634_v55 = vadd.f32 %v897_v34, %v610_v45  ;;  %v611_v4 = vadd.f32 %v603_v57, %v539_v29  ;;  %v607_v17 = vmul.f32 %v590_v7, %v559_v63 }
 0x11b   : > { %v637_v13 = vadd.f32 %v902_v49, %v613_v3  ;;  %v614_v25 = vadd.f32 %v606_v19, %v542_v47  ;;  %v909_v29 = vunpack.c.l.bf16 %v929_v15  ;;  %v608_v34 = vmul.f32 %v595_v30, %v560_v10 }
 0x11c   : > { %v660_v1 = vadd.f32 %v917_v42, %v636_v54  ;;  %v658_v2 = vadd.f32 %v913_v44, %v634_v55  ;;  %v635_v14 = vadd.f32 %v898_v51, %v611_v4  ;;  %v615_v24 = vadd.f32 %v607_v17, %v543_v41 }
 0x11d   : > { %v661_v20 = vadd.f32 %v918_v61, %v637_v13  ;;  %v638_v36 = vadd.f32 %v905_v18, %v614_v25  ;;  %v926_v37 = vunpack.c.h.bf16 %v932_v27  ;;  %v617_v38 = vadd.f32 %v609_v33, %v545_v53 }
 0x11e   : > { %v889_v11 = vpack.c.bf16 %v660_v1, %v660_v1  ;;  %v887_v12 = vpack.c.bf16 %v658_v2, %v658_v2  ;;  %v659_v21 = vadd.f32 %v914_v62, %v635_v14  ;;  %v639_v35 = vadd.f32 %v906_v16, %v615_v24 }
 0x11f   : > { %v890_v31 = vpack.c.bf16 %v661_v20, %v661_v20  ;;  %v925_v39 = vunpack.c.l.bf16 %v932_v27  ;;  %v616_v40 = vadd.f32 %v608_v34, %v544_v59  ;;  %v662_v42 = vadd.f32 %v921_v23, %v638_v36 }
 0x120   : > { %701 = vst.msk [vmem:[%s1134_s28 + $0x8] sm:$0xf] %vm698_vm4, %v889_v11  ;;  %699 = vst.msk [vmem:[%s1134_s28] sm:$0xf] %vm698_vm4, %v887_v12  ;;  %v888_v32 = vpack.c.bf16 %v659_v21, %v659_v21  ;;  %v663_v41 = vadd.f32 %v922_v22, %v639_v35  ;;  %v641_v43 = vadd.f32 %v910_v26, %v617_v38 }
 0x121   : > { %702 = vst.msk [vmem:[%s1134_s28 + $0xc] sm:$0xf] %vm698_vm4, %v890_v31  ;;  %v640_v44 = vadd.f32 %v909_v29, %v616_v40  ;;  %v891_v46 = vpack.c.bf16 %v662_v42, %v662_v42 }
 0x122   : > { %700 = vst.msk [vmem:[%s1134_s28 + $0x4] sm:$0xf] %vm698_vm4, %v888_v32  ;;  %v892_v45 = vpack.c.bf16 %v663_v41, %v663_v41  ;;  %v665_v47 = vadd.f32 %v926_v37, %v641_v43 }
 0x123   : > { %v664_v48 = vadd.f32 %v925_v39, %v640_v44  ;;  %703 = vst.msk [vmem:[%s1134_s28 + $0x10] sm:$0xf] %vm698_vm4, %v891_v46 }
 0x124   : > { %704 = vst.msk [vmem:[%s1134_s28 + $0x14] sm:$0xf] %vm698_vm4, %v892_v45  ;;  %v894_v49 = vpack.c.bf16 %v665_v47, %v665_v47 }
 0x125   : > { %v893_v50 = vpack.c.bf16 %v664_v48, %v664_v48 }
 0x126   : > { %706 = vst.msk [vmem:[%s1134_s28 + $0x1c] sm:$0xf] %vm698_vm4, %v894_v49 }
 0x127   : > { %705 = vst.msk [vmem:[%s1134_s28 + $0x18] sm:$0xf] %vm698_vm4, %v893_v50 }
 0x128 PF: > { %s27_s11 = sadd.s32 1, %s1038_s11   ;;  %s1214_s1 = smov %s1034_s10 }
 0x129   : > { %p24_p2 = scmp.ge.s32.totalorder %s27_s11, 4   ;;  %s1215_s10 = smov %s1217_s12 }
 0x12b   :  { %26 = sbr.rel (!%p24_p2) target bundleno = 27 (0x1b), region = 101 }

// kernel: _lambda_.44
= control target key start
LH: loop header
LB: loop body
LE: loop exit
PB: predicated region body
PF: predicated region fallthrough
CT: control target
= control target key end

     0   :  { %s2453_s0 = inlined_call_operand.vmem [shape: s32[16], index: 0, kind: input, shape index: {}]   ;;  %s2454_s2 = inlined_call_operand.vmem [shape: bf16[2,8,8,8], index: 2, kind: input, shape index: {}]   ;;  %s2455_s3 = inlined_call_operand.vmem [shape: f32[256,1], index: 3, kind: input, shape index: {}]   ;;  %s2456_s4 = inlined_call_operand.vmem [shape: bf16[2,256,8], index: 4, kind: input, shape index: {}]   ;;  %s2457_s5 = inlined_call_operand.vmem [shape: f32[16,8], index: 5, kind: input, shape index: {}]   ;;  %s2458_s6 = inlined_call_operand.vmem [shape: f32[1,8], index: 6, kind: input, shape index: {}]   ;;  %s2459_s7 = inlined_call_operand.vmem [shape: f32[1,8], index: 7, kind: input, shape index: {}]   ;;  %s2460_s8 = inlined_call_operand.vmem [shape: bf16[8,8], index: 8, kind: input, shape index: {}]   ;;  %s2461_s9 = inlined_call_operand.vmem [shape: f32[1,8], index: 9, kind: input, shape index: {}]   ;;  %s2462_s10 = inlined_call_operand.vmem [shape: f32[1,8], index: 10, kind: input, shape index: {}]   ;;  %s2463_s11 = inlined_call_operand.vmem [shape: bf16[8,8], index: 11, kind: input, shape index: {}]   ;;  %s2464_s12 = inlined_call_operand.vmem [shape: bf16[2,256,8], index: 12, kind: output, shape index: {}]   ;;  %s2465_s1 = inlined_call_operand.vmem [shape: s32[16], index: 1, kind: input, shape index: {}]  }
   0x1   :  { %2466 = sst [smem:[#allocation10_spill]] %s2457_s5  ;;  %s17_s23 = sshll.u32 %s2453_s0, 4  ;;  %s18_s23 = int_to_ptr.vmem [resolvable:$true] %s17_s23 }
   0x2   :  { %s21_s26 = sshll.u32 %s2465_s1, 4  ;;  %s1912_s27 = scalar_lea.vmem %s18_s23, 16  ;;  %s22_s26 = int_to_ptr.vmem [resolvable:$true] %s21_s26 }
   0x3   :  { %p1913_p0 = scmp.ne.s32.totalorder %s18_s23, %s1912_s27  ;;  %p1917_p1 = scmp.lt.s32.totalorder %s18_s23, %s18_s23 }
   0x4   :  { %p1918_p2 = scmp.lt.s32.totalorder %s1912_s27, %s1912_s27 }
   0x6   :  { %p1919_p3 = por %p1918_p2, %p1917_p1 }
   0x8   :  { %p1920_p4 = pnand %p1919_p3, %p1913_p0 }
   0xa   :  { %1923 = shalt.err (!%p1920_p4)  }
   0xb   :  { %s1986_s28 = smov [#allocation5]   ;;  %s1924_s29 = scalar_lea.vmem %s22_s26, 16 }
   0xc   :  { %20 = dma.vmem_to_smem %s18_s23, 16, %s1986_s28, [#allocation4] }
   0xd   :  { %p1925_p5 = scmp.ne.s32.totalorder %s22_s26, %s1924_s29  ;;  %p1929_p6 = scmp.lt.s32.totalorder %s22_s26, %s22_s26 }
   0xe   :  { %p1930_p7 = scmp.lt.s32.totalorder %s1924_s29, %s1924_s29 }
  0x10   :  { %p1931_p8 = por %p1930_p7, %p1929_p6 }
  0x12   :  { %p1932_p9 = pnand %p1931_p8, %p1925_p5 }
  0x14   :  { %1935 = shalt.err (!%p1932_p9)  }
  0x15   :  { %s1987_s0 = smov [#allocation6]  }
  0x16   :  { %24 = dma.vmem_to_smem %s22_s26, 16, %s1987_s0, [#allocation4] }
  0x17   :  { %1960 = dma.done.wait [#allocation4], 32 }
  0x18   :  { %1961 = vsyncadd [#allocation4], 4294967264 }
  0x19   :  { %26 = sfence }
  0x1a   :  { %s2060_s1 = smov 0   ;;  %s2062_s30 = smov 0  }
  0x1b   :  { %s2064_s13 = smov 0   ;;  %s2066_s14 = smov 0  }
  0x1c   :  { %s2068_s15 = smov 0  }
  0x1d LB: > { %s41_s16 = sadd.s32 1, %s1972_s13  ;;  %s44_s17 = sadd.s32 1, %s1976_s14  ;;  %s1980_s15 = sphi %s2068_s15, %s32_s15   ;;  %s1976_s14 = sphi %s2066_s14, %s2475_s14   ;;  %s1972_s13 = sphi %s2064_s13, %s2474_s13   ;;  %s1968_s30 = sphi %s2062_s30, %s2473_s30   ;;  %s1964_s1 = sphi %s2060_s1, %s2472_s1  }
  0x1e   : > { %p42_p10 = scmp.ge.s32.totalorder %s41_s16, 2  ;;  %p1594_p11 = scmp.ge.s32.totalorder %s1980_s15, 1 }
  0x1f   : > { %p366_p12 = scmp.lt.s32.totalorder %s1980_s15, 5 }
  0x20   : > { %s2477_s16 = smov (%p42_p10, %s41_s16), 0  ;;  %s2479_s17 = smov (!%p42_p10, %s44_s17), %s1976_s14 }
  0x21   : > { %2467 = sst [smem:[#allocation8_spill]] %s2477_s16  ;;  %p367_p13 = pnand %p1594_p11, %p366_p12 }
  0x22   : > { %p46_p0 = scmp.ge.s32.totalorder %s2479_s17, 2  ;;  %p422_p1 = scmp.lt.s32.totalorder (!%p367_p13), %s1968_s30, 1 }
  0x23   : > { %370 = sbr.rel (%p367_p13) target bundleno = 801 (0x321), region = 60  ;;  %s1597_s18 = sshll.u32 (!%p367_p13), %s1964_s1, 4 }
  0x24   : > { %s2481_s17 = smov (%p46_p0, %s2479_s17), 0  ;;  %s2469_s5 = sld [smem:[#allocation10_spill]] (!%p367_p13) }
  0x25   : > { %2468 = sst [smem:[#allocation9_spill]] %s2481_s17  ;;  %p428_p2 = scmp.lt.s32.totalorder (!%p367_p13), %s1597_s18, 31 }
  0x26   : > { %s2119_s24 = smov (!%p367_p13), 0  }
  0x2a   : > { %v454_v0 = vld [vmem:[%s2469_s5] sm:$0xff]  ;;  %v455_v1 = vld [vmem:[%s2469_s5 + $0x8] sm:$0xff]  ;;  %s2483_s30 = smov (!%p422_p1, %s1968_s30), 1  ;;  %s2485_s18 = smov (!%p428_p2, %s1597_s18), 31 }
  0x2b   : > { %s1667_s23 = sshll.u32 %s2483_s30, 5  ;;  %s1598_s27 = sshll.u32 %s2485_s18, 3 }
  0x2c   : > { %s2102_s26 = scalar_lea.vmem %s2454_s2, %s1667_s23  ;;  %s2107_s0 = scalar_lea.vmem %s2455_s3, %s1598_s27 }
  0x2d   : > { %s439_s19 = sadd.s32 %s1667_s23, %s2485_s18 }
  0x2e   : > { %s1601_s20 = sshll.u32 %s439_s19, 2 }
  0x2f   : > { %s2112_s22 = scalar_lea.vmem %s2456_s4, %s1601_s20  ;;  %s2117_s16 = scalar_lea.vmem %s2464_s12, %s1601_s20 }
  0x30 LB: >> { %s1605_s18 = sshll.u32 %s1964_s1, 3  ;;  %vm471_vm0 = vcmask 64512   ;;  %s1606_s19 = sshll.u32 %s1984_s24, 4  ;;  %s1984_s24 = sphi %s2119_s24, %s461_s24  }
  0x31   : >> { %1749 = vmatprep.mubr.msk.f32.mxu0 %vm471_vm0, %v454_v0  ;;  %1754 = vmatprep.mubr.msk.f32.mxu1 %vm471_vm0, %v454_v0  ;;  %s463_s5 = sadd.s32 %s1984_s24, %s1605_s18  ;;  %s553_s20 = scalar_lea.vmem [#allocation2], %s1606_s19 }
  0x32   : >> { %s464_s17 = sld [smem:[#allocation5 + %s463_s5]]  ;;  %s635_s21 = scalar_lea.vmem [#allocation3], %s1606_s19 }
  0x33   : >> { %s465_s23 = sld [smem:[#allocation6 + %s463_s5]]  ;;  %s461_s24 = sadd.s32 1, %s1984_s24  }
  0x34   : >> { %p458_p3 = scmp.ge.s32.totalorder %s461_s24, 8  }
  0x35   : > { %v640_v10 = vld [vmem:[%s2107_s0 + $0x10] sm:$0xff] (%p458_p3)  ;;  %v638_v11 = vld [vmem:[%s2107_s0] sm:$0xff] (%p458_p3)  ;;  %v1988_v12 = vmov (%p458_p3), 0   ;;  %v641_v13 = vld [vmem:[%s2107_s0 + $0x18] sm:$0xff] (%p458_p3)  ;;  %vm958_vm1 = vcmask (%p458_p3), 1043456   ;;  %vm1446_vm2 = vcmask (%p458_p3), 60416  }
  0x36   : > { %1847 = vset.pattern.permute.xlu1 (%p458_p3), %v1988_v12  ;;  %1846 = vset.pattern.permute.xlu0 (%p458_p3), %v1988_v12  ;;  %v639_v14 = vld [vmem:[%s2107_s0 + $0x8] sm:$0xff] (%p458_p3)  ;;  %v642_v16 = vld [vmem:[%s2107_s0 + $0x20] sm:$0xff] (%p458_p3)  ;;  %v645_v17 = vld [vmem:[%s2107_s0 + $0x38] sm:$0xff] (%p458_p3) }
  0x37   : > { %746 = vperm.xlu1 (%p458_p3), %1847, %v640_v10   ;;  %736 = vperm.xlu0 (%p458_p3), %1846, %v638_v11   ;;  %v643_v15 = vld [vmem:[%s2107_s0 + $0x28] sm:$0xff] (%p458_p3)  ;;  %v644_v18 = vld [vmem:[%s2107_s0 + $0x30] sm:$0xff] (%p458_p3)  ;;  %v646_v20 = vld [vmem:[%s2107_s0 + $0x40] sm:$0xff] (%p458_p3) }
  0x38   : >> { %s1607_s25 = sshll.u32 %s464_s17, 2  ;;  %v647_v19 = vld [vmem:[%s2107_s0 + $0x48] sm:$0xff] (%p458_p3)  ;;  %v932_v21 = vld [vmem:[%s2460_s8] sm:$0xf] (%p458_p3)  ;;  %v649_v23 = vld [vmem:[%s2107_s0 + $0x58] sm:$0xff] (%p458_p3) }
  0x39   : >> { %s1610_s27 = sshll.u32 %s465_s23, 2  ;;  %s468_s28 = scalar_lea.vmem %s2102_s26, %s1607_s25  ;;  %v960_v22 = vsel (%p458_p3), %vm958_vm1, %v932_v21, 0  ;;  %v648_v24 = vld [vmem:[%s2107_s0 + $0x50] sm:$0xff] (%p458_p3)  ;;  %v651_v25 = vld [vmem:[%s2107_s0 + $0x68] sm:$0xff] (%p458_p3)  ;;  %v650_v26 = vld [vmem:[%s2107_s0 + $0x60] sm:$0xff] (%p458_p3) }
  0x3a   : >> { %s557_s29 = scalar_lea.vmem %s2102_s26, %s1610_s27  ;;  %v469_v2 = vld [vmem:[%s468_s28] sm:$0xf]  ;;  %v653_v27 = vld [vmem:[%s2107_s0 + $0x78] sm:$0xff] (%p458_p3)  ;;  %v652_v28 = vld [vmem:[%s2107_s0 + $0x70] sm:$0xff] (%p458_p3) }
  0x3b   : >> { %v558_v3 = vld [vmem:[%s557_s29] sm:$0xf]  ;;  %v470_v4 = vunpack.c.l.bf16 %v469_v2  ;;  %751 = vperm.xlu1 (%p458_p3), %1847, %v641_v13   ;;  %741 = vperm.xlu0 (%p458_p3), %1846, %v639_v14   ;;  %v2162_v33 = vld [vmem:[%s2112_s22 + $0x8] sm:$0xff] (%p458_p3)   ;;  %v2170_v55 = vld [vmem:[%s2112_s22 + $0x10] sm:$0xff] (%p458_p3)  }
  0x3c   : >> { %v559_v5 = vunpack.c.l.bf16 %v558_v3  ;;  %v2165_v35 = vld [vmem:[%s2112_s22] sm:$0xff] (%p458_p3)   ;;  %v1690_v41 = vunpack.c.l.bf16 (%p458_p3), %v2162_v33  ;;  %v1691_v58 = vunpack.c.h.bf16 (%p458_p3), %v2162_v33  ;;  %v2177_v0 = vld [vmem:[%s2112_s22 + $0x18] sm:$0xff] (%p458_p3)   ;;  %v1695_v10 = vunpack.c.h.bf16 (%p458_p3), %v2170_v55 }
  0x3d   : >> { %1747 = vmatprep.subr.mxu0 %v470_v4  ;;  %v1686_v43 = vunpack.c.l.bf16 (%p458_p3), %v2165_v35  ;;  %v1687_v60 = vunpack.c.h.bf16 (%p458_p3), %v2165_v35  ;;  %v2182_v3 = vld [vmem:[%s2458_s6] ss:$0 sm:$0xff] (%p458_p3)  ;;  %v1694_v11 = vunpack.c.l.bf16 (%p458_p3), %v2170_v55 }
  0x3e   : >> { %1752 = vmatprep.subr.mxu1 %v559_v5  ;;  %1748 = vmatpush3.msra.mxu0 %v470_v4 }
  0x3f   : >> { %1753 = vmatpush3.msra.mxu1 %v559_v5  ;;  %1750 = vmatmul.mubr.msk.f32.vlgmr.msra.gmra.mrb[0].mxu0 %vm471_vm0, %v455_v1 }
  0x40   : >> { %1755 = vmatmul.mubr.msk.f32.vlgmr.msra.gmra.mrb[0].mxu1 %vm471_vm0, %v455_v1  ;;  %761 = vperm.xlu1 (%p458_p3), %1847, %v643_v15  }
  0x41   : > { %756 = vperm.xlu0 (%p458_p3), %1846, %v642_v16   ;;  %1793 = vmatprep.subr.msk.bf16.mxu0 (%p458_p3), %vm958_vm1, %v932_v21 }
  0x42   : > { %1758 = vmatpush3.bf16.msra.mxu0 (%p458_p3), %v960_v22 }
  0x44   : > { %771 = vperm.xlu1 (%p458_p3), %1847, %v645_v17   ;;  %v1699_v17 = vunpack.c.h.bf16 (%p458_p3), %v2177_v0 }
  0x45   : > { %766 = vperm.xlu0 (%p458_p3), %1846, %v644_v18  }
  0x48   : > { %781 = vperm.xlu1 (%p458_p3), %1847, %v647_v19   ;;  %v2199_v19 = vld [vmem:[%s2112_s22 + $0x20] sm:$0xff] (%p458_p3)  }
  0x49   : > { %776 = vperm.xlu0 (%p458_p3), %1846, %v646_v20  }
  0x4c   : > { %791 = vperm.xlu1 (%p458_p3), %1847, %v649_v23  }
  0x4d   : > { %786 = vperm.xlu0 (%p458_p3), %1846, %v648_v24  }
  0x50   : > { %801 = vperm.xlu1 (%p458_p3), %1847, %v651_v25   ;;  %v1698_v25 = vunpack.c.l.bf16 (%p458_p3), %v2177_v0 }
  0x51   : > { %796 = vperm.xlu0 (%p458_p3), %1846, %v650_v26  }
  0x54   : > { %811 = vperm.xlu1 (%p458_p3), %1847, %v653_v27  }
  0x55   : > { %806 = vperm.xlu0 (%p458_p3), %1846, %v652_v28   ;;  %v2213_v28 = vld [vmem:[%s2459_s7] ss:$0 sm:$0xff] (%p458_p3) }
  0xb6   : > { %v747_v42 = vpop.permute.xlu1 (%p458_p3), %746  ;;  %v737_v44 = vpop.permute.xlu0 (%p458_p3), %736 }
  0xba   : > { %v752_v59 = vpop.permute.xlu1 (%p458_p3), %751  ;;  %v742_v61 = vpop.permute.xlu0 (%p458_p3), %741 }
  0xbf   : > { %v762_v23 = vpop.permute.xlu1 (%p458_p3), %761 }
  0xc0   : > { %v757_v24 = vpop.permute.xlu0 (%p458_p3), %756 }
 0x10f   : > { %460 = sbr.rel (!%p458_p3) target bundleno = 48 (0x30), region = 107 }
 0x112   : >> { %v1751_v6 = vpop.f32.mrb[0].mxu0 }
 0x113   : >> { %v1756_v7 = vpop.f32.mrb[0].mxu1  ;;  %555 = vst.msk [vmem:[%s553_s20 + $0x8] sm:$0xff] %vm471_vm0, %v1751_v6  ;;  %v544_v8 = vpop.f32.mrb[1].mxu0 }
 0x114   : >> { %637 = vst.msk [vmem:[%s635_s21 + $0x8] sm:$0xff] %vm471_vm0, %v1756_v7  ;;  %v626_v9 = vpop.f32.mrb[1].mxu1  ;;  %554 = vst.msk [vmem:[%s553_s20] sm:$0xff] %vm471_vm0, %v544_v8 }
 0x115   : >> { %636 = vst.msk [vmem:[%s635_s21] sm:$0xff] %vm471_vm0, %v626_v9 }
 0x11b   : > { %v656_v29 = vld [vmem:[#allocation2 + $0x10] sm:$0xff]  ;;  %v654_v31 = vld [vmem:[#allocation2] sm:$0xff]  ;;  %v657_v37 = vld [vmem:[#allocation2 + $0x18] sm:$0xff] }
 0x11c   : > { %v672_v30 = vld [vmem:[#allocation3 + $0x10] sm:$0xff]  ;;  %v670_v32 = vld [vmem:[#allocation3] sm:$0xff]  ;;  %v673_v38 = vld [vmem:[#allocation3 + $0x18] sm:$0xff] }
 0x11d   : > { %v720_v34 = vsub.f32 %v672_v30, %v656_v29  ;;  %v718_v36 = vsub.f32 %v670_v32, %v654_v31  ;;  %v655_v39 = vld [vmem:[#allocation2 + $0x8] sm:$0xff]  ;;  %v721_v48 = vsub.f32 %v673_v38, %v657_v37  ;;  %v658_v51 = vld [vmem:[#allocation2 + $0x20] sm:$0xff]  ;;  %v2172_v56 = vld [vmem:[#allocation2 + $0x38] sm:$0xff]  ;;  %v1703_v38 = vunpack.c.h.bf16 %v2199_v19 }
 0x11e   : > { %v671_v40 = vld [vmem:[#allocation3 + $0x8] sm:$0xff]  ;;  %v674_v52 = vld [vmem:[#allocation3 + $0x20] sm:$0xff]  ;;  %v677_v57 = vld [vmem:[#allocation3 + $0x38] sm:$0xff] }
 0x11f   : > { %v659_v45 = vld [vmem:[#allocation2 + $0x28] sm:$0xff]  ;;  %v816_v46 = vmul.f32 %v747_v42, %v720_v34  ;;  %v814_v47 = vmul.f32 %v737_v44, %v718_v36  ;;  %v719_v49 = vsub.f32 %v671_v40, %v655_v39  ;;  %v722_v63 = vsub.f32 %v674_v52, %v658_v51  ;;  %v660_v1 = vld [vmem:[#allocation2 + $0x30] sm:$0xff]  ;;  %v2195_v13 = vld [vmem:[#allocation2 + $0x40] sm:$0xff]  ;;  %v772_v52 = vpop.permute.xlu1 %771 }
 0x120   : > { %v675_v50 = vld [vmem:[#allocation3 + $0x28] sm:$0xff]  ;;  %v676_v2 = vld [vmem:[#allocation3 + $0x30] sm:$0xff]  ;;  %v817_v6 = vmul.f32 %v752_v59, %v721_v48  ;;  %v725_v12 = vsub.f32 %v677_v57, %v2172_v56  ;;  %v678_v14 = vld [vmem:[#allocation3 + $0x40] sm:$0xff] }
 0x121   : > { %v832_v53 = vadd.f32 %v816_v46, %v656_v29  ;;  %v830_v54 = vadd.f32 %v814_v47, %v654_v31  ;;  %v723_v62 = vsub.f32 %v675_v50, %v659_v45  ;;  %v815_v7 = vmul.f32 %v742_v61, %v719_v49  ;;  %v2188_v8 = vld [vmem:[#allocation2 + $0x48] sm:$0xff]  ;;  %v2201_v20 = vld [vmem:[#allocation2 + $0x58] sm:$0xff]  ;;  %v2222_v36 = vld [vmem:[#allocation2 + $0x50] sm:$0xff] }
 0x122   : > { %v2190_v9 = vld [vmem:[#allocation3 + $0x48] sm:$0xff]  ;;  %v833_v15 = vadd.f32 %v817_v6, %v657_v37  ;;  %v724_v18 = vsub.f32 %v676_v2, %v660_v1  ;;  %v2203_v21 = vld [vmem:[#allocation3 + $0x58] sm:$0xff]  ;;  %v818_v32 = vmul.f32 %v757_v24, %v722_v63  ;;  %v2224_v37 = vld [vmem:[#allocation3 + $0x50] sm:$0xff]  ;;  %v726_v40 = vsub.f32 %v678_v14, %v2195_v13 }
 0x123   : > { %v848_v4 = vadd.f32 %v1690_v41, %v832_v53  ;;  %v846_v5 = vadd.f32 %v1686_v43, %v830_v54  ;;  %v831_v16 = vadd.f32 %v815_v7, %v655_v39  ;;  %v727_v26 = vsub.f32 %v2190_v9, %v2188_v8  ;;  %v2220_v34 = vld [vmem:[%s2112_s22 + $0x28] sm:$0xff]   ;;  %v767_v53 = vpop.permute.xlu0 %766 }
 0x124   : > { %v849_v29 = vadd.f32 %v1691_v58, %v833_v15  ;;  %v819_v31 = vmul.f32 %v762_v23, %v723_v62  ;;  %v1702_v39 = vunpack.c.l.bf16 %v2199_v19  ;;  %v729_v42 = vsub.f32 %v2203_v21, %v2201_v20  ;;  %v2233_v49 = vld [vmem:[#allocation2 + $0x68] sm:$0xff] }
 0x125   : > { %v871_v22 = vmul.f32 %v2182_v3, %v848_v4  ;;  %v869_v27 = vmul.f32 %v2182_v3, %v846_v5  ;;  %v847_v30 = vadd.f32 %v1687_v60, %v831_v16  ;;  %v834_v47 = vadd.f32 %v818_v32, %v658_v51  ;;  %v2235_v50 = vld [vmem:[#allocation3 + $0x68] sm:$0xff]  ;;  %v782_v16 = vpop.permute.xlu1 %781  ;;  %v666_v32 = vld [vmem:[#allocation2 + $0x60] sm:$0xff] }
 0x126   : > { %v872_v44 = vmul.f32 %v2182_v3, %v849_v29  ;;  %v835_v46 = vadd.f32 %v819_v31, %v659_v45  ;;  %v1707_v57 = vunpack.c.h.bf16 %v2220_v34  ;;  %v728_v61 = vsub.f32 %v2224_v37, %v2222_v36  ;;  %v2259_v31 = vld [vmem:[%s2112_s22 + $0x30] sm:$0xff]   ;;  %v682_v37 = vld [vmem:[#allocation3 + $0x60] sm:$0xff] }
 0x127   : > { %v870_v48 = vmul.f32 %v2182_v3, %v847_v30  ;;  %v892_v54 = vadd.f32 %v2213_v28, %v869_v27  ;;  %v894_v59 = vadd.f32 %v2213_v28, %v871_v22  ;;  %v850_v51 = vadd.f32 %v1694_v11, %v834_v47 }
 0x128   : > { %v851_v45 = vadd.f32 %v1695_v10, %v835_v46  ;;  %v821_v62 = vmul.f32 %v772_v52, %v725_v12  ;;  %v820_v63 = vmul.f32 %v767_v53, %v724_v18  ;;  %v895_v4 = vadd.f32 %v2213_v28, %v872_v44  ;;  %v777_v12 = vpop.permute.xlu0 %776 }
 0x129   : > { %v893_v2 = vadd.f32 %v2213_v28, %v870_v48  ;;  %v1706_v5 = vunpack.c.l.bf16 %v2220_v34  ;;  %v731_v6 = vsub.f32 %v2235_v50, %v2233_v49  ;;  %v873_v9 = vmul.f32 %v2182_v3, %v850_v51  ;;  %v669_v51 = vld [vmem:[#allocation2 + $0x78] sm:$0xff] }
 0x12a   : > { %v874_v7 = vmul.f32 %v2182_v3, %v851_v45  ;;  %v837_v14 = vadd.f32 %v821_v62, %v2172_v56  ;;  %v836_v15 = vadd.f32 %v820_v63, %v660_v1  ;;  %v908_v18 = vmax.f32 %v892_v54, 0.0 }
 0x12b   : > { %v909_v21 = vmax.f32 %v893_v2, 0.0  ;;  %v910_v22 = vmax.f32 %v894_v59, 0.0  ;;  %v911_v23 = vmax.f32 %v895_v4, 0.0  ;;  %v823_v29 = vmul.f32 %v782_v16, %v727_v26  ;;  %v792_v26 = vpop.permute.xlu1 %791  ;;  %v668_v4 = vld [vmem:[#allocation2 + $0x70] sm:$0xff] }
 0x12c   : > { %v853_v24 = vadd.f32 %v1699_v17, %v837_v14  ;;  %v852_v27 = vadd.f32 %v1698_v25, %v836_v15  ;;  %v822_v30 = vmul.f32 %v777_v12, %v726_v40  ;;  %v896_v44 = vadd.f32 %v2213_v28, %v873_v9  ;;  %v787_v40 = vpop.permute.xlu0 %786 }
 0x12d   : > { %v924_v56 = vpack.c.bf16 %v909_v21, %v908_v18  ;;  %v925_v1 = vpack.c.bf16 %v911_v23, %v910_v22  ;;  %v897_v46 = vadd.f32 %v2213_v28, %v874_v7  ;;  %v839_v50 = vadd.f32 %v823_v29, %v2188_v8  ;;  %v684_v7 = vld [vmem:[#allocation3 + $0x70] sm:$0xff] }
 0x12e   : > { %v876_v47 = vmul.f32 %v2182_v3, %v853_v24  ;;  %v875_v48 = vmul.f32 %v2182_v3, %v852_v27  ;;  %v838_v52 = vadd.f32 %v822_v30, %v2195_v13  ;;  %v912_v53 = vmax.f32 %v896_v44, 0.0  ;;  %v685_v13 = vld [vmem:[#allocation3 + $0x78] sm:$0xff] }
 0x12f   : > { %1759 = vmatprep.mubr.msk.bf16.mxu0 %vm471_vm0, %v924_v56  ;;  %v913_v54 = vmax.f32 %v897_v46, 0.0  ;;  %v1711_v59 = vunpack.c.h.bf16 %v2259_v31  ;;  %v730_v45 = vsub.f32 %v682_v37, %v666_v32  ;;  %v855_v62 = vadd.f32 %v1703_v38, %v839_v50  ;;  %v2287_v44 = vld [vmem:[%s2112_s22 + $0x38] sm:$0xff]  }
 0x130   : > { %v854_v63 = vadd.f32 %v1702_v39, %v838_v52  ;;  %v825_v2 = vmul.f32 %v792_v26, %v729_v42  ;;  %1760 = vmatmul.mubr.msk.bf16.vlgmr.msra.gmra.mrb[0].mxu0 %vm471_vm0, %v925_v1  ;;  %v824_v8 = vmul.f32 %v787_v40, %v728_v61  ;;  %v1710_v14 = vunpack.c.l.bf16 %v2259_v31  ;;  %v802_v61 = vpop.permute.xlu1 %801  ;;  %v797_v22 = vpop.permute.xlu0 %796 }
 0x131   : > { %v926_v9 = vpack.c.bf16 %v913_v54, %v912_v53  ;;  %v898_v15 = vadd.f32 %v2213_v28, %v875_v48  ;;  %v899_v16 = vadd.f32 %v2213_v28, %v876_v47  ;;  %v878_v12 = vmul.f32 %v2182_v3, %v855_v62 }
 0x132   : > { %v877_v18 = vmul.f32 %v2182_v3, %v854_v63  ;;  %v841_v42 = vadd.f32 %v825_v2, %v2201_v20  ;;  %v840_v21 = vadd.f32 %v824_v8, %v2222_v36  ;;  %v733_v23 = vsub.f32 %v685_v13, %v669_v51 }
 0x133   : > { %1763 = vmatprep.mubr.msk.bf16.mxu0 %vm471_vm0, %v926_v9  ;;  %v914_v24 = vmax.f32 %v898_v15, 0.0  ;;  %v915_v27 = vmax.f32 %v899_v16, 0.0  ;;  %v732_v29 = vsub.f32 %v684_v7, %v668_v4  ;;  %v827_v56 = vmul.f32 %v802_v61, %v731_v6 }
 0x134   : > { %v857_v30 = vadd.f32 %v1707_v57, %v841_v42  ;;  %v856_v37 = vadd.f32 %v1706_v5, %v840_v21  ;;  %v826_v1 = vmul.f32 %v797_v22, %v730_v45  ;;  %v900_v36 = vadd.f32 %v2213_v28, %v877_v18  ;;  %v812_v40 = vpop.permute.xlu1 %811  ;;  %v807_v53 = vpop.permute.xlu0 %806 }
 0x135   : > { %v927_v20 = vpack.c.bf16 %v915_v27, %v914_v24  ;;  %v901_v46 = vadd.f32 %v2213_v28, %v878_v12  ;;  %v843_v50 = vadd.f32 %v827_v56, %v2233_v49  ;;  %v1715_v26 = vunpack.c.h.bf16 %v2287_v44 }
 0x136   : > { %v880_v47 = vmul.f32 %v2182_v3, %v857_v30  ;;  %v879_v48 = vmul.f32 %v2182_v3, %v856_v37  ;;  %v842_v52 = vadd.f32 %v826_v1, %v666_v32  ;;  %v1714_v6 = vunpack.c.l.bf16 %v2287_v44 }
 0x137   : > { %v916_v54 = vmax.f32 %v900_v36, 0.0  ;;  %v917_v45 = vmax.f32 %v901_v46, 0.0  ;;  %v859_v62 = vadd.f32 %v1711_v59, %v843_v50  ;;  %v829_v2 = vmul.f32 %v812_v40, %v733_v23 }
 0x138   : > { %v858_v63 = vadd.f32 %v1710_v14, %v842_v52  ;;  %1764 = vmatmul.mubr.msk.bf16.gmra.mrb[4].mxu0 %vm471_vm0, %v927_v20  ;;  %v828_v8 = vmul.f32 %v807_v53, %v732_v29  ;;  %v902_v32 = vadd.f32 %v2213_v28, %v879_v48  ;;  %v903_v13 = vadd.f32 %v2213_v28, %v880_v47  ;;  %v2332_v47 = vld [vmem:[%s2462_s10] ss:$0 sm:$0xff] }
 0x139   : > { %v928_v49 = vpack.c.bf16 %v917_v45, %v916_v54  ;;  %v882_v7 = vmul.f32 %v2182_v3, %v859_v62  ;;  %v845_v15 = vadd.f32 %v829_v2, %v669_v51 }
 0x13a   : > { %v881_v9 = vmul.f32 %v2182_v3, %v858_v63  ;;  %v844_v16 = vadd.f32 %v828_v8, %v668_v4  ;;  %v918_v12 = vmax.f32 %v902_v32, 0.0  ;;  %v919_v18 = vmax.f32 %v903_v13, 0.0 }
 0x13b   : > { %1767 = vmatprep.mubr.msk.bf16.mxu0 %vm471_vm0, %v928_v49  ;;  %v861_v42 = vadd.f32 %v1715_v26, %v845_v15  ;;  %v905_v22 = vadd.f32 %v2213_v28, %v882_v7 }
 0x13c   : > { %v860_v21 = vadd.f32 %v1714_v6, %v844_v16  ;;  %v904_v61 = vadd.f32 %v2213_v28, %v881_v9  ;;  %v929_v23 = vpack.c.bf16 %v919_v18, %v918_v12 }
 0x13d   : > { %v884_v24 = vmul.f32 %v2182_v3, %v861_v42  ;;  %v921_v27 = vmax.f32 %v905_v22, 0.0 }
 0x13e   : > { %v883_v51 = vmul.f32 %v2182_v3, %v860_v21  ;;  %v920_v4 = vmax.f32 %v904_v61, 0.0  ;;  %v1129_v3 = vld [vmem:[%s2463_s11] sm:$0xf] }
 0x13f   : > { %v907_v37 = vadd.f32 %v2213_v28, %v884_v24  ;;  %1794 = vmatprep.subr.msk.bf16.mxu1 %vm958_vm1, %v1129_v3  ;;  %v1155_v36 = vsel %vm958_vm1, %v1129_v3, 0 }
 0x140   : > { %1768 = vmatmul.mubr.msk.bf16.gmra.mrb[8].mxu0 %vm471_vm0, %v929_v23  ;;  %v930_v29 = vpack.c.bf16 %v921_v27, %v920_v4  ;;  %v906_v30 = vadd.f32 %v2213_v28, %v883_v51  ;;  %1776 = vmatpush3.bf16.msra.mxu1 %v1155_v36  ;;  %v2327_v28 = vld [vmem:[%s2461_s9] ss:$0 sm:$0xff] }
 0x141   : > { %v923_v1 = vmax.f32 %v907_v37, 0.0 }
 0x142   : > { %1771 = vmatprep.mubr.msk.bf16.mxu0 %vm471_vm0, %v930_v29  ;;  %v922_v56 = vmax.f32 %v906_v30, 0.0 }
 0x144   : > { %v931_v20 = vpack.c.bf16 %v923_v1, %v922_v56 }
 0x148   : > { %1772 = vmatmul.mubr.msk.bf16.gmra.mrb[12].mxu0 %vm471_vm0, %v931_v20 }
 0x203   : > { %v1761_v46 = vpop.f32.mrb[0].mxu0 }
 0x204   : > { %v1068_v48 = vmul.f32 %v1761_v46, %v2327_v28  ;;  %v996_v50 = vpop.f32.mrb[1].mxu0 }
 0x205   : > { %v1066_v52 = vmul.f32 %v2327_v28, %v996_v50  ;;  %v1762_v40 = vpop.f32.mrb[2].mxu0 }
 0x206   : > { %v1091_v53 = vadd.f32 %v2332_v47, %v1068_v48  ;;  %v1069_v54 = vmul.f32 %v1762_v40, %v2327_v28  ;;  %v999_v45 = vpop.f32.mrb[3].mxu0 }
 0x207   : > { %v1067_v62 = vmul.f32 %v2327_v28, %v999_v45  ;;  %v1089_v63 = vadd.f32 %v2332_v47, %v1066_v52 }
 0x208   : > { %v1092_v2 = vadd.f32 %v2332_v47, %v1069_v54  ;;  %v1107_v49 = vmax.f32 %v1091_v53, 0.0 }
 0x209   : > { %v1090_v8 = vadd.f32 %v2332_v47, %v1067_v62  ;;  %v1105_v7 = vmax.f32 %v1089_v63, 0.0 }
 0x20a   : > { %v1108_v32 = vmax.f32 %v1092_v2, 0.0 }
 0x20b   : > { %v1765_v13 = vpop.f32.mrb[4].mxu0  ;;  %v1106_v9 = vmax.f32 %v1090_v8, 0.0 }
 0x20c   : > { %v1072_v15 = vmul.f32 %v1765_v13, %v2327_v28  ;;  %v1012_v16 = vpop.f32.mrb[5].mxu0  ;;  %v1122_v12 = vpack.c.bf16 %v1108_v32, %v1107_v49 }
 0x20d   : > { %v1070_v18 = vmul.f32 %v2327_v28, %v1012_v16  ;;  %v1766_v42 = vpop.f32.mrb[6].mxu0  ;;  %v1121_v21 = vpack.c.bf16 %v1106_v9, %v1105_v7 }
 0x20e   : > { %v1095_v61 = vadd.f32 %v2332_v47, %v1072_v15  ;;  %v1073_v22 = vmul.f32 %v1766_v42, %v2327_v28  ;;  %v1015_v23 = vpop.f32.mrb[7].mxu0 }
 0x20f   : > { %v1093_v24 = vadd.f32 %v2332_v47, %v1070_v18  ;;  %v1071_v51 = vmul.f32 %v2327_v28, %v1015_v23  ;;  %1777 = vmatprep.mubr.msk.bf16.mxu1 %vm471_vm0, %v1121_v21 }
 0x210   : > { %v1096_v4 = vadd.f32 %v2332_v47, %v1073_v22  ;;  %1778 = vmatmul.mubr.msk.bf16.vlgmr.msra.gmra.mrb[0].mxu1 %vm471_vm0, %v1122_v12  ;;  %v1111_v29 = vmax.f32 %v1095_v61, 0.0 }
 0x211   : > { %v1094_v27 = vadd.f32 %v2332_v47, %v1071_v51  ;;  %v1109_v37 = vmax.f32 %v1093_v24, 0.0 }
 0x212   : > { %v1112_v30 = vmax.f32 %v1096_v4, 0.0 }
 0x213   : > { %v1110_v56 = vmax.f32 %v1094_v27, 0.0  ;;  %v1769_v1 = vpop.f32.mrb[8].mxu0 }
 0x214   : > { %v1076_v20 = vmul.f32 %v1769_v1, %v2327_v28  ;;  %v1028_v3 = vpop.f32.mrb[9].mxu0  ;;  %v1124_v36 = vpack.c.bf16 %v1112_v30, %v1111_v29 }
 0x215   : > { %v1074_v46 = vmul.f32 %v2327_v28, %v1028_v3  ;;  %v1770_v48 = vpop.f32.mrb[10].mxu0  ;;  %v1123_v50 = vpack.c.bf16 %v1110_v56, %v1109_v37 }
 0x216   : > { %v1099_v52 = vadd.f32 %v2332_v47, %v1076_v20  ;;  %v1077_v40 = vmul.f32 %v1770_v48, %v2327_v28  ;;  %v1031_v53 = vpop.f32.mrb[11].mxu0 }
 0x217   : > { %v1097_v54 = vadd.f32 %v2332_v47, %v1074_v46  ;;  %v1075_v45 = vmul.f32 %v2327_v28, %v1031_v53  ;;  %1781 = vmatprep.mubr.msk.bf16.mxu1 %vm471_vm0, %v1123_v50 }
 0x218   : > { %v1100_v62 = vadd.f32 %v2332_v47, %v1077_v40  ;;  %1782 = vmatmul.mubr.msk.bf16.gmra.mrb[4].mxu1 %vm471_vm0, %v1124_v36  ;;  %v1115_v2 = vmax.f32 %v1099_v52, 0.0 }
 0x219   : > { %v1098_v63 = vadd.f32 %v2332_v47, %v1075_v45  ;;  %v1113_v49 = vmax.f32 %v1097_v54, 0.0 }
 0x21a   : > { %v1116_v8 = vmax.f32 %v1100_v62, 0.0 }
 0x21b   : > { %v1114_v32 = vmax.f32 %v1098_v63, 0.0  ;;  %v1773_v13 = vpop.f32.mrb[12].mxu0 }
 0x21c   : > { %v1080_v7 = vmul.f32 %v1773_v13, %v2327_v28  ;;  %v1044_v9 = vpop.f32.mrb[13].mxu0  ;;  %v1126_v15 = vpack.c.bf16 %v1116_v8, %v1115_v2 }
 0x21d   : > { %v1078_v16 = vmul.f32 %v2327_v28, %v1044_v9  ;;  %v1774_v12 = vpop.f32.mrb[14].mxu0  ;;  %v1125_v18 = vpack.c.bf16 %v1114_v32, %v1113_v49 }
 0x21e   : > { %v1103_v42 = vadd.f32 %v2332_v47, %v1080_v7  ;;  %v1081_v21 = vmul.f32 %v1774_v12, %v2327_v28  ;;  %v1047_v61 = vpop.f32.mrb[15].mxu0 }
 0x21f   : > { %v1101_v22 = vadd.f32 %v2332_v47, %v1078_v16  ;;  %v1079_v23 = vmul.f32 %v2327_v28, %v1047_v61  ;;  %1785 = vmatprep.mubr.msk.bf16.mxu1 %vm471_vm0, %v1125_v18 }
 0x220   : > { %v1104_v24 = vadd.f32 %v2332_v47, %v1081_v21  ;;  %1786 = vmatmul.mubr.msk.bf16.gmra.mrb[8].mxu1 %vm471_vm0, %v1126_v15  ;;  %v1119_v4 = vmax.f32 %v1103_v42, 0.0 }
 0x221   : > { %v1102_v51 = vadd.f32 %v2332_v47, %v1079_v23  ;;  %v1117_v29 = vmax.f32 %v1101_v22, 0.0 }
 0x222   : > { %v1120_v27 = vmax.f32 %v1104_v24, 0.0 }
 0x223   : > { %v1118_v30 = vmax.f32 %v1102_v51, 0.0 }
 0x224   : > { %v1128_v37 = vpack.c.bf16 %v1120_v27, %v1119_v4 }
 0x225   : > { %v1127_v56 = vpack.c.bf16 %v1118_v30, %v1117_v29 }
 0x227   : > { %1789 = vmatprep.mubr.msk.bf16.mxu1 %vm471_vm0, %v1127_v56 }
 0x228   : > { %1790 = vmatmul.mubr.msk.bf16.gmra.mrb[12].mxu1 %vm471_vm0, %v1128_v37 }
 0x2e3   : > { %v1779_v1 = vpop.f32.mrb[0].mxu1 }
 0x2e4   : > { %v1635_v28 = vmul.f32 -1.442695, %v1779_v1  ;;  %v1191_v20 = vpop.f32.mrb[1].mxu1 }
 0x2e5   : > { %v1633_v3 = vmul.f32 -1.442695, %v1191_v20  ;;  %v1780_v36 = vpop.f32.mrb[2].mxu1 }
 0x2e6   : > { %1848 = vpow2.f32 %v1635_v28  ;;  %v1636_v46 = vmul.f32 -1.442695, %v1780_v36  ;;  %v1194_v48 = vpop.f32.mrb[3].mxu1 }
 0x2e7   : > { %1850 = vpow2.f32 %v1633_v3  ;;  %v1634_v47 = vmul.f32 -1.442695, %v1194_v48 }
 0x2e8   : > { %1852 = vpow2.f32 %v1636_v46 }
 0x2e9   : > { %1854 = vpow2.f32 %v1634_v47 }
 0x2eb   : > { %v1783_v50 = vpop.f32.mrb[4].mxu1 }
 0x2ec   : > { %v1639_v52 = vmul.f32 -1.442695, %v1783_v50  ;;  %v1207_v40 = vpop.f32.mrb[5].mxu1 }
 0x2ed   : > { %v1637_v53 = vmul.f32 -1.442695, %v1207_v40  ;;  %v1784_v54 = vpop.f32.mrb[6].mxu1 }
 0x2ee   : > { %1856 = vpow2.f32 %v1639_v52  ;;  %v1640_v45 = vmul.f32 -1.442695, %v1784_v54  ;;  %v1210_v62 = vpop.f32.mrb[7].mxu1 }
 0x2ef   : > { %1858 = vpow2.f32 %v1637_v53  ;;  %v1638_v63 = vmul.f32 -1.442695, %v1210_v62 }
 0x2f0   : > { %v1849_v2 = vpop.eup %1848  ;;  %1860 = vpow2.f32 %v1640_v45 }
 0x2f1   : > { %v1851_v8 = vpop.eup %1850  ;;  %v1304_v49 = vadd.f32 1.0, %v1849_v2  ;;  %1862 = vpow2.f32 %v1638_v63 }
 0x2f2   : > { %v1853_v32 = vpop.eup %1852  ;;  %v1302_v13 = vadd.f32 1.0, %v1851_v8 }
 0x2f3   : > { %v1855_v7 = vpop.eup %1854  ;;  %1864 = vrcp.f32 %v1304_v49  ;;  %v1305_v9 = vadd.f32 1.0, %v1853_v32  ;;  %v1787_v15 = vpop.f32.mrb[8].mxu1 }
 0x2f4   : > { %1866 = vrcp.f32 %v1302_v13  ;;  %v1303_v16 = vadd.f32 1.0, %v1855_v7  ;;  %v1643_v12 = vmul.f32 -1.442695, %v1787_v15  ;;  %v1223_v18 = vpop.f32.mrb[9].mxu1 }
 0x2f5   : > { %1868 = vrcp.f32 %v1305_v9  ;;  %v1641_v42 = vmul.f32 -1.442695, %v1223_v18  ;;  %v1788_v21 = vpop.f32.mrb[10].mxu1 }
 0x2f6   : > { %1870 = vrcp.f32 %v1303_v16  ;;  %v1644_v61 = vmul.f32 -1.442695, %v1788_v21  ;;  %v1226_v22 = vpop.f32.mrb[11].mxu1 }
 0x2f7   : > { %1872 = vpow2.f32 %v1643_v12  ;;  %v1642_v23 = vmul.f32 -1.442695, %v1226_v22 }
 0x2f8   : > { %v1857_v24 = vpop.eup %1856  ;;  %1874 = vpow2.f32 %v1641_v42 }
 0x2f9   : > { %v1859_v51 = vpop.eup %1858  ;;  %v1308_v4 = vadd.f32 1.0, %v1857_v24  ;;  %1876 = vpow2.f32 %v1644_v61 }
 0x2fa   : > { %v1861_v27 = vpop.eup %1860  ;;  %v1306_v29 = vadd.f32 1.0, %v1859_v51  ;;  %1878 = vpow2.f32 %v1642_v23 }
 0x2fb   : > { %v1863_v30 = vpop.eup %1862  ;;  %1880 = vrcp.f32 %v1308_v4  ;;  %v1309_v37 = vadd.f32 1.0, %v1861_v27  ;;  %v1791_v56 = vpop.f32.mrb[12].mxu1 }
 0x2fc   : > { %1882 = vrcp.f32 %v1306_v29  ;;  %v1307_v1 = vadd.f32 1.0, %v1863_v30  ;;  %v1647_v28 = vmul.f32 -1.442695, %v1791_v56  ;;  %v1239_v20 = vpop.f32.mrb[13].mxu1 }
 0x2fd   : > { %v1865_v3 = vpop.eup %1864  ;;  %1884 = vrcp.f32 %v1309_v37  ;;  %v1645_v36 = vmul.f32 -1.442695, %v1239_v20  ;;  %v1792_v46 = vpop.f32.mrb[14].mxu1 }
 0x2fe   : > { %v1867_v48 = vpop.eup %1866  ;;  %v1352_v47 = vadd.f32 1.0, %v1865_v3  ;;  %1886 = vrcp.f32 %v1307_v1  ;;  %v1648_v50 = vmul.f32 -1.442695, %v1792_v46  ;;  %v1242_v52 = vpop.f32.mrb[15].mxu1 }
 0x2ff   : > { %v1869_v40 = vpop.eup %1868  ;;  %v1350_v53 = vadd.f32 1.0, %v1867_v48  ;;  %1888 = vpow2.f32 %v1647_v28  ;;  %v1646_v54 = vmul.f32 -1.442695, %v1242_v52 }
 0x300   : > { %v1871_v45 = vpop.eup %1870  ;;  %v1368_v62 = vmul.f32 %v1690_v41, %v1352_v47  ;;  %v1353_v63 = vadd.f32 1.0, %v1869_v40  ;;  %1890 = vpow2.f32 %v1645_v36 }
 0x301   : > { %v1873_v2 = vpop.eup %1872  ;;  %v1366_v8 = vmul.f32 %v1686_v43, %v1350_v53  ;;  %v1351_v49 = vadd.f32 1.0, %v1871_v45  ;;  %1892 = vpow2.f32 %v1648_v50 }
 0x302   : > { %v1875_v32 = vpop.eup %1874  ;;  %v1670_v13 = vpack.c.bf16 %v1368_v62, %v1368_v62  ;;  %v1369_v7 = vmul.f32 %v1691_v58, %v1353_v63  ;;  %v1312_v9 = vadd.f32 1.0, %v1873_v2  ;;  %1894 = vpow2.f32 %v1646_v54 }
 0x303   : > { %v1877_v41 = vpop.eup %1876  ;;  %v1668_v15 = vpack.c.bf16 %v1366_v8, %v1366_v8  ;;  %v1367_v16 = vmul.f32 %v1687_v60, %v1351_v49  ;;  %v1310_v12 = vadd.f32 1.0, %v1875_v32 }
 0x304   : > { %v1879_v18 = vpop.eup %1878  ;;  %1449 = vst.msk [vmem:[%s2117_s16 + $0x8] sm:$0xf] %vm1446_vm2, %v1670_v13  ;;  %v1671_v43 = vpack.c.bf16 %v1369_v7, %v1369_v7  ;;  %1896 = vrcp.f32 %v1312_v9  ;;  %v1313_v42 = vadd.f32 1.0, %v1877_v41 }
 0x305   : > { %v1881_v21 = vpop.eup %1880  ;;  %1447 = vst.msk [vmem:[%s2117_s16] sm:$0xf] %vm1446_vm2, %v1668_v15  ;;  %v1669_v33 = vpack.c.bf16 %v1367_v16, %v1367_v16  ;;  %1898 = vrcp.f32 %v1310_v12  ;;  %v1311_v58 = vadd.f32 1.0, %v1879_v18 }
 0x306   : > { %v1883_v61 = vpop.eup %1882  ;;  %1450 = vst.msk [vmem:[%s2117_s16 + $0xc] sm:$0xf] %vm1446_vm2, %v1671_v43  ;;  %v1356_v22 = vadd.f32 1.0, %v1881_v21  ;;  %1900 = vrcp.f32 %v1313_v42 }
 0x307   : > { %v1885_v35 = vpop.eup %1884  ;;  %1448 = vst.msk [vmem:[%s2117_s16 + $0x4] sm:$0xf] %vm1446_vm2, %v1669_v33  ;;  %v1354_v60 = vadd.f32 1.0, %v1883_v61  ;;  %1902 = vrcp.f32 %v1311_v58 }
 0x308   : > { %v1887_v23 = vpop.eup %1886  ;;  %v1372_v24 = vmul.f32 %v1698_v25, %v1356_v22  ;;  %v1357_v51 = vadd.f32 1.0, %v1885_v35 }
 0x309   : > { %v1889_v4 = vpop.eup %1888  ;;  %v1370_v27 = vmul.f32 %v1694_v11, %v1354_v60  ;;  %v1355_v29 = vadd.f32 1.0, %v1887_v23 }
 0x30a   : > { %v1891_v30 = vpop.eup %1890  ;;  %v1674_v37 = vpack.c.bf16 %v1372_v24, %v1372_v24  ;;  %v1373_v56 = vmul.f32 %v1699_v17, %v1357_v51  ;;  %v1316_v1 = vadd.f32 1.0, %v1889_v4 }
 0x30b   : > { %v1893_v28 = vpop.eup %1892  ;;  %v1672_v20 = vpack.c.bf16 %v1370_v27, %v1370_v27  ;;  %v1371_v25 = vmul.f32 %v1695_v10, %v1355_v29  ;;  %v1314_v3 = vadd.f32 1.0, %v1891_v30 }
 0x30c   : > { %v1895_v36 = vpop.eup %1894  ;;  %1453 = vst.msk [vmem:[%s2117_s16 + $0x18] sm:$0xf] %vm1446_vm2, %v1674_v37  ;;  %v1675_v46 = vpack.c.bf16 %v1373_v56, %v1373_v56  ;;  %1904 = vrcp.f32 %v1316_v1  ;;  %v1317_v11 = vadd.f32 1.0, %v1893_v28 }
 0x30d   : > { %1451 = vst.msk [vmem:[%s2117_s16 + $0x10] sm:$0xf] %vm1446_vm2, %v1672_v20  ;;  %v1673_v48 = vpack.c.bf16 %v1371_v25, %v1371_v25  ;;  %1906 = vrcp.f32 %v1314_v3  ;;  %v1315_v0 = vadd.f32 1.0, %v1895_v36 }
 0x30e   : > { %v1897_v17 = vpop.eup %1896  ;;  %1454 = vst.msk [vmem:[%s2117_s16 + $0x1c] sm:$0xf] %vm1446_vm2, %v1675_v46  ;;  %1908 = vrcp.f32 %v1317_v11 }
 0x30f   : > { %v1899_v55 = vpop.eup %1898  ;;  %1452 = vst.msk [vmem:[%s2117_s16 + $0x14] sm:$0xf] %vm1446_vm2, %v1673_v48  ;;  %v1360_v10 = vadd.f32 1.0, %v1897_v17  ;;  %1910 = vrcp.f32 %v1315_v0 }
 0x310   : > { %v1901_v47 = vpop.eup %1900  ;;  %v1358_v50 = vadd.f32 1.0, %v1899_v55 }
 0x311   : > { %v1903_v52 = vpop.eup %1902  ;;  %v1376_v40 = vmul.f32 %v1706_v5, %v1360_v10  ;;  %v1361_v53 = vadd.f32 1.0, %v1901_v47 }
 0x312   : > { %v1374_v54 = vmul.f32 %v1702_v39, %v1358_v50  ;;  %v1359_v45 = vadd.f32 1.0, %v1903_v52 }
 0x313   : > { %v1678_v62 = vpack.c.bf16 %v1376_v40, %v1376_v40  ;;  %v1377_v63 = vmul.f32 %v1707_v57, %v1361_v53 }
 0x314   : > { %v1676_v2 = vpack.c.bf16 %v1374_v54, %v1374_v54  ;;  %v1375_v8 = vmul.f32 %v1703_v38, %v1359_v45 }
 0x315   : > { %1457 = vst.msk [vmem:[%s2117_s16 + $0x28] sm:$0xf] %vm1446_vm2, %v1678_v62  ;;  %v1679_v49 = vpack.c.bf16 %v1377_v63, %v1377_v63 }
 0x316   : > { %v1905_v32 = vpop.eup %1904  ;;  %1455 = vst.msk [vmem:[%s2117_s16 + $0x20] sm:$0xf] %vm1446_vm2, %v1676_v2  ;;  %v1677_v5 = vpack.c.bf16 %v1375_v8, %v1375_v8 }
 0x317   : > { %v1907_v13 = vpop.eup %1906  ;;  %1458 = vst.msk [vmem:[%s2117_s16 + $0x2c] sm:$0xf] %vm1446_vm2, %v1679_v49  ;;  %v1364_v39 = vadd.f32 1.0, %v1905_v32 }
 0x318   : > { %v1909_v7 = vpop.eup %1908  ;;  %1456 = vst.msk [vmem:[%s2117_s16 + $0x24] sm:$0xf] %vm1446_vm2, %v1677_v5  ;;  %v1362_v19 = vadd.f32 1.0, %v1907_v13 }
 0x319   : > { %v1911_v34 = vpop.eup %1910  ;;  %v1380_v38 = vmul.f32 %v1714_v6, %v1364_v39  ;;  %v1365_v57 = vadd.f32 1.0, %v1909_v7 }
 0x31a   : > { %v1378_v9 = vmul.f32 %v1710_v14, %v1362_v19  ;;  %v1363_v41 = vadd.f32 1.0, %v1911_v34 }
 0x31b   : > { %v1682_v15 = vpack.c.bf16 %v1380_v38, %v1380_v38  ;;  %v1381_v16 = vmul.f32 %v1715_v26, %v1365_v57 }
 0x31c   : > { %v1680_v12 = vpack.c.bf16 %v1378_v9, %v1378_v9  ;;  %v1379_v18 = vmul.f32 %v1711_v59, %v1363_v41 }
 0x31d   : > { %1461 = vst.msk [vmem:[%s2117_s16 + $0x38] sm:$0xf] %vm1446_vm2, %v1682_v15  ;;  %v1683_v43 = vpack.c.bf16 %v1381_v16, %v1381_v16 }
 0x31e   : > { %1459 = vst.msk [vmem:[%s2117_s16 + $0x30] sm:$0xf] %vm1446_vm2, %v1680_v12  ;;  %v1681_v42 = vpack.c.bf16 %v1379_v18, %v1379_v18 }
 0x31f   : > { %1462 = vst.msk [vmem:[%s2117_s16 + $0x3c] sm:$0xf] %vm1446_vm2, %v1683_v43 }
 0x320   : > { %1460 = vst.msk [vmem:[%s2117_s16 + $0x34] sm:$0xf] %vm1446_vm2, %v1681_v42 }
 0x321 PF: > { %s32_s15 = sadd.s32 1, %s1980_s15   ;;  %s2470_s28 = sld [smem:[#allocation8_spill]] }
 0x322   : > { %p29_p4 = scmp.ge.s32.totalorder %s32_s15, 6   ;;  %s2471_s29 = sld [smem:[#allocation9_spill]] }
 0x323   : > { %s2472_s1 = smov %s1972_s13  ;;  %s2473_s30 = smov %s1976_s14 }
 0x324   :  { %31 = sbr.rel (!%p29_p4) target bundleno = 29 (0x1d), region = 118 }
 0x327   : > { %s2474_s13 = smov %s2470_s28 }
 0x328   : > { %s2475_s14 = smov %s2471_s29 }

</bundles_post_ra>
